<compile_context>
chip_gen: v7x
topology: tpu7x:2x2x1
jax: 0.10.0
libtpu: 0.0.40
codegen_flags: <defaults>
</compile_context>

<pallas_src>
import functools

import jax
import jax.numpy as jnp
import numpy as np
from jax import lax
from jax.experimental import pallas as pl
from jax.experimental.pallas import tpu as pltpu


_MONOTONE_ACTS = ('relu', 'leaky_relu', 'elu', 'selu', 'sigmoid', 'tanh', 'none')


def _activation(name):
    if name == 'relu':
        return lambda x: jnp.maximum(x, 0.0)
    if name == 'leaky_relu':
        return lambda x: jnp.where(x >= 0, x, 0.01 * x)
    if name == 'gelu':
        # PyTorch nn.GELU default is the exact erf form.
        return lambda x: jax.nn.gelu(x, approximate=False)
    if name == 'elu':
        return jax.nn.elu
    if name == 'selu':
        return jax.nn.selu
    if name == 'sigmoid':
        return jax.nn.sigmoid
    if name == 'tanh':
        return jnp.tanh
    if name == 'swish':
        return jax.nn.silu
    if name == 'none':
        return lambda x: x
    # TODO(synk): 'prelu' has a learnable negative-slope parameter; not wired here.
    raise ValueError('Unsupported activation function')


def _round_up(x, m):
    return ((x + m - 1) // m) * m


def _vmem_estimate(th, pf, w, wp, cin, cout, itemsize):
    """Rough, layout-aware (sublane x lane padded) VMEM working-set bound."""
    tr = th * pf
    w2 = w + 2
    n = tr * w
    k = 9 * cin
    lane = lambda v: _round_up(v, 128)
    sub = lambda v: _round_up(v, 8)
    in_body = cin * sub(tr) * lane(w2) * itemsize
    in_halo = cin * 8 * lane(w2) * itemsize
    xt = cin * sub(tr + 2) * lane(w2) * itemsize
    # 9 dense tap copies + the concatenated (9*Cin, TR*W) patch matrix
    patches = (9 * sub(cin) + sub(k)) * lane(n) * itemsize
    acc = sub(cout) * lane(n) * 4
    pool_tmp = 2 * acc                      # reshape / activation temporaries
    out_blk = cout * sub(th) * lane(wp) * 4
    params = sub(cout) * lane(k) * itemsize + sub(cout) * 128 * 4
    return 2 * (in_body + in_halo) + xt + patches + acc + pool_tmp + 2 * out_blk + params


def _pick_tile(batch, hp, pf, w, wp, cin, cout, itemsize, budget_bytes,
               split_for_megacore):
    """Largest pooled-row tile TH that is a multiple of 8 (block-shape rule),
    divides Hp, and fits the VMEM budget.  Falls back to the whole image."""
    cands = sorted({d for d in range(8, hp, 8) if hp % d == 0} | {hp})
    fitting = [d for d in cands
               if _vmem_estimate(d, pf, w, wp, cin, cout, itemsize) <= budget_bytes]
    pool = fitting if fitting else cands[:1]
    th = max(pool)
    if split_for_megacore and batch == 1 and th == hp:
        # v7x has 2 TensorCores: give the grid >= 2 parallel steps when B == 1.
        smaller = [d for d in pool if d < hp] or [d for d in cands if d < hp]
        if smaller:
            th = max(smaller)
    return th


def _conv_pool(xt, w_ref, b_ref, o_ref, *, pf, act, max_pooling, pool_first):
    """Shared compute: xt is the (Cin, TR+2, W+2) padded CHW window."""
    cin, trp2, wcols2 = xt.shape
    tr, w = trp2 - 2, wcols2 - 2
    cout, th, wp = o_ref.shape
    n = tr * w

    # --- in-VMEM im2col: all 9 taps folded into the contraction dim K = 9*Cin.
    # Each tap copy is dense (lanes = image width), and a single MXU matmul
    # replaces 9 tiny-K matmuls + 8 full-tile f32 accumulator adds.
    parts = []
    for ky in range(3):
        for kx in range(3):
            parts.append(xt[:, ky:ky + tr, kx:kx + w].reshape(cin, n))
    patches = jnp.concatenate(parts, axis=0)                     # (9*Cin, TR*W)

    acc = jnp.dot(w_ref[...], patches,
                  preferred_element_type=jnp.float32)            # (Cout, TR*W) f32

    red = jnp.maximum if max_pooling else jnp.add

    def pool(y):                                                 # (Cout, TR*W) -> (Cout, TH, Wp)
        y3 = y.reshape(cout, th, pf * w)
        yh = y3[:, :, 0:w]
        for a in range(1, pf):                                   # fold H-pool partners
            yh = red(yh, y3[:, :, a * w:(a + 1) * w])
        y4 = yh.reshape(cout, th, wp, pf)                        # fold W-pool partners
        return jnp.max(y4, axis=-1) if max_pooling else jnp.sum(y4, axis=-1)

    bias = b_ref[...].astype(jnp.float32)                        # (Cout, 1)
    if pool_first:
        # max-pool commutes with monotone activations (and bias with max),
        # so pool the raw accumulator and apply bias + act pf^2 times less.
        p = pool(acc)
        if not max_pooling:
            p = p * (1.0 / float(pf * pf))
        out = act(p + bias.reshape(cout, 1, 1))
    else:
        y = act(acc + bias)                                      # bias broadcasts along lanes
        p = pool(y)
        if not max_pooling:
            p = p * (1.0 / float(pf * pf))
        out = p
    o_ref[...] = out.astype(o_ref.dtype)


def _cne_kernel_tiled(xb_ref, xh_ref, w_ref, b_ref, o_ref, *, pf, act,
                      max_pooling, pool_first):
    # body rows [i*TR, i*TR+TR) + first 2 rows of the 8-row halo block.
    xt = jnp.concatenate([xb_ref[...], xh_ref[:, 0:2, :]], axis=1)
    _conv_pool(xt, w_ref, b_ref, o_ref, pf=pf, act=act,
               max_pooling=max_pooling, pool_first=pool_first)


def _cne_kernel_single(x_ref, w_ref, b_ref, o_ref, *, pf, act,
                       max_pooling, pool_first):
    _conv_pool(x_ref[...], w_ref, b_ref, o_ref, pf=pf, act=act,
               max_pooling=max_pooling, pool_first=pool_first)


def cne_encoder(x, weight, bias, *, pooling_factor=2, max_pooling=True,
                activation='relu', tile_pooled_rows=None, compute_dtype=None):
    """Forward pass equivalent to CNEncoder.forward.

    x      : (B, Cin, H, W)    NCHW, like PyTorch
    weight : (Cout, Cin, 3, 3) PyTorch Conv2d layout
    bias   : (Cout,)
    returns: (B, Cout, H // pooling_factor, W // pooling_factor)  (NCHW)
    compute_dtype: optionally jnp.bfloat16 for the MXU inputs (recommended on
                   v6e/v7x); accumulation, bias, activation, pooling stay f32.
    """
    if pooling_factor % 2 != 0:
        raise ValueError('The pooling factor must be an even number.')
    B, Cin, H, W = x.shape
    Cout = weight.shape[0]
    pf = pooling_factor
    assert H % pf == 0 and W % pf == 0, 'spatial dims must divide the pooling factor'
    Hp, Wp = H // pf, W // pf
    K = 9 * Cin

    cdtype = jnp.dtype(compute_dtype) if compute_dtype is not None else jnp.dtype(x.dtype)
    itemsize = cdtype.itemsize

    # --- per-generation VMEM policy (v7x: 64 MiB physical; v5e/v6e: 128 MiB).
    kind = ''
    try:
        kind = jax.devices()[0].device_kind.lower()
    except Exception:
        pass
    is_v7 = '7' in kind
    budget = (18 << 20) if is_v7 else (40 << 20)
    vmem_cap = (48 << 20) if is_v7 else (96 << 20)

    if tile_pooled_rows is not None:
        TH = int(tile_pooled_rows)
        if Hp % TH != 0:
            raise ValueError('tile_pooled_rows must divide H // pooling_factor')
        if TH != Hp and TH % 8 != 0:
            raise ValueError('tile_pooled_rows must be a multiple of 8 '
                             '(or equal H // pooling_factor)')
    else:
        TH = _pick_tile(B, Hp, pf, W, Wp, Cin, Cout, itemsize, budget,
                        split_for_megacore=is_v7)
    NT = Hp // TH
    TR = TH * pf

    est = _vmem_estimate(TH, pf, W, Wp, Cin, Cout, itemsize)
    vmem_limit = int(min(vmem_cap, max(est + (16 << 20), 32 << 20)))

    act = _activation(activation)
    pool_first = (max_pooling and activation in _MONOTONE_ACTS) or \
                 ((not max_pooling) and activation == 'none')

    # weights (Cout, Cin, 3, 3) -> (Cout, 9*Cin), K ordered (ky, kx, ci) to
    # match the in-kernel patch construction.
    w_mat = jnp.transpose(weight, (0, 2, 3, 1)).reshape(Cout, K).astype(cdtype)
    b_mat = bias.reshape(Cout, 1).astype(jnp.float32)
    xc = x.astype(cdtype)

    out_shape = jax.ShapeDtypeStruct((B, Cout, Hp, Wp), x.dtype)
    kern_kwargs = dict(pf=pf, act=act, max_pooling=max_pooling, pool_first=pool_first)

    if NT == 1:
        # Whole (padded) image per grid step; full-extent blocks.
        x_pad = jnp.pad(xc, ((0, 0), (0, 0), (1, 1), (1, 1)))
        out = pl.pallas_call(
            functools.partial(_cne_kernel_single, **kern_kwargs),
            out_shape=out_shape,
            grid=(B,),
            in_specs=[
                pl.BlockSpec((None, Cin, H + 2, W + 2), lambda b: (b, 0, 0, 0)),
                pl.BlockSpec((Cout, K), lambda b: (0, 0)),
                pl.BlockSpec((Cout, 1), lambda b: (0, 0)),
            ],
            out_specs=pl.BlockSpec((None, Cout, Hp, Wp), lambda b: (b, 0, 0, 0)),
            compiler_params=pltpu.CompilerParams(
                dimension_semantics=("parallel",),
                vmem_limit_bytes=vmem_limit),
        )(x_pad, w_mat, b_mat)
    else:
        # Row-tiled path: the padded input is passed twice -- a TR-row body
        # block and an 8-row halo block (first 2 rows used) -- so no halo
        # duplication is materialized in HBM.  H is padded by (1, 7): 1 conv
        # pad row on top, 1 conv pad + 6 alignment rows at the bottom so the
        # 8-row halo block never runs past the array.
        x_pad = jnp.pad(xc, ((0, 0), (0, 0), (1, 7), (1, 1)))
        halo_idx = TR // 8
        out = pl.pallas_call(
            functools.partial(_cne_kernel_tiled, **kern_kwargs),
            out_shape=out_shape,
            grid=(B, NT),
            in_specs=[
                pl.BlockSpec((None, Cin, TR, W + 2), lambda b, i: (b, 0, i, 0)),
                pl.BlockSpec((None, Cin, 8, W + 2),
                             lambda b, i: (b, 0, (i + 1) * halo_idx, 0)),
                pl.BlockSpec((Cout, K), lambda b, i: (0, 0)),
                pl.BlockSpec((Cout, 1), lambda b, i: (0, 0)),
            ],
            out_specs=pl.BlockSpec((None, Cout, TH, Wp), lambda b, i: (b, 0, i, 0)),
            compiler_params=pltpu.CompilerParams(
                dimension_semantics=("parallel", "parallel"),
                vmem_limit_bytes=vmem_limit),
        )(x_pad, x_pad, w_mat, b_mat)
    return out


def _reference(x, weight, bias, pooling_factor=2, max_pooling=True,
               activation='relu'):
    """Pure-JAX reference (matches PyTorch semantics)."""
    act = _activation(activation)
    y = lax.conv_general_dilated(
        x, weight, window_strides=(1, 1), padding=((1, 1), (1, 1)),
        dimension_numbers=('NCHW', 'OIHW', 'NCHW'))
    y = act(y + bias[None, :, None, None])
    pf = pooling_factor
    if max_pooling:
        return lax.reduce_window(y, -jnp.inf, lax.max,
                                 (1, 1, pf, pf), (1, 1, pf, pf), 'VALID')
    return lax.reduce_window(y, 0.0, lax.add,
                             (1, 1, pf, pf), (1, 1, pf, pf), 'VALID') / (pf * pf)


if __name__ == "__main__":
    key = jax.random.PRNGKey(0)
    k_x, k_w, k_b, k_x2 = jax.random.split(key, 4)

    B, Cin, H, W = 2, 4, 16, 16
    Cout = 32
    pf = 2

    x = jax.random.normal(k_x, (B, Cin, H, W), dtype=jnp.float32)
    fan_in = Cin * 3 * 3
    bound = 1.0 / np.sqrt(fan_in)
    weight = jax.random.uniform(k_w, (Cout, Cin, 3, 3), dtype=jnp.float32,
                                minval=-bound, maxval=bound)
    bias = jax.random.uniform(k_b, (Cout,), dtype=jnp.float32,
                              minval=-bound, maxval=bound)

    # 1) max pooling + relu (pool-before-activation fast path), single tile.
    out1 = jax.block_until_ready(
        cne_encoder(x, weight, bias, pooling_factor=pf,
                    max_pooling=True, activation='relu'))
    ref1 = _reference(x, weight, bias, pf, True, 'relu')
    assert out1.shape == (B, Cout, H // pf, W // pf)
    np.testing.assert_allclose(np.asarray(out1), np.asarray(ref1),
                               rtol=1e-4, atol=1e-4)

    # 2) avg pooling + relu (activation-before-pool path).
    out2 = jax.block_until_ready(
        cne_encoder(x, weight, bias, pooling_factor=pf,
                    max_pooling=False, activation='relu'))
    ref2 = _reference(x, weight, bias, pf, False, 'relu')
    np.testing.assert_allclose(np.asarray(out2), np.asarray(ref2),
                               rtol=1e-4, atol=1e-4)

    # 3) row-tiled path with body + halo BlockSpecs (forced TH=8 -> 2 tiles).
    x3 = jax.random.normal(k_x2, (1, Cin, 32, 32), dtype=jnp.float32)
    out3 = jax.block_until_ready(
        cne_encoder(x3, weight, bias, pooling_factor=pf,
                    max_pooling=True, activation='relu', tile_pooled_rows=8))
    ref3 = _reference(x3, weight, bias, pf, True, 'relu')
    np.testing.assert_allclose(np.asarray(out3), np.asarray(ref3),
                               rtol=1e-4, atol=1e-4)

    # 4) bf16 MXU inputs (v6e/v7x recommendation), f32 accumulation.
    #    Looser tolerance is expected vs the exact f32 reference.
    out4 = jax.block_until_ready(
        cne_encoder(x, weight, bias, pooling_factor=pf,
                    max_pooling=True, activation='relu',
                    compute_dtype=jnp.bfloat16))
    np.testing.assert_allclose(np.asarray(out4), np.asarray(ref1),
                               rtol=5e-2, atol=5e-2)

    print("KERNEL_OK")
</pallas_src>

<mosaic_0001>
module attributes {stable_mosaic.version = 11 : i64} {
  func.func @_cne_kernel_single(%arg0: i32, %arg1: memref<1x4x18x18xf32, #tpu.memory_space<vmem>>, %arg2: memref<32x36xf32, #tpu.memory_space<vmem>>, %arg3: memref<32x1xf32, #tpu.memory_space<vmem>>, %arg4: memref<1x32x8x8xf32, #tpu.memory_space<vmem>>) attributes {dimension_semantics = [#tpu.dimension_semantics<parallel>], iteration_bounds = array<i64: 2>, scalar_prefetch = 0 : i64, scratch_operands = 0 : i64, tpu.core_type = #tpu.core_type<tc>, window_params = [{transform_indices = @transform_0, window_bounds = array<i64: 1, 4, 18, 18>}, {pipeline_mode = #tpu.pipeline_mode<synchronous>, transform_indices = @transform_1, window_bounds = array<i64: 32, 36>}, {pipeline_mode = #tpu.pipeline_mode<synchronous>, transform_indices = @transform_2, window_bounds = array<i64: 32, 1>}, {transform_indices = @transform_3, window_bounds = array<i64: 1, 32, 8, 8>}]} {
    %c0 = arith.constant 0 : index
    %c0_0 = arith.constant 0 : index
    %c0_1 = arith.constant 0 : index
    %c0_2 = arith.constant 0 : index
    %0 = vector.load %arg1[%c0, %c0_0, %c0_1, %c0_2] : memref<1x4x18x18xf32, #tpu.memory_space<vmem>>, vector<1x4x18x18xf32>
    %1 = vector.shape_cast %0 : vector<1x4x18x18xf32> to vector<4x18x18xf32>
    %2 = vector.extract_strided_slice %1 {offsets = [0, 0, 0], sizes = [4, 16, 16], strides = [1, 1, 1]} : vector<4x18x18xf32> to vector<4x16x16xf32>
    %3 = vector.shape_cast %2 : vector<4x16x16xf32> to vector<4x256xf32>
    %4 = vector.extract_strided_slice %1 {offsets = [0, 0, 1], sizes = [4, 16, 16], strides = [1, 1, 1]} : vector<4x18x18xf32> to vector<4x16x16xf32>
    %5 = vector.shape_cast %4 : vector<4x16x16xf32> to vector<4x256xf32>
    %6 = vector.extract_strided_slice %1 {offsets = [0, 0, 2], sizes = [4, 16, 16], strides = [1, 1, 1]} : vector<4x18x18xf32> to vector<4x16x16xf32>
    %7 = vector.shape_cast %6 : vector<4x16x16xf32> to vector<4x256xf32>
    %8 = vector.extract_strided_slice %1 {offsets = [0, 1, 0], sizes = [4, 16, 16], strides = [1, 1, 1]} : vector<4x18x18xf32> to vector<4x16x16xf32>
    %9 = vector.shape_cast %8 : vector<4x16x16xf32> to vector<4x256xf32>
    %10 = vector.extract_strided_slice %1 {offsets = [0, 1, 1], sizes = [4, 16, 16], strides = [1, 1, 1]} : vector<4x18x18xf32> to vector<4x16x16xf32>
    %11 = vector.shape_cast %10 : vector<4x16x16xf32> to vector<4x256xf32>
    %12 = vector.extract_strided_slice %1 {offsets = [0, 1, 2], sizes = [4, 16, 16], strides = [1, 1, 1]} : vector<4x18x18xf32> to vector<4x16x16xf32>
    %13 = vector.shape_cast %12 : vector<4x16x16xf32> to vector<4x256xf32>
    %14 = vector.extract_strided_slice %1 {offsets = [0, 2, 0], sizes = [4, 16, 16], strides = [1, 1, 1]} : vector<4x18x18xf32> to vector<4x16x16xf32>
    %15 = vector.shape_cast %14 : vector<4x16x16xf32> to vector<4x256xf32>
    %16 = vector.extract_strided_slice %1 {offsets = [0, 2, 1], sizes = [4, 16, 16], strides = [1, 1, 1]} : vector<4x18x18xf32> to vector<4x16x16xf32>
    %17 = vector.shape_cast %16 : vector<4x16x16xf32> to vector<4x256xf32>
    %18 = vector.extract_strided_slice %1 {offsets = [0, 2, 2], sizes = [4, 16, 16], strides = [1, 1, 1]} : vector<4x18x18xf32> to vector<4x16x16xf32>
    %19 = vector.shape_cast %18 : vector<4x16x16xf32> to vector<4x256xf32>
    %20 = tpu.concatenate %3, %5, %7, %9, %11, %13, %15, %17, %19 in 0 : vector<4x256xf32>, vector<4x256xf32>, vector<4x256xf32>, vector<4x256xf32>, vector<4x256xf32>, vector<4x256xf32>, vector<4x256xf32>, vector<4x256xf32>, vector<4x256xf32> -> vector<36x256xf32>
    %c0_3 = arith.constant 0 : index
    %c0_4 = arith.constant 0 : index
    %21 = vector.load %arg2[%c0_3, %c0_4] : memref<32x36xf32, #tpu.memory_space<vmem>>, vector<32x36xf32>
    %cst = arith.constant dense<0.000000e+00> : vector<32x256xf32>
    %22 = tpu.matmul %21, %20, %cst {dimension_numbers = #tpu.dot_dimension_numbers<[1], [0], [0], [1], [0, 0, 1, 1], [], []>} : vector<32x36xf32>, vector<36x256xf32>, vector<32x256xf32> -> vector<32x256xf32>
    %c0_5 = arith.constant 0 : index
    %c0_6 = arith.constant 0 : index
    %23 = vector.load %arg3[%c0_5, %c0_6] : memref<32x1xf32, #tpu.memory_space<vmem>>, vector<32x1xf32>
    %24 = vector.shape_cast %22 : vector<32x256xf32> to vector<32x8x32xf32>
    %25 = vector.extract_strided_slice %24 {offsets = [0, 0, 0], sizes = [32, 8, 16], strides = [1, 1, 1]} : vector<32x8x32xf32> to vector<32x8x16xf32>
    %26 = vector.extract_strided_slice %24 {offsets = [0, 0, 16], sizes = [32, 8, 16], strides = [1, 1, 1]} : vector<32x8x32xf32> to vector<32x8x16xf32>
    %27 = arith.maximumf %25, %26 : vector<32x8x16xf32>
    %28 = vector.shape_cast %27 : vector<32x8x16xf32> to vector<32x8x8x2xf32>
    %cst_7 = arith.constant dense<0xFF800000> : vector<32x8x8xf32>
    %29 = vector.multi_reduction <maximumf>, %28, %cst_7 [3] : vector<32x8x8x2xf32> to vector<32x8x8xf32>
    %30 = vector.shape_cast %23 : vector<32x1xf32> to vector<32x1x1xf32>
    %31 = vector.broadcast %30 : vector<32x1x1xf32> to vector<32x8x8xf32>
    %32 = arith.addf %29, %31 : vector<32x8x8xf32>
    %cst_8 = arith.constant 0.000000e+00 : f32
    %33 = vector.broadcast %cst_8 : f32 to vector<32x8x8xf32>
    %34 = arith.maximumf %32, %33 : vector<32x8x8xf32>
    %c0_9 = arith.constant 0 : index
    %c0_10 = arith.constant 0 : index
    %c0_11 = arith.constant 0 : index
    %c0_12 = arith.constant 0 : index
    %35 = vector.load %arg4[%c0_9, %c0_10, %c0_11, %c0_12] : memref<1x32x8x8xf32, #tpu.memory_space<vmem>>, vector<1x32x8x8xf32>
    %36 = vector.shape_cast %35 : vector<1x32x8x8xf32> to vector<32x8x8xf32>
    %37 = vector.shape_cast %34 : vector<32x8x8xf32> to vector<1x32x8x8xf32>
    tpu.vector_store %arg4[%c0_9, %c0_10, %c0_11, %c0_12], %37 {strides = array<i32>} : memref<1x32x8x8xf32, #tpu.memory_space<vmem>>, vector<1x32x8x8xf32>,
    return
  }
  func.func @transform_0(%arg0: i32) -> (i32, i32, i32, i32) {
    %c0_i32 = arith.constant 0 : i32
    %c0_i32_0 = arith.constant 0 : i32
    %c0_i32_1 = arith.constant 0 : i32
    %c0_i32_2 = arith.constant 0 : i32
    return %arg0, %c0_i32, %c0_i32_0, %c0_i32_1 : i32, i32, i32, i32
  }
  func.func @transform_1(%arg0: i32) -> (i32, i32) {
    %c0_i32 = arith.constant 0 : i32
    %c0_i32_0 = arith.constant 0 : i32
    %c0_i32_1 = arith.constant 0 : i32
    return %c0_i32, %c0_i32_0 : i32, i32
  }
  func.func @transform_2(%arg0: i32) -> (i32, i32) {
    %c0_i32 = arith.constant 0 : i32
    %c0_i32_0 = arith.constant 0 : i32
    %c0_i32_1 = arith.constant 0 : i32
    return %c0_i32, %c0_i32_0 : i32, i32
  }
  func.func @transform_3(%arg0: i32) -> (i32, i32, i32, i32) {
    %c0_i32 = arith.constant 0 : i32
    %c0_i32_0 = arith.constant 0 : i32
    %c0_i32_1 = arith.constant 0 : i32
    %c0_i32_2 = arith.constant 0 : i32
    return %arg0, %c0_i32, %c0_i32_0, %c0_i32_1 : i32, i32, i32, i32
  }
}

</mosaic_0001>

<bundles_post_ra>
// kernel: tpu_custom_call.1
= control target key start
LH: loop header
LB: loop body
LE: loop exit
PB: predicated region body
PF: predicated region fallthrough
CT: control target
= control target key end

     0   :  { %s12019_s12 = smov 0   ;;  %s17162_s0 = inlined_call_operand.vmem [shape: f32[2,4,18,18], index: 0, kind: input, shape index: {}]   ;;  %s17163_s1 = inlined_call_operand.vmem [shape: f32[32,36], index: 1, kind: input, shape index: {}]   ;;  %s17164_s2 = inlined_call_operand.vmem [shape: f32[32,1], index: 2, kind: input, shape index: {}]   ;;  %s17165_s3 = inlined_call_operand.vmem [shape: f32[2,32,8,8], index: 3, kind: output, shape index: {}]  }
   0x1 LB: > { %s11617_s13 = sadd.s32 4294967295, %s11977_s12   ;;  %p11621_p0 = scmp.ge.s32.totalorder %s11977_s12, 1  ;;  %s11977_s12 = sphi %s12019_s12, %s13_s12  }
   0x2   : > { %p137_p1 = scmp.lt.s32.totalorder %s11977_s12, 3 }
   0x4   : > { %p138_p2 = pnand %p11621_p0, %p137_p1 }
   0x6   : > { %141 = sbr.rel (%p138_p2) target bundleno = 2629 (0xa45), region = 32 }
   0xd   : > { %p161_p3 = scmp.lt.s32.totalorder %s11617_s13, 1  ;;  %v17166_v0 = vlaneseq  ;;  %v11979_v1 = vmov 1983009808   ;;  %v11980_v3 = vmov 1934713408   ;;  %v17168_v5 = vmov 0.0  }
   0xe   : > { %v186_v2 = vunpack.c.l.s4 %v11979_v1  ;;  %v218_v4 = vunpack.c.l.s4 %v11980_v3  ;;  %2378 = vmatprep.mubr.f32.mxu0 %v17168_v5  ;;  %2390 = vmatprep.mubr.f32.mxu1 %v17168_v5  ;;  %s11982_s18 = smov 127   ;;  %s11983_s19 = smov 64   ;;  %vm868_vm0 = vcmask 1046528   ;;  %vm1563_vm1 = vcmask 1045504  }
   0xf   : > { %s18186_s13 = smov (!%p161_p3, %s11617_s13), 1  ;;  %v12032_v7 = vshrl.u32 %v17166_v0, 7  ;;  %s11984_s20 = smov 32   ;;  %vm375_vm2 = vcmask 130048   ;;  %vm377_vm3 = vcmask 261120   ;;  %vm379_vm4 = vcmask 392192  }
  0x10   : > { %v187_v6 = vunpack.c.0.s8 %v186_v2  ;;  %s11648_s14 = smul.u32 96, %s18186_s13  ;;  %v219_v8 = vunpack.c.0.s8 %v218_v4  ;;  %s11985_s21 = smov 96   ;;  %vm381_vm5 = vcmask 523264   ;;  %vm383_vm6 = vcmask 654336  }
  0x11   : > { %17382 = vst [vmem:[#allocation2_spill] sm:$0xff] %v12032_v7  ;;  %s11986_s22 = smov 16   ;;  %s11987_s23 = smov 48   ;;  %vm385_vm7 = vcmask 785408   ;;  %vm387_vm8 = vcmask 916480   ;;  %vm2282_vm9 = vcmask 1043456  }
  0x12   : > { %s12038_s17 = scalar_lea.vmem %s17162_s0, %s11648_s14  ;;  %v12050_v12 = vsub.s32 %v187_v6, %v12032_v7  ;;  %v12074_v19 = vsub.s32 %v219_v8, %v12032_v7  ;;  %s11988_s24 = smov 80   ;;  %vm2295_vm10 = vcmask 293888   ;;  %vm8247_vm11 = vcmask 15360  }
  0x13   : > { %v12041_v9 = vld [vmem:[%s12038_s17] sm:$0xff]  ;;  %v12044_v10 = vld [vmem:[%s12038_s17 + $0x8] sm:$0xff]  ;;  %v12047_v11 = vld [vmem:[%s12038_s17 + $0x18] sm:$0xff]  ;;  %s11989_s25 = smov 112   ;;  %s11990_s26 = smov 126   ;;  %vm11266_vm12 = vcmask 1041409  }
  0x14   : > { %404 = vrot.lane.b32.xlu1 %v12041_v9, %s11982_s18  ;;  %406 = vrot.lane.b32.xlu0 %v12044_v10, %s11982_s18  ;;  %v12057_v13 = vld [vmem:[%s12038_s17 + $0x20] sm:$0xff]  ;;  %v12060_v14 = vld [vmem:[%s12038_s17 + $0x30] sm:$0xff]  ;;  %v869_v61 = vrot.slane %v12041_v9, 1  ;;  %v870_v62 = vrot.slane %v12044_v10, 1  ;;  %v874_v2 = vrot.slane %v12047_v11, 1  ;;  %s11991_s8 = smov 124  }
  0x15   : > { %v12063_v15 = vld [vmem:[%s12038_s17 + $0x38] sm:$0xff]  ;;  %v12066_v16 = vld [vmem:[%s12038_s17 + $0x48] sm:$0xff]  ;;  %v12069_v17 = vld [vmem:[%s12038_s17 + $0x50] sm:$0xff]  ;;  %v184_v18 = vcombine.high %v12041_v9, %v12060_v14  ;;  %v183_v20 = vcombine.low %v12041_v9, %v12060_v14  ;;  %s11992_s9 = smov 122   ;;  %s11993_s10 = smov 120   ;;  %vm11268_vm13 = vcmask 1042434  }
  0x16   : > { %v200_v21 = vcombine.high %v12047_v11, %v12066_v16  ;;  %v252_v22 = vcombine.high %v12044_v10, %v12063_v15  ;;  %v268_v23 = vcombine.high %v12057_v13, %v12069_v17  ;;  %v199_v24 = vcombine.low %v12047_v11, %v12066_v16  ;;  %v12119_v57 = vld [vmem:[%s12038_s17 + $0x10] sm:$0x3]  ;;  %v12128_v1 = vld [vmem:[%s12038_s17 + $0x28] sm:$0x3]  ;;  %v12132_v3 = vld [vmem:[%s12038_s17 + $0x40] sm:$0x3] }
  0x17   : > { %v198_v25 = vrot.slane %v184_v18, %v12050_v12  ;;  %v191_v26 = vrot.slane %v183_v20, %v12050_v12  ;;  %v251_v27 = vcombine.low %v12044_v10, %v12063_v15  ;;  %v267_v28 = vcombine.low %v12057_v13, %v12069_v17  ;;  %v12135_v4 = vld [vmem:[%s12038_s17 + $0x58] sm:$0x3]  ;;  %s11994_s11 = smov 118   ;;  %s11995_s14 = smov 116  }
  0x18   : > { %408 = vrot.lane.b32.xlu1 %v12047_v11, %s11982_s18  ;;  %v214_v29 = vrot.slane %v200_v21, %v12050_v12  ;;  %v266_v30 = vrot.slane %v252_v22, %v12050_v12  ;;  %v282_v31 = vrot.slane %v268_v23, %v12050_v12  ;;  %v207_v32 = vrot.slane %v199_v24, %v12050_v12  ;;  %s11996_s15 = smov 114  }
  0x19   : > { %v259_v33 = vrot.slane %v251_v27, %v12050_v12  ;;  %v275_v34 = vrot.slane %v267_v28, %v12050_v12  ;;  %v872_v6 = vrot.slane %v12119_v57, 1  ;;  %v875_v21 = vrot.slane %v12057_v13, 1 }
  0x1a   : > { %v231_v35 = vcombine.low %v198_v25, %v214_v29  ;;  %v299_v36 = vcombine.low %v266_v30, %v282_v31  ;;  %v216_v37 = vcombine.high %v191_v26, %v207_v32  ;;  %v232_v38 = vcombine.high %v198_v25, %v214_v29 }
  0x1b   : > { %v284_v39 = vcombine.high %v259_v33, %v275_v34  ;;  %v300_v40 = vcombine.high %v266_v30, %v282_v31  ;;  %v215_v41 = vcombine.low %v191_v26, %v207_v32  ;;  %v283_v42 = vcombine.low %v259_v33, %v275_v34 }
  0x1c   : > { %v239_v43 = vrot.slane %v231_v35, %v12074_v19  ;;  %v307_v44 = vrot.slane %v299_v36, %v12074_v19  ;;  %v230_v45 = vrot.slane %v216_v37, %v12074_v19  ;;  %v246_v46 = vrot.slane %v232_v38, %v12074_v19 }
  0x1d   : > { %v298_v47 = vrot.slane %v284_v39, %v12074_v19  ;;  %v314_v48 = vrot.slane %v300_v40, %v12074_v19  ;;  %v12107_v49 = vrot.slane %v215_v41, %v12074_v19  ;;  %v12110_v50 = vrot.slane %v283_v42, %v12074_v19 }
  0x1e   : > { %v11682_v51 = vpack.i.bf16 %v307_v44, %v239_v43  ;;  %v249_v52 = vcombine.high %v239_v43, %v17168_v5  ;;  %v317_v56 = vcombine.high %v307_v44, %v17168_v5  ;;  %v248_v59 = vcombine.high %v230_v45, %v17168_v5 }
  0x1f   : > { %v11677_v53 = vpack.i.bf16 %v298_v47, %v230_v45  ;;  %v247_v54 = vcombine.high %v12107_v49, %v17168_v5  ;;  %v315_v55 = vcombine.high %v12110_v50, %v17168_v5  ;;  %v11687_v58 = vpack.i.bf16 %v314_v48, %v246_v46 }
  0x20   : > { %11683 = vrot.lane.b32.xlu1 %v11682_v51, %s11983_s19  ;;  %v316_v60 = vcombine.high %v298_v47, %v17168_v5  ;;  %v11702_v8 = vpack.i.bf16 %v317_v56, %v249_v52  ;;  %v250_v18 = vcombine.high %v246_v46, %v17168_v5  ;;  %v318_v20 = vcombine.high %v314_v48, %v17168_v5 }
  0x21   : > { %11678 = vrot.lane.b32.xlu0 %v11677_v53, %s11984_s20  ;;  %v11692_v63 = vpack.i.bf16 %v315_v55, %v247_v54  ;;  %v877_v23 = vrot.slane %v12128_v1, 1  ;;  %v879_v24 = vrot.slane %v12060_v14, 1  ;;  %v880_v25 = vrot.slane %v12063_v15, 1 }
  0x22   : > { %v11697_v22 = vpack.i.bf16 %v316_v60, %v248_v59  ;;  %v882_v26 = vrot.slane %v12132_v3, 1  ;;  %v884_v27 = vrot.slane %v12066_v16, 1  ;;  %v885_v28 = vrot.slane %v12069_v17, 1 }
  0x23   : > { %v887_v29 = vrot.slane %v12135_v4, 1  ;;  %v12151_v30 = vsel %vm868_vm0, %v869_v61, %v870_v62  ;;  %v11707_v31 = vpack.i.bf16 %v318_v20, %v250_v18  ;;  %v12155_v32 = vsel %vm868_vm0, %v870_v62, %v872_v6 }
  0x24   : > { %11688 = vrot.lane.b32.xlu1 %v11687_v58, %s11985_s21  ;;  %v12158_v33 = vsel %vm868_vm0, %v874_v2, %v875_v21  ;;  %v12161_v34 = vsel %vm868_vm0, %v875_v21, %v877_v23  ;;  %v12165_v35 = vsel %vm868_vm0, %v879_v24, %v880_v25  ;;  %v12168_v36 = vsel %vm868_vm0, %v880_v25, %v882_v26 }
  0x25   : > { %11693 = vrot.lane.b32.xlu0 %v11692_v63, %s11986_s22  ;;  %v12171_v37 = vsel %vm868_vm0, %v884_v27, %v885_v28  ;;  %v12174_v38 = vsel %vm868_vm0, %v885_v28, %v887_v29  ;;  %v897_v39 = vcombine.low %v12151_v30, %v12165_v35  ;;  %v965_v41 = vcombine.low %v12155_v32, %v12168_v36 }
  0x26   : > { %v913_v40 = vcombine.low %v12158_v33, %v12171_v37  ;;  %v981_v42 = vcombine.low %v12161_v34, %v12174_v38  ;;  %v898_v47 = vcombine.high %v12151_v30, %v12165_v35  ;;  %v914_v48 = vcombine.high %v12158_v33, %v12171_v37 }
  0x27   : > { %v905_v43 = vrot.slane %v897_v39, %v12050_v12  ;;  %v973_v45 = vrot.slane %v965_v41, %v12050_v12  ;;  %v966_v51 = vcombine.high %v12155_v32, %v12168_v36  ;;  %v982_v52 = vcombine.high %v12161_v34, %v12174_v38 }
  0x28   : > { %11698 = vrot.lane.b32.xlu1 %v11697_v22, %s11987_s23  ;;  %v921_v44 = vrot.slane %v913_v40, %v12050_v12  ;;  %v989_v46 = vrot.slane %v981_v42, %v12050_v12  ;;  %v912_v55 = vrot.slane %v898_v47, %v12050_v12  ;;  %v928_v56 = vrot.slane %v914_v48, %v12050_v12 }
  0x29   : > { %11703 = vrot.lane.b32.xlu0 %v11702_v8, %s11988_s24  ;;  %v980_v58 = vrot.slane %v966_v51, %v12050_v12  ;;  %v996_v59 = vrot.slane %v982_v52, %v12050_v12  ;;  %vm11270_vm14 = vcmask 1043459   ;;  %vm11272_vm15 = vcmask 1044484  }
  0x2a   : > { %v929_v53 = vcombine.low %v905_v43, %v921_v44  ;;  %v997_v54 = vcombine.low %v973_v45, %v989_v46  ;;  %v930_v62 = vcombine.high %v905_v43, %v921_v44  ;;  %v998_v63 = vcombine.high %v973_v45, %v989_v46 }
  0x2b   : > { %v945_v2 = vcombine.low %v912_v55, %v928_v56  ;;  %v1013_v6 = vcombine.low %v980_v58, %v996_v59  ;;  %v946_v23 = vcombine.high %v912_v55, %v928_v56  ;;  %v1014_v24 = vcombine.high %v980_v58, %v996_v59 }
  0x2c   : > { %412 = vrot.lane.b32.xlu1 %v12060_v14, %s11982_s18  ;;  %v12214_v60 = vrot.slane %v929_v53, %v12074_v19  ;;  %v12217_v61 = vrot.slane %v997_v54, %v12074_v19  ;;  %v944_v20 = vrot.slane %v930_v62, %v12074_v19  ;;  %v1012_v21 = vrot.slane %v998_v63, %v12074_v19 }
  0x2d   : > { %11708 = vrot.lane.b32.xlu0 %v11707_v31, %s11989_s25  ;;  %v953_v22 = vrot.slane %v945_v2, %v12074_v19  ;;  %v1021_v28 = vrot.slane %v1013_v6, %v12074_v19  ;;  %v960_v29 = vrot.slane %v946_v23, %v12074_v19  ;;  %v1028_v41 = vrot.slane %v1014_v24, %v12074_v19 }
  0x2e   : > { %v961_v8 = vcombine.high %v12214_v60, %v17168_v5  ;;  %v1029_v18 = vcombine.high %v12217_v61, %v17168_v5  ;;  %v962_v26 = vcombine.high %v944_v20, %v17168_v5  ;;  %v1030_v27 = vcombine.high %v1012_v21, %v17168_v5 }
  0x2f   : > { %v963_v39 = vcombine.high %v953_v22, %v17168_v5  ;;  %v1031_v40 = vcombine.high %v1021_v28, %v17168_v5  ;;  %v964_v43 = vcombine.high %v960_v29, %v17168_v5  ;;  %v1032_v44 = vcombine.high %v1028_v41, %v17168_v5 }
  0x30   : > { %416 = vrot.lane.b32.xlu1 %v12066_v16, %s11982_s18  ;;  %v11712_v25 = vpack.i.bf16 %v1029_v18, %v961_v8  ;;  %v11722_v31 = vpack.i.bf16 %v1030_v27, %v962_v26  ;;  %v11717_v45 = vpack.i.bf16 %v1012_v21, %v944_v20  ;;  %v11727_v47 = vpack.i.bf16 %v1021_v28, %v953_v22 }
  0x31   : > { %410 = vrot.lane.b32.xlu0 %v12057_v13, %s11982_s18  ;;  %v11732_v42 = vpack.i.bf16 %v1031_v40, %v963_v39  ;;  %v11742_v46 = vpack.i.bf16 %v1032_v44, %v964_v43  ;;  %v11737_v48 = vpack.i.bf16 %v1028_v41, %v960_v29  ;;  %vm11274_vm0 = vcmask 1045509  }
  0x34   : > { %636 = vrot.lane.b32.xlu1 %v12044_v10, %s11990_s26 }
  0x35   : > { %414 = vrot.lane.b32.xlu0 %v12063_v15, %s11982_s18 }
  0x38   : > { %640 = vrot.lane.b32.xlu1 %v12057_v13, %s11990_s26 }
  0x39   : > { %418 = vrot.lane.b32.xlu0 %v12069_v17, %s11982_s18 }
  0x3c   : > { %644 = vrot.lane.b32.xlu1 %v12063_v15, %s11990_s26 }
  0x3d   : > { %634 = vrot.lane.b32.xlu0 %v12041_v9, %s11990_s26 }
  0x40   : > { %648 = vrot.lane.b32.xlu1 %v12069_v17, %s11990_s26 }
  0x41   : > { %638 = vrot.lane.b32.xlu0 %v12047_v11, %s11990_s26 }
  0x44   : > { %11713 = vrot.lane.b32.xlu1 %v11712_v25, %s11986_s22 }
  0x45   : > { %642 = vrot.lane.b32.xlu0 %v12060_v14, %s11990_s26 }
  0x48   : > { %11723 = vrot.lane.b32.xlu1 %v11722_v31, %s11987_s23 }
  0x49   : > { %646 = vrot.lane.b32.xlu0 %v12066_v16, %s11990_s26 }
  0x4c   : > { %11733 = vrot.lane.b32.xlu1 %v11732_v42, %s11988_s24 }
  0x4d   : > { %11718 = vrot.lane.b32.xlu0 %v11717_v45, %s11984_s20 }
  0x50   : > { %11743 = vrot.lane.b32.xlu1 %v11742_v46, %s11989_s25 }
  0x51   : > { %11728 = vrot.lane.b32.xlu0 %v11727_v47, %s11983_s19 }
  0x54   : > { %1105 = vrot.lane.b32.xlu1 %v12155_v32, %s11982_s18 }
  0x55   : > { %11738 = vrot.lane.b32.xlu0 %v11737_v48, %s11985_s21 }
  0x58   : > { %1109 = vrot.lane.b32.xlu1 %v12161_v34, %s11982_s18 }
  0x59   : > { %1103 = vrot.lane.b32.xlu0 %v12151_v30, %s11982_s18 }
  0x5c   : > { %1113 = vrot.lane.b32.xlu1 %v12168_v36, %s11982_s18 }
  0x5d   : > { %1107 = vrot.lane.b32.xlu0 %v12158_v33, %s11982_s18 }
  0x60   : > { %1117 = vrot.lane.b32.xlu1 %v12174_v38, %s11982_s18 }
  0x61   : > { %1111 = vrot.lane.b32.xlu0 %v12165_v35, %s11982_s18 }
  0x64   : > { %1333 = vrot.lane.b32.xlu1 %v12151_v30, %s11990_s26  ;;  %v1564_v30 = vrot.slane %v12041_v9, 2 }
  0x65   : > { %1115 = vrot.lane.b32.xlu0 %v12171_v37, %s11982_s18 }
  0x68   : > { %1337 = vrot.lane.b32.xlu1 %v12158_v33, %s11990_s26  ;;  %v17167_v33 = vrot.slane %v12044_v10, 2 }
  0x69   : > { %1335 = vrot.lane.b32.xlu0 %v12155_v32, %s11990_s26 }
  0x6a   : > { %v12293_v32 = vsel %vm1563_vm1, %v1564_v30, %v17167_v33 }
  0x6c   : > { %1341 = vrot.lane.b32.xlu1 %v12165_v35, %s11990_s26 }
  0x6d   : > { %1339 = vrot.lane.b32.xlu0 %v12161_v34, %s11990_s26 }
  0x70   : > { %1345 = vrot.lane.b32.xlu1 %v12171_v37, %s11990_s26 }
  0x71   : > { %1343 = vrot.lane.b32.xlu0 %v12168_v36, %s11990_s26 }
  0x75   : > { %1347 = vrot.lane.b32.xlu0 %v12174_v38, %s11990_s26 }
  0x86   : > { %v405_v34 = vpop.permute.xlu1 %404  ;;  %v407_v51 = vpop.permute.xlu0 %406 }
  0x8a   : > { %v409_v35 = vpop.permute.xlu1 %408 }
  0x92   : > { %v12295_v37 = vpop.permute.xlu1 %11683 }
  0x93   : > { %v12297_v52 = vpop.permute.xlu0 %11678 }
  0x96   : > { %v12299_v36 = vpop.permute.xlu1 %11688 }
  0x97   : > { %v12301_v38 = vpop.permute.xlu0 %11693 }
  0x9a   : > { %v12303_v9 = vpop.permute.xlu1 %11698 }
  0x9b   : > { %v12305_v53 = vpop.permute.xlu0 %11703 }
  0x9e   : > { %v413_v54 = vpop.permute.xlu1 %412 }
  0x9f   : > { %v12307_v55 = vpop.permute.xlu0 %11708  ;;  %v428_v63 = vcombine.low %v405_v34, %v413_v54  ;;  %v429_v24 = vcombine.high %v405_v34, %v413_v54 }
  0xa1   : > { %v12315_v22 = vrot.slane %v428_v63, %v12050_v12  ;;  %v443_v43 = vrot.slane %v429_v24, %v12050_v12 }
  0xa2   : > { %v417_v56 = vpop.permute.xlu1 %416 }
  0xa3   : > { %v411_v58 = vpop.permute.xlu0 %410  ;;  %v444_v59 = vcombine.low %v409_v35, %v417_v56  ;;  %v445_v6 = vcombine.high %v409_v35, %v417_v56 }
  0xa5   : > { %v12312_v8 = vrot.slane %v444_v59, %v12050_v12  ;;  %v459_v27 = vrot.slane %v445_v6, %v12050_v12 }
  0xa6   : > { %v12309_v62 = vpop.permute.xlu1 %636 }
  0xa7   : > { %v415_v2 = vpop.permute.xlu0 %414  ;;  %v461_v28 = vcombine.high %v12315_v22, %v12312_v8  ;;  %v476_v46 = vcombine.low %v443_v43, %v459_v27 }
  0xa8   : > { %v496_v18 = vcombine.low %v407_v51, %v415_v2  ;;  %v497_v20 = vcombine.high %v407_v51, %v415_v2 }
  0xa9   : > { %v12332_v48 = vrot.slane %v461_v28, %v12074_v19  ;;  %v12347_v2 = vrot.slane %v476_v46, %v12074_v19 }
  0xaa   : > { %v641_v21 = vpop.permute.xlu1 %640  ;;  %v12321_v29 = vrot.slane %v496_v18, %v12050_v12  ;;  %v511_v31 = vrot.slane %v497_v20, %v12050_v12 }
  0xab   : > { %v419_v23 = vpop.permute.xlu0 %418 }
  0xac   : > { %v512_v25 = vcombine.low %v411_v58, %v419_v23  ;;  %v513_v26 = vcombine.high %v411_v58, %v419_v23  ;;  %v477_v58 = vcombine.high %v443_v43, %v459_v27 }
  0xae   : > { %v12325_v39 = vrot.slane %v512_v25, %v12050_v12  ;;  %v527_v40 = vrot.slane %v513_v26, %v12050_v12  ;;  %v645_v41 = vpop.permute.xlu1 %644  ;;  %v12360_v27 = vrot.slane %v477_v58, %v12074_v19 }
  0xaf   : > { %v635_v42 = vpop.permute.xlu0 %634  ;;  %v726_v59 = vcombine.low %v12309_v62, %v645_v41 }
  0xb0   : > { %v529_v44 = vcombine.high %v12321_v29, %v12325_v39  ;;  %v544_v45 = vcombine.low %v511_v31, %v527_v40  ;;  %v545_v35 = vcombine.high %v511_v31, %v527_v40 }
  0xb1   : > { %v734_v24 = vrot.slane %v726_v59, %v12050_v12 }
  0xb2   : > { %v649_v47 = vpop.permute.xlu1 %648  ;;  %v12335_v30 = vrot.slane %v529_v44, %v12074_v19  ;;  %v12340_v56 = vrot.slane %v544_v45, %v12074_v19  ;;  %v12353_v23 = vrot.slane %v545_v35, %v12074_v19  ;;  %v727_v35 = vcombine.high %v12309_v62, %v645_v41 }
  0xb3   : > { %v639_v34 = vpop.permute.xlu0 %638  ;;  %v742_v51 = vcombine.low %v641_v21, %v649_v47  ;;  %v743_v28 = vcombine.high %v641_v21, %v649_v47 }
  0xb4   : > { %v11747_v54 = vpack.i.bf16 %v12335_v30, %v12332_v48  ;;  %v11752_v20 = vpack.i.bf16 %v12340_v56, %v12347_v2  ;;  %v11757_v46 = vpack.i.bf16 %v12353_v23, %v12360_v27  ;;  %v741_v41 = vrot.slane %v727_v35, %v12050_v12 }
  0xb5   : > { %v750_v18 = vrot.slane %v742_v51, %v12050_v12  ;;  %v757_v21 = vrot.slane %v743_v28, %v12050_v12 }
  0xb6   : > { %11748 = vrot.lane.b32.xlu0 %v11747_v54, %s11984_s20  ;;  %v12344_v63 = vpop.permute.xlu1 %11713 }
  0xb7   : > { %v643_v6 = vpop.permute.xlu0 %642  ;;  %v758_v43 = vcombine.low %v734_v24, %v750_v18  ;;  %v775_v0 = vcombine.high %v741_v41, %v757_v21 }
  0xb8   : > { %v658_v25 = vcombine.low %v635_v42, %v643_v6  ;;  %v659_v31 = vcombine.high %v635_v42, %v643_v6  ;;  %v759_v42 = vcombine.high %v734_v24, %v750_v18  ;;  %v774_v18 = vcombine.low %v741_v41, %v757_v21 }
  0xb9   : > { %v12376_v62 = vrot.slane %v758_v43, %v12074_v19 }
  0xba   : > { %11753 = vrot.lane.b32.xlu0 %v11752_v20, %s11983_s19  ;;  %v12357_v26 = vpop.permute.xlu1 %11723  ;;  %v666_v51 = vrot.slane %v658_v25, %v12050_v12  ;;  %v673_v47 = vrot.slane %v659_v31, %v12050_v12  ;;  %v773_v28 = vrot.slane %v759_v42, %v12074_v19  ;;  %v528_v31 = vcombine.low %v12321_v29, %v12325_v39 }
  0xbb   : > { %v647_v40 = vpop.permute.xlu0 %646  ;;  %17383 = vst [vmem:[#allocation3_spill] sm:$0xff] %v12376_v62  ;;  %v790_v43 = vcombine.high %v12376_v62, %v17168_v5  ;;  %v782_v39 = vrot.slane %v774_v18, %v12074_v19 }
  0xbc   : > { %v674_v44 = vcombine.low %v639_v34, %v647_v40  ;;  %v675_v45 = vcombine.high %v639_v34, %v647_v40 }
  0xbe   : > { %v682_v54 = vrot.slane %v674_v44, %v12050_v12  ;;  %v689_v59 = vrot.slane %v675_v45, %v12050_v12  ;;  %11758 = vrot.lane.b32.xlu0 %v11757_v46, %s11985_s21  ;;  %v12369_v58 = vpop.permute.xlu1 %11733 }
  0xbf   : > { %v12373_v34 = vpop.permute.xlu0 %11718 }
  0xc0   : > { %v690_v6 = vcombine.low %v666_v51, %v682_v54  ;;  %v691_v20 = vcombine.high %v666_v51, %v682_v54  ;;  %v706_v25 = vcombine.low %v673_v47, %v689_v59  ;;  %v707_v46 = vcombine.high %v673_v47, %v689_v59 }
  0xc2   : > { %v12379_v40 = vpop.permute.xlu1 %11743  ;;  %v705_v44 = vrot.slane %v691_v20, %v12074_v19  ;;  %v12383_v45 = vrot.slane %v690_v6, %v12074_v19  ;;  %v714_v54 = vrot.slane %v706_v25, %v12074_v19  ;;  %v460_v6 = vcombine.low %v12315_v22, %v12312_v8 }
  0xc3   : > { %v12385_v24 = vpop.permute.xlu0 %11728  ;;  %v791_v25 = vcombine.high %v773_v28, %v17168_v5  ;;  %v721_v33 = vrot.slane %v707_v46, %v12074_v19  ;;  %v12408_v8 = vrot.slane %v528_v31, %v12074_v19  ;;  %v792_v46 = vcombine.high %v782_v39, %v17168_v5 }
  0xc4   : > { %17384 = vst [vmem:[#allocation4_spill] sm:$0xff] %v12383_v45  ;;  %v11762_v35 = vpack.i.bf16 %v773_v28, %v705_v44  ;;  %v722_v51 = vcombine.high %v12383_v45, %v17168_v5  ;;  %v723_v59 = vcombine.high %v705_v44, %v17168_v5  ;;  %v11767_v47 = vpack.i.bf16 %v782_v39, %v714_v54 }
  0xc5   : > { %17385 = vst [vmem:[#allocation5_spill] sm:$0xff] %v12408_v8  ;;  %v724_v18 = vcombine.high %v714_v54, %v17168_v5  ;;  %v12414_v44 = vrot.slane %v460_v6, %v12074_v19  ;;  %v560_v31 = vcombine.high %v12408_v8, %v17168_v5  ;;  %v725_v54 = vcombine.high %v721_v33, %v17168_v5 }
  0xc6   : > { %v12397_v20 = vpop.permute.xlu1 %1105  ;;  %11763 = vrot.lane.b32.xlu1 %v11762_v35, %s11984_s20  ;;  %v11797_v29 = vpack.i.bf16 %v790_v43, %v722_v51  ;;  %v11802_v41 = vpack.i.bf16 %v791_v25, %v723_v59  ;;  %v789_v43 = vrot.slane %v775_v0, %v12074_v19  ;;  %v561_v39 = vcombine.high %v12335_v30, %v17168_v5 }
  0xc7   : > { %v12400_v42 = vpop.permute.xlu0 %11738  ;;  %17386 = vst [vmem:[#allocation6_spill] sm:$0xff] %v12414_v44  ;;  %v492_v0 = vcombine.high %v12414_v44, %v17168_v5 }
  0xc8   : > { %11798 = vrot.lane.b32.xlu0 %v11797_v29, %s11986_s22  ;;  %v11772_v28 = vpack.i.bf16 %v789_v43, %v721_v33  ;;  %v11807_v29 = vpack.i.bf16 %v792_v46, %v724_v18  ;;  %v793_v59 = vcombine.high %v789_v43, %v17168_v5  ;;  %v493_v18 = vcombine.high %v12332_v48, %v17168_v5 }
  0xc9   : > { %v11777_v6 = vpack.i.bf16 %v560_v31, %v492_v0  ;;  %v562_v43 = vcombine.high %v12340_v56, %v17168_v5  ;;  %v494_v48 = vcombine.high %v12347_v2, %v17168_v5 }
  0xca   : > { %v1110_v22 = vpop.permute.xlu1 %1109  ;;  %11768 = vrot.lane.b32.xlu1 %v11767_v47, %s11983_s19  ;;  %v11782_v33 = vpack.i.bf16 %v561_v39, %v493_v18  ;;  %v563_v18 = vcombine.high %v12353_v23, %v17168_v5 }
  0xcb   : > { %v1104_v21 = vpop.permute.xlu0 %1103 }
  0xcc   : > { %11803 = vrot.lane.b32.xlu0 %v11802_v41, %s11987_s23 }
  0xce   : > { %v1114_v35 = vpop.permute.xlu1 %1113  ;;  %11773 = vrot.lane.b32.xlu1 %v11772_v28, %s11985_s21  ;;  %v11812_v28 = vpack.i.bf16 %v793_v59, %v725_v54 }
  0xcf   : > { %v1108_v51 = vpop.permute.xlu0 %1107  ;;  %v1195_v46 = vcombine.low %v12397_v20, %v1114_v35  ;;  %v1196_v56 = vcombine.high %v12397_v20, %v1114_v35  ;;  %v495_v35 = vcombine.high %v12360_v27, %v17168_v5 }
  0xd0   : > { %11808 = vrot.lane.b32.xlu0 %v11807_v29, %s11988_s24 }
  0xd1   : > { %v12444_v59 = vrot.slane %v1195_v46, %v12050_v12 }
  0xd2   : > { %v1118_v47 = vpop.permute.xlu1 %1117  ;;  %11778 = vrot.lane.b32.xlu1 %v11777_v6, %s11986_s22 }
  0xd3   : > { %v1211_v25 = vcombine.low %v1110_v22, %v1118_v47  ;;  %v1112_v41 = vpop.permute.xlu0 %1111  ;;  %v1212_v0 = vcombine.high %v1110_v22, %v1118_v47 }
  0xd4   : > { %11813 = vrot.lane.b32.xlu0 %v11812_v28, %s11989_s25  ;;  %v1127_v30 = vcombine.low %v1104_v21, %v1112_v41  ;;  %v1128_v6 = vcombine.high %v1104_v21, %v1112_v41 }
  0xd5   : > { %v12436_v31 = vrot.slane %v1211_v25, %v12050_v12  ;;  %v11787_v25 = vpack.i.bf16 %v562_v43, %v494_v48  ;;  %v1569_v48 = vrot.slane %v12047_v11, 2 }
  0xd6   : > { %v12438_v29 = vpop.permute.xlu1 %1333  ;;  %11783 = vrot.lane.b32.xlu1 %v11782_v33, %s11987_s23  ;;  %v12452_v21 = vrot.slane %v1127_v30, %v12050_v12  ;;  %v1142_v20 = vrot.slane %v1128_v6, %v12050_v12  ;;  %v1210_v33 = vrot.slane %v1196_v56, %v12050_v12  ;;  %v11792_v30 = vpack.i.bf16 %v563_v18, %v495_v35 }
  0xd7   : > { %v1116_v54 = vpop.permute.xlu0 %1115  ;;  %v1228_v22 = vcombine.high %v12444_v59, %v12436_v31  ;;  %v1570_v56 = vrot.slane %v12057_v13, 2  ;;  %v1572_v18 = vrot.slane %v12128_v1, 2  ;;  %v1574_v35 = vrot.slane %v12060_v14, 2 }
  0xd8   : > { %v1143_v39 = vcombine.low %v1108_v51, %v1116_v54  ;;  %v1144_v28 = vcombine.high %v1108_v51, %v1116_v54  ;;  %v1226_v51 = vrot.slane %v1212_v0, %v12050_v12 }
  0xd9   : > { %v12476_v6 = vrot.slane %v1228_v22, %v12074_v19  ;;  %v1575_v22 = vrot.slane %v12063_v15, 2  ;;  %v1579_v15 = vrot.slane %v12066_v16, 2 }
  0xda   : > { %v12455_v47 = vrot.slane %v1143_v39, %v12050_v12  ;;  %v1158_v2 = vrot.slane %v1144_v28, %v12050_v12  ;;  %v12458_v41 = vpop.permute.xlu1 %1337  ;;  %11788 = vrot.lane.b32.xlu1 %v11787_v25, %s11988_s24  ;;  %v1243_v39 = vcombine.low %v1210_v33, %v1226_v51  ;;  %v1567_v28 = vrot.slane %v12119_v57, 2 }
  0xdb   : > { %v12463_v23 = vpop.permute.xlu0 %1335  ;;  %v1244_v13 = vcombine.high %v1210_v33, %v1226_v51  ;;  %v12508_v51 = vsel %vm1563_vm1, %v1570_v56, %v1572_v18  ;;  %v12511_v33 = vsel %vm1563_vm1, %v1574_v35, %v1575_v22 }
  0xdc   : > { %v1160_v46 = vcombine.high %v12452_v21, %v12455_v47  ;;  %v1175_v43 = vcombine.low %v1142_v20, %v1158_v2  ;;  %v12496_v14 = vrot.slane %v1243_v39, %v12074_v19 }
  0xde   : > { %v12470_v54 = vpop.permute.xlu1 %1341  ;;  %v12473_v0 = vrot.slane %v1160_v46, %v12074_v19  ;;  %11793 = vrot.lane.b32.xlu1 %v11792_v30, %s11989_s25  ;;  %v1176_v46 = vcombine.high %v1142_v20, %v1158_v2  ;;  %v12488_v11 = vrot.slane %v1175_v43, %v12074_v19  ;;  %v1577_v30 = vrot.slane %v12132_v3, 2 }
  0xdf   : > { %v1340_v27 = vpop.permute.xlu0 %1339  ;;  %v1357_v57 = vcombine.low %v12438_v29, %v12470_v54  ;;  %v17387_v2 = vrot.slane %v12044_v10, 2  ;;  %v12505_v3 = vsel %vm1563_vm1, %v1569_v48, %v1570_v56  ;;  %v1580_v56 = vrot.slane %v12069_v17, 2 }
  0xe0   : > { %v11817_v25 = vpack.i.bf16 %v12476_v6, %v12473_v0  ;;  %v11822_v39 = vpack.i.bf16 %v12496_v14, %v12488_v11  ;;  %v12517_v16 = vrot.slane %v1176_v46, %v12074_v19  ;;  %v12520_v10 = vsel %vm1563_vm1, %v1575_v22, %v1577_v30 }
  0xe1   : > { %v12502_v20 = vsel %vm1563_vm1, %v17387_v2, %v1567_v28  ;;  %v1365_v48 = vrot.slane %v1357_v57, %v12050_v12  ;;  %v12531_v46 = vrot.slane %v1244_v13, %v12074_v19  ;;  %v1592_v22 = vcombine.low %v12293_v32, %v12511_v33 }
  0xe2   : > { %v1346_v5 = vpop.permute.xlu1 %1345  ;;  %11818 = vrot.lane.b32.xlu1 %v11817_v25, %s11984_s20  ;;  %v1582_v25 = vrot.slane %v12135_v4, 2  ;;  %v1227_v4 = vcombine.low %v12444_v59, %v12436_v31 }
  0xe3   : > { %v1373_v7 = vcombine.low %v12458_v41, %v1346_v5  ;;  %v1344_v1 = vpop.permute.xlu0 %1343  ;;  %v1374_v18 = vcombine.high %v12458_v41, %v1346_v5  ;;  %v1358_v5 = vcombine.high %v12438_v29, %v12470_v54  ;;  %v12553_v29 = vsel %vm1563_vm1, %v1579_v15, %v1580_v56 }
  0xe4   : > { %v1425_v28 = vcombine.low %v12463_v23, %v1344_v1  ;;  %v1426_v57 = vcombine.high %v12463_v23, %v1344_v1  ;;  %v12556_v59 = vsel %vm1563_vm1, %v1580_v56, %v1582_v25  ;;  %vm11276_vm1 = vcmask 1046534  }
  0xe5   : > { %v1381_v43 = vrot.slane %v1373_v7, %v12050_v12  ;;  %v1159_v7 = vcombine.low %v12452_v21, %v12455_v47  ;;  %v11827_v21 = vpack.i.bf16 %v12531_v46, %v12517_v16  ;;  %v1660_v47 = vcombine.low %v12502_v20, %v12520_v10 }
  0xe6   : > { %11823 = vrot.lane.b32.xlu1 %v11822_v39, %s11983_s19  ;;  %v1433_v13 = vrot.slane %v1425_v28, %v12050_v12  ;;  %v1440_v54 = vrot.slane %v1426_v57, %v12050_v12  ;;  %v1372_v28 = vrot.slane %v1358_v5, %v12050_v12  ;;  %v17392_v57 = vmov 0.0  }
  0xe7   : > { %v1348_v35 = vpop.permute.xlu0 %1347  ;;  %v1389_v30 = vcombine.low %v1365_v48, %v1381_v43  ;;  %v1390_v41 = vcombine.high %v1365_v48, %v1381_v43  ;;  %v12550_v31 = vrot.slane %v1159_v7, %v12074_v19  ;;  %v12567_v7 = vrot.slane %v1592_v22, %v12050_v12 }
  0xe8   : > { %v1441_v17 = vcombine.low %v1340_v27, %v1348_v35  ;;  %v1442_v2 = vcombine.high %v1340_v27, %v1348_v35  ;;  %v1388_v27 = vrot.slane %v1374_v18, %v12050_v12  ;;  %v12564_v18 = vrot.slane %v1227_v4, %v12074_v19 }
  0xe9   : > { %17388 = vst [vmem:[#allocation7_spill] sm:$0xff] %v12550_v31  ;;  %v12560_v48 = vrot.slane %v1389_v30, %v12074_v19  ;;  %v1404_v35 = vrot.slane %v1390_v41, %v12074_v19  ;;  %v1191_v30 = vcombine.high %v12550_v31, %v17392_v57  ;;  %v1676_v22 = vcombine.low %v12508_v51, %v12556_v59 }
  0xea   : > { %v1449_v39 = vrot.slane %v1441_v17, %v12050_v12  ;;  %v1456_v23 = vrot.slane %v1442_v2, %v12050_v12  ;;  %11828 = vrot.lane.b32.xlu1 %v11827_v21, %s11985_s21  ;;  %17390 = vst [vmem:[#allocation9_spill] sm:$0xff] %v12564_v18  ;;  %v1608_v17 = vcombine.low %v12505_v3, %v12553_v29 }
  0xeb   : > { %17389 = vst [vmem:[#allocation8_spill] sm:$0xff] %v12560_v48  ;;  %v12579_v2 = vrot.slane %v1660_v47, %v12050_v12  ;;  %v1405_v4 = vcombine.low %v1372_v28, %v1388_v27  ;;  %v1421_v21 = vcombine.high %v12560_v48, %v17392_v57  ;;  %v1609_v47 = vcombine.high %v12505_v3, %v12553_v29 }
  0xec   : > { %v1457_v1 = vcombine.low %v1433_v13, %v1449_v39  ;;  %v1458_v43 = vcombine.high %v1433_v13, %v1449_v39  ;;  %v1473_v15 = vcombine.low %v1440_v54, %v1456_v23  ;;  %v1259_v13 = vcombine.high %v12564_v18, %v17392_v57 }
  0xed   : > { %v1593_v39 = vcombine.high %v12293_v32, %v12511_v33  ;;  %v1192_v18 = vcombine.high %v12473_v0, %v17392_v57  ;;  %v1616_v44 = vrot.slane %v1608_v17, %v12050_v12  ;;  %v1684_v8 = vrot.slane %v1676_v22, %v12050_v12 }
  0xee   : > { %v1472_v56 = vrot.slane %v1458_v43, %v12074_v19  ;;  %v12572_v25 = vrot.slane %v1457_v1, %v12074_v19  ;;  %v1661_v1 = vcombine.high %v12502_v20, %v12520_v10  ;;  %v1474_v43 = vcombine.high %v1440_v54, %v1456_v23 }
  0xef   : > { %v1677_v45 = vcombine.high %v12508_v51, %v12556_v59  ;;  %v1406_v62 = vcombine.high %v1372_v28, %v1388_v27  ;;  %v11837_v23 = vpack.i.bf16 %v1259_v13, %v1191_v30  ;;  %v1422_v54 = vcombine.high %v1404_v35, %v17392_v57 }
  0xf0   : > { %17391 = vst [vmem:[#allocation10_spill] sm:$0xff] %v12572_v25  ;;  %v11832_v5 = vpack.i.bf16 %v1472_v56, %v1404_v35  ;;  %v1489_v41 = vcombine.high %v12572_v25, %v17392_v57  ;;  %v1490_v48 = vcombine.high %v1472_v56, %v17392_v57  ;;  %v1481_v25 = vrot.slane %v1473_v15, %v12074_v19 }
  0xf1   : > { %v1413_v56 = vrot.slane %v1405_v4, %v12074_v19  ;;  %v1607_v15 = vrot.slane %v1593_v39, %v12050_v12  ;;  %v1260_v17 = vcombine.high %v12476_v6, %v17392_v57  ;;  %v1488_v27 = vrot.slane %v1474_v43, %v12074_v19 }
  0xf2   : > { %11833 = vrot.lane.b32.xlu0 %v11832_v5, %s11984_s20  ;;  %v11862_v31 = vpack.i.bf16 %v1489_v41, %v1421_v21  ;;  %v1623_v5 = vrot.slane %v1609_v47, %v12050_v12  ;;  %v11867_v0 = vpack.i.bf16 %v1490_v48, %v1422_v54  ;;  %v1491_v22 = vcombine.high %v1481_v25, %v17392_v57 }
  0xf3   : > { %v1693_v28 = vcombine.high %v12579_v2, %v1684_v8  ;;  %v1675_v35 = vrot.slane %v1661_v1, %v12050_v12  ;;  %v1691_v30 = vrot.slane %v1677_v45, %v12050_v12  ;;  %v11842_v4 = vpack.i.bf16 %v1260_v17, %v1192_v18 }
  0xf4   : > { %11863 = vrot.lane.b32.xlu1 %v11862_v31, %s11986_s22  ;;  %v1625_v31 = vcombine.high %v12567_v7, %v1616_v44  ;;  %v1423_v48 = vcombine.high %v1413_v56, %v17392_v57  ;;  %v1193_v6 = vcombine.high %v12488_v11, %v17392_v57  ;;  %v1420_v21 = vrot.slane %v1406_v62, %v12074_v19 }
  0xf5   : > { %v1261_v13 = vcombine.high %v12496_v14, %v17392_v57  ;;  %v1492_v39 = vcombine.high %v1488_v27, %v17392_v57  ;;  %v1640_v47 = vcombine.low %v1607_v15, %v1623_v5  ;;  %v1708_v1 = vcombine.low %v1675_v35, %v1691_v30 }
  0xf6   : > { %11838 = vrot.lane.b32.xlu0 %v11837_v23, %s11986_s22  ;;  %v11872_v41 = vpack.i.bf16 %v1491_v22, %v1423_v48  ;;  %v1639_v45 = vrot.slane %v1625_v31, %v12074_v19  ;;  %v1424_v43 = vcombine.high %v1420_v21, %v17392_v57  ;;  %v1194_v62 = vcombine.high %v12517_v16, %v17392_v57 }
  0xf7   : > { %v11847_v18 = vpack.i.bf16 %v1261_v13, %v1193_v6  ;;  %v1707_v11 = vrot.slane %v1693_v28, %v12074_v19  ;;  %v1262_v14 = vcombine.high %v12531_v46, %v17392_v57  ;;  %v1624_v54 = vcombine.low %v12567_v7, %v1616_v44 }
  0xf8   : > { %11868 = vrot.lane.b32.xlu1 %v11867_v0, %s11987_s23  ;;  %v11882_v23 = vpack.i.bf16 %v1492_v39, %v1424_v43  ;;  %v1692_v0 = vcombine.low %v12579_v2, %v1684_v8  ;;  %v1648_v17 = vrot.slane %v1640_v47, %v12074_v19  ;;  %v1716_v22 = vrot.slane %v1708_v1, %v12074_v19 }
  0xf9   : > { %v11852_v31 = vpack.i.bf16 %v1262_v14, %v1194_v62  ;;  %v11892_v16 = vpack.i.bf16 %v1707_v11, %v1639_v45  ;;  %v1709_v28 = vcombine.high %v1675_v35, %v1691_v30  ;;  %v12643_v48 = vrot.slane %v1624_v54, %v12074_v19 }
  0xfa   : > { %11843 = vrot.lane.b32.xlu0 %v11842_v4, %s11987_s23  ;;  %v1641_v4 = vcombine.high %v1607_v15, %v1623_v5  ;;  %v12646_v46 = vrot.slane %v1692_v0, %v12074_v19  ;;  %v11857_v44 = vpack.i.bf16 %v1481_v25, %v1413_v56  ;;  %v11902_v8 = vpack.i.bf16 %v1716_v22, %v1648_v17 }
  0xfb   : > { %v1723_v2 = vrot.slane %v1709_v28, %v12074_v19  ;;  %v1656_v15 = vcombine.high %v12643_v48, %v17392_v57  ;;  %v11877_v35 = vpack.i.bf16 %v1488_v27, %v1420_v21  ;;  %v1657_v56 = vcombine.high %v1639_v45, %v17392_v57 }
  0xfc   : > { %11873 = vrot.lane.b32.xlu1 %v11872_v41, %s11988_s24  ;;  %v1655_v7 = vrot.slane %v1641_v4, %v12074_v19  ;;  %v1724_v5 = vcombine.high %v12646_v46, %v17392_v57  ;;  %v1725_v6 = vcombine.high %v1707_v11, %v17392_v57  ;;  %v1658_v13 = vcombine.high %v1648_v17, %v17392_v57 }
  0xfd   : > { %v1726_v39 = vcombine.high %v1716_v22, %v17392_v57  ;;  %v1727_v45 = vcombine.high %v1723_v2, %v17392_v57  ;;  %v11695_v62 = vunpack.i.l.bf16 %v12301_v38  ;;  %v11681_v14 = vunpack.i.h.bf16 %v12297_v52 }
  0xfe   : > { %11848 = vrot.lane.b32.xlu0 %v11847_v18, %s11988_s24  ;;  %v11912_v30 = vpack.i.bf16 %v1723_v2, %v1655_v7  ;;  %v11887_v25 = vpack.i.bf16 %v1724_v5, %v1656_v15  ;;  %v11897_v41 = vpack.i.bf16 %v1725_v6, %v1657_v56  ;;  %v1659_v21 = vcombine.high %v1655_v7, %v17392_v57 }
  0xff   : > { %v11907_v27 = vpack.i.bf16 %v1726_v39, %v1658_v13  ;;  %v11696_v18 = vunpack.i.h.bf16 %v12301_v38  ;;  %v376_v54 = vsel %vm375_vm2, %v12107_v49, %v11695_v62  ;;  %v11700_v0 = vunpack.i.l.bf16 %v12303_v9 }
 0x100   : > { %11883 = vrot.lane.b32.xlu1 %v11882_v23, %s11989_s25  ;;  %v11917_v47 = vpack.i.bf16 %v1727_v45, %v1659_v21  ;;  %v11701_v23 = vunpack.i.h.bf16 %v12303_v9  ;;  %v11680_v38 = vunpack.i.l.bf16 %v12297_v52  ;;  %v11716_v28 = vunpack.i.h.bf16 %v12344_v63 }
 0x101   : > { %v389_v11 = vsel %vm375_vm2, %v12110_v50, %v11696_v18  ;;  %v11686_v50 = vunpack.i.h.bf16 %v12295_v37  ;;  %v11685_v52 = vunpack.i.l.bf16 %v12295_v37  ;;  %v11706_v7 = vunpack.i.h.bf16 %v12305_v53 }
 0x102   : > { %11853 = vrot.lane.b32.xlu0 %v11852_v31, %s11989_s25  ;;  %v390_v17 = vsel %vm377_vm3, %v389_v11, %v11681_v14  ;;  %v378_v4 = vsel %vm377_vm3, %v376_v54, %v11680_v38  ;;  %v11721_v2 = vunpack.i.h.bf16 %v12373_v34  ;;  %v11720_v15 = vunpack.i.l.bf16 %v12373_v34 }
 0x103   : > { %v391_v31 = vsel %vm379_vm4, %v390_v17, %v11701_v23  ;;  %v380_v49 = vsel %vm379_vm4, %v378_v4, %v11700_v0  ;;  %v1096_v37 = vsel %vm375_vm2, %v12217_v61, %v11716_v28  ;;  %v11726_v6 = vunpack.i.h.bf16 %v12357_v26  ;;  %v17394_v4 = vld [vmem:[#allocation4_spill] sm:$0xff] }
 0x104   : > { %11893 = vrot.lane.b32.xlu1 %v11892_v16, %s11984_s20  ;;  %v392_v9 = vsel %vm381_vm5, %v391_v31, %v11686_v50  ;;  %v11725_v34 = vunpack.i.l.bf16 %v12357_v26  ;;  %v11730_v39 = vunpack.i.l.bf16 %v12385_v24  ;;  %v11711_v18 = vunpack.i.h.bf16 %v12307_v55  ;;  %v17393_v50 = vld [vmem:[#allocation3_spill] sm:$0xff] }
 0x105   : > { %v11710_v26 = vunpack.i.l.bf16 %v12307_v55  ;;  %v11736_v11 = vunpack.i.h.bf16 %v12369_v58  ;;  %v11746_v38 = vunpack.i.h.bf16 %v12379_v40  ;;  %v11745_v31 = vunpack.i.l.bf16 %v12379_v40 }
 0x106   : > { %11858 = vrot.lane.b32.xlu0 %v11857_v44, %s11983_s19  ;;  %v11715_v44 = vunpack.i.l.bf16 %v12344_v63  ;;  %v393_v63 = vsel %vm383_vm6, %v392_v9, %v11706_v7 }
 0x108   : > { %11903 = vrot.lane.b32.xlu1 %v11902_v8, %s11983_s19  ;;  %v1089_v56 = vsel %vm375_vm2, %v12214_v60, %v11715_v44  ;;  %v11690_v60 = vunpack.i.l.bf16 %v12299_v36 }
 0x109   : > { %v1090_v13 = vsel %vm377_vm3, %v1089_v56, %v11720_v15  ;;  %v17396_v56 = vld [vmem:[#allocation6_spill] sm:$0xff] }
 0x10a   : > { %11878 = vrot.lane.b32.xlu0 %v11877_v35, %s11985_s21  ;;  %v11691_v35 = vunpack.i.h.bf16 %v12299_v36  ;;  %v1091_v23 = vsel %vm379_vm4, %v1090_v13, %v11725_v34  ;;  %v11741_v36 = vunpack.i.h.bf16 %v12400_v42 }
 0x10b   : > { %v1092_v54 = vsel %vm381_vm5, %v1091_v23, %v11730_v39 }
 0x10c   : > { %11913 = vrot.lane.b32.xlu1 %v11912_v30, %s11985_s21  ;;  %v11705_v30 = vunpack.i.l.bf16 %v12305_v53  ;;  %v11731_v53 = vunpack.i.h.bf16 %v12385_v24  ;;  %v12738_v62 = vsel %vm385_vm7, %v393_v63, %v11691_v35  ;;  %v11735_v24 = vunpack.i.l.bf16 %v12369_v58  ;;  %v17395_v63 = vld [vmem:[#allocation5_spill] sm:$0xff] }
 0x10e   : > { %11888 = vrot.lane.b32.xlu0 %v11887_v25, %s11986_s22  ;;  %v382_v25 = vsel %vm381_vm5, %v380_v49, %v11685_v52  ;;  %v1093_v7 = vsel %vm383_vm6, %v1092_v54, %v11735_v24 }
 0x110   : > { %1798 = vrot.lane.b32.xlu1 %v12293_v32, %s11982_s18 }
 0x112   : > { %11898 = vrot.lane.b32.xlu0 %v11897_v41, %s11987_s23  ;;  %v1097_v41 = vsel %vm377_vm3, %v1096_v37, %v11721_v2 }
 0x113   : > { %v1098_v14 = vsel %vm379_vm4, %v1097_v41, %v11726_v6 }
 0x114   : > { %1802 = vrot.lane.b32.xlu1 %v12505_v3, %s11982_s18  ;;  %v1099_v0 = vsel %vm381_vm5, %v1098_v14, %v11731_v53 }
 0x115   : > { %v1100_v2 = vsel %vm383_vm6, %v1099_v0, %v11736_v11 }
 0x116   : > { %11908 = vrot.lane.b32.xlu0 %v11907_v27, %s11988_s24  ;;  %v384_v27 = vsel %vm383_vm6, %v382_v25, %v11705_v30  ;;  %v11740_v30 = vunpack.i.l.bf16 %v12400_v42  ;;  %v1101_v25 = vsel %vm385_vm7, %v1100_v2, %v11741_v36 }
 0x117   : > { %v12748_v17 = vsel %vm385_vm7, %v384_v27, %v11690_v60 }
 0x118   : > { %1806 = vrot.lane.b32.xlu1 %v12511_v33, %s11982_s18  ;;  %v1094_v54 = vsel %vm385_vm7, %v1093_v7, %v11740_v30 }
 0x11a   : > { %11918 = vrot.lane.b32.xlu0 %v11917_v47, %s11989_s25 }
 0x11c   : > { %1810 = vrot.lane.b32.xlu1 %v12553_v29, %s11982_s18 }
 0x11e   : > { %1800 = vrot.lane.b32.xlu0 %v12502_v20, %s11982_s18 }
 0x122   : > { %1804 = vrot.lane.b32.xlu0 %v12508_v51, %s11982_s18 }
 0x126   : > { %1808 = vrot.lane.b32.xlu0 %v12520_v10, %s11982_s18 }
 0x128   : > { %v12685_v1 = vpop.permute.xlu0 %11748 }
 0x129   : > { %v11751_v34 = vunpack.i.h.bf16 %v12685_v1  ;;  %v11750_v41 = vunpack.i.l.bf16 %v12685_v1 }
 0x12a   : > { %1812 = vrot.lane.b32.xlu0 %v12556_v59, %s11982_s18 }
 0x12c   : > { %v12688_v43 = vpop.permute.xlu0 %11753 }
 0x12d   : > { %v11756_v0 = vunpack.i.h.bf16 %v12688_v43  ;;  %v11755_v36 = vunpack.i.l.bf16 %v12688_v43 }
 0x130   : > { %v12699_v22 = vpop.permute.xlu0 %11758 }
 0x138   : > { %v12704_v16 = vpop.permute.xlu1 %11763 }
 0x139   : > { %v11766_v15 = vunpack.i.h.bf16 %v12704_v16  ;;  %v11765_v35 = vunpack.i.l.bf16 %v12704_v16 }
 0x13a   : > { %v11799_v8 = vpop.permute.xlu0 %11798 }
 0x13b   : > { %v11801_v21 = vunpack.i.h.bf16 %v11799_v8  ;;  %v11800_v45 = vunpack.i.l.bf16 %v11799_v8 }
 0x13c   : > { %v12715_v5 = vpop.permute.xlu1 %11768 }
 0x13d   : > { %v857_v58 = vsel %vm375_vm2, %v17393_v50, %v11801_v21  ;;  %v850_v49 = vsel %vm375_vm2, %v17394_v4, %v11800_v45  ;;  %v11771_v24 = vunpack.i.h.bf16 %v12715_v5  ;;  %v11770_v1 = vunpack.i.l.bf16 %v12715_v5 }
 0x13e   : > { %v11804_v61 = vpop.permute.xlu0 %11803  ;;  %v851_v13 = vsel %vm377_vm3, %v850_v49, %v11765_v35  ;;  %v858_v53 = vsel %vm377_vm3, %v857_v58, %v11766_v15  ;;  %v1102_v4 = vsel %vm387_vm8, %v1101_v25, %v11746_v38  ;;  %v11761_v35 = vunpack.i.h.bf16 %v12699_v22 }
 0x13f   : > { %v11806_v28 = vunpack.i.h.bf16 %v11804_v61  ;;  %v11805_v44 = vunpack.i.l.bf16 %v11804_v61 }
 0x140   : > { %v12732_v47 = vpop.permute.xlu1 %11773 }
 0x141   : > { %v852_v39 = vsel %vm379_vm4, %v851_v13, %v11805_v44  ;;  %v859_v42 = vsel %vm379_vm4, %v858_v53, %v11806_v28  ;;  %v11776_v30 = vunpack.i.h.bf16 %v12732_v47  ;;  %v11775_v25 = vunpack.i.l.bf16 %v12732_v47 }
 0x142   : > { %v11809_v40 = vpop.permute.xlu0 %11808  ;;  %v853_v49 = vsel %vm381_vm5, %v852_v39, %v11770_v1 }
 0x143   : > { %v11811_v45 = vunpack.i.h.bf16 %v11809_v40  ;;  %v11810_v61 = vunpack.i.l.bf16 %v11809_v40  ;;  %v11760_v40 = vunpack.i.l.bf16 %v12699_v22 }
 0x144   : > { %v11779_v9 = vpop.permute.xlu1 %11778 }
 0x145   : > { %v11781_v8 = vunpack.i.h.bf16 %v11779_v9  ;;  %v11780_v52 = vunpack.i.l.bf16 %v11779_v9  ;;  %v860_v9 = vsel %vm381_vm5, %v859_v42, %v11771_v24  ;;  %v854_v44 = vsel %vm383_vm6, %v853_v49, %v11810_v61 }
 0x146   : > { %v11814_v50 = vpop.permute.xlu0 %11813  ;;  %v855_v53 = vsel %vm385_vm7, %v854_v44, %v11775_v25  ;;  %v395_v61 = vsel %vm387_vm8, %v12738_v62, %v11711_v18 }
 0x147   : > { %v627_v37 = vsel %vm375_vm2, %v17395_v63, %v11781_v8  ;;  %v620_v6 = vsel %vm375_vm2, %v17396_v56, %v11780_v52  ;;  %v861_v8 = vsel %vm383_vm6, %v860_v9, %v11811_v45  ;;  %v11816_v2 = vunpack.i.h.bf16 %v11814_v50 }
 0x148   : > { %v11784_v16 = vpop.permute.xlu1 %11783  ;;  %v621_v60 = vsel %vm377_vm3, %v620_v6, %v11750_v41  ;;  %v628_v11 = vsel %vm377_vm3, %v627_v37, %v11751_v34  ;;  %v11815_v43 = vunpack.i.l.bf16 %v11814_v50  ;;  %v1095_v6 = vsel %vm387_vm8, %v1094_v54, %v11745_v31 }
 0x149   : > { %v11786_v27 = vunpack.i.h.bf16 %v11784_v16  ;;  %v11785_v21 = vunpack.i.l.bf16 %v11784_v16  ;;  %v862_v41 = vsel %vm385_vm7, %v861_v8, %v11776_v30  ;;  %v2266_v31 = vrot.slane %v1095_v6, 4 }
 0x14a   : > { %v863_v16 = vsel %vm387_vm8, %v862_v41, %v11816_v2  ;;  %v856_v39 = vsel %vm387_vm8, %v855_v53, %v11815_v43 }
 0x14b   : > { %v622_v23 = vsel %vm379_vm4, %v621_v60, %v11785_v21  ;;  %v629_v14 = vsel %vm379_vm4, %v628_v11, %v11786_v27  ;;  %v2267_v27 = vrot.slane %v1102_v4, 4  ;;  %v388_v60 = vsel %vm387_vm8, %v12748_v17, %v11710_v26 }
 0x14c   : > { %v11789_v58 = vpop.permute.xlu1 %11788  ;;  %v623_v52 = vsel %vm381_vm5, %v622_v23, %v11755_v36  ;;  %v630_v7 = vsel %vm381_vm5, %v629_v14, %v11756_v0  ;;  %v2285_v23 = vsel %vm2282_vm9, %v856_v39, %v2266_v31 }
 0x14d   : > { %v11791_v28 = vunpack.i.h.bf16 %v11789_v58  ;;  %v11790_v5 = vunpack.i.l.bf16 %v11789_v58  ;;  %v2286_v24 = vsel %vm2282_vm9, %v863_v16, %v2267_v27 }
 0x14f   : > { %v624_v15 = vsel %vm383_vm6, %v623_v52, %v11790_v5  ;;  %v631_v38 = vsel %vm383_vm6, %v630_v7, %v11791_v28 }
 0x150   : > { %v11794_v63 = vpop.permute.xlu1 %11793  ;;  %v632_v34 = vsel %vm385_vm7, %v631_v38, %v11761_v35  ;;  %v625_v13 = vsel %vm385_vm7, %v624_v15, %v11760_v40 }
 0x151   : > { %v11796_v37 = vunpack.i.h.bf16 %v11794_v63  ;;  %v11795_v56 = vunpack.i.l.bf16 %v11794_v63 }
 0x153   : > { %v633_v22 = vsel %vm387_vm8, %v632_v34, %v11796_v37  ;;  %v626_v47 = vsel %vm387_vm8, %v625_v13, %v11795_v56 }
 0x154   : > { %v2261_v42 = vrot.slane %v633_v22, 4  ;;  %v2260_v21 = vrot.slane %v626_v47, 4  ;;  %v12803_v45 = vpop.permute.xlu1 %11818 }
 0x156   : > { %v2284_v11 = vsel %vm2282_vm9, %v395_v61, %v2261_v42  ;;  %v2283_v1 = vsel %vm2282_vm9, %v388_v60, %v2260_v21 }
 0x157   : > { %v11634_v14 = vpack.c.bf16 %v2286_v24, %v2284_v11  ;;  %v11636_v54 = vpack.c.bf16 %v2285_v23, %v2283_v1 }
 0x158   : > { %v12817_v18 = vpop.permute.xlu1 %11823 }
 0x159   : > { %11635 = vmatprep.subr.bf16.mxu0 %v11634_v14  ;;  %11642 = vmatprep.subr.bf16.mxu1 %v11634_v14 }
 0x15a   : > { %11637 = vmatpush1.bf16.msra.mxu0 %v11636_v54  ;;  %11645 = vmatpush1.bf16.msra.mxu1 %v11636_v54 }
 0x15c   : > { %v12819_v55 = vpop.permute.xlu1 %11828 }
 0x164   : > { %v12821_v62 = vpop.permute.xlu0 %11833 }
 0x166   : > { %v12823_v26 = vpop.permute.xlu1 %11863 }
 0x168   : > { %v12825_v17 = vpop.permute.xlu0 %11838 }
 0x16a   : > { %v12827_v0 = vpop.permute.xlu1 %11868 }
 0x16c   : > { %v12829_v36 = vpop.permute.xlu0 %11843 }
 0x16e   : > { %v12831_v50 = vpop.permute.xlu1 %11873 }
 0x170   : > { %v12833_v58 = vpop.permute.xlu0 %11848 }
 0x172   : > { %v12835_v4 = vpop.permute.xlu1 %11883 }
 0x174   : > { %v12837_v49 = vpop.permute.xlu0 %11853 }
 0x176   : > { %v12839_v9 = vpop.permute.xlu1 %11893 }
 0x178   : > { %v12841_v28 = vpop.permute.xlu0 %11858 }
 0x17a   : > { %v12843_v5 = vpop.permute.xlu1 %11903 }
 0x17c   : > { %v12845_v44 = vpop.permute.xlu0 %11878 }
 0x17e   : > { %v12847_v8 = vpop.permute.xlu1 %11913 }
 0x180   : > { %v12849_v52 = vpop.permute.xlu0 %11888 }
 0x182   : > { %v1799_v7 = vpop.permute.xlu1 %1798 }
 0x184   : > { %v12851_v2 = vpop.permute.xlu0 %11898 }
 0x186   : > { %v1803_v43 = vpop.permute.xlu1 %1802 }
 0x188   : > { %v12853_v15 = vpop.permute.xlu0 %11908 }
 0x18a   : > { %v1807_v38 = vpop.permute.xlu1 %1806 }
 0x18b   : > { %v1822_v25 = vcombine.low %v1799_v7, %v1807_v38  ;;  %v1823_v41 = vcombine.high %v1799_v7, %v1807_v38 }
 0x18c   : > { %v12855_v35 = vpop.permute.xlu0 %11918 }
 0x18d   : > { %v1830_v56 = vrot.slane %v1822_v25, %v12050_v12  ;;  %v1837_v27 = vrot.slane %v1823_v41, %v12050_v12 }
 0x18e   : > { %v1811_v30 = vpop.permute.xlu1 %1810 }
 0x18f   : > { %v1838_v63 = vcombine.low %v1803_v43, %v1811_v30  ;;  %v1839_v13 = vcombine.high %v1803_v43, %v1811_v30 }
 0x190   : > { %v1801_v40 = vpop.permute.xlu0 %1800 }
 0x191   : > { %v1846_v6 = vrot.slane %v1838_v63, %v12050_v12  ;;  %v1853_v21 = vrot.slane %v1839_v13, %v12050_v12 }
 0x193   : > { %v1854_v16 = vcombine.low %v1830_v56, %v1846_v6  ;;  %v1855_v31 = vcombine.high %v1830_v56, %v1846_v6  ;;  %v1870_v7 = vcombine.low %v1837_v27, %v1853_v21  ;;  %v1871_v6 = vcombine.high %v1837_v27, %v1853_v21 }
 0x194   : > { %v1805_v37 = vpop.permute.xlu0 %1804 }
 0x195   : > { %v12866_v1 = vrot.slane %v1854_v16, %v12074_v19  ;;  %v1869_v43 = vrot.slane %v1855_v31, %v12074_v19  ;;  %v1878_v41 = vrot.slane %v1870_v7, %v12074_v19  ;;  %v11825_v7 = vunpack.i.l.bf16 %v12817_v18 }
 0x197   : > { %v1886_v30 = vcombine.high %v12866_v1, %v17392_v57  ;;  %v1888_v21 = vcombine.high %v1878_v41, %v17392_v57 }
 0x198   : > { %v1809_v34 = vpop.permute.xlu0 %1808 }
 0x199   : > { %v1890_v53 = vcombine.low %v1801_v40, %v1809_v34  ;;  %v1891_v22 = vcombine.high %v1801_v40, %v1809_v34 }
 0x19b   : > { %v1898_v61 = vrot.slane %v1890_v53, %v12050_v12  ;;  %v1905_v60 = vrot.slane %v1891_v22, %v12050_v12  ;;  %v1887_v22 = vcombine.high %v1869_v43, %v17392_v57 }
 0x19c   : > { %v1813_v47 = vpop.permute.xlu0 %1812 }
 0x19d   : > { %v1906_v39 = vcombine.low %v1805_v37, %v1813_v47  ;;  %v1907_v42 = vcombine.high %v1805_v37, %v1813_v47 }
 0x19f   : > { %v1914_v11 = vrot.slane %v1906_v39, %v12050_v12  ;;  %v1921_v24 = vrot.slane %v1907_v42, %v12050_v12  ;;  %v1885_v39 = vrot.slane %v1871_v6, %v12074_v19 }
 0x1a1   : > { %v1922_v23 = vcombine.low %v1898_v61, %v1914_v11  ;;  %v1923_v14 = vcombine.high %v1898_v61, %v1914_v11  ;;  %v1938_v54 = vcombine.low %v1905_v60, %v1921_v24  ;;  %v1939_v25 = vcombine.high %v1905_v60, %v1921_v24  ;;  %v17397_v24 = vld [vmem:[#allocation9_spill] sm:$0xff] }
 0x1a2   : > { %v1889_v60 = vcombine.high %v1885_v39, %v17392_v57 }
 0x1a3   : > { %v1937_v38 = vrot.slane %v1923_v14, %v12074_v19  ;;  %v12871_v40 = vrot.slane %v1922_v23, %v12074_v19  ;;  %v1946_v56 = vrot.slane %v1938_v54, %v12074_v19  ;;  %v1953_v16 = vrot.slane %v1939_v25, %v12074_v19  ;;  %v17398_v23 = vld [vmem:[#allocation7_spill] sm:$0xff] }
 0x1a4   : > { %v11846_v14 = vunpack.i.h.bf16 %v12829_v36  ;;  %v11820_v54 = vunpack.i.l.bf16 %v12803_v45  ;;  %v11871_v25 = vunpack.i.h.bf16 %v12827_v0 }
 0x1a5   : > { %v11927_v63 = vpack.i.bf16 %v1937_v38, %v1869_v43  ;;  %v1954_v37 = vcombine.high %v12871_v40, %v17392_v57  ;;  %v1955_v13 = vcombine.high %v1937_v38, %v17392_v57  ;;  %v11937_v53 = vpack.i.bf16 %v1946_v56, %v1878_v41  ;;  %v17399_v43 = vld [vmem:[#allocation10_spill] sm:$0xff]  ;;  %v17400_v38 = vld [vmem:[#allocation8_spill] sm:$0xff] }
 0x1a6   : > { %v1956_v42 = vcombine.high %v1946_v56, %v17392_v57  ;;  %v11947_v27 = vpack.i.bf16 %v1953_v16, %v1885_v39  ;;  %v1957_v61 = vcombine.high %v1953_v16, %v17392_v57  ;;  %v11850_v41 = vunpack.i.l.bf16 %v12833_v58 }
 0x1a7   : > { %11928 = vrot.lane.b32.xlu0 %v11927_v63, %s11984_s20  ;;  %v11922_v34 = vpack.i.bf16 %v1954_v37, %v1886_v30  ;;  %v11932_v47 = vpack.i.bf16 %v1955_v13, %v1887_v22  ;;  %v11870_v63 = vunpack.i.l.bf16 %v12827_v0  ;;  %v11835_v37 = vunpack.i.l.bf16 %v12821_v62 }
 0x1a8   : > { %v11942_v31 = vpack.i.bf16 %v1956_v42, %v1888_v21  ;;  %v11952_v11 = vpack.i.bf16 %v1957_v61, %v1889_v60  ;;  %v11831_v13 = vunpack.i.h.bf16 %v12819_v55  ;;  %v11830_v0 = vunpack.i.l.bf16 %v12819_v55 }
 0x1a9   : > { %11923 = vrot.lane.b32.xlu1 %v11922_v34, %s11986_s22  ;;  %v11851_v34 = vunpack.i.h.bf16 %v12833_v58  ;;  %v11860_v39 = vunpack.i.l.bf16 %v12841_v28  ;;  %v11876_v42 = vunpack.i.h.bf16 %v12831_v50  ;;  %v11875_v58 = vunpack.i.l.bf16 %v12831_v50 }
 0x1aa   : > { %v11891_v60 = vunpack.i.h.bf16 %v12849_v52  ;;  %v11856_v50 = vunpack.i.h.bf16 %v12837_v49 }
 0x1ab   : > { %11938 = vrot.lane.b32.xlu0 %v11937_v53, %s11983_s19 }
 0x1ad   : > { %11933 = vrot.lane.b32.xlu1 %v11932_v47, %s11987_s23  ;;  %v11861_v47 = vunpack.i.h.bf16 %v12841_v28  ;;  %v11886_v28 = vunpack.i.h.bf16 %v12835_v4 }
 0x1af   : > { %11948 = vrot.lane.b32.xlu0 %v11947_v27, %s11985_s21 }
 0x1b1   : > { %11943 = vrot.lane.b32.xlu1 %v11942_v31, %s11988_s24 }
 0x1b3   : > { %2028 = vrot.lane.b32.xlu0 %v12293_v32, %s11990_s26  ;;  %v11841_v32 = vunpack.i.h.bf16 %v12825_v17 }
 0x1b5   : > { %11953 = vrot.lane.b32.xlu1 %v11952_v11, %s11989_s25  ;;  %v11890_v11 = vunpack.i.l.bf16 %v12849_v52  ;;  %v11881_v52 = vunpack.i.h.bf16 %v12845_v44 }
 0x1b7   : > { %2032 = vrot.lane.b32.xlu0 %v12505_v3, %s11990_s26  ;;  %v11840_v3 = vunpack.i.l.bf16 %v12825_v17  ;;  %v11826_v17 = vunpack.i.h.bf16 %v12817_v18 }
 0x1b9   : > { %2030 = vrot.lane.b32.xlu1 %v12502_v20, %s11990_s26  ;;  %v11866_v20 = vunpack.i.h.bf16 %v12823_v26 }
 0x1bb   : > { %2036 = vrot.lane.b32.xlu0 %v12511_v33, %s11990_s26  ;;  %v11865_v33 = vunpack.i.l.bf16 %v12823_v26  ;;  %v1556_v26 = vsel %vm375_vm2, %v17399_v43, %v11866_v20  ;;  %v11855_v20 = vunpack.i.l.bf16 %v12837_v49  ;;  %v11901_v43 = vunpack.i.h.bf16 %v12851_v2 }
 0x1bd   : > { %2034 = vrot.lane.b32.xlu1 %v12508_v51, %s11990_s26  ;;  %v1326_v51 = vsel %vm375_vm2, %v17397_v24, %v11841_v32  ;;  %v1549_v30 = vsel %vm375_vm2, %v17400_v38, %v11865_v33  ;;  %v11896_v33 = vunpack.i.h.bf16 %v12839_v9  ;;  %v11895_v24 = vunpack.i.l.bf16 %v12839_v9 }
 0x1be   : > { %v1550_v53 = vsel %vm377_vm3, %v1549_v30, %v11835_v37  ;;  %v1784_v9 = vsel %vm375_vm2, %v12643_v48, %v11890_v11 }
 0x1bf   : > { %2040 = vrot.lane.b32.xlu0 %v12553_v29, %s11990_s26  ;;  %v1319_v29 = vsel %vm375_vm2, %v17398_v23, %v11840_v3  ;;  %v1551_v22 = vsel %vm379_vm4, %v1550_v53, %v11870_v63  ;;  %v11885_v3 = vunpack.i.l.bf16 %v12835_v4  ;;  %v11906_v4 = vunpack.i.h.bf16 %v12843_v5 }
 0x1c1   : > { %2038 = vrot.lane.b32.xlu1 %v12520_v10, %s11990_s26  ;;  %v11845_v10 = vunpack.i.l.bf16 %v12829_v36  ;;  %v11836_v36 = vunpack.i.h.bf16 %v12821_v62 }
 0x1c3   : > { %v1557_v62 = vsel %vm377_vm3, %v1556_v26, %v11836_v36  ;;  %v11900_v26 = vunpack.i.l.bf16 %v12851_v2  ;;  %v1785_v2 = vsel %vm377_vm3, %v1784_v9, %v11895_v24 }
 0x1c4   : > { %v1558_v16 = vsel %vm379_vm4, %v1557_v62, %v11871_v25  ;;  %v11911_v62 = vunpack.i.h.bf16 %v12853_v15 }
 0x1c5   : > { %2042 = vrot.lane.b32.xlu1 %v12556_v59, %s11990_s26  ;;  %v11821_v59 = vunpack.i.h.bf16 %v12803_v45  ;;  %v1320_v45 = vsel %vm377_vm3, %v1319_v29, %v11820_v54  ;;  %v1559_v23 = vsel %vm381_vm5, %v1558_v16, %v11861_v47  ;;  %v11905_v54 = vunpack.i.l.bf16 %v12843_v5 }
 0x1c6   : > { %v1321_v18 = vsel %vm379_vm4, %v1320_v45, %v11845_v10  ;;  %v1560_v5 = vsel %vm383_vm6, %v1559_v23, %v11876_v42  ;;  %v11916_v42 = vunpack.i.h.bf16 %v12847_v8 }
 0x1c7   : > { %v1327_v56 = vsel %vm377_vm3, %v1326_v51, %v11821_v59  ;;  %v1322_v27 = vsel %vm381_vm5, %v1321_v18, %v11825_v7  ;;  %v1552_v51 = vsel %vm381_vm5, %v1551_v22, %v11860_v39  ;;  %v1561_v36 = vsel %vm385_vm7, %v1560_v5, %v11881_v52 }
 0x1c8   : > { %v1328_v6 = vsel %vm379_vm4, %v1327_v56, %v11846_v14  ;;  %v12951_v31 = vsel %vm383_vm6, %v1322_v27, %v11850_v41  ;;  %v11880_v14 = vunpack.i.l.bf16 %v12845_v44  ;;  %v1553_v30 = vsel %vm383_vm6, %v1552_v51, %v11875_v58 }
 0x1c9   : > { %v1329_v21 = vsel %vm381_vm5, %v1328_v6, %v11826_v17  ;;  %v1791_v17 = vsel %vm375_vm2, %v12646_v46, %v11891_v60  ;;  %v1786_v6 = vsel %vm379_vm4, %v1785_v2, %v11900_v26  ;;  %v11910_v22 = vunpack.i.l.bf16 %v12853_v15 }
 0x1ca   : > { %v12954_v61 = vsel %vm383_vm6, %v1329_v21, %v11851_v34  ;;  %v1554_v48 = vsel %vm385_vm7, %v1553_v30, %v11880_v14  ;;  %v11915_v58 = vunpack.i.l.bf16 %v12847_v8  ;;  %v1787_v15 = vsel %vm381_vm5, %v1786_v6, %v11905_v54 }
 0x1cb   : > { %v1555_v24 = vsel %vm387_vm8, %v1554_v48, %v11885_v3  ;;  %v1788_v8 = vsel %vm383_vm6, %v1787_v15, %v11910_v22  ;;  %v1331_v30 = vsel %vm385_vm7, %v12954_v61, %v11831_v13 }
 0x1cc   : > { %v2272_v26 = vrot.slane %v1555_v24, 4  ;;  %v1789_v48 = vsel %vm385_vm7, %v1788_v8, %v11915_v58 }
 0x219   : > { %v11929_v32 = vpop.permute.xlu0 %11928 }
 0x21a   : > { %v11931_v25 = vunpack.i.h.bf16 %v11929_v32  ;;  %v11930_v46 = vunpack.i.l.bf16 %v11929_v32 }
 0x21b   : > { %v11924_v29 = vpop.permute.xlu1 %11923 }
 0x21c   : > { %v11926_v10 = vunpack.i.h.bf16 %v11924_v29  ;;  %v11925_v59 = vunpack.i.l.bf16 %v11924_v29 }
 0x21d   : > { %v11939_v7 = vpop.permute.xlu0 %11938 }
 0x21e   : > { %v2021_v44 = vsel %vm375_vm2, %v12871_v40, %v11926_v10  ;;  %v2014_v38 = vsel %vm375_vm2, %v12866_v1, %v11925_v59  ;;  %v1792_v40 = vsel %vm377_vm3, %v1791_v17, %v11896_v33  ;;  %v11941_v16 = vunpack.i.h.bf16 %v11939_v7 }
 0x21f   : > { %v11934_v63 = vpop.permute.xlu1 %11933  ;;  %v2015_v56 = vsel %vm377_vm3, %v2014_v38, %v11930_v46  ;;  %v2022_v1 = vsel %vm377_vm3, %v2021_v44, %v11931_v25  ;;  %v1793_v34 = vsel %vm379_vm4, %v1792_v40, %v11901_v43  ;;  %v11940_v47 = vunpack.i.l.bf16 %v11939_v7 }
 0x220   : > { %v11936_v37 = vunpack.i.h.bf16 %v11934_v63  ;;  %v11935_v45 = vunpack.i.l.bf16 %v11934_v63  ;;  %v1562_v33 = vsel %vm387_vm8, %v1561_v36, %v11886_v28  ;;  %v1794_v51 = vsel %vm381_vm5, %v1793_v34, %v11906_v4 }
 0x221   : > { %v11949_v18 = vpop.permute.xlu0 %11948  ;;  %v1795_v52 = vsel %vm383_vm6, %v1794_v51, %v11911_v62  ;;  %v11921_v17 = vunpack.i.h.bf16 %v12855_v35  ;;  %v11920_v28 = vunpack.i.l.bf16 %v12855_v35  ;;  %v2273_v43 = vrot.slane %v1562_v33, 4 }
 0x222   : > { %v2016_v41 = vsel %vm379_vm4, %v2015_v56, %v11935_v45  ;;  %v2023_v53 = vsel %vm379_vm4, %v2022_v1, %v11936_v37  ;;  %v11951_v14 = vunpack.i.h.bf16 %v11949_v18  ;;  %v11950_v10 = vunpack.i.l.bf16 %v11949_v18 }
 0x223   : > { %v11944_v39 = vpop.permute.xlu1 %11943  ;;  %v2017_v60 = vsel %vm381_vm5, %v2016_v41, %v11940_v47  ;;  %v2024_v11 = vsel %vm381_vm5, %v2023_v53, %v11941_v16  ;;  %v1324_v35 = vsel %vm385_vm7, %v12951_v31, %v11830_v0  ;;  %v1796_v63 = vsel %vm385_vm7, %v1795_v52, %v11916_v42 }
 0x224   : > { %v11946_v27 = vunpack.i.h.bf16 %v11944_v39  ;;  %v11945_v21 = vunpack.i.l.bf16 %v11944_v39  ;;  %v1332_v36 = vsel %vm387_vm8, %v1331_v30, %v11856_v50  ;;  %v1797_v37 = vsel %vm387_vm8, %v1796_v63, %v11921_v17 }
 0x225   : > { %v2029_v32 = vpop.permute.xlu0 %2028  ;;  %v1325_v55 = vsel %vm387_vm8, %v1324_v35, %v11855_v20  ;;  %v1790_v13 = vsel %vm387_vm8, %v1789_v48, %v11920_v28  ;;  %v2288_v31 = vsel %vm2282_vm9, %v1332_v36, %v2273_v43 }
 0x226   : > { %v2018_v23 = vsel %vm383_vm6, %v2017_v60, %v11945_v21  ;;  %v2025_v29 = vsel %vm383_vm6, %v2024_v11, %v11946_v27  ;;  %v2287_v45 = vsel %vm2282_vm9, %v1325_v55, %v2272_v26 }
 0x227   : > { %v11954_v59 = vpop.permute.xlu1 %11953  ;;  %v2019_v54 = vsel %vm385_vm7, %v2018_v23, %v11950_v10  ;;  %v2026_v4 = vsel %vm385_vm7, %v2025_v29, %v11951_v14 }
 0x228   : > { %v11956_v3 = vunpack.i.h.bf16 %v11954_v59  ;;  %v11955_v9 = vunpack.i.l.bf16 %v11954_v59 }
 0x229   : > { %v2033_v7 = vpop.permute.xlu0 %2032 }
 0x22a   : > { %v2020_v44 = vsel %vm387_vm8, %v2019_v54, %v11955_v9  ;;  %v2027_v38 = vsel %vm387_vm8, %v2026_v4, %v11956_v3 }
 0x22b   : > { %v2278_v5 = vrot.slane %v2020_v44, 4  ;;  %v2279_v25 = vrot.slane %v2027_v38, 4  ;;  %v2031_v46 = vpop.permute.xlu1 %2030 }
 0x22d   : > { %v2037_v0 = vpop.permute.xlu0 %2036  ;;  %v2290_v61 = vsel %vm2282_vm9, %v1797_v37, %v2279_v25  ;;  %v2289_v2 = vsel %vm2282_vm9, %v1790_v13, %v2278_v5 }
 0x22e   : > { %v11638_v40 = vpack.c.bf16 %v2290_v61, %v2288_v31  ;;  %v11640_v56 = vpack.c.bf16 %v2289_v2, %v2287_v45  ;;  %v2052_v1 = vcombine.low %v2029_v32, %v2037_v0  ;;  %v2053_v20 = vcombine.high %v2029_v32, %v2037_v0 }
 0x22f   : > { %v2035_v50 = vpop.permute.xlu1 %2034 }
 0x230   : > { %11639 = vmatprep.subr.bf16.mxu0 %v11638_v40  ;;  %11643 = vmatprep.subr.bf16.mxu1 %v11638_v40  ;;  %v2060_v41 = vrot.slane %v2052_v1, %v12050_v12  ;;  %v2067_v22 = vrot.slane %v2053_v20, %v12050_v12 }
 0x231   : > { %v2041_v49 = vpop.permute.xlu0 %2040  ;;  %11641 = vmatpush1.bf16.msra.mxu0 %v11640_v56  ;;  %11646 = vmatpush1.bf16.msra.mxu1 %v11640_v56 }
 0x232   : > { %v2068_v18 = vcombine.low %v2033_v7, %v2041_v49  ;;  %v2069_v6 = vcombine.high %v2033_v7, %v2041_v49 }
 0x233   : > { %v2039_v34 = vpop.permute.xlu1 %2038 }
 0x234   : > { %v2076_v53 = vrot.slane %v2068_v18, %v12050_v12  ;;  %v2083_v62 = vrot.slane %v2069_v6, %v12050_v12  ;;  %v2120_v39 = vcombine.low %v2031_v46, %v2039_v34  ;;  %v2121_v29 = vcombine.high %v2031_v46, %v2039_v34 }
 0x236   : > { %v2084_v16 = vcombine.low %v2060_v41, %v2076_v53  ;;  %v2085_v47 = vcombine.high %v2060_v41, %v2076_v53  ;;  %v2100_v58 = vcombine.low %v2067_v22, %v2083_v62  ;;  %v2128_v11 = vrot.slane %v2120_v39, %v12050_v12  ;;  %v2292_v39 = vld [vmem:[%s17163_s1 + $0x8] sm:$0xff] }
 0x237   : > { %v2043_v42 = vpop.permute.xlu1 %2042  ;;  %v2101_v24 = vcombine.high %v2067_v22, %v2083_v62  ;;  %v2135_v17 = vrot.slane %v2121_v29, %v12050_v12  ;;  %v2291_v22 = vld [vmem:[%s17163_s1] sm:$0xff] }
 0x238   : > { %v2136_v27 = vcombine.low %v2035_v50, %v2043_v42  ;;  %v2099_v21 = vrot.slane %v2085_v47, %v12074_v19  ;;  %v2092_v60 = vrot.slane %v2084_v16, %v12074_v19  ;;  %v2137_v15 = vcombine.high %v2035_v50, %v2043_v42  ;;  %v2293_v16 = vld [vmem:[%s17163_s1 + $0x10] sm:$0xff]  ;;  %v2294_v42 = vld [vmem:[%s17163_s1 + $0x18] sm:$0xff] }
 0x239   : > { %v2108_v23 = vrot.slane %v2100_v58, %v12074_v19  ;;  %v2115_v10 = vrot.slane %v2101_v24, %v12074_v19 }
 0x23a   : > { %v2144_v32 = vrot.slane %v2136_v27, %v12050_v12  ;;  %2193 = vrot.lane.b32.xlu1 %v2099_v21, %s11984_s20  ;;  %v2116_v33 = vcombine.high %v2092_v60, %v17392_v57  ;;  %v2117_v8 = vcombine.high %v2099_v21, %v17392_v57  ;;  %v2151_v52 = vrot.slane %v2137_v15, %v12050_v12 }
 0x23b   : > { %v2118_v28 = vcombine.high %v2108_v23, %v17392_v57  ;;  %v2119_v4 = vcombine.high %v2115_v10, %v17392_v57 }
 0x23c   : > { %v2152_v51 = vcombine.low %v2128_v11, %v2144_v32  ;;  %2189 = vrot.lane.b32.xlu0 %v2116_v33, %s11986_s22  ;;  %v2153_v14 = vcombine.high %v2128_v11, %v2144_v32  ;;  %v2168_v3 = vcombine.low %v2135_v17, %v2151_v52  ;;  %v2169_v7 = vcombine.high %v2135_v17, %v2151_v52 }
 0x23e   : > { %2201 = vrot.lane.b32.xlu1 %v2108_v23, %s11983_s19  ;;  %v2160_v59 = vrot.slane %v2152_v51, %v12074_v19  ;;  %v2167_v54 = vrot.slane %v2153_v14, %v12074_v19  ;;  %v2176_v26 = vrot.slane %v2168_v3, %v12074_v19  ;;  %v2183_v38 = vrot.slane %v2169_v7, %v12074_v19 }
 0x240   : > { %2197 = vrot.lane.b32.xlu0 %v2117_v8, %s11987_s23  ;;  %v2184_v9 = vcombine.high %v2160_v59, %v17392_v57  ;;  %v2185_v43 = vcombine.high %v2167_v54, %v17392_v57  ;;  %v2186_v44 = vcombine.high %v2176_v26, %v17392_v57  ;;  %v2187_v30 = vcombine.high %v2183_v38, %v17392_v57 }
 0x242   : > { %2209 = vrot.lane.b32.xlu1 %v2115_v10, %s11985_s21 }
 0x244   : > { %2205 = vrot.lane.b32.xlu0 %v2118_v28, %s11988_s24 }
 0x246   : > { %2217 = vrot.lane.b32.xlu1 %v2184_v9, %s11986_s22 }
 0x248   : > { %2213 = vrot.lane.b32.xlu0 %v2119_v4, %s11989_s25 }
 0x24a   : > { %2225 = vrot.lane.b32.xlu1 %v2185_v43, %s11987_s23 }
 0x24c   : > { %2221 = vrot.lane.b32.xlu0 %v2167_v54, %s11984_s20 }
 0x24e   : > { %2233 = vrot.lane.b32.xlu1 %v2186_v44, %s11988_s24  ;;  %s11633_s24 = sshll.u32 %s18186_s13, 8 }
 0x250   : > { %2229 = vrot.lane.b32.xlu0 %v2176_v26, %s11983_s19 }
 0x252   : > { %2241 = vrot.lane.b32.xlu1 %v2187_v30, %s11989_s25 }
 0x254   : > { %2237 = vrot.lane.b32.xlu0 %v2183_v38, %s11985_s21 }
 0x2ac   : > { %v2194_v35 = vpop.permute.xlu1 %2193 }
 0x2ae   : > { %v2190_v5 = vpop.permute.xlu0 %2189 }
 0x2af   : > { %v2244_v13 = vsel %vm375_vm2, %v2092_v60, %v2190_v5 }
 0x2b0   : > { %v2202_v25 = vpop.permute.xlu1 %2201  ;;  %v2245_v45 = vsel %vm377_vm3, %v2244_v13, %v2194_v35 }
 0x2b2   : > { %v2198_v46 = vpop.permute.xlu0 %2197 }
 0x2b3   : > { %v2246_v2 = vsel %vm379_vm4, %v2245_v45, %v2198_v46 }
 0x2b4   : > { %v2210_v63 = vpop.permute.xlu1 %2209  ;;  %v2247_v49 = vsel %vm381_vm5, %v2246_v2, %v2202_v25 }
 0x2b6   : > { %v2206_v48 = vpop.permute.xlu0 %2205 }
 0x2b7   : > { %v2248_v20 = vsel %vm383_vm6, %v2247_v49, %v2206_v48 }
 0x2b8   : > { %v2218_v36 = vpop.permute.xlu1 %2217  ;;  %v2249_v53 = vsel %vm385_vm7, %v2248_v20, %v2210_v63 }
 0x2b9   : > { %v2251_v0 = vsel %vm375_vm2, %v2160_v59, %v2218_v36  ;;  %vm11278_vm2 = vcmask 1047559  }
 0x2ba   : > { %v2214_v37 = vpop.permute.xlu0 %2213 }
 0x2bb   : > { %v2250_v47 = vsel %vm387_vm8, %v2249_v53, %v2214_v37 }
 0x2bc   : > { %v2226_v55 = vpop.permute.xlu1 %2225 }
 0x2be   : > { %v2222_v31 = vpop.permute.xlu0 %2221 }
 0x2bf   : > { %v2252_v61 = vsel %vm377_vm3, %v2251_v0, %v2222_v31  ;;  %vm11529_vm3 = vcmask 64512  }
 0x2c0   : > { %v2234_v40 = vpop.permute.xlu1 %2233  ;;  %v2253_v50 = vsel %vm379_vm4, %v2252_v61, %v2226_v55 }
 0x2c2   : > { %v2230_v56 = vpop.permute.xlu0 %2229 }
 0x2c3   : > { %v2254_v1 = vsel %vm381_vm5, %v2253_v50, %v2230_v56 }
 0x2c4   : > { %v2255_v6 = vsel %vm383_vm6, %v2254_v1, %v2234_v40  ;;  %v2242_v34 = vpop.permute.xlu1 %2241 }
 0x2c6   : > { %v2238_v18 = vpop.permute.xlu0 %2237 }
 0x2c7   : > { %v2256_v41 = vsel %vm385_vm7, %v2255_v6, %v2238_v18 }
 0x2c8   : > { %v2257_v62 = vsel %vm387_vm8, %v2256_v41, %v2242_v34 }
 0x2c9   : > { %11625 = vmatprep.subr.msk.mxu0 %vm2282_vm9, %v2257_v62  ;;  %11644 = vmatprep.subr.msk.mxu1 %vm2282_vm9, %v2257_v62 }
 0x2ca   : > { %11626 = vmatpush1.msk.msra.mxu0 %vm2282_vm9, %v2250_v47  ;;  %11647 = vmatpush1.msk.msra.mxu1 %vm2282_vm9, %v2250_v47 }
 0x2cb   : > { %11627 = vmatmul.mubr.msk.f32.vlgmr.msra.gmra.mrb[0].mxu0 %vm2295_vm10, %v2291_v22  ;;  %11629 = vmatmul.mubr.msk.f32.vlgmr.msra.gmra.mrb[0].mxu1 %vm2295_vm10, %v2293_v16 }
 0x2cc   : > { %2384 = vmatprep.mubr.f32.mxu0 %v17392_v57  ;;  %2396 = vmatprep.mubr.f32.mxu1 %v17392_v57 }
 0x2cf   : > { %11628 = vmatmul.mubr.msk.f32.gmra.mrb[2].mxu0 %vm2295_vm10, %v2292_v39  ;;  %11630 = vmatmul.mubr.msk.f32.gmra.mrb[2].mxu1 %vm2295_vm10, %v2294_v42 }
 0x39e   : > { %v2380_v58 = vpop.f32.mrb[0].mxu0  ;;  %v13104_v27 = vpop.f32.mrb[0].mxu1 }
 0x39f   : > { %2411 = vrot.lane.b32.xlu0 %v2380_v58, %s11985_s21  ;;  %v13107_v21 = vpop.f32.mrb[1].mxu0  ;;  %v13109_v60 = vpop.f32.mrb[1].mxu1 }
 0x3a2   : > { %v13111_v11 = vpop.f32.mrb[2].mxu0  ;;  %v13113_v32 = vpop.f32.mrb[2].mxu1 }
 0x3a3   : > { %2415 = vrot.lane.b32.xlu0 %v13104_v27, %s11985_s21  ;;  %2413 = vrot.lane.b32.xlu1 %v13111_v11, %s11985_s21  ;;  %v13119_v57 = vpop.f32.mrb[3].mxu0  ;;  %v13121_v33 = vpop.f32.mrb[3].mxu1 }
 0x3a7   : > { %2423 = vrot.lane.b32.xlu0 %v2380_v58, %s11983_s19  ;;  %2417 = vrot.lane.b32.xlu1 %v13113_v32, %s11985_s21 }
 0x3ab   : > { %2427 = vrot.lane.b32.xlu0 %v13104_v27, %s11983_s19  ;;  %2425 = vrot.lane.b32.xlu1 %v13111_v11, %s11983_s19 }
 0x3af   : > { %2435 = vrot.lane.b32.xlu0 %v2380_v58, %s11984_s20  ;;  %2429 = vrot.lane.b32.xlu1 %v13113_v32, %s11983_s19 }
 0x3b3   : > { %2439 = vrot.lane.b32.xlu0 %v13104_v27, %s11984_s20  ;;  %2437 = vrot.lane.b32.xlu1 %v13111_v11, %s11984_s20 }
 0x3b7   : > { %2451 = vrot.lane.b32.xlu0 %v13107_v21, %s11985_s21  ;;  %2441 = vrot.lane.b32.xlu1 %v13113_v32, %s11984_s20 }
 0x3bb   : > { %2455 = vrot.lane.b32.xlu0 %v13109_v60, %s11985_s21  ;;  %2453 = vrot.lane.b32.xlu1 %v13119_v57, %s11985_s21 }
 0x3bf   : > { %2463 = vrot.lane.b32.xlu0 %v13107_v21, %s11983_s19  ;;  %2457 = vrot.lane.b32.xlu1 %v13121_v33, %s11985_s21 }
 0x3c3   : > { %2467 = vrot.lane.b32.xlu0 %v13109_v60, %s11983_s19  ;;  %2465 = vrot.lane.b32.xlu1 %v13119_v57, %s11983_s19 }
 0x3c7   : > { %2475 = vrot.lane.b32.xlu0 %v13107_v21, %s11984_s20  ;;  %2469 = vrot.lane.b32.xlu1 %v13121_v33, %s11983_s19 }
 0x3cb   : > { %2479 = vrot.lane.b32.xlu0 %v13109_v60, %s11984_s20  ;;  %2477 = vrot.lane.b32.xlu1 %v13119_v57, %s11984_s20 }
 0x3cf   : > { %2481 = vrot.lane.b32.xlu1 %v13121_v33, %s11984_s20 }
 0x411   : > { %v2412_v24 = vpop.permute.xlu0 %2411 }
 0x415   : > { %v2416_v15 = vpop.permute.xlu0 %2415  ;;  %v2414_v51 = vpop.permute.xlu1 %2413 }
 0x419   : > { %v2424_v23 = vpop.permute.xlu0 %2423  ;;  %v2418_v29 = vpop.permute.xlu1 %2417 }
 0x41a   : > { %v2487_v3 = vcombine.low %v2380_v58, %v2424_v23  ;;  %v2488_v9 = vcombine.high %v2380_v58, %v2424_v23 }
 0x41c   : > { %v2495_v25 = vrot.slane %v2487_v3, %v12050_v12  ;;  %v2502_v46 = vrot.slane %v2488_v9, %v12050_v12 }
 0x41d   : > { %v2428_v8 = vpop.permute.xlu0 %2427  ;;  %v2426_v52 = vpop.permute.xlu1 %2425 }
 0x41e   : > { %v2759_v4 = vcombine.low %v13104_v27, %v2428_v8  ;;  %v2760_v44 = vcombine.high %v13104_v27, %v2428_v8  ;;  %v2623_v38 = vcombine.low %v13111_v11, %v2426_v52  ;;  %v2624_v36 = vcombine.high %v13111_v11, %v2426_v52 }
 0x420   : > { %v2767_v48 = vrot.slane %v2759_v4, %v12050_v12  ;;  %v2774_v31 = vrot.slane %v2760_v44, %v12050_v12  ;;  %v2631_v61 = vrot.slane %v2623_v38, %v12050_v12  ;;  %v2638_v34 = vrot.slane %v2624_v36, %v12050_v12 }
 0x421   : > { %v2436_v14 = vpop.permute.xlu0 %2435  ;;  %v2430_v10 = vpop.permute.xlu1 %2429 }
 0x422   : > { %v2503_v28 = vcombine.low %v2412_v24, %v2436_v14  ;;  %v2504_v54 = vcombine.high %v2412_v24, %v2436_v14  ;;  %v2895_v56 = vcombine.low %v13113_v32, %v2430_v10  ;;  %v2896_v50 = vcombine.high %v13113_v32, %v2430_v10 }
 0x424   : > { %v2511_v5 = vrot.slane %v2503_v28, %v12050_v12  ;;  %v2518_v63 = vrot.slane %v2504_v54, %v12050_v12  ;;  %v2903_v27 = vrot.slane %v2895_v56, %v12050_v12  ;;  %v13191_v11 = vrot.slane %v2896_v50, %v12050_v12 }
 0x425   : > { %v2440_v59 = vpop.permute.xlu0 %2439  ;;  %v2438_v17 = vpop.permute.xlu1 %2437 }
 0x426   : > { %v2775_v7 = vcombine.low %v2416_v15, %v2440_v59  ;;  %v2776_v30 = vcombine.high %v2416_v15, %v2440_v59  ;;  %v2639_v35 = vcombine.low %v2414_v51, %v2438_v17  ;;  %v2640_v55 = vcombine.high %v2414_v51, %v2438_v17 }
 0x427   : > { %v2551_v40 = vcombine.low %v2495_v25, %v2511_v5  ;;  %v2552_v49 = vcombine.high %v2495_v25, %v2511_v5  ;;  %v2567_v20 = vcombine.low %v2502_v46, %v2518_v63  ;;  %v2568_v18 = vcombine.high %v2502_v46, %v2518_v63 }
 0x428   : > { %v2783_v37 = vrot.slane %v2775_v7, %v12050_v12  ;;  %v2790_v45 = vrot.slane %v2776_v30, %v12050_v12  ;;  %v2647_v2 = vrot.slane %v2639_v35, %v12050_v12  ;;  %v2654_v62 = vrot.slane %v2640_v55, %v12050_v12 }
 0x429   : > { %v13164_v43 = vpop.permute.xlu0 %2451  ;;  %v2442_v26 = vpop.permute.xlu1 %2441  ;;  %v13195_v24 = vrot.slane %v2551_v40, %v12074_v19  ;;  %v13201_v51 = vrot.slane %v2552_v49, %v12074_v19  ;;  %v13204_v23 = vrot.slane %v2567_v20, %v12074_v19 }
 0x42a   : > { %v2911_v1 = vcombine.low %v2418_v29, %v2442_v26  ;;  %v2912_v6 = vcombine.high %v2418_v29, %v2442_v26  ;;  %v2823_v41 = vcombine.low %v2767_v48, %v2783_v37  ;;  %v2824_v53 = vcombine.high %v2767_v48, %v2783_v37 }
 0x42b   : > { %v2839_v47 = vcombine.low %v2774_v31, %v2790_v45  ;;  %v2840_v39 = vcombine.high %v2774_v31, %v2790_v45  ;;  %v2687_v42 = vcombine.low %v2631_v61, %v2647_v2  ;;  %v2688_v58 = vcombine.high %v2631_v61, %v2647_v2 }
 0x42c   : > { %v2919_v32 = vrot.slane %v2911_v1, %v12050_v12  ;;  %v13198_v15 = vrot.slane %v2912_v6, %v12050_v12  ;;  %v13207_v29 = vrot.slane %v2568_v18, %v12074_v19  ;;  %v2703_v8 = vcombine.low %v2638_v34, %v2654_v62 }
 0x42d   : > { %v13175_v13 = vpop.permute.xlu0 %2455  ;;  %v13177_v0 = vpop.permute.xlu1 %2453  ;;  %v2704_v52 = vcombine.high %v2638_v34, %v2654_v62  ;;  %v13210_v59 = vrot.slane %v2823_v41, %v12074_v19  ;;  %v13213_v17 = vrot.slane %v2824_v53, %v12074_v19  ;;  %v13216_v28 = vrot.slane %v2839_v47, %v12074_v19 }
 0x42e   : > { %v13219_v3 = vrot.slane %v2840_v39, %v12074_v19  ;;  %v13222_v9 = vrot.slane %v2687_v42, %v12074_v19  ;;  %v13225_v54 = vrot.slane %v2688_v58, %v12074_v19  ;;  %v2959_v4 = vcombine.low %v2903_v27, %v2919_v32 }
 0x42f   : > { %v2960_v7 = vcombine.high %v2903_v27, %v2919_v32  ;;  %v2975_v38 = vcombine.low %v13191_v11, %v13198_v15  ;;  %v2976_v30 = vcombine.high %v13191_v11, %v13198_v15  ;;  %v13238_v36 = vrot.slane %v2703_v8, %v12074_v19 }
 0x430   : > { %v13250_v45 = vrot.slane %v2959_v4, %v12074_v19 }
 0x431   : > { %v2464_v22 = vpop.permute.xlu0 %2463  ;;  %v13187_v16 = vpop.permute.xlu1 %2457  ;;  %v13253_v2 = vrot.slane %v2960_v7, %v12074_v19 }
 0x432   : > { %v2519_v26 = vcombine.low %v13107_v21, %v2464_v22  ;;  %v2520_v44 = vcombine.high %v13107_v21, %v2464_v22  ;;  %v13241_v21 = vrot.slane %v2704_v52, %v12074_v19 }
 0x434   : > { %v2527_v61 = vrot.slane %v2519_v26, %v12050_v12 }
 0x435   : > { %v2468_v14 = vpop.permute.xlu0 %2467  ;;  %v2466_v10 = vpop.permute.xlu1 %2465 }
 0x436   : > { %v2791_v35 = vcombine.low %v13109_v60, %v2468_v14  ;;  %v2792_v5 = vcombine.high %v13109_v60, %v2468_v14  ;;  %v2655_v25 = vcombine.low %v13119_v57, %v2466_v10  ;;  %v2656_v46 = vcombine.high %v13119_v57, %v2466_v10 }
 0x437   : > { %v2534_v57 = vrot.slane %v2520_v44, %v12050_v12 }
 0x438   : > { %v2799_v40 = vrot.slane %v2791_v35, %v12050_v12  ;;  %v2806_v56 = vrot.slane %v2792_v5, %v12050_v12  ;;  %v2670_v1 = vrot.slane %v2656_v46, %v12050_v12 }
 0x439   : > { %v2476_v63 = vpop.permute.xlu0 %2475  ;;  %v2470_v48 = vpop.permute.xlu1 %2469 }
 0x43a   : > { %v2535_v37 = vcombine.low %v13164_v43, %v2476_v63  ;;  %v2536_v55 = vcombine.high %v13164_v43, %v2476_v63  ;;  %v2927_v31 = vcombine.low %v13121_v33, %v2470_v48  ;;  %v2928_v60 = vcombine.high %v13121_v33, %v2470_v48 }
 0x43b   : > { %v2663_v33 = vrot.slane %v2655_v25, %v12050_v12 }
 0x43c   : > { %v2543_v43 = vrot.slane %v2535_v37, %v12050_v12  ;;  %v2550_v50 = vrot.slane %v2536_v55, %v12050_v12  ;;  %v13262_v49 = vrot.slane %v2927_v31, %v12050_v12  ;;  %v13265_v20 = vrot.slane %v2928_v60, %v12050_v12 }
 0x43d   : > { %v2480_v18 = vpop.permute.xlu0 %2479  ;;  %v2478_v6 = vpop.permute.xlu1 %2477 }
 0x43e   : > { %v2583_v34 = vcombine.low %v2527_v61, %v2543_v43  ;;  %v2584_v41 = vcombine.high %v2527_v61, %v2543_v43  ;;  %v2599_v53 = vcombine.low %v2534_v57, %v2550_v50  ;;  %v2600_v62 = vcombine.high %v2534_v57, %v2550_v50 }
 0x43f   : > { %v2807_v22 = vcombine.low %v13175_v13, %v2480_v18  ;;  %v2808_v47 = vcombine.high %v13175_v13, %v2480_v18  ;;  %v2671_v39 = vcombine.low %v13177_v0, %v2478_v6  ;;  %v2672_v42 = vcombine.high %v13177_v0, %v2478_v6 }
 0x440   : > { %v2591_v58 = vrot.slane %v2583_v34, %v12074_v19  ;;  %v2598_v27 = vrot.slane %v2584_v41, %v12074_v19  ;;  %v2607_v32 = vrot.slane %v2599_v53, %v12074_v19  ;;  %v2614_v8 = vrot.slane %v2600_v62, %v12074_v19 }
 0x441   : > { %v2815_v52 = vrot.slane %v2807_v22, %v12050_v12  ;;  %v2822_v14 = vrot.slane %v2808_v47, %v12050_v12  ;;  %v2679_v10 = vrot.slane %v2671_v39, %v12050_v12  ;;  %v2686_v13 = vrot.slane %v2672_v42, %v12050_v12  ;;  %v2482_v4 = vpop.permute.xlu1 %2481 }
 0x442   : > { %v2943_v7 = vcombine.low %v13187_v16, %v2482_v4  ;;  %v2944_v0 = vcombine.high %v13187_v16, %v2482_v4  ;;  %v13282_v26 = vcombine.low %v13195_v24, %v2591_v58  ;;  %v13285_v44 = vcombine.high %v13195_v24, %v2591_v58 }
 0x443   : > { %v2855_v35 = vcombine.low %v2799_v40, %v2815_v52  ;;  %v2856_v5 = vcombine.high %v2799_v40, %v2815_v52  ;;  %v2871_v25 = vcombine.low %v2806_v56, %v2822_v14  ;;  %v2872_v46 = vcombine.high %v2806_v56, %v2822_v14 }
 0x444   : > { %v2719_v63 = vcombine.low %v2663_v33, %v2679_v10  ;;  %v2720_v48 = vcombine.high %v2663_v33, %v2679_v10  ;;  %v2735_v37 = vcombine.low %v2670_v1, %v2686_v13  ;;  %v2736_v55 = vcombine.high %v2670_v1, %v2686_v13  ;;  %3063 = vrot.lane.b32.xlu0 %v13282_v26, %s11989_s25 }
 0x445   : > { %v2951_v31 = vrot.slane %v2943_v7, %v12050_v12  ;;  %v2958_v16 = vrot.slane %v2944_v0, %v12050_v12  ;;  %3065 = vrot.lane.b32.xlu1 %v13285_v44, %s11989_s25  ;;  %v13294_v24 = vcombine.low %v13201_v51, %v2598_v27  ;;  %v13297_v60 = vcombine.high %v13201_v51, %v2598_v27 }
 0x446   : > { %v13300_v61 = vcombine.low %v13204_v23, %v2607_v32  ;;  %v13303_v57 = vcombine.high %v13204_v23, %v2607_v32  ;;  %v13306_v40 = vcombine.low %v13207_v29, %v2614_v8  ;;  %v13309_v56 = vcombine.high %v13207_v29, %v2614_v8 }
 0x447   : > { %v2991_v43 = vcombine.low %v13262_v49, %v2951_v31  ;;  %v2992_v50 = vcombine.high %v13262_v49, %v2951_v31  ;;  %v3007_v33 = vcombine.low %v13265_v20, %v2958_v16  ;;  %v3008_v51 = vcombine.high %v13265_v20, %v2958_v16 }
 0x448   : > { %3067 = vrot.lane.b32.xlu0 %v13294_v24, %s11989_s25  ;;  %v2863_v23 = vrot.slane %v2855_v35, %v12074_v19  ;;  %v2870_v1 = vrot.slane %v2856_v5, %v12074_v19  ;;  %v2879_v18 = vrot.slane %v2871_v25, %v12074_v19  ;;  %v2886_v29 = vrot.slane %v2872_v46, %v12074_v19 }
 0x449   : > { %3069 = vrot.lane.b32.xlu1 %v13297_v60, %s11989_s25  ;;  %v2727_v49 = vrot.slane %v2719_v63, %v12074_v19  ;;  %v2734_v6 = vrot.slane %v2720_v48, %v12074_v19  ;;  %v2743_v20 = vrot.slane %v2735_v37, %v12074_v19  ;;  %v2750_v34 = vrot.slane %v2736_v55, %v12074_v19 }
 0x44a   : > { %v13328_v41 = vcombine.low %v13210_v59, %v2863_v23  ;;  %v13331_v53 = vcombine.high %v13210_v59, %v2863_v23  ;;  %v13334_v62 = vcombine.low %v13213_v17, %v2870_v1  ;;  %v13337_v22 = vcombine.high %v13213_v17, %v2870_v1 }
 0x44b   : > { %v13340_v47 = vcombine.low %v13216_v28, %v2879_v18  ;;  %v13343_v39 = vcombine.high %v13216_v28, %v2879_v18  ;;  %v13346_v42 = vcombine.low %v13219_v3, %v2886_v29  ;;  %v13349_v58 = vcombine.high %v13219_v3, %v2886_v29 }
 0x44c   : > { %3071 = vrot.lane.b32.xlu0 %v13300_v61, %s11989_s25  ;;  %v13354_v59 = vcombine.high %v13222_v9, %v2727_v49  ;;  %v13357_v17 = vcombine.low %v13222_v9, %v2727_v49  ;;  %v13360_v27 = vcombine.high %v13225_v54, %v2734_v6  ;;  %v13363_v28 = vcombine.low %v13225_v54, %v2734_v6 }
 0x44d   : > { %3073 = vrot.lane.b32.xlu1 %v13303_v57, %s11989_s25  ;;  %v13368_v3 = vcombine.high %v13238_v36, %v2743_v20  ;;  %v13371_v32 = vcombine.low %v13238_v36, %v2743_v20  ;;  %v13374_v8 = vcombine.high %v13241_v21, %v2750_v34  ;;  %v13377_v9 = vcombine.low %v13241_v21, %v2750_v34 }
 0x44e   : > { %v2999_v52 = vrot.slane %v2991_v43, %v12074_v19  ;;  %v3006_v54 = vrot.slane %v2992_v50, %v12074_v19  ;;  %v3015_v14 = vrot.slane %v3007_v33, %v12074_v19  ;;  %v3022_v10 = vrot.slane %v3008_v51, %v12074_v19 }
 0x44f   : > { %v2983_v36 = vrot.slane %v2975_v38, %v12074_v19  ;;  %v2990_v13 = vrot.slane %v2976_v30, %v12074_v19 }
 0x450   : > { %3075 = vrot.lane.b32.xlu0 %v13306_v40, %s11989_s25  ;;  %v13394_v21 = vcombine.high %v13250_v45, %v2999_v52  ;;  %v13397_v4 = vcombine.low %v13250_v45, %v2999_v52  ;;  %v13400_v7 = vcombine.high %v13253_v2, %v3006_v54  ;;  %v13403_v0 = vcombine.low %v13253_v2, %v3006_v54 }
 0x451   : > { %3077 = vrot.lane.b32.xlu1 %v13309_v56, %s11989_s25  ;;  %v13407_v11 = vcombine.high %v2983_v36, %v3015_v14  ;;  %v13409_v15 = vcombine.low %v2983_v36, %v3015_v14  ;;  %v13411_v38 = vcombine.high %v2990_v13, %v3022_v10  ;;  %v13413_v30 = vcombine.low %v2990_v13, %v3022_v10 }
 0x454   : > { %3095 = vrot.lane.b32.xlu0 %v13328_v41, %s11989_s25 }
 0x455   : > { %3097 = vrot.lane.b32.xlu1 %v13331_v53, %s11989_s25 }
 0x458   : > { %3099 = vrot.lane.b32.xlu0 %v13334_v62, %s11989_s25 }
 0x459   : > { %3101 = vrot.lane.b32.xlu1 %v13337_v22, %s11989_s25 }
 0x45c   : > { %3103 = vrot.lane.b32.xlu0 %v13340_v47, %s11989_s25 }
 0x45d   : > { %3105 = vrot.lane.b32.xlu1 %v13343_v39, %s11989_s25 }
 0x460   : > { %3107 = vrot.lane.b32.xlu0 %v13346_v42, %s11989_s25 }
 0x461   : > { %3109 = vrot.lane.b32.xlu1 %v13349_v58, %s11989_s25 }
 0x464   : > { %3079 = vrot.lane.b32.xlu0 %v13357_v17, %s11989_s25 }
 0x465   : > { %3081 = vrot.lane.b32.xlu1 %v13354_v59, %s11989_s25 }
 0x468   : > { %3083 = vrot.lane.b32.xlu0 %v13363_v28, %s11989_s25 }
 0x469   : > { %3085 = vrot.lane.b32.xlu1 %v13360_v27, %s11989_s25 }
 0x46c   : > { %3087 = vrot.lane.b32.xlu0 %v13371_v32, %s11989_s25 }
 0x46d   : > { %3089 = vrot.lane.b32.xlu1 %v13368_v3, %s11989_s25 }
 0x470   : > { %3091 = vrot.lane.b32.xlu0 %v13377_v9, %s11989_s25 }
 0x471   : > { %3093 = vrot.lane.b32.xlu1 %v13374_v8, %s11989_s25 }
 0x474   : > { %3111 = vrot.lane.b32.xlu0 %v13397_v4, %s11989_s25 }
 0x475   : > { %3113 = vrot.lane.b32.xlu1 %v13394_v21, %s11989_s25 }
 0x478   : > { %3115 = vrot.lane.b32.xlu0 %v13403_v0, %s11989_s25 }
 0x479   : > { %3117 = vrot.lane.b32.xlu1 %v13400_v7, %s11989_s25 }
 0x47c   : > { %3119 = vrot.lane.b32.xlu0 %v13409_v15, %s11989_s25 }
 0x47d   : > { %3121 = vrot.lane.b32.xlu1 %v13407_v11, %s11989_s25 }
 0x480   : > { %3123 = vrot.lane.b32.xlu0 %v13413_v30, %s11989_s25 }
 0x481   : > { %3125 = vrot.lane.b32.xlu1 %v13411_v38, %s11989_s25 }
 0x4b6   : > { %v3064_v45 = vpop.permute.xlu0 %3063 }
 0x4b7   : > { %v13464_v2 = vmax.f32 %v13282_v26, %v3064_v45  ;;  %v3066_v35 = vpop.permute.xlu1 %3065 }
 0x4b8   : > { %v13467_v5 = vmax.f32 %v13285_v44, %v3066_v35 }
 0x4b9   : > { %3223 = vrot.lane.b32.xlu0 %v13464_v2, %s11990_s26 }
 0x4ba   : > { %3225 = vrot.lane.b32.xlu1 %v13467_v5, %s11990_s26  ;;  %v3068_v25 = vpop.permute.xlu0 %3067 }
 0x4bb   : > { %v13474_v46 = vmax.f32 %v13294_v24, %v3068_v25  ;;  %v3070_v63 = vpop.permute.xlu1 %3069 }
 0x4bc   : > { %v13477_v48 = vmax.f32 %v13297_v60, %v3070_v63 }
 0x4bd   : > { %3227 = vrot.lane.b32.xlu0 %v13474_v46, %s11990_s26 }
 0x4be   : > { %3229 = vrot.lane.b32.xlu1 %v13477_v48, %s11990_s26  ;;  %v3072_v26 = vpop.permute.xlu0 %3071 }
 0x4bf   : > { %v13484_v44 = vmax.f32 %v13300_v61, %v3072_v26  ;;  %v3074_v37 = vpop.permute.xlu1 %3073 }
 0x4c0   : > { %v13487_v55 = vmax.f32 %v13303_v57, %v3074_v37 }
 0x4c1   : > { %3231 = vrot.lane.b32.xlu0 %v13484_v44, %s11990_s26 }
 0x4c2   : > { %3233 = vrot.lane.b32.xlu1 %v13487_v55, %s11990_s26  ;;  %v3076_v31 = vpop.permute.xlu0 %3075 }
 0x4c3   : > { %v13494_v16 = vmax.f32 %v13306_v40, %v3076_v31  ;;  %v3078_v24 = vpop.permute.xlu1 %3077 }
 0x4c4   : > { %v13497_v60 = vmax.f32 %v13309_v56, %v3078_v24 }
 0x4c5   : > { %3235 = vrot.lane.b32.xlu0 %v13494_v16, %s11990_s26 }
 0x4c6   : > { %3237 = vrot.lane.b32.xlu1 %v13497_v60, %s11990_s26  ;;  %v3096_v61 = vpop.permute.xlu0 %3095 }
 0x4c7   : > { %v13504_v57 = vmax.f32 %v13328_v41, %v3096_v61  ;;  %v3098_v43 = vpop.permute.xlu1 %3097 }
 0x4c8   : > { %v13507_v50 = vmax.f32 %v13331_v53, %v3098_v43 }
 0x4c9   : > { %17401 = vst [vmem:[#allocation3_spill] sm:$0xff] %v13504_v57  ;;  %3255 = vrot.lane.b32.xlu0 %v13504_v57, %s11990_s26 }
 0x4ca   : > { %17402 = vst [vmem:[#allocation4_spill] sm:$0xff] %v13507_v50  ;;  %3257 = vrot.lane.b32.xlu1 %v13507_v50, %s11990_s26  ;;  %v3100_v40 = vpop.permute.xlu0 %3099 }
 0x4cb   : > { %v13514_v56 = vmax.f32 %v13334_v62, %v3100_v40  ;;  %v3102_v33 = vpop.permute.xlu1 %3101 }
 0x4cc   : > { %v13517_v51 = vmax.f32 %v13337_v22, %v3102_v33 }
 0x4cd   : > { %17403 = vst [vmem:[#allocation5_spill] sm:$0xff] %v13514_v56  ;;  %3259 = vrot.lane.b32.xlu0 %v13514_v56, %s11990_s26 }
 0x4ce   : > { %17404 = vst [vmem:[#allocation6_spill] sm:$0xff] %v13517_v51  ;;  %3261 = vrot.lane.b32.xlu1 %v13517_v51, %s11990_s26  ;;  %v3104_v23 = vpop.permute.xlu0 %3103 }
 0x4cf   : > { %v13524_v1 = vmax.f32 %v13340_v47, %v3104_v23  ;;  %v3106_v18 = vpop.permute.xlu1 %3105 }
 0x4d0   : > { %v13527_v29 = vmax.f32 %v13343_v39, %v3106_v18 }
 0x4d1   : > { %17405 = vst [vmem:[#allocation9_spill] sm:$0xff] %v13524_v1  ;;  %3263 = vrot.lane.b32.xlu0 %v13524_v1, %s11990_s26 }
 0x4d2   : > { %17406 = vst [vmem:[#allocation7_spill] sm:$0xff] %v13527_v29  ;;  %3265 = vrot.lane.b32.xlu1 %v13527_v29, %s11990_s26  ;;  %v3108_v49 = vpop.permute.xlu0 %3107 }
 0x4d3   : > { %v13534_v6 = vmax.f32 %v13346_v42, %v3108_v49  ;;  %v3110_v20 = vpop.permute.xlu1 %3109 }
 0x4d4   : > { %v13537_v34 = vmax.f32 %v13349_v58, %v3110_v20 }
 0x4d5   : > { %17407 = vst [vmem:[#allocation10_spill] sm:$0xff] %v13534_v6  ;;  %3267 = vrot.lane.b32.xlu0 %v13534_v6, %s11990_s26 }
 0x4d6   : > { %17408 = vst [vmem:[#allocation8_spill] sm:$0xff] %v13537_v34  ;;  %3269 = vrot.lane.b32.xlu1 %v13537_v34, %s11990_s26  ;;  %v13579_v41 = vpop.permute.xlu0 %3079 }
 0x4d7   : > { %v13583_v53 = vpop.permute.xlu1 %3081 }
 0x4d9   : > { %3319 = vrot.lane.b32.xlu0 %v13464_v2, %s11991_s8 }
 0x4da   : > { %3321 = vrot.lane.b32.xlu1 %v13467_v5, %s11991_s8  ;;  %v13591_v62 = vpop.permute.xlu0 %3083 }
 0x4db   : > { %v13593_v22 = vpop.permute.xlu1 %3085 }
 0x4dd   : > { %3323 = vrot.lane.b32.xlu0 %v13474_v46, %s11991_s8 }
 0x4de   : > { %3325 = vrot.lane.b32.xlu1 %v13477_v48, %s11991_s8  ;;  %v13599_v47 = vpop.permute.xlu0 %3087 }
 0x4df   : > { %v13603_v39 = vpop.permute.xlu1 %3089 }
 0x4e1   : > { %3327 = vrot.lane.b32.xlu0 %v13484_v44, %s11991_s8 }
 0x4e2   : > { %3329 = vrot.lane.b32.xlu1 %v13487_v55, %s11991_s8  ;;  %v13611_v42 = vpop.permute.xlu0 %3091 }
 0x4e3   : > { %v13613_v58 = vpop.permute.xlu1 %3093 }
 0x4e5   : > { %3331 = vrot.lane.b32.xlu0 %v13494_v16, %s11991_s8 }
 0x4e6   : > { %3333 = vrot.lane.b32.xlu1 %v13497_v60, %s11991_s8  ;;  %v13619_v52 = vpop.permute.xlu0 %3111 }
 0x4e7   : > { %v13623_v54 = vpop.permute.xlu1 %3113 }
 0x4e9   : > { %3351 = vrot.lane.b32.xlu0 %v13504_v57, %s11991_s8 }
 0x4ea   : > { %3353 = vrot.lane.b32.xlu1 %v13507_v50, %s11991_s8  ;;  %v13631_v14 = vpop.permute.xlu0 %3115 }
 0x4eb   : > { %v13633_v10 = vpop.permute.xlu1 %3117 }
 0x4ed   : > { %3355 = vrot.lane.b32.xlu0 %v13514_v56, %s11991_s8 }
 0x4ee   : > { %3357 = vrot.lane.b32.xlu1 %v13517_v51, %s11991_s8  ;;  %v13639_v36 = vpop.permute.xlu0 %3119 }
 0x4ef   : > { %v13643_v13 = vpop.permute.xlu1 %3121 }
 0x4f1   : > { %3359 = vrot.lane.b32.xlu0 %v13524_v1, %s11991_s8 }
 0x4f2   : > { %3361 = vrot.lane.b32.xlu1 %v13527_v29, %s11991_s8  ;;  %v13651_v45 = vpop.permute.xlu0 %3123 }
 0x4f3   : > { %v13653_v35 = vpop.permute.xlu1 %3125 }
 0x4f5   : > { %3363 = vrot.lane.b32.xlu0 %v13534_v6, %s11991_s8 }
 0x4f6   : > { %3365 = vrot.lane.b32.xlu1 %v13537_v34, %s11991_s8 }
 0x4f9   : > { %3415 = vrot.lane.b32.xlu0 %v13464_v2, %s11992_s9 }
 0x4fa   : > { %3417 = vrot.lane.b32.xlu1 %v13467_v5, %s11992_s9 }
 0x4fd   : > { %3419 = vrot.lane.b32.xlu0 %v13474_v46, %s11992_s9 }
 0x4fe   : > { %3421 = vrot.lane.b32.xlu1 %v13477_v48, %s11992_s9 }
 0x501   : > { %3423 = vrot.lane.b32.xlu0 %v13484_v44, %s11992_s9 }
 0x502   : > { %3425 = vrot.lane.b32.xlu1 %v13487_v55, %s11992_s9 }
 0x505   : > { %3427 = vrot.lane.b32.xlu0 %v13494_v16, %s11992_s9 }
 0x506   : > { %3429 = vrot.lane.b32.xlu1 %v13497_v60, %s11992_s9 }
 0x509   : > { %3447 = vrot.lane.b32.xlu0 %v13504_v57, %s11992_s9 }
 0x50a   : > { %3449 = vrot.lane.b32.xlu1 %v13507_v50, %s11992_s9 }
 0x50d   : > { %3451 = vrot.lane.b32.xlu0 %v13514_v56, %s11992_s9 }
 0x50e   : > { %3453 = vrot.lane.b32.xlu1 %v13517_v51, %s11992_s9 }
 0x511   : > { %3455 = vrot.lane.b32.xlu0 %v13524_v1, %s11992_s9 }
 0x512   : > { %3457 = vrot.lane.b32.xlu1 %v13527_v29, %s11992_s9 }
 0x515   : > { %3459 = vrot.lane.b32.xlu0 %v13534_v6, %s11992_s9 }
 0x516   : > { %3461 = vrot.lane.b32.xlu1 %v13537_v34, %s11992_s9 }
 0x519   : > { %3511 = vrot.lane.b32.xlu0 %v13464_v2, %s11993_s10 }
 0x51a   : > { %3513 = vrot.lane.b32.xlu1 %v13467_v5, %s11993_s10 }
 0x51d   : > { %3515 = vrot.lane.b32.xlu0 %v13474_v46, %s11993_s10 }
 0x51e   : > { %3517 = vrot.lane.b32.xlu1 %v13477_v48, %s11993_s10 }
 0x521   : > { %3519 = vrot.lane.b32.xlu0 %v13484_v44, %s11993_s10 }
 0x522   : > { %3521 = vrot.lane.b32.xlu1 %v13487_v55, %s11993_s10 }
 0x525   : > { %3523 = vrot.lane.b32.xlu0 %v13494_v16, %s11993_s10 }
 0x526   : > { %3525 = vrot.lane.b32.xlu1 %v13497_v60, %s11993_s10 }
 0x529   : > { %3543 = vrot.lane.b32.xlu0 %v13504_v57, %s11993_s10 }
 0x52a   : > { %3545 = vrot.lane.b32.xlu1 %v13507_v50, %s11993_s10 }
 0x52b   : > { %v13659_v25 = vpop.permute.xlu0 %3223 }
 0x52c   : > { %v13661_v63 = vpop.permute.xlu1 %3225 }
 0x52d   : > { %3547 = vrot.lane.b32.xlu0 %v13514_v56, %s11993_s10 }
 0x52e   : > { %3549 = vrot.lane.b32.xlu1 %v13517_v51, %s11993_s10 }
 0x52f   : > { %v13667_v26 = vpop.permute.xlu0 %3227 }
 0x530   : > { %v13669_v37 = vpop.permute.xlu1 %3229 }
 0x531   : > { %17409 = vst [vmem:[#allocation11_spill] sm:$0xff] %v13669_v37  ;;  %3551 = vrot.lane.b32.xlu0 %v13524_v1, %s11993_s10 }
 0x532   : > { %3553 = vrot.lane.b32.xlu1 %v13527_v29, %s11993_s10 }
 0x533   : > { %v13675_v31 = vpop.permute.xlu0 %3231 }
 0x534   : > { %17410 = vst [vmem:[#allocation12_spill] sm:$0xff] %v13675_v31  ;;  %v13677_v24 = vpop.permute.xlu1 %3233 }
 0x535   : > { %17411 = vst [vmem:[#allocation13_spill] sm:$0xff] %v13677_v24  ;;  %3555 = vrot.lane.b32.xlu0 %v13534_v6, %s11993_s10 }
 0x536   : > { %3557 = vrot.lane.b32.xlu1 %v13537_v34, %s11993_s10 }
 0x537   : > { %v13683_v61 = vpop.permute.xlu0 %3235 }
 0x538   : > { %17412 = vst [vmem:[#allocation14_spill] sm:$0xff] %v13683_v61  ;;  %v13685_v43 = vpop.permute.xlu1 %3237 }
 0x539   : > { %17413 = vst [vmem:[#allocation15_spill] sm:$0xff] %v13685_v43  ;;  %3607 = vrot.lane.b32.xlu0 %v13464_v2, %s11994_s11 }
 0x53a   : > { %3609 = vrot.lane.b32.xlu1 %v13467_v5, %s11994_s11 }
 0x53b   : > { %v13691_v40 = vpop.permute.xlu0 %3255 }
 0x53c   : > { %17414 = vst [vmem:[#allocation16_spill] sm:$0xff] %v13691_v40  ;;  %v13693_v33 = vpop.permute.xlu1 %3257 }
 0x53d   : > { %17415 = vst [vmem:[#allocation17_spill] sm:$0xff] %v13693_v33  ;;  %3611 = vrot.lane.b32.xlu0 %v13474_v46, %s11994_s11 }
 0x53e   : > { %3613 = vrot.lane.b32.xlu1 %v13477_v48, %s11994_s11 }
 0x53f   : > { %v13699_v23 = vpop.permute.xlu0 %3259 }
 0x540   : > { %17416 = vst [vmem:[#allocation18_spill] sm:$0xff] %v13699_v23  ;;  %v13701_v18 = vpop.permute.xlu1 %3261 }
 0x541   : > { %17417 = vst [vmem:[#allocation19_spill] sm:$0xff] %v13701_v18  ;;  %3615 = vrot.lane.b32.xlu0 %v13484_v44, %s11994_s11 }
 0x542   : > { %3617 = vrot.lane.b32.xlu1 %v13487_v55, %s11994_s11 }
 0x543   : > { %v13707_v49 = vpop.permute.xlu0 %3263 }
 0x544   : > { %17418 = vst [vmem:[#allocation20_spill] sm:$0xff] %v13707_v49  ;;  %v13709_v20 = vpop.permute.xlu1 %3265 }
 0x545   : > { %17419 = vst [vmem:[#allocation21_spill] sm:$0xff] %v13709_v20  ;;  %3619 = vrot.lane.b32.xlu0 %v13494_v16, %s11994_s11 }
 0x546   : > { %3621 = vrot.lane.b32.xlu1 %v13497_v60, %s11994_s11 }
 0x547   : > { %v13715_v33 = vpop.permute.xlu0 %3267 }
 0x548   : > { %17420 = vst [vmem:[#allocation22_spill] sm:$0xff] %v13715_v33  ;;  %v13717_v23 = vpop.permute.xlu1 %3269 }
 0x549   : > { %17421 = vst [vmem:[#allocation23_spill] sm:$0xff] %v13717_v23  ;;  %3639 = vrot.lane.b32.xlu0 %v13504_v57, %s11994_s11 }
 0x54a   : > { %3641 = vrot.lane.b32.xlu1 %v13507_v50, %s11994_s11 }
 0x54b   : > { %v13723_v18 = vpop.permute.xlu0 %3319 }
 0x54c   : > { %v13725_v49 = vpop.permute.xlu1 %3321 }
 0x54d   : > { %3643 = vrot.lane.b32.xlu0 %v13514_v56, %s11994_s11 }
 0x54e   : > { %3645 = vrot.lane.b32.xlu1 %v13517_v51, %s11994_s11 }
 0x54f   : > { %v13731_v20 = vpop.permute.xlu0 %3323 }
 0x550   : > { %17422 = vst [vmem:[#allocation24_spill] sm:$0xff] %v13731_v20  ;;  %v13733_v33 = vpop.permute.xlu1 %3325 }
 0x551   : > { %17423 = vst [vmem:[#allocation25_spill] sm:$0xff] %v13733_v33  ;;  %3647 = vrot.lane.b32.xlu0 %v13524_v1, %s11994_s11  ;;  %v13813_v33 = vmax.f32 %v13357_v17, %v13579_v41  ;;  %v13835_v41 = vmax.f32 %v13360_v27, %v13593_v22  ;;  %v13861_v22 = vmax.f32 %v13377_v9, %v13611_v42 }
 0x552   : > { %3649 = vrot.lane.b32.xlu1 %v13527_v29, %s11994_s11  ;;  %v13883_v42 = vmax.f32 %v13394_v21, %v13623_v54  ;;  %v13909_v54 = vmax.f32 %v13409_v15, %v13639_v36  ;;  %v13931_v36 = vmax.f32 %v13411_v38, %v13653_v35 }
 0x553   : > { %v13739_v23 = vpop.permute.xlu0 %3327  ;;  %17443 = vst [vmem:[#allocation45_spill] sm:$0xff] %v13835_v41  ;;  %17449 = vst [vmem:[#allocation51_spill] sm:$0xff] %v13861_v22 }
 0x554   : > { %17424 = vst [vmem:[#allocation26_spill] sm:$0xff] %v13739_v23  ;;  %v13741_v40 = vpop.permute.xlu1 %3329  ;;  %17455 = vst [vmem:[#allocation57_spill] sm:$0xff] %v13883_v42 }
 0x555   : > { %17425 = vst [vmem:[#allocation27_spill] sm:$0xff] %v13741_v40  ;;  %3651 = vrot.lane.b32.xlu0 %v13534_v6, %s11994_s11  ;;  %17459 = vst [vmem:[#allocation61_spill] sm:$0xff] %v13909_v54 }
 0x556   : > { %3653 = vrot.lane.b32.xlu1 %v13537_v34, %s11994_s11  ;;  %17462 = vst [vmem:[#allocation64_spill] sm:$0xff] %v13931_v36 }
 0x557   : > { %v13747_v43 = vpop.permute.xlu0 %3331 }
 0x558   : > { %17426 = vst [vmem:[#allocation28_spill] sm:$0xff] %v13747_v43  ;;  %v13749_v61 = vpop.permute.xlu1 %3333 }
 0x559   : > { %17427 = vst [vmem:[#allocation29_spill] sm:$0xff] %v13749_v61  ;;  %3703 = vrot.lane.b32.xlu0 %v13464_v2, %s11995_s14 }
 0x55a   : > { %3705 = vrot.lane.b32.xlu1 %v13467_v5, %s11995_s14 }
 0x55b   : > { %v13755_v24 = vpop.permute.xlu0 %3351 }
 0x55c   : > { %17428 = vst [vmem:[#allocation30_spill] sm:$0xff] %v13755_v24  ;;  %v13757_v40 = vpop.permute.xlu1 %3353 }
 0x55d   : > { %17429 = vst [vmem:[#allocation31_spill] sm:$0xff] %v13757_v40  ;;  %3707 = vrot.lane.b32.xlu0 %v13474_v46, %s11995_s14 }
 0x55e   : > { %3709 = vrot.lane.b32.xlu1 %v13477_v48, %s11995_s14 }
 0x55f   : > { %v13763_v43 = vpop.permute.xlu0 %3355 }
 0x560   : > { %17430 = vst [vmem:[#allocation32_spill] sm:$0xff] %v13763_v43  ;;  %v13765_v61 = vpop.permute.xlu1 %3357 }
 0x561   : > { %17431 = vst [vmem:[#allocation33_spill] sm:$0xff] %v13765_v61  ;;  %3711 = vrot.lane.b32.xlu0 %v13484_v44, %s11995_s14 }
 0x562   : > { %3713 = vrot.lane.b32.xlu1 %v13487_v55, %s11995_s14 }
 0x563   : > { %v13771_v23 = vpop.permute.xlu0 %3359 }
 0x564   : > { %17432 = vst [vmem:[#allocation34_spill] sm:$0xff] %v13771_v23  ;;  %v13773_v24 = vpop.permute.xlu1 %3361 }
 0x565   : > { %17433 = vst [vmem:[#allocation35_spill] sm:$0xff] %v13773_v24  ;;  %3715 = vrot.lane.b32.xlu0 %v13494_v16, %s11995_s14 }
 0x566   : > { %3717 = vrot.lane.b32.xlu1 %v13497_v60, %s11995_s14 }
 0x567   : > { %v13779_v40 = vpop.permute.xlu0 %3363 }
 0x568   : > { %17434 = vst [vmem:[#allocation36_spill] sm:$0xff] %v13779_v40  ;;  %v13781_v43 = vpop.permute.xlu1 %3365 }
 0x569   : > { %17435 = vst [vmem:[#allocation37_spill] sm:$0xff] %v13781_v43  ;;  %3735 = vrot.lane.b32.xlu0 %v13504_v57, %s11995_s14 }
 0x56a   : > { %3737 = vrot.lane.b32.xlu1 %v13507_v50, %s11995_s14 }
 0x56b   : > { %v13787_v61 = vpop.permute.xlu0 %3415 }
 0x56c   : > { %v13789_v23 = vpop.permute.xlu1 %3417 }
 0x56d   : > { %3739 = vrot.lane.b32.xlu0 %v13514_v56, %s11995_s14 }
 0x56e   : > { %3741 = vrot.lane.b32.xlu1 %v13517_v51, %s11995_s14 }
 0x56f   : > { %v13795_v24 = vpop.permute.xlu0 %3419 }
 0x570   : > { %v13797_v40 = vpop.permute.xlu1 %3421 }
 0x571   : > { %17436 = vst [vmem:[#allocation38_spill] sm:$0xff] %v13797_v40  ;;  %3743 = vrot.lane.b32.xlu0 %v13524_v1, %s11995_s14  ;;  %v13819_v40 = vmax.f32 %v13354_v59, %v13583_v53  ;;  %v13845_v53 = vmax.f32 %v13371_v32, %v13599_v47  ;;  %v13867_v47 = vmax.f32 %v13374_v8, %v13613_v58 }
 0x572   : > { %3745 = vrot.lane.b32.xlu1 %v13527_v29, %s11995_s14  ;;  %v13893_v58 = vmax.f32 %v13403_v0, %v13631_v14  ;;  %v13915_v14 = vmax.f32 %v13407_v11, %v13643_v13 }
 0x573   : > { %v13803_v43 = vpop.permute.xlu0 %3423  ;;  %17439 = vst [vmem:[#allocation41_spill] sm:$0xff] %v13819_v40  ;;  %17445 = vst [vmem:[#allocation47_spill] sm:$0xff] %v13845_v53 }
 0x574   : > { %v13805_v31 = vpop.permute.xlu1 %3425  ;;  %17451 = vst [vmem:[#allocation53_spill] sm:$0xff] %v13867_v47  ;;  %17457 = vst [vmem:[#allocation59_spill] sm:$0xff] %v13893_v58 }
 0x575   : > { %17437 = vst [vmem:[#allocation39_spill] sm:$0xff] %v13805_v31  ;;  %3747 = vrot.lane.b32.xlu0 %v13534_v6, %s11995_s14  ;;  %v13829_v31 = vmax.f32 %v13363_v28, %v13591_v62  ;;  %v13851_v62 = vmax.f32 %v13368_v3, %v13603_v39  ;;  %v13877_v39 = vmax.f32 %v13397_v4, %v13619_v52  ;;  %17460 = vst [vmem:[#allocation62_spill] sm:$0xff] %v13915_v14 }
 0x576   : > { %3749 = vrot.lane.b32.xlu1 %v13537_v34, %s11995_s14  ;;  %v13899_v52 = vmax.f32 %v13400_v7, %v13633_v10  ;;  %v13925_v10 = vmax.f32 %v13413_v30, %v13651_v45 }
 0x577   : > { %v13815_v37 = vpop.permute.xlu0 %3427  ;;  %17441 = vst [vmem:[#allocation43_spill] sm:$0xff] %v13829_v31  ;;  %17447 = vst [vmem:[#allocation49_spill] sm:$0xff] %v13851_v62 }
 0x578   : > { %17438 = vst [vmem:[#allocation40_spill] sm:$0xff] %v13815_v37  ;;  %v13821_v20 = vpop.permute.xlu1 %3429  ;;  %17453 = vst [vmem:[#allocation55_spill] sm:$0xff] %v13877_v39 }
 0x579   : > { %17440 = vst [vmem:[#allocation42_spill] sm:$0xff] %v13821_v20  ;;  %3239 = vrot.lane.b32.xlu0 %v13813_v33, %s11990_s26  ;;  %17458 = vst [vmem:[#allocation60_spill] sm:$0xff] %v13899_v52 }
 0x57a   : > { %3241 = vrot.lane.b32.xlu1 %v13819_v40, %s11990_s26  ;;  %17461 = vst [vmem:[#allocation63_spill] sm:$0xff] %v13925_v10 }
 0x57b   : > { %v13831_v17 = vpop.permute.xlu0 %3447 }
 0x57c   : > { %17442 = vst [vmem:[#allocation44_spill] sm:$0xff] %v13831_v17  ;;  %v13837_v59 = vpop.permute.xlu1 %3449 }
 0x57d   : > { %17444 = vst [vmem:[#allocation46_spill] sm:$0xff] %v13837_v59  ;;  %3243 = vrot.lane.b32.xlu0 %v13829_v31, %s11990_s26 }
 0x57e   : > { %3245 = vrot.lane.b32.xlu1 %v13835_v41, %s11990_s26 }
 0x57f   : > { %v13847_v28 = vpop.permute.xlu0 %3451 }
 0x580   : > { %17446 = vst [vmem:[#allocation48_spill] sm:$0xff] %v13847_v28  ;;  %v13853_v27 = vpop.permute.xlu1 %3453 }
 0x581   : > { %17448 = vst [vmem:[#allocation50_spill] sm:$0xff] %v13853_v27  ;;  %3247 = vrot.lane.b32.xlu0 %v13845_v53, %s11990_s26 }
 0x582   : > { %3249 = vrot.lane.b32.xlu1 %v13851_v62, %s11990_s26 }
 0x583   : > { %v13863_v32 = vpop.permute.xlu0 %3455 }
 0x584   : > { %17450 = vst [vmem:[#allocation52_spill] sm:$0xff] %v13863_v32  ;;  %v13869_v3 = vpop.permute.xlu1 %3457 }
 0x585   : > { %17452 = vst [vmem:[#allocation54_spill] sm:$0xff] %v13869_v3  ;;  %3251 = vrot.lane.b32.xlu0 %v13861_v22, %s11990_s26 }
 0x586   : > { %3253 = vrot.lane.b32.xlu1 %v13867_v47, %s11990_s26 }
 0x587   : > { %v13879_v9 = vpop.permute.xlu0 %3459 }
 0x588   : > { %17454 = vst [vmem:[#allocation56_spill] sm:$0xff] %v13879_v9  ;;  %v13885_v8 = vpop.permute.xlu1 %3461 }
 0x589   : > { %17456 = vst [vmem:[#allocation58_spill] sm:$0xff] %v13885_v8  ;;  %3271 = vrot.lane.b32.xlu0 %v13877_v39, %s11990_s26 }
 0x58a   : > { %3273 = vrot.lane.b32.xlu1 %v13883_v42, %s11990_s26 }
 0x58b   : > { %v13895_v4 = vpop.permute.xlu0 %3511 }
 0x58c   : > { %v13901_v21 = vpop.permute.xlu1 %3513 }
 0x58d   : > { %3275 = vrot.lane.b32.xlu0 %v13893_v58, %s11990_s26 }
 0x58e   : > { %3277 = vrot.lane.b32.xlu1 %v13899_v52, %s11990_s26 }
 0x58f   : > { %v13911_v0 = vpop.permute.xlu0 %3515 }
 0x590   : > { %v13917_v7 = vpop.permute.xlu1 %3517 }
 0x591   : > { %3279 = vrot.lane.b32.xlu0 %v13909_v54, %s11990_s26 }
 0x592   : > { %3281 = vrot.lane.b32.xlu1 %v13915_v14, %s11990_s26 }
 0x593   : > { %v13927_v15 = vpop.permute.xlu0 %3519 }
 0x594   : > { %v13933_v11 = vpop.permute.xlu1 %3521 }
 0x595   : > { %17463 = vst [vmem:[#allocation65_spill] sm:$0xff] %v13933_v11  ;;  %3283 = vrot.lane.b32.xlu0 %v13925_v10, %s11990_s26 }
 0x596   : > { %3285 = vrot.lane.b32.xlu1 %v13931_v36, %s11990_s26  ;;  %s16383_s26 = scalar_lea.vmem %s17165_s3, %s11633_s24 }
 0x597   : > { %v13939_v13 = vpop.permute.xlu0 %3523 }
 0x598   : > { %17464 = vst [vmem:[#allocation66_spill] sm:$0xff] %v13939_v13  ;;  %v13941_v8 = vpop.permute.xlu1 %3525 }
 0x599   : > { %17465 = vst [vmem:[#allocation67_spill] sm:$0xff] %v13941_v8  ;;  %3335 = vrot.lane.b32.xlu0 %v13813_v33, %s11991_s8 }
 0x59a   : > { %3337 = vrot.lane.b32.xlu1 %v13819_v40, %s11991_s8 }
 0x59b   : > { %v13947_v38 = vpop.permute.xlu0 %3543 }
 0x59c   : > { %17466 = vst [vmem:[#allocation68_spill] sm:$0xff] %v13947_v38  ;;  %v13949_v30 = vpop.permute.xlu1 %3545 }
 0x59d   : > { %17467 = vst [vmem:[#allocation69_spill] sm:$0xff] %v13949_v30  ;;  %3339 = vrot.lane.b32.xlu0 %v13829_v31, %s11991_s8 }
 0x59e   : > { %3341 = vrot.lane.b32.xlu1 %v13835_v41, %s11991_s8 }
 0x59f   : > { %v13955_v45 = vpop.permute.xlu0 %3547 }
 0x5a0   : > { %17468 = vst [vmem:[#allocation70_spill] sm:$0xff] %v13955_v45  ;;  %v13957_v35 = vpop.permute.xlu1 %3549 }
 0x5a1   : > { %17469 = vst [vmem:[#allocation71_spill] sm:$0xff] %v13957_v35  ;;  %3343 = vrot.lane.b32.xlu0 %v13845_v53, %s11991_s8 }
 0x5a2   : > { %3345 = vrot.lane.b32.xlu1 %v13851_v62, %s11991_s8 }
 0x5a3   : > { %v13963_v9 = vpop.permute.xlu0 %3551 }
 0x5a4   : > { %17470 = vst [vmem:[#allocation72_spill] sm:$0xff] %v13963_v9  ;;  %v13965_v3 = vpop.permute.xlu1 %3553 }
 0x5a5   : > { %17471 = vst [vmem:[#allocation73_spill] sm:$0xff] %v13965_v3  ;;  %3347 = vrot.lane.b32.xlu0 %v13861_v22, %s11991_s8 }
 0x5a6   : > { %3349 = vrot.lane.b32.xlu1 %v13867_v47, %s11991_s8 }
 0x5a7   : > { %v13971_v32 = vpop.permute.xlu0 %3555 }
 0x5a8   : > { %17472 = vst [vmem:[#allocation74_spill] sm:$0xff] %v13971_v32  ;;  %v13973_v27 = vpop.permute.xlu1 %3557 }
 0x5a9   : > { %17473 = vst [vmem:[#allocation75_spill] sm:$0xff] %v13973_v27  ;;  %3367 = vrot.lane.b32.xlu0 %v13877_v39, %s11991_s8 }
 0x5aa   : > { %3369 = vrot.lane.b32.xlu1 %v13883_v42, %s11991_s8 }
 0x5ab   : > { %v13979_v35 = vpop.permute.xlu0 %3607 }
 0x5ac   : > { %v13981_v9 = vpop.permute.xlu1 %3609 }
 0x5ad   : > { %3371 = vrot.lane.b32.xlu0 %v13893_v58, %s11991_s8 }
 0x5ae   : > { %3373 = vrot.lane.b32.xlu1 %v13899_v52, %s11991_s8 }
 0x5af   : > { %v13987_v3 = vpop.permute.xlu0 %3611 }
 0x5b0   : > { %v13989_v32 = vpop.permute.xlu1 %3613 }
 0x5b1   : > { %3375 = vrot.lane.b32.xlu0 %v13909_v54, %s11991_s8 }
 0x5b2   : > { %3377 = vrot.lane.b32.xlu1 %v13915_v14, %s11991_s8 }
 0x5b3   : > { %v13995_v27 = vpop.permute.xlu0 %3615 }
 0x5b4   : > { %v13997_v45 = vpop.permute.xlu1 %3617 }
 0x5b5   : > { %3379 = vrot.lane.b32.xlu0 %v13925_v10, %s11991_s8 }
 0x5b6   : > { %3381 = vrot.lane.b32.xlu1 %v13931_v36, %s11991_s8 }
 0x5b7   : > { %v14003_v28 = vpop.permute.xlu0 %3619 }
 0x5b8   : > { %17474 = vst [vmem:[#allocation76_spill] sm:$0xff] %v14003_v28  ;;  %v14005_v30 = vpop.permute.xlu1 %3621 }
 0x5b9   : > { %17475 = vst [vmem:[#allocation77_spill] sm:$0xff] %v14005_v30  ;;  %3431 = vrot.lane.b32.xlu0 %v13813_v33, %s11992_s9 }
 0x5ba   : > { %3433 = vrot.lane.b32.xlu1 %v13819_v40, %s11992_s9 }
 0x5bb   : > { %v14011_v59 = vpop.permute.xlu0 %3639 }
 0x5bc   : > { %17476 = vst [vmem:[#allocation78_spill] sm:$0xff] %v14011_v59  ;;  %v14013_v38 = vpop.permute.xlu1 %3641 }
 0x5bd   : > { %17477 = vst [vmem:[#allocation79_spill] sm:$0xff] %v14013_v38  ;;  %3435 = vrot.lane.b32.xlu0 %v13829_v31, %s11992_s9 }
 0x5be   : > { %3437 = vrot.lane.b32.xlu1 %v13835_v41, %s11992_s9 }
 0x5bf   : > { %v14019_v17 = vpop.permute.xlu0 %3643 }
 0x5c0   : > { %17478 = vst [vmem:[#allocation80_spill] sm:$0xff] %v14019_v17  ;;  %v14021_v8 = vpop.permute.xlu1 %3645 }
 0x5c1   : > { %17479 = vst [vmem:[#allocation81_spill] sm:$0xff] %v14021_v8  ;;  %3439 = vrot.lane.b32.xlu0 %v13845_v53, %s11992_s9 }
 0x5c2   : > { %3441 = vrot.lane.b32.xlu1 %v13851_v62, %s11992_s9 }
 0x5c3   : > { %v14027_v20 = vpop.permute.xlu0 %3647 }
 0x5c4   : > { %17480 = vst [vmem:[#allocation82_spill] sm:$0xff] %v14027_v20  ;;  %v14029_v59 = vpop.permute.xlu1 %3649 }
 0x5c5   : > { %17481 = vst [vmem:[#allocation83_spill] sm:$0xff] %v14029_v59  ;;  %3443 = vrot.lane.b32.xlu0 %v13861_v22, %s11992_s9 }
 0x5c6   : > { %3445 = vrot.lane.b32.xlu1 %v13867_v47, %s11992_s9 }
 0x5c7   : > { %v14035_v38 = vpop.permute.xlu0 %3651 }
 0x5c8   : > { %17482 = vst [vmem:[#allocation84_spill] sm:$0xff] %v14035_v38  ;;  %v14037_v17 = vpop.permute.xlu1 %3653 }
 0x5c9   : > { %17483 = vst [vmem:[#allocation85_spill] sm:$0xff] %v14037_v17  ;;  %3463 = vrot.lane.b32.xlu0 %v13877_v39, %s11992_s9 }
 0x5ca   : > { %3465 = vrot.lane.b32.xlu1 %v13883_v42, %s11992_s9 }
 0x5cb   : > { %v14043_v8 = vpop.permute.xlu0 %3703 }
 0x5cc   : > { %v14045_v20 = vpop.permute.xlu1 %3705 }
 0x5cd   : > { %3467 = vrot.lane.b32.xlu0 %v13893_v58, %s11992_s9 }
 0x5ce   : > { %3469 = vrot.lane.b32.xlu1 %v13899_v52, %s11992_s9 }
 0x5cf   : > { %v14051_v59 = vpop.permute.xlu0 %3707 }
 0x5d0   : > { %v14053_v38 = vpop.permute.xlu1 %3709 }
 0x5d1   : > { %3471 = vrot.lane.b32.xlu0 %v13909_v54, %s11992_s9 }
 0x5d2   : > { %3473 = vrot.lane.b32.xlu1 %v13915_v14, %s11992_s9 }
 0x5d3   : > { %v14059_v17 = vpop.permute.xlu0 %3711 }
 0x5d4   : > { %v14061_v30 = vpop.permute.xlu1 %3713 }
 0x5d5   : > { %17484 = vst [vmem:[#allocation86_spill] sm:$0xff] %v14061_v30  ;;  %3475 = vrot.lane.b32.xlu0 %v13925_v10, %s11992_s9 }
 0x5d6   : > { %3477 = vrot.lane.b32.xlu1 %v13931_v36, %s11992_s9 }
 0x5d7   : > { %v14067_v13 = vpop.permute.xlu0 %3715 }
 0x5d8   : > { %17485 = vst [vmem:[#allocation87_spill] sm:$0xff] %v14067_v13  ;;  %v14069_v37 = vpop.permute.xlu1 %3717 }
 0x5d9   : > { %17486 = vst [vmem:[#allocation88_spill] sm:$0xff] %v14069_v37  ;;  %3527 = vrot.lane.b32.xlu0 %v13813_v33, %s11993_s10 }
 0x5da   : > { %3529 = vrot.lane.b32.xlu1 %v13819_v40, %s11993_s10 }
 0x5db   : > { %v14075_v28 = vpop.permute.xlu0 %3735 }
 0x5dc   : > { %17487 = vst [vmem:[#allocation89_spill] sm:$0xff] %v14075_v28  ;;  %v14077_v11 = vpop.permute.xlu1 %3737 }
 0x5dd   : > { %17488 = vst [vmem:[#allocation90_spill] sm:$0xff] %v14077_v11  ;;  %3531 = vrot.lane.b32.xlu0 %v13829_v31, %s11993_s10 }
 0x5de   : > { %3533 = vrot.lane.b32.xlu1 %v13835_v41, %s11993_s10 }
 0x5df   : > { %v14083_v30 = vpop.permute.xlu0 %3739 }
 0x5e0   : > { %17489 = vst [vmem:[#allocation91_spill] sm:$0xff] %v14083_v30  ;;  %v14085_v13 = vpop.permute.xlu1 %3741 }
 0x5e1   : > { %17490 = vst [vmem:[#allocation92_spill] sm:$0xff] %v14085_v13  ;;  %3535 = vrot.lane.b32.xlu0 %v13845_v53, %s11993_s10 }
 0x5e2   : > { %3537 = vrot.lane.b32.xlu1 %v13851_v62, %s11993_s10 }
 0x5e3   : > { %v14091_v37 = vpop.permute.xlu0 %3743 }
 0x5e4   : > { %17491 = vst [vmem:[#allocation93_spill] sm:$0xff] %v14091_v37  ;;  %v14093_v28 = vpop.permute.xlu1 %3745 }
 0x5e5   : > { %17492 = vst [vmem:[#allocation94_spill] sm:$0xff] %v14093_v28  ;;  %3539 = vrot.lane.b32.xlu0 %v13861_v22, %s11993_s10 }
 0x5e6   : > { %3541 = vrot.lane.b32.xlu1 %v13867_v47, %s11993_s10 }
 0x5e7   : > { %v14099_v11 = vpop.permute.xlu0 %3747 }
 0x5e8   : > { %17493 = vst [vmem:[#allocation95_spill] sm:$0xff] %v14099_v11  ;;  %v14101_v30 = vpop.permute.xlu1 %3749 }
 0x5e9   : > { %17494 = vst [vmem:[#allocation96_spill] sm:$0xff] %v14101_v30  ;;  %3559 = vrot.lane.b32.xlu0 %v13877_v39, %s11993_s10 }
 0x5ea   : > { %3561 = vrot.lane.b32.xlu1 %v13883_v42, %s11993_s10 }
 0x5eb   : > { %v14107_v13 = vpop.permute.xlu0 %3239 }
 0x5ec   : > { %17495 = vst [vmem:[#allocation97_spill] sm:$0xff] %v14107_v13  ;;  %v14109_v37 = vpop.permute.xlu1 %3241 }
 0x5ed   : > { %17496 = vst [vmem:[#allocation98_spill] sm:$0xff] %v14109_v37  ;;  %3563 = vrot.lane.b32.xlu0 %v13893_v58, %s11993_s10 }
 0x5ee   : > { %3565 = vrot.lane.b32.xlu1 %v13899_v52, %s11993_s10 }
 0x5ef   : > { %v14115_v28 = vpop.permute.xlu0 %3243 }
 0x5f0   : > { %17497 = vst [vmem:[#allocation99_spill] sm:$0xff] %v14115_v28  ;;  %v14117_v11 = vpop.permute.xlu1 %3245 }
 0x5f1   : > { %17498 = vst [vmem:[#allocation100_spill] sm:$0xff] %v14117_v11  ;;  %3567 = vrot.lane.b32.xlu0 %v13909_v54, %s11993_s10 }
 0x5f2   : > { %3569 = vrot.lane.b32.xlu1 %v13915_v14, %s11993_s10 }
 0x5f3   : > { %v14123_v30 = vpop.permute.xlu0 %3247 }
 0x5f4   : > { %17499 = vst [vmem:[#allocation101_spill] sm:$0xff] %v14123_v30  ;;  %v14125_v13 = vpop.permute.xlu1 %3249 }
 0x5f5   : > { %17500 = vst [vmem:[#allocation102_spill] sm:$0xff] %v14125_v13  ;;  %3571 = vrot.lane.b32.xlu0 %v13925_v10, %s11993_s10 }
 0x5f6   : > { %3573 = vrot.lane.b32.xlu1 %v13931_v36, %s11993_s10 }
 0x5f7   : > { %v14131_v37 = vpop.permute.xlu0 %3251 }
 0x5f8   : > { %17501 = vst [vmem:[#allocation103_spill] sm:$0xff] %v14131_v37  ;;  %v14133_v28 = vpop.permute.xlu1 %3253 }
 0x5f9   : > { %17502 = vst [vmem:[#allocation104_spill] sm:$0xff] %v14133_v28  ;;  %3623 = vrot.lane.b32.xlu0 %v13813_v33, %s11994_s11 }
 0x5fa   : > { %3625 = vrot.lane.b32.xlu1 %v13819_v40, %s11994_s11 }
 0x5fb   : > { %v14139_v11 = vpop.permute.xlu0 %3271 }
 0x5fc   : > { %17503 = vst [vmem:[#allocation105_spill] sm:$0xff] %v14139_v11  ;;  %v14141_v30 = vpop.permute.xlu1 %3273 }
 0x5fd   : > { %17504 = vst [vmem:[#allocation106_spill] sm:$0xff] %v14141_v30  ;;  %3627 = vrot.lane.b32.xlu0 %v13829_v31, %s11994_s11 }
 0x5fe   : > { %3629 = vrot.lane.b32.xlu1 %v13835_v41, %s11994_s11 }
 0x5ff   : > { %v14147_v13 = vpop.permute.xlu0 %3275 }
 0x600   : > { %17505 = vst [vmem:[#allocation107_spill] sm:$0xff] %v14147_v13  ;;  %v14149_v37 = vpop.permute.xlu1 %3277 }
 0x601   : > { %17506 = vst [vmem:[#allocation108_spill] sm:$0xff] %v14149_v37  ;;  %3631 = vrot.lane.b32.xlu0 %v13845_v53, %s11994_s11 }
 0x602   : > { %3633 = vrot.lane.b32.xlu1 %v13851_v62, %s11994_s11 }
 0x603   : > { %v14155_v28 = vpop.permute.xlu0 %3279 }
 0x604   : > { %17507 = vst [vmem:[#allocation109_spill] sm:$0xff] %v14155_v28  ;;  %v14157_v11 = vpop.permute.xlu1 %3281 }
 0x605   : > { %17508 = vst [vmem:[#allocation110_spill] sm:$0xff] %v14157_v11  ;;  %3635 = vrot.lane.b32.xlu0 %v13861_v22, %s11994_s11 }
 0x606   : > { %3637 = vrot.lane.b32.xlu1 %v13867_v47, %s11994_s11 }
 0x607   : > { %v14163_v30 = vpop.permute.xlu0 %3283 }
 0x608   : > { %17509 = vst [vmem:[#allocation111_spill] sm:$0xff] %v14163_v30  ;;  %v14165_v13 = vpop.permute.xlu1 %3285 }
 0x609   : > { %17510 = vst [vmem:[#allocation112_spill] sm:$0xff] %v14165_v13  ;;  %3655 = vrot.lane.b32.xlu0 %v13877_v39, %s11994_s11 }
 0x60a   : > { %3657 = vrot.lane.b32.xlu1 %v13883_v42, %s11994_s11 }
 0x60b   : > { %v14171_v37 = vpop.permute.xlu0 %3335 }
 0x60c   : > { %17511 = vst [vmem:[#allocation113_spill] sm:$0xff] %v14171_v37  ;;  %v14173_v28 = vpop.permute.xlu1 %3337 }
 0x60d   : > { %17512 = vst [vmem:[#allocation114_spill] sm:$0xff] %v14173_v28  ;;  %3659 = vrot.lane.b32.xlu0 %v13893_v58, %s11994_s11 }
 0x60e   : > { %3661 = vrot.lane.b32.xlu1 %v13899_v52, %s11994_s11 }
 0x60f   : > { %v14179_v11 = vpop.permute.xlu0 %3339 }
 0x610   : > { %17513 = vst [vmem:[#allocation115_spill] sm:$0xff] %v14179_v11  ;;  %v14181_v30 = vpop.permute.xlu1 %3341 }
 0x611   : > { %17514 = vst [vmem:[#allocation116_spill] sm:$0xff] %v14181_v30  ;;  %3663 = vrot.lane.b32.xlu0 %v13909_v54, %s11994_s11 }
 0x612   : > { %3665 = vrot.lane.b32.xlu1 %v13915_v14, %s11994_s11 }
 0x613   : > { %v14187_v13 = vpop.permute.xlu0 %3343 }
 0x614   : > { %17515 = vst [vmem:[#allocation117_spill] sm:$0xff] %v14187_v13  ;;  %v14189_v37 = vpop.permute.xlu1 %3345 }
 0x615   : > { %17516 = vst [vmem:[#allocation118_spill] sm:$0xff] %v14189_v37  ;;  %3667 = vrot.lane.b32.xlu0 %v13925_v10, %s11994_s11 }
 0x616   : > { %3669 = vrot.lane.b32.xlu1 %v13931_v36, %s11994_s11 }
 0x617   : > { %v14195_v28 = vpop.permute.xlu0 %3347 }
 0x618   : > { %17517 = vst [vmem:[#allocation119_spill] sm:$0xff] %v14195_v28  ;;  %v14197_v11 = vpop.permute.xlu1 %3349 }
 0x619   : > { %17518 = vst [vmem:[#allocation120_spill] sm:$0xff] %v14197_v11  ;;  %3719 = vrot.lane.b32.xlu0 %v13813_v33, %s11995_s14 }
 0x61a   : > { %3721 = vrot.lane.b32.xlu1 %v13819_v40, %s11995_s14 }
 0x61b   : > { %v14203_v30 = vpop.permute.xlu0 %3367 }
 0x61c   : > { %17519 = vst [vmem:[#allocation121_spill] sm:$0xff] %v14203_v30  ;;  %v14205_v13 = vpop.permute.xlu1 %3369 }
 0x61d   : > { %17520 = vst [vmem:[#allocation122_spill] sm:$0xff] %v14205_v13  ;;  %3723 = vrot.lane.b32.xlu0 %v13829_v31, %s11995_s14 }
 0x61e   : > { %3725 = vrot.lane.b32.xlu1 %v13835_v41, %s11995_s14 }
 0x61f   : > { %v14211_v37 = vpop.permute.xlu0 %3371 }
 0x620   : > { %17521 = vst [vmem:[#allocation123_spill] sm:$0xff] %v14211_v37  ;;  %v14213_v28 = vpop.permute.xlu1 %3373 }
 0x621   : > { %17522 = vst [vmem:[#allocation124_spill] sm:$0xff] %v14213_v28  ;;  %3727 = vrot.lane.b32.xlu0 %v13845_v53, %s11995_s14 }
 0x622   : > { %3729 = vrot.lane.b32.xlu1 %v13851_v62, %s11995_s14 }
 0x623   : > { %v14219_v11 = vpop.permute.xlu0 %3375 }
 0x624   : > { %17523 = vst [vmem:[#allocation125_spill] sm:$0xff] %v14219_v11  ;;  %v14221_v30 = vpop.permute.xlu1 %3377 }
 0x625   : > { %17524 = vst [vmem:[#allocation126_spill] sm:$0xff] %v14221_v30  ;;  %3731 = vrot.lane.b32.xlu0 %v13861_v22, %s11995_s14 }
 0x626   : > { %3733 = vrot.lane.b32.xlu1 %v13867_v47, %s11995_s14 }
 0x627   : > { %v14227_v13 = vpop.permute.xlu0 %3379 }
 0x628   : > { %17525 = vst [vmem:[#allocation127_spill] sm:$0xff] %v14227_v13  ;;  %v14229_v37 = vpop.permute.xlu1 %3381 }
 0x629   : > { %17526 = vst [vmem:[#allocation128_spill] sm:$0xff] %v14229_v37  ;;  %3751 = vrot.lane.b32.xlu0 %v13877_v39, %s11995_s14 }
 0x62a   : > { %3753 = vrot.lane.b32.xlu1 %v13883_v42, %s11995_s14 }
 0x62b   : > { %v14235_v28 = vpop.permute.xlu0 %3431 }
 0x62c   : > { %17527 = vst [vmem:[#allocation129_spill] sm:$0xff] %v14235_v28  ;;  %v14237_v11 = vpop.permute.xlu1 %3433 }
 0x62d   : > { %17528 = vst [vmem:[#allocation130_spill] sm:$0xff] %v14237_v11  ;;  %3755 = vrot.lane.b32.xlu0 %v13893_v58, %s11995_s14 }
 0x62e   : > { %3757 = vrot.lane.b32.xlu1 %v13899_v52, %s11995_s14 }
 0x62f   : > { %v14243_v30 = vpop.permute.xlu0 %3435 }
 0x630   : > { %17529 = vst [vmem:[#allocation131_spill] sm:$0xff] %v14243_v30  ;;  %v14245_v13 = vpop.permute.xlu1 %3437 }
 0x631   : > { %17530 = vst [vmem:[#allocation132_spill] sm:$0xff] %v14245_v13  ;;  %3759 = vrot.lane.b32.xlu0 %v13909_v54, %s11995_s14 }
 0x632   : > { %3761 = vrot.lane.b32.xlu1 %v13915_v14, %s11995_s14 }
 0x633   : > { %v14251_v37 = vpop.permute.xlu0 %3439 }
 0x634   : > { %17531 = vst [vmem:[#allocation133_spill] sm:$0xff] %v14251_v37  ;;  %v14253_v28 = vpop.permute.xlu1 %3441 }
 0x635   : > { %17532 = vst [vmem:[#allocation134_spill] sm:$0xff] %v14253_v28  ;;  %3763 = vrot.lane.b32.xlu0 %v13925_v10, %s11995_s14 }
 0x636   : > { %3765 = vrot.lane.b32.xlu1 %v13931_v36, %s11995_s14 }
 0x637   : > { %v14259_v11 = vpop.permute.xlu0 %3443 }
 0x638   : > { %17533 = vst [vmem:[#allocation135_spill] sm:$0xff] %v14259_v11  ;;  %v14261_v30 = vpop.permute.xlu1 %3445 }
 0x639   : > { %17534 = vst [vmem:[#allocation136_spill] sm:$0xff] %v14261_v30  ;;  %3799 = vrot.lane.b32.xlu0 %v13464_v2, %s11996_s15 }
 0x63a   : > { %3801 = vrot.lane.b32.xlu1 %v13467_v5, %s11996_s15 }
 0x63b   : > { %v14267_v37 = vpop.permute.xlu0 %3463 }
 0x63c   : > { %17535 = vst [vmem:[#allocation137_spill] sm:$0xff] %v14267_v37  ;;  %v14269_v28 = vpop.permute.xlu1 %3465 }
 0x63d   : > { %17536 = vst [vmem:[#allocation138_spill] sm:$0xff] %v14269_v28  ;;  %3803 = vrot.lane.b32.xlu0 %v13474_v46, %s11996_s15 }
 0x63e   : > { %3805 = vrot.lane.b32.xlu1 %v13477_v48, %s11996_s15 }
 0x63f   : > { %v14275_v11 = vpop.permute.xlu0 %3467 }
 0x640   : > { %17537 = vst [vmem:[#allocation139_spill] sm:$0xff] %v14275_v11  ;;  %v14277_v30 = vpop.permute.xlu1 %3469 }
 0x641   : > { %17538 = vst [vmem:[#allocation140_spill] sm:$0xff] %v14277_v30  ;;  %3807 = vrot.lane.b32.xlu0 %v13484_v44, %s11996_s15 }
 0x642   : > { %3809 = vrot.lane.b32.xlu1 %v13487_v55, %s11996_s15 }
 0x643   : > { %v14283_v13 = vpop.permute.xlu0 %3471 }
 0x644   : > { %17539 = vst [vmem:[#allocation141_spill] sm:$0xff] %v14283_v13  ;;  %v14285_v37 = vpop.permute.xlu1 %3473 }
 0x645   : > { %17540 = vst [vmem:[#allocation142_spill] sm:$0xff] %v14285_v37  ;;  %3811 = vrot.lane.b32.xlu0 %v13494_v16, %s11996_s15 }
 0x646   : > { %3813 = vrot.lane.b32.xlu1 %v13497_v60, %s11996_s15 }
 0x647   : > { %v14291_v28 = vpop.permute.xlu0 %3475 }
 0x648   : > { %17541 = vst [vmem:[#allocation143_spill] sm:$0xff] %v14291_v28  ;;  %v14293_v11 = vpop.permute.xlu1 %3477 }
 0x649   : > { %17542 = vst [vmem:[#allocation144_spill] sm:$0xff] %v14293_v11  ;;  %3815 = vrot.lane.b32.xlu0 %v13813_v33, %s11996_s15 }
 0x64a   : > { %3817 = vrot.lane.b32.xlu1 %v13819_v40, %s11996_s15 }
 0x64b   : > { %v14299_v30 = vpop.permute.xlu0 %3527 }
 0x64c   : > { %v14301_v13 = vpop.permute.xlu1 %3529 }
 0x64d   : > { %3819 = vrot.lane.b32.xlu0 %v13829_v31, %s11996_s15 }
 0x64e   : > { %3821 = vrot.lane.b32.xlu1 %v13835_v41, %s11996_s15 }
 0x64f   : > { %v14307_v37 = vpop.permute.xlu0 %3531 }
 0x650   : > { %v14309_v28 = vpop.permute.xlu1 %3533 }
 0x651   : > { %17543 = vst [vmem:[#allocation145_spill] sm:$0xff] %v14309_v28  ;;  %3823 = vrot.lane.b32.xlu0 %v13845_v53, %s11996_s15 }
 0x652   : > { %3825 = vrot.lane.b32.xlu1 %v13851_v62, %s11996_s15 }
 0x653   : > { %v14315_v11 = vpop.permute.xlu0 %3535 }
 0x654   : > { %17544 = vst [vmem:[#allocation146_spill] sm:$0xff] %v14315_v11  ;;  %v14317_v40 = vpop.permute.xlu1 %3537  ;;  %v3928_v11 = vcombine.high %v13895_v4, %v14043_v8 }
 0x655   : > { %17545 = vst [vmem:[#allocation147_spill] sm:$0xff] %v14317_v40  ;;  %3827 = vrot.lane.b32.xlu0 %v13861_v22, %s11996_s15 }
 0x656   : > { %3829 = vrot.lane.b32.xlu1 %v13867_v47, %s11996_s15 }
 0x657   : > { %v14323_v41 = vpop.permute.xlu0 %3539 }
 0x658   : > { %17546 = vst [vmem:[#allocation148_spill] sm:$0xff] %v14323_v41  ;;  %v14325_v31 = vpop.permute.xlu1 %3541  ;;  %v3911_v41 = vcombine.low %v13659_v25, %v13787_v61 }
 0x659   : > { %17547 = vst [vmem:[#allocation149_spill] sm:$0xff] %v14325_v31  ;;  %3831 = vrot.lane.b32.xlu0 %v13504_v57, %s11996_s15 }
 0x65a   : > { %3833 = vrot.lane.b32.xlu1 %v13507_v50, %s11996_s15 }
 0x65b   : > { %v14331_v62 = vpop.permute.xlu0 %3559 }
 0x65c   : > { %17548 = vst [vmem:[#allocation150_spill] sm:$0xff] %v14331_v62  ;;  %v14333_v53 = vpop.permute.xlu1 %3561 }
 0x65d   : > { %17549 = vst [vmem:[#allocation151_spill] sm:$0xff] %v14333_v53  ;;  %3835 = vrot.lane.b32.xlu0 %v13514_v56, %s11996_s15 }
 0x65e   : > { %3837 = vrot.lane.b32.xlu1 %v13517_v51, %s11996_s15 }
 0x65f   : > { %v14339_v47 = vpop.permute.xlu0 %3563 }
 0x660   : > { %17550 = vst [vmem:[#allocation152_spill] sm:$0xff] %v14339_v47  ;;  %v14341_v22 = vpop.permute.xlu1 %3565 }
 0x661   : > { %17551 = vst [vmem:[#allocation153_spill] sm:$0xff] %v14341_v22  ;;  %3839 = vrot.lane.b32.xlu0 %v13524_v1, %s11996_s15 }
 0x662   : > { %3841 = vrot.lane.b32.xlu1 %v13527_v29, %s11996_s15 }
 0x663   : > { %v14347_v50 = vpop.permute.xlu0 %3567 }
 0x664   : > { %17552 = vst [vmem:[#allocation154_spill] sm:$0xff] %v14347_v50  ;;  %v14349_v62 = vpop.permute.xlu1 %3569 }
 0x665   : > { %17553 = vst [vmem:[#allocation155_spill] sm:$0xff] %v14349_v62  ;;  %3843 = vrot.lane.b32.xlu0 %v13534_v6, %s11996_s15 }
 0x666   : > { %3845 = vrot.lane.b32.xlu1 %v13537_v34, %s11996_s15 }
 0x667   : > { %v14355_v53 = vpop.permute.xlu0 %3571 }
 0x668   : > { %17554 = vst [vmem:[#allocation156_spill] sm:$0xff] %v14355_v53  ;;  %v14357_v47 = vpop.permute.xlu1 %3573 }
 0x669   : > { %17555 = vst [vmem:[#allocation157_spill] sm:$0xff] %v14357_v47  ;;  %3847 = vrot.lane.b32.xlu0 %v13877_v39, %s11996_s15 }
 0x66a   : > { %3849 = vrot.lane.b32.xlu1 %v13883_v42, %s11996_s15 }
 0x66b   : > { %v14363_v22 = vpop.permute.xlu0 %3623 }
 0x66c   : > { %v14365_v50 = vpop.permute.xlu1 %3625 }
 0x66d   : > { %3851 = vrot.lane.b32.xlu0 %v13893_v58, %s11996_s15 }
 0x66e   : > { %3853 = vrot.lane.b32.xlu1 %v13899_v52, %s11996_s15 }
 0x66f   : > { %v14371_v62 = vpop.permute.xlu0 %3627 }
 0x670   : > { %v14373_v53 = vpop.permute.xlu1 %3629 }
 0x671   : > { %3855 = vrot.lane.b32.xlu0 %v13909_v54, %s11996_s15 }
 0x672   : > { %3857 = vrot.lane.b32.xlu1 %v13915_v14, %s11996_s15 }
 0x673   : > { %v14379_v47 = vpop.permute.xlu0 %3631 }
 0x674   : > { %17556 = vst [vmem:[#allocation158_spill] sm:$0xff] %v14379_v47  ;;  %v14381_v42 = vpop.permute.xlu1 %3633 }
 0x675   : > { %17557 = vst [vmem:[#allocation159_spill] sm:$0xff] %v14381_v42  ;;  %3859 = vrot.lane.b32.xlu0 %v13925_v10, %s11996_s15  ;;  %v3912_v42 = vcombine.high %v13659_v25, %v13787_v61 }
 0x676   : > { %3861 = vrot.lane.b32.xlu1 %v13931_v36, %s11996_s15 }
 0x677   : > { %v14387_v52 = vpop.permute.xlu0 %3635 }
 0x678   : > { %17558 = vst [vmem:[#allocation160_spill] sm:$0xff] %v14387_v52  ;;  %v14389_v58 = vpop.permute.xlu1 %3637 }
 0x679   : > { %17559 = vst [vmem:[#allocation161_spill] sm:$0xff] %v14389_v58 }
 0x67b   : > { %v14391_v39 = vpop.permute.xlu0 %3655 }
 0x67c   : > { %17560 = vst [vmem:[#allocation162_spill] sm:$0xff] %v14391_v39  ;;  %v14393_v54 = vpop.permute.xlu1 %3657 }
 0x67d   : > { %17561 = vst [vmem:[#allocation163_spill] sm:$0xff] %v14393_v54 }
 0x67f   : > { %v14395_v34 = vpop.permute.xlu0 %3659 }
 0x680   : > { %17562 = vst [vmem:[#allocation164_spill] sm:$0xff] %v14395_v34  ;;  %v14397_v14 = vpop.permute.xlu1 %3661 }
 0x681   : > { %17563 = vst [vmem:[#allocation165_spill] sm:$0xff] %v14397_v14 }
 0x683   : > { %v14399_v6 = vpop.permute.xlu0 %3663 }
 0x684   : > { %17564 = vst [vmem:[#allocation166_spill] sm:$0xff] %v14399_v6  ;;  %v14401_v29 = vpop.permute.xlu1 %3665 }
 0x685   : > { %17565 = vst [vmem:[#allocation167_spill] sm:$0xff] %v14401_v29 }
 0x687   : > { %v14403_v10 = vpop.permute.xlu0 %3667 }
 0x688   : > { %17566 = vst [vmem:[#allocation168_spill] sm:$0xff] %v14403_v10  ;;  %v14405_v1 = vpop.permute.xlu1 %3669 }
 0x689   : > { %17567 = vst [vmem:[#allocation169_spill] sm:$0xff] %v14405_v1 }
 0x68b   : > { %v14407_v36 = vpop.permute.xlu0 %3719 }
 0x68c   : > { %v14409_v51 = vpop.permute.xlu1 %3721 }
 0x68f   : > { %v14411_v56 = vpop.permute.xlu0 %3723 }
 0x690   : > { %v14413_v39 = vpop.permute.xlu1 %3725 }
 0x693   : > { %v14415_v54 = vpop.permute.xlu0 %3727 }
 0x694   : > { %17568 = vst [vmem:[#allocation170_spill] sm:$0xff] %v14415_v54  ;;  %v14417_v34 = vpop.permute.xlu1 %3729 }
 0x695   : > { %17569 = vst [vmem:[#allocation171_spill] sm:$0xff] %v14417_v34 }
 0x697   : > { %v14419_v14 = vpop.permute.xlu0 %3731 }
 0x698   : > { %17570 = vst [vmem:[#allocation172_spill] sm:$0xff] %v14419_v14  ;;  %v14423_v29 = vpop.permute.xlu1 %3733  ;;  %v3927_v14 = vcombine.low %v13895_v4, %v14043_v8 }
 0x699   : > { %17572 = vst [vmem:[#allocation174_spill] sm:$0xff] %v14423_v29 }
 0x69b   : > { %v14421_v6 = vpop.permute.xlu0 %3751 }
 0x69c   : > { %17571 = vst [vmem:[#allocation173_spill] sm:$0xff] %v14421_v6  ;;  %v14427_v1 = vpop.permute.xlu1 %3753 }
 0x69d   : > { %17574 = vst [vmem:[#allocation176_spill] sm:$0xff] %v14427_v1 }
 0x69f   : > { %v14425_v10 = vpop.permute.xlu0 %3755 }
 0x6a0   : > { %17573 = vst [vmem:[#allocation175_spill] sm:$0xff] %v14425_v10  ;;  %v14433_v58 = vpop.permute.xlu1 %3757  ;;  %v3895_v10 = vcombine.low %v13464_v2, %v13723_v18 }
 0x6a1   : > { %17577 = vst [vmem:[#allocation179_spill] sm:$0xff] %v14433_v58 }
 0x6a2   : > { %v3903_v40 = vrot.slane %v3895_v10, %v12050_v12  ;;  %v3926_v10 = vrot.slane %v3912_v42, %v12050_v12  ;;  %v4047_v42 = vcombine.low %v13661_v63, %v13789_v23 }
 0x6a3   : > { %v14429_v57 = vpop.permute.xlu0 %3759 }
 0x6a4   : > { %17575 = vst [vmem:[#allocation177_spill] sm:$0xff] %v14429_v57  ;;  %v3919_v57 = vrot.slane %v3911_v41, %v12050_v12  ;;  %v14445_v29 = vpop.permute.xlu1 %3761 }
 0x6a5   : > { %17578 = vst [vmem:[#allocation180_spill] sm:$0xff] %v14445_v29 }
 0x6a6   : > { %v3959_v54 = vcombine.low %v3903_v40, %v3919_v57  ;;  %v3960_v47 = vcombine.high %v3903_v40, %v3919_v57 }
 0x6a7   : > { %v14431_v31 = vpop.permute.xlu0 %3763 }
 0x6a8   : > { %17576 = vst [vmem:[#allocation178_spill] sm:$0xff] %v14431_v31  ;;  %v3935_v31 = vrot.slane %v3927_v14, %v12050_v12  ;;  %v14456_v14 = vpop.permute.xlu1 %3765  ;;  %v3967_v25 = vrot.slane %v3959_v54, %v12074_v19 }
 0x6a9   : > { %17579 = vst [vmem:[#allocation181_spill] sm:$0xff] %v14456_v14 }
 0x6ab   : > { %v3800_v52 = vpop.permute.xlu0 %3799 }
 0x6ac   : > { %v3943_v6 = vcombine.low %v13979_v35, %v3800_v52  ;;  %v3944_v58 = vcombine.high %v13979_v35, %v3800_v52  ;;  %v3942_v35 = vrot.slane %v3928_v11, %v12050_v12  ;;  %v3802_v14 = vpop.permute.xlu1 %3801 }
 0x6ad   : > { %v4079_v11 = vcombine.low %v13981_v9, %v3802_v14 }
 0x6ae   : > { %v3951_v1 = vrot.slane %v3943_v6, %v12050_v12  ;;  %v3896_v6 = vcombine.high %v13464_v2, %v13723_v18  ;;  %v3958_v41 = vrot.slane %v3944_v58, %v12050_v12 }
 0x6b0   : > { %v3991_v34 = vcombine.low %v3935_v31, %v3951_v1  ;;  %v3992_v29 = vcombine.high %v3935_v31, %v3951_v1  ;;  %v3910_v61 = vrot.slane %v3896_v6, %v12050_v12  ;;  %v4007_v8 = vcombine.low %v3942_v35, %v3958_v41 }
 0x6b1   : > { %v3974_v1 = vrot.slane %v3960_v47, %v12074_v19  ;;  %v4008_v54 = vcombine.high %v3942_v35, %v3958_v41  ;;  %v4031_v47 = vcombine.low %v13467_v5, %v13725_v49 }
 0x6b2   : > { %v3999_v52 = vrot.slane %v3991_v34, %v12074_v19  ;;  %v4006_v18 = vrot.slane %v3992_v29, %v12074_v19  ;;  %v3975_v58 = vcombine.low %v3910_v61, %v3926_v10  ;;  %v4015_v57 = vrot.slane %v4007_v8, %v12074_v19 }
 0x6b3   : > { %v3976_v6 = vcombine.high %v3910_v61, %v3926_v10  ;;  %v4022_v35 = vrot.slane %v4008_v54, %v12074_v19  ;;  %v4048_v54 = vcombine.high %v13661_v63, %v13789_v23 }
 0x6b4   : > { %v4023_v4 = vcombine.low %v3967_v25, %v3999_v52  ;;  %v4024_v2 = vcombine.high %v3967_v25, %v3999_v52  ;;  %v4025_v40 = vcombine.low %v3974_v1, %v4006_v18  ;;  %v3983_v29 = vrot.slane %v3975_v58, %v12074_v19 }
 0x6b5   : > { %v4063_v52 = vcombine.low %v13901_v21, %v14045_v20  ;;  %v4026_v58 = vcombine.high %v3974_v1, %v4006_v18  ;;  %v3990_v61 = vrot.slane %v3976_v6, %v12074_v19  ;;  %v4064_v1 = vcombine.high %v13901_v21, %v14045_v20 }
 0x6b6   : > { %v8248_v34 = vsel %vm8247_vm11, %v4023_v4, -inf  ;;  %v8251_v31 = vsel %vm8247_vm11, %v4024_v2, -inf  ;;  %v8254_v25 = vsel %vm8247_vm11, %v4025_v40, -inf  ;;  %v4027_v8 = vcombine.low %v3983_v29, %v4015_v57 }
 0x6b7   : > { %8249 = vmax.xlane.f32.xlu0 %v8248_v34  ;;  %8252 = vmax.xlane.f32.xlu1 %v8251_v31  ;;  %v4055_v4 = vrot.slane %v4047_v42, %v12050_v12  ;;  %v4087_v2 = vrot.slane %v4079_v11, %v12050_v12  ;;  %v4039_v34 = vrot.slane %v4031_v47, %v12050_v12 }
 0x6b8   : > { %v8260_v41 = vsel %vm8247_vm11, %v4027_v8, -inf  ;;  %v4071_v10 = vrot.slane %v4063_v52, %v12050_v12  ;;  %v4029_v28 = vcombine.low %v3990_v61, %v4022_v35  ;;  %v4028_v42 = vcombine.high %v3983_v29, %v4015_v57 }
 0x6b9   : > { %v4095_v31 = vcombine.low %v4039_v34, %v4055_v4  ;;  %v4080_v11 = vcombine.high %v13981_v9, %v3802_v14  ;;  %v4032_v57 = vcombine.high %v13467_v5, %v13725_v49  ;;  %v4062_v23 = vrot.slane %v4048_v54, %v12050_v12 }
 0x6ba   : > { %v4127_v40 = vcombine.low %v4071_v10, %v4087_v2  ;;  %v8266_v18 = vsel %vm8247_vm11, %v4029_v28, -inf  ;;  %v8263_v47 = vsel %vm8247_vm11, %v4028_v42, -inf  ;;  %v4128_v14 = vcombine.high %v4071_v10, %v4087_v2 }
 0x6bb   : > { %8255 = vmax.xlane.f32.xlu0 %v8254_v25  ;;  %8261 = vmax.xlane.f32.xlu1 %v8260_v41  ;;  %v8257_v25 = vsel %vm8247_vm11, %v4026_v58, -inf  ;;  %v4103_v6 = vrot.slane %v4095_v31, %v12074_v19  ;;  %v4094_v9 = vrot.slane %v4080_v11, %v12050_v12  ;;  %v4096_v28 = vcombine.high %v4039_v34, %v4055_v4  ;;  %v3804_v41 = vpop.permute.xlu0 %3803 }
 0x6bc   : > { %v4135_v52 = vrot.slane %v4127_v40, %v12074_v19  ;;  %v4030_v29 = vcombine.high %v3990_v61, %v4022_v35  ;;  %v4078_v20 = vrot.slane %v4064_v1, %v12050_v12  ;;  %v4046_v8 = vrot.slane %v4032_v57, %v12050_v12 }
 0x6bd   : > { %v4142_v49 = vrot.slane %v4128_v14, %v12074_v19  ;;  %v4110_v10 = vrot.slane %v4096_v28, %v12074_v19  ;;  %v4215_v4 = vcombine.low %v13987_v3, %v3804_v41  ;;  %v4183_v35 = vcombine.low %v13667_v26, %v13795_v24 }
 0x6be   : > { %v4159_v63 = vcombine.low %v4103_v6, %v4135_v52  ;;  %v8269_v58 = vsel %vm8247_vm11, %v4030_v29, -inf  ;;  %v4143_v5 = vcombine.low %v4078_v20, %v4094_v9  ;;  %v4111_v2 = vcombine.low %v4046_v8, %v4062_v23 }
 0x6bf   : > { %8258 = vmax.xlane.f32.xlu0 %v8257_v25  ;;  %8267 = vmax.xlane.f32.xlu1 %v8266_v18  ;;  %v4161_v34 = vcombine.low %v4110_v10, %v4142_v49  ;;  %v4199_v61 = vcombine.low %v13911_v0, %v14051_v59  ;;  %v4160_v31 = vcombine.high %v4103_v6, %v4135_v52  ;;  %v17580_v25 = vld [vmem:[#allocation24_spill] sm:$0xff] }
 0x6c0   : > { %v8272_v21 = vsel %vm8247_vm11, %v4159_v63, -inf  ;;  %v4151_v40 = vrot.slane %v4143_v5, %v12074_v19  ;;  %v4167_v42 = vcombine.low %v13474_v46, %v17580_v25  ;;  %v4119_v54 = vrot.slane %v4111_v2, %v12074_v19 }
 0x6c1   : > { %v8278_v11 = vsel %vm8247_vm11, %v4161_v34, -inf  ;;  %v4144_v18 = vcombine.high %v4078_v20, %v4094_v9  ;;  %v4223_v1 = vrot.slane %v4215_v4, %v12050_v12  ;;  %v4191_v57 = vrot.slane %v4183_v35, %v12050_v12 }
 0x6c2   : > { %v8275_v14 = vsel %vm8247_vm11, %v4160_v31, -inf  ;;  %v4163_v63 = vcombine.low %v4119_v54, %v4151_v40  ;;  %v4207_v6 = vrot.slane %v4199_v61, %v12050_v12  ;;  %v4175_v52 = vrot.slane %v4167_v42, %v12050_v12 }
 0x6c3   : > { %8264 = vmax.xlane.f32.xlu0 %v8263_v47  ;;  %8273 = vmax.xlane.f32.xlu1 %v8272_v21  ;;  %v4112_v47 = vcombine.high %v4046_v8, %v4062_v23  ;;  %v4162_v21 = vcombine.high %v4110_v10, %v4142_v49  ;;  %v4158_v9 = vrot.slane %v4144_v18, %v12074_v19 }
 0x6c4   : > { %v8284_v28 = vsel %vm8247_vm11, %v4163_v63, -inf  ;;  %v4263_v29 = vcombine.low %v4207_v6, %v4223_v1  ;;  %v4231_v20 = vcombine.low %v4175_v52, %v4191_v57  ;;  %v4216_v5 = vcombine.high %v13987_v3, %v3804_v41 }
 0x6c5   : > { %v4126_v23 = vrot.slane %v4112_v47, %v12074_v19  ;;  %v8281_v8 = vsel %vm8247_vm11, %v4162_v21, -inf  ;;  %v4164_v2 = vcombine.high %v4119_v54, %v4151_v40  ;;  %v4184_v35 = vcombine.high %v13667_v26, %v13795_v24 }
 0x6c6   : > { %v4271_v4 = vrot.slane %v4263_v29, %v12074_v19  ;;  %v4239_v49 = vrot.slane %v4231_v20, %v12074_v19  ;;  %v4200_v10 = vcombine.high %v13911_v0, %v14051_v59  ;;  %v4264_v61 = vcombine.high %v4207_v6, %v4223_v1  ;;  %v17581_v6 = vld [vmem:[#allocation38_spill] sm:$0xff] }
 0x6c7   : > { %8270 = vmax.xlane.f32.xlu0 %v8269_v58  ;;  %8279 = vmax.xlane.f32.xlu1 %v8278_v11  ;;  %v4165_v58 = vcombine.low %v4126_v23, %v4158_v9  ;;  %v4168_v31 = vcombine.high %v13474_v46, %v17580_v25  ;;  %v4232_v3 = vcombine.high %v4175_v52, %v4191_v57  ;;  %v8287_v41 = vsel %vm8247_vm11, %v4164_v2, -inf  ;;  %v3806_v46 = vpop.permute.xlu1 %3805  ;;  %v17582_v52 = vld [vmem:[#allocation11_spill] sm:$0xff] }
 0x6c8   : > { %v4295_v40 = vcombine.low %v4239_v49, %v4271_v4  ;;  %v4230_v42 = vrot.slane %v4216_v5, %v12050_v12  ;;  %v4198_v26 = vrot.slane %v4184_v35, %v12050_v12  ;;  %v4214_v11 = vrot.slane %v4200_v10, %v12050_v12 }
 0x6c9   : > { %v8290_v34 = vsel %vm8247_vm11, %v4165_v58, -inf  ;;  %v4166_v59 = vcombine.high %v4126_v23, %v4158_v9  ;;  %v4278_v0 = vrot.slane %v4264_v61, %v12074_v19  ;;  %v4182_v54 = vrot.slane %v4168_v31, %v12050_v12 }
 0x6ca   : > { %v8296_v24 = vsel %vm8247_vm11, %v4295_v40, -inf  ;;  %v4246_v25 = vrot.slane %v4232_v3, %v12074_v19  ;;  %v4279_v18 = vcombine.low %v4214_v11, %v4230_v42  ;;  %v4296_v63 = vcombine.high %v4239_v49, %v4271_v4 }
 0x6cb   : > { %8276 = vmax.xlane.f32.xlu0 %v8275_v14  ;;  %8285 = vmax.xlane.f32.xlu1 %v8284_v28  ;;  %v8293_v1 = vsel %vm8247_vm11, %v4166_v59, -inf  ;;  %v4247_v47 = vcombine.low %v4182_v54, %v4198_v26  ;;  %v4351_v14 = vcombine.low %v13989_v32, %v3806_v46  ;;  %v4319_v28 = vcombine.low %v17582_v52, %v17581_v6 }
 0x6cc   : > { %v4297_v57 = vcombine.low %v4246_v25, %v4278_v0  ;;  %v4335_v21 = vcombine.low %v13917_v7, %v14053_v38  ;;  %v4280_v9 = vcombine.high %v4214_v11, %v4230_v42  ;;  %v8299_v20 = vsel %vm8247_vm11, %v4296_v63, -inf }
 0x6cd   : > { %v4287_v23 = vrot.slane %v4279_v18, %v12074_v19  ;;  %v4248_v5 = vcombine.high %v4182_v54, %v4198_v26  ;;  %v4255_v2 = vrot.slane %v4247_v47, %v12074_v19  ;;  %v4359_v4 = vrot.slane %v4351_v14, %v12050_v12  ;;  %v3808_v18 = vpop.permute.xlu0 %3807 }
 0x6ce   : > { %v8302_v29 = vsel %vm8247_vm11, %v4297_v57, -inf  ;;  %v4327_v35 = vrot.slane %v4319_v28, %v12050_v12  ;;  %v4343_v49 = vrot.slane %v4335_v21, %v12050_v12  ;;  %v4298_v10 = vcombine.high %v4246_v25, %v4278_v0  ;;  %v17584_v21 = vld [vmem:[#allocation12_spill] sm:$0xff] }
 0x6cf   : > { %8282 = vmax.xlane.f32.xlu0 %v8281_v8  ;;  %8291 = vmax.xlane.f32.xlu1 %v8290_v34  ;;  %v17583_v8 = vld [vmem:[#allocation25_spill] sm:$0xff]  ;;  %v4299_v34 = vcombine.low %v4255_v2, %v4287_v23  ;;  %v4294_v61 = vrot.slane %v4280_v9, %v12074_v19  ;;  %v4320_v26 = vcombine.high %v17582_v52, %v17581_v6 }
 0x6d0   : > { %v4303_v58 = vcombine.low %v13477_v48, %v17583_v8  ;;  %v4399_v40 = vcombine.low %v4343_v49, %v4359_v4  ;;  %v8305_v42 = vsel %vm8247_vm11, %v4298_v10, -inf  ;;  %v4352_v59 = vcombine.high %v13989_v32, %v3806_v46 }
 0x6d1   : > { %v8308_v3 = vsel %vm8247_vm11, %v4299_v34, -inf  ;;  %v4304_v0 = vcombine.high %v13477_v48, %v17583_v8  ;;  %v4336_v25 = vcombine.high %v13917_v7, %v14053_v38  ;;  %v4334_v57 = vrot.slane %v4320_v26, %v12050_v12 }
 0x6d2   : > { %v4311_v31 = vrot.slane %v4303_v58, %v12050_v12  ;;  %v4407_v47 = vrot.slane %v4399_v40, %v12074_v19  ;;  %v4366_v32 = vrot.slane %v4352_v59, %v12050_v12  ;;  %v4400_v6 = vcombine.high %v4343_v49, %v4359_v4  ;;  %v17585_v58 = vld [vmem:[#allocation26_spill] sm:$0xff] }
 0x6d3   : > { %8288 = vmax.xlane.f32.xlu0 %v8287_v41  ;;  %8297 = vmax.xlane.f32.xlu1 %v8296_v24  ;;  %v4262_v41 = vrot.slane %v4248_v5, %v12074_v19  ;;  %v4318_v48 = vrot.slane %v4304_v0, %v12050_v12  ;;  %v4487_v52 = vcombine.low %v13995_v27, %v3808_v18 }
 0x6d4   : > { %v4367_v24 = vcombine.low %v4311_v31, %v4327_v35  ;;  %v4368_v63 = vcombine.high %v4311_v31, %v4327_v35  ;;  %v4350_v38 = vrot.slane %v4336_v25, %v12050_v12  ;;  %v4455_v9 = vcombine.low %v17584_v21, %v13803_v43 }
 0x6d5   : > { %v4301_v11 = vcombine.low %v4262_v41, %v4294_v61  ;;  %v4302_v28 = vcombine.high %v4262_v41, %v4294_v61  ;;  %v4439_v5 = vcombine.low %v13484_v44, %v17585_v58  ;;  %v4495_v49 = vrot.slane %v4487_v52, %v12050_v12 }
 0x6d6   : > { %v4375_v14 = vrot.slane %v4367_v24, %v12074_v19  ;;  %v4382_v35 = vrot.slane %v4368_v63, %v12074_v19  ;;  %v4416_v34 = vcombine.high %v4350_v38, %v4366_v32  ;;  %v4414_v10 = vrot.slane %v4400_v6, %v12074_v19  ;;  %v14594_v24 = vpop.permute.xlu0 %3811 }
 0x6d7   : > { %8294 = vmax.xlane.f32.xlu0 %v8293_v1  ;;  %8303 = vmax.xlane.f32.xlu1 %v8302_v29  ;;  %v8314_v54 = vsel %vm8247_vm11, %v4301_v11, -inf  ;;  %v4300_v1 = vcombine.high %v4255_v2, %v4287_v23  ;;  %v4383_v29 = vcombine.low %v4318_v48, %v4334_v57  ;;  %v14581_v23 = vpop.permute.xlu1 %3809  ;;  %v4415_v2 = vcombine.low %v4350_v38, %v4366_v32 }
 0x6d8   : > { %v4431_v7 = vcombine.low %v4375_v14, %v4407_v47  ;;  %v8317_v4 = vsel %vm8247_vm11, %v4302_v28, -inf  ;;  %v4432_v61 = vcombine.high %v4375_v14, %v4407_v47  ;;  %v4384_v31 = vcombine.high %v4318_v48, %v4334_v57 }
 0x6d9   : > { %v8311_v46 = vsel %vm8247_vm11, %v4300_v1, -inf  ;;  %v4433_v40 = vcombine.low %v4382_v35, %v4414_v10  ;;  %v4488_v26 = vcombine.high %v13995_v27, %v3808_v18  ;;  %v4423_v59 = vrot.slane %v4415_v2, %v12074_v19 }
 0x6da   : > { %v8320_v8 = vsel %vm8247_vm11, %v4431_v7, -inf  ;;  %v8323_v11 = vsel %vm8247_vm11, %v4432_v61, -inf  ;;  %v4434_v0 = vcombine.high %v4382_v35, %v4414_v10  ;;  %v4430_v57 = vrot.slane %v4416_v34, %v12074_v19  ;;  %v17586_v10 = vld [vmem:[#allocation39_spill] sm:$0xff]  ;;  %v17587_v61 = vld [vmem:[#allocation13_spill] sm:$0xff] }
 0x6db   : > { %8300 = vmax.xlane.f32.xlu0 %v8299_v20  ;;  %8309 = vmax.xlane.f32.xlu1 %v8308_v3  ;;  %v4471_v20 = vcombine.low %v13927_v15, %v14059_v17  ;;  %v4463_v3 = vrot.slane %v4455_v9, %v12050_v12  ;;  %v14599_v1 = vpop.permute.xlu1 %3813  ;;  %v8326_v47 = vsel %vm8247_vm11, %v4433_v40, -inf  ;;  %v4456_v27 = vcombine.high %v17584_v21, %v13803_v43 }
 0x6dc   : > { %v4472_v63 = vcombine.high %v13927_v15, %v14059_v17  ;;  %v4398_v32 = vrot.slane %v4384_v31, %v12074_v19  ;;  %v4502_v48 = vrot.slane %v4488_v26, %v12050_v12  ;;  %v8329_v6 = vsel %vm8247_vm11, %v4434_v0, -inf  ;;  %v17590_v26 = vld [vmem:[#allocation27_spill] sm:$0xff] }
 0x6dd   : > { %v4479_v41 = vrot.slane %v4471_v20, %v12050_v12  ;;  %v4470_v17 = vrot.slane %v4456_v27, %v12050_v12  ;;  %v4591_v31 = vcombine.low %v17587_v61, %v17586_v10 }
 0x6de   : > { %v4437_v28 = vcombine.low %v4398_v32, %v4430_v57 }
 0x6df   : > { %8306 = vmax.xlane.f32.xlu0 %v8305_v42  ;;  %8315 = vmax.xlane.f32.xlu1 %v8314_v54  ;;  %v4391_v42 = vrot.slane %v4383_v29, %v12074_v19  ;;  %v4447_v54 = vrot.slane %v4439_v5, %v12050_v12  ;;  %v4535_v25 = vcombine.low %v4479_v41, %v4495_v49  ;;  %v14614_v29 = vpop.permute.xlu0 %3815  ;;  %v14618_v21 = vpop.permute.xlu1 %3817 }
 0x6e0   : > { %v4536_v7 = vcombine.high %v4479_v41, %v4495_v49  ;;  %v4438_v5 = vcombine.high %v4398_v32, %v4430_v57  ;;  %v17589_v41 = vld [vmem:[#allocation65_spill] sm:$0xff]  ;;  %v4599_v32 = vrot.slane %v4591_v31, %v12050_v12 }
 0x6e1   : > { %v4435_v14 = vcombine.low %v4391_v42, %v4423_v59  ;;  %v4503_v18 = vcombine.low %v4447_v54, %v4463_v3  ;;  %v4436_v52 = vcombine.high %v4391_v42, %v4423_v59  ;;  %v4543_v43 = vrot.slane %v4535_v25, %v12074_v19 }
 0x6e2   : > { %v4504_v15 = vcombine.high %v4447_v54, %v4463_v3  ;;  %v4550_v34 = vrot.slane %v4536_v7, %v12074_v19  ;;  %v17588_v3 = vld [vmem:[#allocation86_spill] sm:$0xff]  ;;  %v8341_v54 = vsel %vm8247_vm11, %v4438_v5, -inf }
 0x6e3   : > { %8312 = vmax.xlane.f32.xlu0 %v8311_v46  ;;  %8321 = vmax.xlane.f32.xlu1 %v8320_v8  ;;  %v4440_v46 = vcombine.high %v13484_v44, %v17585_v58  ;;  %v8332_v38 = vsel %vm8247_vm11, %v4435_v14, -inf  ;;  %v4486_v44 = vrot.slane %v4472_v63, %v12050_v12  ;;  %v4511_v9 = vrot.slane %v4503_v18, %v12074_v19  ;;  %v14635_v0 = vpop.permute.xlu0 %3819  ;;  %v14638_v57 = vpop.permute.xlu1 %3821 }
 0x6e4   : > { %v4623_v8 = vcombine.low %v13997_v45, %v14581_v23  ;;  %v8335_v58 = vsel %vm8247_vm11, %v4436_v52, -inf  ;;  %v4607_v40 = vcombine.low %v17589_v41, %v17588_v3  ;;  %v4518_v42 = vrot.slane %v4504_v15, %v12074_v19 }
 0x6e5   : > { %v4454_v20 = vrot.slane %v4440_v46, %v12050_v12  ;;  %v4551_v2 = vcombine.low %v4486_v44, %v4502_v48  ;;  %v4567_v35 = vcombine.low %v4511_v9, %v4543_v43  ;;  %v4568_v25 = vcombine.high %v4511_v9, %v4543_v43 }
 0x6e6   : > { %v4631_v59 = vrot.slane %v4623_v8, %v12050_v12  ;;  %v4569_v27 = vcombine.low %v4518_v42, %v4550_v34  ;;  %v4615_v46 = vrot.slane %v4607_v40, %v12050_v12  ;;  %v4592_v9 = vcombine.high %v17587_v61, %v17586_v10  ;;  %v17591_v40 = vld [vmem:[#allocation76_spill] sm:$0xff] }
 0x6e7   : > { %8318 = vmax.xlane.f32.xlu0 %v8317_v4  ;;  %8327 = vmax.xlane.f32.xlu1 %v8326_v47  ;;  %v8338_v4 = vsel %vm8247_vm11, %v4437_v28, -inf  ;;  %v4519_v49 = vcombine.low %v4454_v20, %v4470_v17  ;;  %v4552_v47 = vcombine.high %v4486_v44, %v4502_v48  ;;  %v8344_v14 = vsel %vm8247_vm11, %v4567_v35, -inf  ;;  %v14651_v44 = vpop.permute.xlu0 %3823 }
 0x6e8   : > { %v4559_v18 = vrot.slane %v4551_v2, %v12074_v19  ;;  %v4520_v63 = vcombine.high %v4454_v20, %v4470_v17  ;;  %v4624_v48 = vcombine.high %v13997_v45, %v14581_v23  ;;  %v8347_v7 = vsel %vm8247_vm11, %v4568_v25, -inf  ;;  %v14657_v23 = vpop.permute.xlu1 %3825 }
 0x6e9   : > { %v4671_v28 = vcombine.low %v4615_v46, %v4631_v59  ;;  %v8350_v43 = vsel %vm8247_vm11, %v4569_v27, -inf  ;;  %v4566_v17 = vrot.slane %v4552_v47, %v12074_v19  ;;  %v4608_v45 = vcombine.high %v17589_v41, %v17588_v3 }
 0x6ea   : > { %v4534_v8 = vrot.slane %v4520_v63, %v12074_v19  ;;  %v4638_v5 = vrot.slane %v4624_v48, %v12050_v12  ;;  %v4672_v35 = vcombine.high %v4615_v46, %v4631_v59  ;;  %v4606_v61 = vrot.slane %v4592_v9, %v12050_v12  ;;  %v17592_v63 = vld [vmem:[#allocation40_spill] sm:$0xff] }
 0x6eb   : > { %8324 = vmax.xlane.f32.xlu0 %v8323_v11  ;;  %8333 = vmax.xlane.f32.xlu1 %v8332_v38  ;;  %v4575_v11 = vcombine.low %v13487_v55, %v17590_v26  ;;  %v4570_v38 = vcombine.high %v4518_v42, %v4550_v34  ;;  %v4679_v10 = vrot.slane %v4671_v28, %v12074_v19 }
 0x6ec   : > { %v4622_v3 = vrot.slane %v4608_v45, %v12050_v12  ;;  %v4759_v42 = vcombine.low %v17591_v40, %v14594_v24  ;;  %v4574_v59 = vcombine.high %v4534_v8, %v4566_v17  ;;  %v14675_v25 = vpop.permute.xlu1 %3829  ;;  %v4686_v27 = vrot.slane %v4672_v35, %v12074_v19 }
 0x6ed   : > { %v4583_v52 = vrot.slane %v4575_v11, %v12050_v12  ;;  %v8353_v2 = vsel %vm8247_vm11, %v4570_v38, -inf  ;;  %v17596_v38 = vld [vmem:[#allocation28_spill] sm:$0xff] }
 0x6ee   : > { %v4711_v28 = vcombine.low %v13494_v16, %v17596_v38  ;;  %v4767_v9 = vrot.slane %v4759_v42, %v12050_v12 }
 0x6ef   : > { %8330 = vmax.xlane.f32.xlu0 %v8329_v6  ;;  %8339 = vmax.xlane.f32.xlu1 %v8338_v4  ;;  %v4527_v6 = vrot.slane %v4519_v49, %v12074_v19  ;;  %v4639_v20 = vcombine.low %v4583_v52, %v4599_v32  ;;  %v4573_v49 = vcombine.low %v4534_v8, %v4566_v17 }
 0x6f0   : > { %v4640_v31 = vcombine.high %v4583_v52, %v4599_v32  ;;  %v17593_v32 = vld [vmem:[#allocation14_spill] sm:$0xff] }
 0x6f1   : > { %v4571_v15 = vcombine.low %v4527_v6, %v4559_v18  ;;  %v4572_v4 = vcombine.high %v4527_v6, %v4559_v18  ;;  %v8362_v47 = vsel %vm8247_vm11, %v4573_v49, -inf  ;;  %v4727_v46 = vcombine.low %v17593_v32, %v17592_v63  ;;  %v17594_v6 = vld [vmem:[#allocation87_spill] sm:$0xff]  ;;  %v17595_v52 = vld [vmem:[#allocation66_spill] sm:$0xff] }
 0x6f2   : > { %v4743_v48 = vcombine.low %v17595_v52, %v17594_v6  ;;  %v4719_v49 = vrot.slane %v4711_v28, %v12050_v12 }
 0x6f3   : > { %8336 = vmax.xlane.f32.xlu0 %v8335_v58  ;;  %8345 = vmax.xlane.f32.xlu1 %v8344_v14  ;;  %v4576_v58 = vcombine.high %v13487_v55, %v17590_v26  ;;  %v8356_v34 = vsel %vm8247_vm11, %v4571_v15, -inf  ;;  %v4647_v55 = vrot.slane %v4639_v20, %v12074_v19  ;;  %v14672_v26 = vpop.permute.xlu0 %3827  ;;  %v8359_v11 = vsel %vm8247_vm11, %v4572_v4, -inf }
 0x6f4   : > { %v8365_v15 = vsel %vm8247_vm11, %v4574_v59, -inf  ;;  %v4735_v4 = vrot.slane %v4727_v46, %v12050_v12  ;;  %v4751_v35 = vrot.slane %v4743_v48, %v12050_v12 }
 0x6f5   : > { %v4590_v41 = vrot.slane %v4576_v58, %v12050_v12  ;;  %v4703_v14 = vcombine.low %v4647_v55, %v4679_v10  ;;  %v4704_v17 = vcombine.high %v4647_v55, %v4679_v10  ;;  %v4760_v10 = vcombine.high %v17591_v40, %v14594_v24 }
 0x6f6   : > { %v4807_v55 = vcombine.low %v4751_v35, %v4767_v9  ;;  %v4775_v59 = vcombine.low %v4719_v49, %v4735_v4  ;;  %v4712_v40 = vcombine.high %v13494_v16, %v17596_v38  ;;  %v4808_v46 = vcombine.high %v4751_v35, %v4767_v9 }
 0x6f7   : > { %8342 = vmax.xlane.f32.xlu0 %v8341_v54  ;;  %8351 = vmax.xlane.f32.xlu1 %v8350_v43  ;;  %v4687_v54 = vcombine.low %v4622_v3, %v4638_v5  ;;  %v4655_v18 = vcombine.low %v4590_v41, %v4606_v61  ;;  %v4688_v43 = vcombine.high %v4622_v3, %v4638_v5  ;;  %v8368_v20 = vsel %vm8247_vm11, %v4703_v14, -inf  ;;  %v14690_v58 = vpop.permute.xlu0 %3831  ;;  %v14694_v5 = vpop.permute.xlu1 %3833 }
 0x6f8   : > { %v4776_v16 = vcombine.high %v4719_v49, %v4735_v4  ;;  %v4783_v38 = vrot.slane %v4775_v59, %v12074_v19  ;;  %v4726_v28 = vrot.slane %v4712_v40, %v12050_v12  ;;  %v17599_v49 = vld [vmem:[#allocation15_spill] sm:$0xff] }
 0x6f9   : > { %v4695_v8 = vrot.slane %v4687_v54, %v12074_v19  ;;  %v4744_v54 = vcombine.high %v17595_v52, %v17594_v6  ;;  %v4815_v6 = vrot.slane %v4807_v55, %v12074_v19 }
 0x6fb   : > { %8348 = vmax.xlane.f32.xlu0 %v8347_v7  ;;  %8357 = vmax.xlane.f32.xlu1 %v8356_v34  ;;  %v4654_v7 = vrot.slane %v4640_v31, %v12074_v19  ;;  %v4663_v34 = vrot.slane %v4655_v18, %v12074_v19  ;;  %v8371_v31 = vsel %vm8247_vm11, %v4704_v17, -inf  ;;  %v14711_v14 = vpop.permute.xlu0 %3835  ;;  %v14714_v48 = vpop.permute.xlu1 %3837 }
 0x6fd   : > { %v4705_v45 = vcombine.low %v4654_v7, %v4686_v27  ;;  %v4706_v3 = vcombine.high %v4654_v7, %v4686_v27  ;;  %v4708_v18 = vcombine.high %v4663_v34, %v4695_v8  ;;  %v4758_v7 = vrot.slane %v4744_v54, %v12050_v12 }
 0x6ff   : > { %8354 = vmax.xlane.f32.xlu0 %v8353_v2  ;;  %8363 = vmax.xlane.f32.xlu1 %v8362_v47  ;;  %v4656_v2 = vcombine.high %v4590_v41, %v4606_v61  ;;  %v8374_v42 = vsel %vm8247_vm11, %v4705_v45, -inf  ;;  %v4707_v61 = vcombine.low %v4663_v34, %v4695_v8  ;;  %v4702_v41 = vrot.slane %v4688_v43, %v12074_v19  ;;  %v17597_v43 = vld [vmem:[#allocation77_spill] sm:$0xff]  ;;  %v14727_v4 = vpop.permute.xlu0 %3839  ;;  %v17598_v34 = vld [vmem:[#allocation42_spill] sm:$0xff] }
 0x700   : > { %v4774_v47 = vrot.slane %v4760_v10, %v12050_v12  ;;  %v8377_v27 = vsel %vm8247_vm11, %v4706_v3, -inf  ;;  %v8383_v17 = vsel %vm8247_vm11, %v4708_v18, -inf  ;;  %v4839_v8 = vcombine.low %v4783_v38, %v4815_v6  ;;  %v17601_v3 = vld [vmem:[#allocation67_spill] sm:$0xff] }
 0x701   : > { %v4670_v24 = vrot.slane %v4656_v2, %v12074_v19  ;;  %v4822_v2 = vrot.slane %v4808_v46, %v12074_v19  ;;  %v4863_v10 = vcombine.low %v17599_v49, %v17598_v34 }
 0x702   : > { %v4824_v59 = vcombine.high %v4758_v7, %v4774_v47 }
 0x703   : > { %8360 = vmax.xlane.f32.xlu0 %v8359_v11  ;;  %8369 = vmax.xlane.f32.xlu1 %v8368_v20  ;;  %v4728_v11 = vcombine.high %v17593_v32, %v17592_v63  ;;  %v8380_v63 = vsel %vm8247_vm11, %v4707_v61, -inf  ;;  %v4709_v32 = vcombine.low %v4670_v24, %v4702_v41  ;;  %v4710_v9 = vcombine.high %v4670_v24, %v4702_v41  ;;  %v17602_v41 = vld [vmem:[#allocation29_spill] sm:$0xff] }
 0x704   : > { %v4823_v20 = vcombine.low %v4758_v7, %v4774_v47  ;;  %v4790_v61 = vrot.slane %v4776_v16, %v12074_v19  ;;  %v4840_v24 = vcombine.high %v4783_v38, %v4815_v6  ;;  %v4896_v6 = vcombine.high %v17597_v43, %v14599_v1  ;;  %v14748_v7 = vpop.permute.xlu0 %3843 }
 0x705   : > { %v4742_v52 = vrot.slane %v4728_v11, %v12050_v12  ;;  %v8386_v45 = vsel %vm8247_vm11, %v4709_v32, -inf  ;;  %v4847_v11 = vcombine.low %v13497_v60, %v17602_v41  ;;  %v8389_v54 = vsel %vm8247_vm11, %v4710_v9, -inf }
 0x706   : > { %v4841_v18 = vcombine.low %v4790_v61, %v4822_v2  ;;  %v4831_v46 = vrot.slane %v4823_v20, %v12074_v19  ;;  %v4871_v32 = vrot.slane %v4863_v10, %v12050_v12  ;;  %v8395_v38 = vsel %vm8247_vm11, %v4840_v24, -inf }
 0x707   : > { %8366 = vmax.xlane.f32.xlu0 %v8365_v15  ;;  %8375 = vmax.xlane.f32.xlu1 %v8374_v42  ;;  %v4895_v15 = vcombine.low %v17597_v43, %v14599_v1  ;;  %v4791_v35 = vcombine.low %v4726_v28, %v4742_v52  ;;  %v14733_v42 = vpop.permute.xlu1 %3841  ;;  %v4855_v47 = vrot.slane %v4847_v11, %v12050_v12 }
 0x708   : > { %v4910_v10 = vrot.slane %v4896_v6, %v12050_v12  ;;  %v17603_v6 = vld [vmem:[#allocation129_spill] sm:$0xff] }
 0x709   : > { %v4903_v40 = vrot.slane %v4895_v15, %v12050_v12  ;;  %v4842_v15 = vcombine.high %v4790_v61, %v4822_v2  ;;  %v4848_v2 = vcombine.high %v13497_v60, %v17602_v41 }
 0x70b   : > { %8372 = vmax.xlane.f32.xlu0 %v8371_v31  ;;  %8381 = vmax.xlane.f32.xlu1 %v8380_v63  ;;  %v17600_v31 = vld [vmem:[#allocation88_spill] sm:$0xff]  ;;  %v4792_v63 = vcombine.high %v4726_v28, %v4742_v52  ;;  %v14751_v20 = vpop.permute.xlu1 %3845  ;;  %v8398_v52 = vsel %vm8247_vm11, %v4841_v18, -inf }
 0x70c   : > { %v4879_v55 = vcombine.low %v17601_v3, %v17600_v31  ;;  %v4880_v1 = vcombine.high %v17601_v3, %v17600_v31  ;;  %v4912_v3 = vcombine.high %v4855_v47, %v4871_v32 }
 0x70d   : > { %v4806_v43 = vrot.slane %v4792_v63, %v12074_v19 }
 0x70e   : > { %v4887_v16 = vrot.slane %v4879_v55, %v12050_v12  ;;  %v8401_v55 = vsel %vm8247_vm11, %v4842_v15, -inf  ;;  %v4894_v60 = vrot.slane %v4880_v1, %v12050_v12 }
 0x70f   : > { %8378 = vmax.xlane.f32.xlu0 %v8377_v27  ;;  %8387 = vmax.xlane.f32.xlu1 %v8386_v45  ;;  %v8392_v27 = vsel %vm8247_vm11, %v4839_v8, -inf  ;;  %v4838_v45 = vrot.slane %v4824_v59, %v12074_v19  ;;  %v4864_v8 = vcombine.high %v17599_v49, %v17598_v34  ;;  %v14766_v49 = vpop.permute.xlu0 %3847  ;;  %v14770_v41 = vpop.permute.xlu1 %3849 }
 0x710   : > { %v4943_v9 = vcombine.low %v4887_v16, %v4903_v40  ;;  %v4944_v11 = vcombine.high %v4887_v16, %v4903_v40  ;;  %v4862_v40 = vrot.slane %v4848_v2, %v12050_v12  ;;  %v4959_v63 = vcombine.low %v4894_v60, %v4910_v10 }
 0x711   : > { %v4878_v31 = vrot.slane %v4864_v8, %v12050_v12  ;;  %v4960_v8 = vcombine.high %v4894_v60, %v4910_v10 }
 0x712   : > { %v4951_v34 = vrot.slane %v4943_v9, %v12074_v19  ;;  %v5015_v9 = vcombine.low %v14299_v30, %v14407_v36 }
 0x713   : > { %8384 = vmax.xlane.f32.xlu0 %v8383_v17  ;;  %8393 = vmax.xlane.f32.xlu1 %v8392_v27  ;;  %v4799_v17 = vrot.slane %v4791_v35, %v12074_v19  ;;  %v4911_v35 = vcombine.low %v4855_v47, %v4871_v32  ;;  %v5031_v27 = vcombine.low %v14363_v22, %v14614_v29 }
 0x714   : > { %v4958_v32 = vrot.slane %v4944_v11, %v12074_v19  ;;  %v4927_v47 = vcombine.low %v4862_v40, %v4878_v31  ;;  %v5023_v10 = vrot.slane %v5015_v9, %v12050_v12 }
 0x715   : > { %v4843_v28 = vcombine.low %v4799_v17, %v4831_v46  ;;  %v4844_v61 = vcombine.high %v4799_v17, %v4831_v46  ;;  %v4919_v24 = vrot.slane %v4911_v35, %v12074_v19  ;;  %v4846_v46 = vcombine.high %v4806_v43, %v4838_v45  ;;  %v14786_v35 = vpop.permute.xlu0 %3851 }
 0x716   : > { %v5039_v2 = vrot.slane %v5031_v27, %v12050_v12  ;;  %v4935_v60 = vrot.slane %v4927_v47, %v12074_v19 }
 0x717   : > { %8390 = vmax.xlane.f32.xlu0 %v8389_v54  ;;  %8399 = vmax.xlane.f32.xlu1 %v8398_v52  ;;  %v8404_v59 = vsel %vm8247_vm11, %v4843_v28, -inf  ;;  %v4845_v54 = vcombine.low %v4806_v43, %v4838_v45  ;;  %v8407_v18 = vsel %vm8247_vm11, %v4844_v61, -inf  ;;  %v4975_v17 = vcombine.low %v4919_v24, %v4951_v34  ;;  %v17605_v28 = vld [vmem:[#allocation113_spill] sm:$0xff] }
 0x718   : > { %v4926_v52 = vrot.slane %v4912_v3, %v12074_v19  ;;  %v4983_v45 = vcombine.low %v13813_v33, %v17605_v28  ;;  %v8413_v1 = vsel %vm8247_vm11, %v4846_v46, -inf  ;;  %v4976_v43 = vcombine.high %v4919_v24, %v4951_v34 }
 0x719   : > { %v8410_v16 = vsel %vm8247_vm11, %v4845_v54, -inf  ;;  %v8416_v61 = vsel %vm8247_vm11, %v4975_v17, -inf  ;;  %v4928_v54 = vcombine.high %v4862_v40, %v4878_v31  ;;  %v5032_v24 = vcombine.high %v14363_v22, %v14614_v29  ;;  %v14803_v40 = vpop.permute.xlu0 %3855 }
 0x71a   : > { %v4977_v11 = vcombine.low %v4926_v52, %v4958_v32  ;;  %v4991_v34 = vrot.slane %v4983_v45, %v12050_v12  ;;  %v8419_v27 = vsel %vm8247_vm11, %v4976_v43, -inf  ;;  %v5079_v46 = vcombine.low %v5023_v10, %v5039_v2 }
 0x71b   : > { %8396 = vmax.xlane.f32.xlu0 %v8395_v38  ;;  %8405 = vmax.xlane.f32.xlu1 %v8404_v59  ;;  %v17604_v38 = vld [vmem:[#allocation97_spill] sm:$0xff]  ;;  %v4967_v59 = vrot.slane %v4959_v63, %v12074_v19  ;;  %v4974_v31 = vrot.slane %v4960_v8, %v12074_v19  ;;  %v5016_v22 = vcombine.high %v14299_v30, %v14407_v36 }
 0x71c   : > { %v4999_v15 = vcombine.low %v17604_v38, %v17603_v6  ;;  %v5000_v17 = vcombine.high %v17604_v38, %v17603_v6  ;;  %v5046_v9 = vrot.slane %v5032_v24, %v12050_v12  ;;  %v5080_v8 = vcombine.high %v5023_v10, %v5039_v2 }
 0x71d   : > { %v4979_v63 = vcombine.low %v4935_v60, %v4967_v59  ;;  %v4980_v45 = vcombine.high %v4935_v60, %v4967_v59  ;;  %v5087_v38 = vrot.slane %v5079_v46, %v12074_v19  ;;  %v5030_v43 = vrot.slane %v5016_v22, %v12050_v12  ;;  %v14824_v2 = vpop.permute.xlu0 %3859 }
 0x71e   : > { %v5007_v3 = vrot.slane %v4999_v15, %v12050_v12  ;;  %v4984_v15 = vcombine.high %v13813_v33, %v17605_v28  ;;  %v5014_v36 = vrot.slane %v5000_v17, %v12050_v12  ;;  %v17609_v17 = vld [vmem:[#allocation41_spill] sm:$0xff] }
 0x71f   : > { %8402 = vmax.xlane.f32.xlu0 %v8401_v55  ;;  %8411 = vmax.xlane.f32.xlu1 %v8410_v16  ;;  %v14790_v55 = vpop.permute.xlu1 %3853  ;;  %v8422_v16 = vsel %vm8247_vm11, %v4977_v11, -inf  ;;  %v8431_v11 = vsel %vm8247_vm11, %v4980_v45, -inf  ;;  %v5096_v45 = vcombine.high %v5030_v43, %v5046_v9 }
 0x720   : > { %v5047_v47 = vcombine.low %v4991_v34, %v5007_v3  ;;  %v5048_v30 = vcombine.high %v4991_v34, %v5007_v3  ;;  %v4998_v28 = vrot.slane %v4984_v15, %v12050_v12  ;;  %v5094_v34 = vrot.slane %v5080_v8, %v12074_v19 }
 0x722   : > { %v5055_v33 = vrot.slane %v5047_v47, %v12074_v19  ;;  %v5063_v24 = vcombine.low %v4998_v28, %v5014_v36 }
 0x723   : > { %8408 = vmax.xlane.f32.xlu0 %v8407_v18  ;;  %8417 = vmax.xlane.f32.xlu1 %v8416_v61  ;;  %v4978_v18 = vcombine.high %v4926_v52, %v4958_v32  ;;  %v14809_v29 = vpop.permute.xlu1 %3857  ;;  %v4942_v32 = vrot.slane %v4928_v54, %v12074_v19  ;;  %v5167_v61 = vcombine.low %v14365_v50, %v14618_v21 }
 0x724   : > { %v5095_v54 = vcombine.low %v5030_v43, %v5046_v9  ;;  %v5111_v3 = vcombine.low %v5055_v33, %v5087_v38  ;;  %v5112_v15 = vcombine.high %v5055_v33, %v5087_v38  ;;  %v5168_v9 = vcombine.high %v14365_v50, %v14618_v21 }
 0x725   : > { %v8425_v52 = vsel %vm8247_vm11, %v4978_v18, -inf  ;;  %v4981_v6 = vcombine.low %v4942_v32, %v4974_v31  ;;  %v4982_v59 = vcombine.high %v4942_v32, %v4974_v31  ;;  %v17607_v18 = vld [vmem:[#allocation98_spill] sm:$0xff]  ;;  %v5175_v22 = vrot.slane %v5167_v61, %v12050_v12 }
 0x726   : > { %v17608_v31 = vld [vmem:[#allocation114_spill] sm:$0xff]  ;;  %v8440_v8 = vsel %vm8247_vm11, %v5111_v3, -inf  ;;  %v8443_v43 = vsel %vm8247_vm11, %v5112_v15, -inf  ;;  %v5152_v50 = vcombine.high %v14301_v13, %v14409_v51 }
 0x727   : > { %8414 = vmax.xlane.f32.xlu0 %v8413_v1  ;;  %8423 = vmax.xlane.f32.xlu1 %v8422_v16  ;;  %v8428_v1 = vsel %vm8247_vm11, %v4979_v63, -inf  ;;  %v14827_v10 = vpop.permute.xlu1 %3861  ;;  %v8434_v60 = vsel %vm8247_vm11, %v4981_v6, -inf  ;;  %v5151_v16 = vcombine.low %v14301_v13, %v14409_v51  ;;  %v5062_v63 = vrot.slane %v5048_v30, %v12074_v19 }
 0x728   : > { %v5119_v47 = vcombine.low %v17609_v17, %v17608_v31  ;;  %v8437_v32 = vsel %vm8247_vm11, %v4982_v59, -inf  ;;  %v5103_v6 = vrot.slane %v5095_v54, %v12074_v19  ;;  %v5064_v30 = vcombine.high %v4998_v28, %v5014_v36 }
 0x729   : > { %v5159_v61 = vrot.slane %v5151_v16, %v12050_v12  ;;  %v5071_v59 = vrot.slane %v5063_v24, %v12074_v19  ;;  %v5114_v33 = vcombine.high %v5062_v63, %v5094_v34  ;;  %v5110_v28 = vrot.slane %v5096_v45, %v12074_v19 }
 0x72a   : > { %v5127_v38 = vrot.slane %v5119_v47, %v12050_v12  ;;  %v5078_v21 = vrot.slane %v5064_v30, %v12074_v19  ;;  %v5120_v16 = vcombine.high %v17609_v17, %v17608_v31  ;;  %v5166_v31 = vrot.slane %v5152_v50, %v12050_v12  ;;  %v17615_v50 = vld [vmem:[#allocation115_spill] sm:$0xff] }
 0x72b   : > { %8420 = vmax.xlane.f32.xlu0 %v8419_v27  ;;  %8429 = vmax.xlane.f32.xlu1 %v8428_v1  ;;  %v17606_v27 = vld [vmem:[#allocation130_spill] sm:$0xff]  ;;  %v5113_v1 = vcombine.low %v5062_v63, %v5094_v34  ;;  %v5215_v54 = vcombine.low %v5159_v61, %v5175_v22  ;;  %v5115_v36 = vcombine.low %v5071_v59, %v5103_v6  ;;  %v8449_v47 = vsel %vm8247_vm11, %v5114_v33, -inf }
 0x72c   : > { %v5135_v46 = vcombine.low %v17607_v18, %v17606_v27  ;;  %v5136_v24 = vcombine.high %v17607_v18, %v17606_v27  ;;  %v5182_v63 = vrot.slane %v5168_v9, %v12050_v12  ;;  %v5116_v15 = vcombine.high %v5071_v59, %v5103_v6 }
 0x72d   : > { %v5216_v45 = vcombine.high %v5159_v61, %v5175_v22  ;;  %v5117_v27 = vcombine.low %v5078_v21, %v5110_v28  ;;  %v5223_v18 = vrot.slane %v5215_v54, %v12074_v19  ;;  %v5134_v30 = vrot.slane %v5120_v16, %v12050_v12  ;;  %v17612_v54 = vld [vmem:[#allocation131_spill] sm:$0xff] }
 0x72e   : > { %v5150_v13 = vrot.slane %v5136_v24, %v12050_v12  ;;  %v5303_v22 = vcombine.low %v14371_v62, %v14635_v0  ;;  %v8455_v6 = vsel %vm8247_vm11, %v5116_v15, -inf  ;;  %v5118_v61 = vcombine.high %v5078_v21, %v5110_v28  ;;  %v17616_v21 = vld [vmem:[#allocation43_spill] sm:$0xff] }
 0x72f   : > { %8426 = vmax.xlane.f32.xlu0 %v8425_v52  ;;  %8435 = vmax.xlane.f32.xlu1 %v8434_v60  ;;  %v5143_v60 = vrot.slane %v5135_v46, %v12050_v12  ;;  %v5231_v59 = vcombine.low %v5166_v31, %v5182_v63  ;;  %v8458_v9 = vsel %vm8247_vm11, %v5117_v27, -inf  ;;  %v5230_v33 = vrot.slane %v5216_v45, %v12074_v19 }
 0x730   : > { %v5287_v24 = vcombine.low %v14307_v37, %v14411_v56  ;;  %v5255_v16 = vcombine.low %v17616_v21, %v17615_v50  ;;  %v8461_v15 = vsel %vm8247_vm11, %v5118_v61, -inf }
 0x731   : > { %v5183_v46 = vcombine.low %v5127_v38, %v5143_v60 }
 0x733   : > { %8432 = vmax.xlane.f32.xlu0 %v8431_v11  ;;  %8441 = vmax.xlane.f32.xlu1 %v8440_v8  ;;  %v8452_v8 = vsel %vm8247_vm11, %v5115_v36, -inf  ;;  %v5191_v17 = vrot.slane %v5183_v46, %v12074_v19 }
 0x735   : > { %v5248_v45 = vcombine.high %v5191_v17, %v5223_v18 }
 0x737   : > { %8438 = vmax.xlane.f32.xlu0 %v8437_v32  ;;  %v8446_v32 = vsel %vm8247_vm11, %v5113_v1, -inf  ;;  %v5184_v1 = vcombine.high %v5127_v38, %v5143_v60  ;;  %v5199_v38 = vcombine.low %v5134_v30, %v5150_v13 }
 0x738   : > { %8447 = vmax.xlane.f32.xlu1 %v8446_v32  ;;  %v17613_v32 = vld [vmem:[#allocation99_spill] sm:$0xff] }
 0x739   : > { %v5271_v36 = vcombine.low %v17613_v32, %v17612_v54  ;;  %v5198_v46 = vrot.slane %v5184_v1, %v12074_v19 }
 0x73b   : > { %8444 = vmax.xlane.f32.xlu0 %v8443_v43  ;;  %v5247_v43 = vcombine.low %v5191_v17, %v5223_v18  ;;  %v5279_v1 = vrot.slane %v5271_v36, %v12050_v12  ;;  %v5263_v18 = vrot.slane %v5255_v16, %v12050_v12  ;;  %v8467_v17 = vsel %vm8247_vm11, %v5248_v45, -inf }
 0x73c   : > { %8453 = vmax.xlane.f32.xlu1 %v8452_v8  ;;  %v5311_v8 = vrot.slane %v5303_v22, %v12050_v12  ;;  %v5250_v22 = vcombine.high %v5198_v46, %v5230_v33 }
 0x73d   : > { %v8464_v27 = vsel %vm8247_vm11, %v5247_v43, -inf  ;;  %v5319_v36 = vcombine.low %v5263_v18, %v5279_v1 }
 0x73f   : > { %8450 = vmax.xlane.f32.xlu0 %v8449_v47  ;;  %v5232_v47 = vcombine.high %v5166_v31, %v5182_v63  ;;  %v5304_v31 = vcombine.high %v14371_v62, %v14635_v0  ;;  %v5288_v62 = vcombine.high %v14307_v37, %v14411_v56  ;;  %v5320_v37 = vcombine.high %v5263_v18, %v5279_v1 }
 0x740   : > { %8459 = vmax.xlane.f32.xlu1 %v8458_v9  ;;  %v5239_v9 = vrot.slane %v5231_v59, %v12074_v19 }
 0x743   : > { %8456 = vmax.xlane.f32.xlu0 %v8455_v6  ;;  %v5249_v6 = vcombine.low %v5198_v46, %v5230_v33  ;;  %v5256_v33 = vcombine.high %v17616_v21, %v17615_v50  ;;  %v8473_v46 = vsel %vm8247_vm11, %v5250_v22, -inf  ;;  %v5327_v50 = vrot.slane %v5319_v36, %v12074_v19  ;;  %v17621_v22 = vld [vmem:[#allocation132_spill] sm:$0xff] }
 0x744   : > { %v14840_v52 = vpop.xlane.xlu0 %8249  ;;  %v14844_v11 = vpop.xlane.xlu1 %8252  ;;  %8465 = vmax.xlane.f32.xlu1 %v8464_v27  ;;  %v5334_v36 = vrot.slane %v5320_v37, %v12074_v19 }
 0x745   : > { %v8470_v59 = vsel %vm8247_vm11, %v5249_v6, -inf }
 0x747   : > { %8462 = vmax.xlane.f32.xlu0 %v8461_v15 }
 0x748   : > { %v14853_v3 = vpop.xlane.xlu0 %8255  ;;  %v14862_v34 = vpop.xlane.xlu1 %8261  ;;  %8471 = vmax.xlane.f32.xlu1 %v8470_v59 }
 0x749   : > { %17610 = vst [vmem:[#allocation24_spill] sm:$0xff] %v14862_v34  ;;  %v5207_v34 = vrot.slane %v5199_v38, %v12074_v19  ;;  %v5272_v38 = vcombine.high %v17613_v32, %v17612_v54 }
 0x74b   : > { %8468 = vmax.xlane.f32.xlu0 %v8467_v17  ;;  %v5252_v16 = vcombine.high %v5207_v34, %v5239_v9  ;;  %v5286_v56 = vrot.slane %v5272_v38, %v12050_v12 }
 0x74c   : > { %v14870_v51 = vpop.xlane.xlu0 %8258  ;;  %v14881_v60 = vpop.xlane.xlu1 %8267 }
 0x74d   : > { %17611 = vst [vmem:[#allocation38_spill] sm:$0xff] %v14881_v60  ;;  %v5200_v60 = vcombine.high %v5134_v30, %v5150_v13  ;;  %v5251_v13 = vcombine.low %v5207_v34, %v5239_v9  ;;  %v5246_v30 = vrot.slane %v5232_v47, %v12074_v19  ;;  %v5270_v34 = vrot.slane %v5256_v33, %v12050_v12 }
 0x74f   : > { %v5214_v0 = vrot.slane %v5200_v60, %v12074_v19  ;;  %v8476_v15 = vsel %vm8247_vm11, %v5251_v13, -inf  ;;  %8474 = vmax.xlane.f32.xlu0 %v8473_v46  ;;  %v5302_v60 = vrot.slane %v5288_v62, %v12050_v12  ;;  %v5335_v17 = vcombine.low %v5270_v34, %v5286_v56  ;;  %v17623_v13 = vld [vmem:[#allocation145_spill] sm:$0xff] }
 0x750   : > { %v14888_v28 = vpop.xlane.xlu0 %8264  ;;  %v14899_v63 = vpop.xlane.xlu1 %8273  ;;  %8477 = vmax.xlane.f32.xlu1 %v8476_v15  ;;  %v5423_v38 = vcombine.low %v17623_v13, %v14413_v39  ;;  %v17625_v62 = vld [vmem:[#allocation45_spill] sm:$0xff] }
 0x751   : > { %17614 = vst [vmem:[#allocation11_spill] sm:$0xff] %v14888_v28  ;;  %v5295_v28 = vrot.slane %v5287_v24, %v12050_v12  ;;  %17617 = vst [vmem:[#allocation25_spill] sm:$0xff] %v14899_v63  ;;  %v5318_v24 = vrot.slane %v5304_v31, %v12050_v12  ;;  %v5253_v45 = vcombine.low %v5214_v0, %v5246_v30 }
 0x752   : > { %v5254_v27 = vcombine.high %v5214_v0, %v5246_v30  ;;  %v17624_v30 = vld [vmem:[#allocation116_spill] sm:$0xff] }
 0x753   : > { %v5351_v61 = vcombine.low %v5295_v28, %v5311_v8  ;;  %v5352_v47 = vcombine.high %v5295_v28, %v5311_v8  ;;  %v5439_v28 = vcombine.low %v14373_v53, %v14638_v57  ;;  %v8479_v8 = vsel %vm8247_vm11, %v5252_v16, -inf }
 0x754   : > { %v14907_v43 = vpop.xlane.xlu0 %8270  ;;  %v14920_v32 = vpop.xlane.xlu1 %8279  ;;  %v5367_v6 = vcombine.low %v5302_v60, %v5318_v24  ;;  %v8482_v9 = vsel %vm8247_vm11, %v5253_v45, -inf  ;;  %8480 = vmax.xlane.f32.xlu0 %v8479_v8  ;;  %v5391_v0 = vcombine.low %v17625_v62, %v17624_v30  ;;  %v5368_v33 = vcombine.high %v5302_v60, %v5318_v24 }
 0x755   : > { %v5359_v54 = vrot.slane %v5351_v61, %v12074_v19  ;;  %17618 = vst [vmem:[#allocation12_spill] sm:$0xff] %v14920_v32  ;;  %v5366_v1 = vrot.slane %v5352_v47, %v12074_v19  ;;  %8483 = vmax.xlane.f32.xlu1 %v8482_v9  ;;  %v17622_v61 = vld [vmem:[#allocation100_spill] sm:$0xff]  ;;  %v8485_v46 = vsel %vm8247_vm11, %v5254_v27, -inf  ;;  %v5447_v47 = vrot.slane %v5439_v28, %v12050_v12 }
 0x756   : > { %v5407_v59 = vcombine.low %v17622_v61, %v17621_v22  ;;  %v5375_v8 = vrot.slane %v5367_v6, %v12074_v19  ;;  %v5431_v32 = vrot.slane %v5423_v38, %v12050_v12  ;;  %v5343_v24 = vrot.slane %v5335_v17, %v12074_v19 }
 0x757   : > { %v5383_v31 = vcombine.low %v5327_v50, %v5359_v54  ;;  %v5384_v16 = vcombine.high %v5327_v50, %v5359_v54  ;;  %v5385_v45 = vcombine.low %v5334_v36, %v5366_v1  ;;  %v5399_v54 = vrot.slane %v5391_v0, %v12050_v12 }
 0x758   : > { %v14925_v21 = vpop.xlane.xlu0 %8276  ;;  %v14933_v18 = vpop.xlane.xlu1 %8285  ;;  %8486 = vmax.xlane.f32.xlu0 %v8485_v46  ;;  %v5415_v37 = vrot.slane %v5407_v59, %v12050_v12  ;;  %v5440_v50 = vcombine.high %v14373_v53, %v14638_v57  ;;  %v5386_v27 = vcombine.high %v5334_v36, %v5366_v1  ;;  %v5487_v6 = vcombine.low %v5431_v32, %v5447_v47 }
 0x759   : > { %17619 = vst [vmem:[#allocation26_spill] sm:$0xff] %v14925_v21  ;;  %17620 = vst [vmem:[#allocation39_spill] sm:$0xff] %v14933_v18  ;;  %v8488_v15 = vsel %vm8247_vm11, %v5383_v31, -inf  ;;  %v5336_v18 = vcombine.high %v5270_v34, %v5286_v56  ;;  %v8491_v28 = vsel %vm8247_vm11, %v5384_v16, -inf  ;;  %v8494_v31 = vsel %vm8247_vm11, %v5385_v45, -inf }
 0x75a   : > { %8489 = vmax.xlane.f32.xlu1 %v8488_v15  ;;  %v5387_v56 = vcombine.low %v5343_v24, %v5375_v8  ;;  %v5382_v34 = vrot.slane %v5368_v33, %v12074_v19  ;;  %v5408_v17 = vcombine.high %v17622_v61, %v17621_v22  ;;  %v5455_v38 = vcombine.low %v5399_v54, %v5415_v37 }
 0x75b   : > { %v5424_v53 = vcombine.high %v17623_v13, %v14413_v39  ;;  %v5350_v57 = vrot.slane %v5336_v18, %v12074_v19  ;;  %v5392_v36 = vcombine.high %v17625_v62, %v17624_v30  ;;  %v5454_v0 = vrot.slane %v5440_v50, %v12050_v12 }
 0x75c   : > { %v14946_v9 = vpop.xlane.xlu0 %8282  ;;  %v14951_v60 = vpop.xlane.xlu1 %8291  ;;  %8492 = vmax.xlane.f32.xlu0 %v8491_v28  ;;  %v8497_v33 = vsel %vm8247_vm11, %v5386_v27, -inf  ;;  %v5388_v46 = vcombine.high %v5343_v24, %v5375_v8  ;;  %v5488_v16 = vcombine.high %v5431_v32, %v5447_v47  ;;  %v8500_v15 = vsel %vm8247_vm11, %v5387_v56, -inf  ;;  %v17630_v32 = vld [vmem:[#allocation158_spill] sm:$0xff]  ;;  %v17631_v56 = vld [vmem:[#allocation133_spill] sm:$0xff] }
 0x75d   : > { %17626 = vst [vmem:[#allocation13_spill] sm:$0xff] %v14946_v9  ;;  %17627 = vst [vmem:[#allocation86_spill] sm:$0xff] %v14951_v60  ;;  %v5389_v22 = vcombine.low %v5350_v57, %v5382_v34  ;;  %v5495_v61 = vrot.slane %v5487_v6, %v12074_v19  ;;  %v5422_v18 = vrot.slane %v5408_v17, %v12050_v12  ;;  %v17632_v17 = vld [vmem:[#allocation101_spill] sm:$0xff] }
 0x75e   : > { %8495 = vmax.xlane.f32.xlu1 %v8494_v31  ;;  %v5456_v13 = vcombine.high %v5399_v54, %v5415_v37  ;;  %v5438_v30 = vrot.slane %v5424_v53, %v12050_v12  ;;  %v5463_v62 = vrot.slane %v5455_v38, %v12074_v19  ;;  %v5406_v45 = vrot.slane %v5392_v36, %v12050_v12  ;;  %v17633_v53 = vld [vmem:[#allocation170_spill] sm:$0xff] }
 0x75f   : > { %v5575_v47 = vcombine.low %v17630_v32, %v14651_v44  ;;  %v8503_v8 = vsel %vm8247_vm11, %v5388_v46, -inf  ;;  %v5390_v24 = vcombine.high %v5350_v57, %v5382_v34  ;;  %v8506_v28 = vsel %vm8247_vm11, %v5389_v22, -inf  ;;  %v17634_v36 = vld [vmem:[#allocation146_spill] sm:$0xff]  ;;  %v17635_v57 = vld [vmem:[#allocation117_spill] sm:$0xff]  ;;  %v17636_v46 = vld [vmem:[#allocation47_spill] sm:$0xff] }
 0x760   : > { %v14959_v59 = vpop.xlane.xlu0 %8288  ;;  %v14966_v1 = vpop.xlane.xlu1 %8297  ;;  %8498 = vmax.xlane.f32.xlu0 %v8497_v33  ;;  %v5503_v50 = vcombine.low %v5438_v30, %v5454_v0  ;;  %v5519_v27 = vcombine.low %v5463_v62, %v5495_v61  ;;  %v5502_v37 = vrot.slane %v5488_v16, %v12074_v19  ;;  %v5471_v31 = vcombine.low %v5406_v45, %v5422_v18 }
 0x761   : > { %17628 = vst [vmem:[#allocation65_spill] sm:$0xff] %v14959_v59  ;;  %v5543_v38 = vcombine.low %v17632_v17, %v17631_v56  ;;  %v5559_v33 = vcombine.low %v17634_v36, %v17633_v53  ;;  %v5470_v34 = vrot.slane %v5456_v13, %v12074_v19  ;;  %v5583_v22 = vrot.slane %v5575_v47, %v12050_v12 }
 0x762   : > { %8501 = vmax.xlane.f32.xlu1 %v8500_v15  ;;  %v5527_v15 = vcombine.low %v17636_v46, %v17635_v57  ;;  %v5520_v16 = vcombine.high %v5463_v62, %v5495_v61  ;;  %v5511_v59 = vrot.slane %v5503_v50, %v12074_v19  ;;  %v5472_v9 = vcombine.high %v5406_v45, %v5422_v18 }
 0x763   : > { %v5521_v60 = vcombine.low %v5470_v34, %v5502_v37  ;;  %v5551_v21 = vrot.slane %v5543_v38, %v12050_v12  ;;  %v5567_v13 = vrot.slane %v5559_v33, %v12050_v12  ;;  %v5479_v47 = vrot.slane %v5471_v31, %v12074_v19 }
 0x764   : > { %v14974_v39 = vpop.xlane.xlu0 %8294  ;;  %8504 = vmax.xlane.f32.xlu0 %v8503_v8  ;;  %v14984_v6 = vpop.xlane.xlu1 %8303  ;;  %v8509_v8 = vsel %vm8247_vm11, %v5390_v24, -inf  ;;  %v5535_v24 = vrot.slane %v5527_v15, %v12050_v12  ;;  %v8515_v61 = vsel %vm8247_vm11, %v5520_v16, -inf  ;;  %v5522_v62 = vcombine.high %v5470_v34, %v5502_v37 }
 0x765   : > { %17629 = vst [vmem:[#allocation27_spill] sm:$0xff] %v14974_v39  ;;  %v8512_v39 = vsel %vm8247_vm11, %v5519_v27, -inf  ;;  %v8518_v18 = vsel %vm8247_vm11, %v5521_v60, -inf  ;;  %v5523_v45 = vcombine.low %v5479_v47, %v5511_v59  ;;  %v5544_v27 = vcombine.high %v17632_v17, %v17631_v56 }
 0x766   : > { %8507 = vmax.xlane.f32.xlu1 %v8506_v28  ;;  %v5504_v28 = vcombine.high %v5438_v30, %v5454_v0  ;;  %v5576_v0 = vcombine.high %v17630_v32, %v14651_v44  ;;  %v5591_v31 = vcombine.low %v5535_v24, %v5551_v21  ;;  %v5560_v44 = vcombine.high %v17634_v36, %v17633_v53 }
 0x767   : > { %v5486_v38 = vrot.slane %v5472_v9, %v12074_v19  ;;  %v5528_v37 = vcombine.high %v17636_v46, %v17635_v57  ;;  %v8521_v33 = vsel %vm8247_vm11, %v5522_v62, -inf  ;;  %v5524_v34 = vcombine.high %v5479_v47, %v5511_v59  ;;  %v17641_v59 = vld [vmem:[#allocation159_spill] sm:$0xff] }
 0x768   : > { %v14987_v54 = vpop.xlane.xlu0 %8300  ;;  %8510 = vmax.xlane.f32.xlu0 %v8509_v8  ;;  %v15002_v63 = vpop.xlane.xlu1 %8309  ;;  %v5518_v50 = vrot.slane %v5504_v28, %v12074_v19  ;;  %v5590_v60 = vrot.slane %v5576_v0, %v12050_v12  ;;  %v5624_v15 = vcombine.high %v5567_v13, %v5583_v22  ;;  %v8524_v8 = vsel %vm8247_vm11, %v5523_v45, -inf  ;;  %v17645_v45 = vld [vmem:[#allocation102_spill] sm:$0xff] }
 0x769   : > { %17637 = vst [vmem:[#allocation76_spill] sm:$0xff] %v15002_v63  ;;  %v5558_v9 = vrot.slane %v5544_v27, %v12050_v12  ;;  %v5592_v36 = vcombine.high %v5535_v24, %v5551_v21  ;;  %v5574_v57 = vrot.slane %v5560_v44, %v12050_v12  ;;  %v5599_v46 = vrot.slane %v5591_v31, %v12074_v19  ;;  %v17646_v31 = vld [vmem:[#allocation171_spill] sm:$0xff] }
 0x76a   : > { %8513 = vmax.xlane.f32.xlu1 %v8512_v39  ;;  %v5623_v39 = vcombine.low %v5567_v13, %v5583_v22  ;;  %v5525_v56 = vcombine.low %v5486_v38, %v5518_v50  ;;  %v5542_v16 = vrot.slane %v5528_v37, %v12050_v12  ;;  %v5711_v22 = vcombine.low %v17641_v59, %v14657_v23  ;;  %v17647_v44 = vld [vmem:[#allocation147_spill] sm:$0xff] }
 0x76b   : > { %v8527_v28 = vsel %vm8247_vm11, %v5524_v34, -inf  ;;  %v5526_v13 = vcombine.high %v5486_v38, %v5518_v50  ;;  %v5639_v47 = vcombine.low %v5574_v57, %v5590_v60  ;;  %v5638_v21 = vrot.slane %v5624_v15, %v12074_v19  ;;  %v17648_v38 = vld [vmem:[#allocation118_spill] sm:$0xff] }
 0x76c   : > { %v15009_v30 = vpop.xlane.xlu0 %8306  ;;  %8516 = vmax.xlane.f32.xlu0 %v8515_v61  ;;  %v15017_v32 = vpop.xlane.xlu1 %8315  ;;  %v5631_v17 = vrot.slane %v5623_v39, %v12074_v19  ;;  %v8530_v0 = vsel %vm8247_vm11, %v5525_v56, -inf  ;;  %v5607_v39 = vcombine.low %v5542_v16, %v5558_v9  ;;  %v5695_v37 = vcombine.low %v17647_v44, %v17646_v31 }
 0x76d   : > { %17638 = vst [vmem:[#allocation40_spill] sm:$0xff] %v15009_v30  ;;  %17639 = vst [vmem:[#allocation14_spill] sm:$0xff] %v15017_v32  ;;  %v5606_v50 = vrot.slane %v5592_v36, %v12074_v19  ;;  %v8533_v56 = vsel %vm8247_vm11, %v5526_v13, -inf }
 0x76e   : > { %8519 = vmax.xlane.f32.xlu1 %v8518_v18  ;;  %v5655_v62 = vcombine.low %v5599_v46, %v5631_v17  ;;  %v17644_v18 = vld [vmem:[#allocation134_spill] sm:$0xff]  ;;  %v5656_v15 = vcombine.high %v5599_v46, %v5631_v17  ;;  %v5703_v63 = vrot.slane %v5695_v37, %v12050_v12  ;;  %v5712_v17 = vcombine.high %v17641_v59, %v14657_v23 }
 0x76f   : > { %v5679_v27 = vcombine.low %v17645_v45, %v17644_v18  ;;  %v5658_v46 = vcombine.high %v5606_v50, %v5638_v21  ;;  %v5696_v23 = vcombine.high %v17647_v44, %v17646_v31 }
 0x770   : > { %8522 = vmax.xlane.f32.xlu0 %v8521_v33  ;;  %v15026_v53 = vpop.xlane.xlu0 %8312  ;;  %v15036_v61 = vpop.xlane.xlu1 %8321  ;;  %v17649_v33 = vld [vmem:[#allocation49_spill] sm:$0xff]  ;;  %v5726_v37 = vrot.slane %v5712_v17, %v12050_v12 }
 0x771   : > { %17640 = vst [vmem:[#allocation87_spill] sm:$0xff] %v15026_v53  ;;  %17642 = vst [vmem:[#allocation66_spill] sm:$0xff] %v15036_v61  ;;  %v5663_v34 = vcombine.low %v17649_v33, %v17648_v38  ;;  %v5657_v61 = vcombine.low %v5606_v50, %v5638_v21  ;;  %v5608_v53 = vcombine.high %v5542_v16, %v5558_v9  ;;  %v8545_v50 = vsel %vm8247_vm11, %v5658_v46, -inf }
 0x772   : > { %8525 = vmax.xlane.f32.xlu1 %v8524_v8  ;;  %v5719_v8 = vrot.slane %v5711_v22, %v12050_v12  ;;  %v5687_v36 = vrot.slane %v5679_v27, %v12050_v12  ;;  %v5615_v22 = vrot.slane %v5607_v39, %v12074_v19  ;;  %v5680_v39 = vcombine.high %v17645_v45, %v17644_v18 }
 0x773   : > { %v5622_v21 = vrot.slane %v5608_v53, %v12074_v19 }
 0x774   : > { %8528 = vmax.xlane.f32.xlu0 %v8527_v28  ;;  %v15039_v24 = vpop.xlane.xlu0 %8318  ;;  %v5640_v28 = vcombine.high %v5574_v57, %v5590_v60  ;;  %v15056_v30 = vpop.xlane.xlu1 %8327  ;;  %v5671_v60 = vrot.slane %v5663_v34, %v12050_v12  ;;  %v8539_v57 = vsel %vm8247_vm11, %v5656_v15, -inf  ;;  %v5759_v13 = vcombine.low %v5703_v63, %v5719_v8 }
 0x775   : > { %17643 = vst [vmem:[#allocation28_spill] sm:$0xff] %v15039_v24  ;;  %v5647_v24 = vrot.slane %v5639_v47, %v12074_v19  ;;  %17650 = vst [vmem:[#allocation77_spill] sm:$0xff] %v15056_v30  ;;  %v8542_v47 = vsel %vm8247_vm11, %v5657_v61, -inf  ;;  %v5664_v61 = vcombine.high %v17649_v33, %v17648_v38  ;;  %v5694_v53 = vrot.slane %v5680_v39, %v12050_v12 }
 0x776   : > { %8531 = vmax.xlane.f32.xlu1 %v8530_v0  ;;  %v8536_v0 = vsel %vm8247_vm11, %v5655_v62, -inf  ;;  %v5654_v16 = vrot.slane %v5640_v28, %v12074_v19  ;;  %v5727_v27 = vcombine.low %v5671_v60, %v5687_v36  ;;  %v5767_v45 = vrot.slane %v5759_v13, %v12074_v19 }
 0x777   : > { %v5659_v9 = vcombine.low %v5615_v22, %v5647_v24  ;;  %v5660_v34 = vcombine.high %v5615_v22, %v5647_v24  ;;  %v5728_v44 = vcombine.high %v5671_v60, %v5687_v36  ;;  %v5710_v38 = vrot.slane %v5696_v23, %v12050_v12  ;;  %v17655_v24 = vld [vmem:[#allocation160_spill] sm:$0xff] }
 0x778   : > { %8534 = vmax.xlane.f32.xlu0 %v8533_v56  ;;  %v15052_v32 = vpop.xlane.xlu0 %8324  ;;  %v15071_v59 = vpop.xlane.xlu1 %8333  ;;  %v5760_v56 = vcombine.high %v5703_v63, %v5719_v8  ;;  %v5661_v18 = vcombine.low %v5622_v21, %v5654_v16  ;;  %v5735_v28 = vrot.slane %v5727_v27, %v12074_v19  ;;  %v5678_v63 = vrot.slane %v5664_v61, %v12050_v12  ;;  %v17659_v27 = vld [vmem:[#allocation172_spill] sm:$0xff] }
 0x779   : > { %17652 = vst [vmem:[#allocation15_spill] sm:$0xff] %v15071_v59  ;;  %v8548_v15 = vsel %vm8247_vm11, %v5659_v9, -inf  ;;  %v5847_v8 = vcombine.low %v17655_v24, %v14672_v26  ;;  %v5662_v22 = vcombine.high %v5622_v21, %v5654_v16  ;;  %v5775_v17 = vcombine.low %v5710_v38, %v5726_v37  ;;  %v17658_v9 = vld [vmem:[#allocation103_spill] sm:$0xff]  ;;  %v17660_v23 = vld [vmem:[#allocation148_spill] sm:$0xff] }
 0x77a   : > { %8537 = vmax.xlane.f32.xlu1 %v8536_v0  ;;  %v8551_v0 = vsel %vm8247_vm11, %v5660_v34, -inf  ;;  %v5791_v46 = vcombine.low %v5735_v28, %v5767_v45  ;;  %v5774_v36 = vrot.slane %v5760_v56, %v12074_v19  ;;  %v5743_v13 = vcombine.low %v5678_v63, %v5694_v53  ;;  %v17662_v21 = vld [vmem:[#allocation119_spill] sm:$0xff] }
 0x77b   : > { %v5831_v61 = vcombine.low %v17660_v23, %v17659_v27  ;;  %v5742_v16 = vrot.slane %v5728_v44, %v12074_v19  ;;  %v17663_v34 = vld [vmem:[#allocation51_spill] sm:$0xff]  ;;  %v8557_v56 = vsel %vm8247_vm11, %v5662_v22, -inf }
 0x77c   : > { %8540 = vmax.xlane.f32.xlu0 %v8539_v57  ;;  %v15065_v62 = vpop.xlane.xlu0 %8330  ;;  %v15084_v33 = vpop.xlane.xlu1 %8339  ;;  %v8554_v57 = vsel %vm8247_vm11, %v5661_v18, -inf  ;;  %v5855_v18 = vrot.slane %v5847_v8, %v12050_v12  ;;  %v5751_v8 = vrot.slane %v5743_v13, %v12074_v19 }
 0x77d   : > { %17651 = vst [vmem:[#allocation42_spill] sm:$0xff] %v15065_v62  ;;  %17654 = vst [vmem:[#allocation67_spill] sm:$0xff] %v15084_v33  ;;  %v5793_v33 = vcombine.low %v5742_v16, %v5774_v36  ;;  %v5839_v62 = vrot.slane %v5831_v61, %v12050_v12 }
 0x77e   : > { %8543 = vmax.xlane.f32.xlu1 %v8542_v47  ;;  %v17657_v47 = vld [vmem:[#allocation135_spill] sm:$0xff] }
 0x77f   : > { %v5815_v39 = vcombine.low %v17658_v9, %v17657_v47  ;;  %v5895_v22 = vcombine.low %v5839_v62, %v5855_v18 }
 0x780   : > { %8546 = vmax.xlane.f32.xlu0 %v8545_v50  ;;  %v15080_v31 = vpop.xlane.xlu0 %8336  ;;  %v15099_v50 = vpop.xlane.xlu1 %8345 }
 0x781   : > { %17653 = vst [vmem:[#allocation88_spill] sm:$0xff] %v15080_v31  ;;  %17661 = vst [vmem:[#allocation129_spill] sm:$0xff] %v15099_v50  ;;  %v5783_v31 = vrot.slane %v5775_v17, %v12074_v19  ;;  %v5744_v50 = vcombine.high %v5678_v63, %v5694_v53  ;;  %v5823_v44 = vrot.slane %v5815_v39, %v12050_v12  ;;  %v8566_v17 = vsel %vm8247_vm11, %v5793_v33, -inf }
 0x782   : > { %8549 = vmax.xlane.f32.xlu1 %v8548_v15  ;;  %v5799_v15 = vcombine.low %v17663_v34, %v17662_v21  ;;  %v5800_v33 = vcombine.high %v17663_v34, %v17662_v21 }
 0x783   : > { %v5795_v53 = vcombine.low %v5751_v8, %v5783_v31 }
 0x784   : > { %8552 = vmax.xlane.f32.xlu0 %v8551_v0  ;;  %v15093_v60 = vpop.xlane.xlu0 %8342  ;;  %v5792_v0 = vcombine.high %v5735_v28, %v5767_v45  ;;  %v15112_v30 = vpop.xlane.xlu1 %8351  ;;  %v5848_v45 = vcombine.high %v17655_v24, %v14672_v26  ;;  %v5794_v28 = vcombine.high %v5742_v16, %v5774_v36  ;;  %v5832_v26 = vcombine.high %v17660_v23, %v17659_v27 }
 0x785   : > { %17656 = vst [vmem:[#allocation29_spill] sm:$0xff] %v15093_v60  ;;  %v8560_v60 = vsel %vm8247_vm11, %v5791_v46, -inf  ;;  %v5758_v36 = vrot.slane %v5744_v50, %v12074_v19  ;;  %v5796_v16 = vcombine.high %v5751_v8, %v5783_v31  ;;  %v17668_v31 = vld [vmem:[#allocation161_spill] sm:$0xff] }
 0x786   : > { %8555 = vmax.xlane.f32.xlu1 %v8554_v57  ;;  %v5776_v57 = vcombine.high %v5710_v38, %v5726_v37  ;;  %v5807_v37 = vrot.slane %v5799_v15, %v12050_v12  ;;  %v8563_v38 = vsel %vm8247_vm11, %v5792_v0, -inf  ;;  %v5862_v39 = vrot.slane %v5848_v45, %v12050_v12 }
 0x787   : > { %v8569_v61 = vsel %vm8247_vm11, %v5794_v28, -inf  ;;  %v5896_v15 = vcombine.high %v5839_v62, %v5855_v18  ;;  %v5846_v21 = vrot.slane %v5832_v26, %v12050_v12  ;;  %v5814_v62 = vrot.slane %v5800_v33, %v12050_v12  ;;  %v17673_v26 = vld [vmem:[#allocation149_spill] sm:$0xff] }
 0x788   : > { %8558 = vmax.xlane.f32.xlu0 %v8557_v56  ;;  %v15108_v59 = vpop.xlane.xlu0 %8348  ;;  %v5790_v63 = vrot.slane %v5776_v57, %v12074_v19  ;;  %v5863_v13 = vcombine.low %v5807_v37, %v5823_v44  ;;  %v15127_v24 = vpop.xlane.xlu1 %8357  ;;  %v8572_v56 = vsel %vm8247_vm11, %v5795_v53, -inf  ;;  %v5864_v50 = vcombine.high %v5807_v37, %v5823_v44  ;;  %v17671_v53 = vld [vmem:[#allocation104_spill] sm:$0xff] }
 0x789   : > { %17665 = vst [vmem:[#allocation113_spill] sm:$0xff] %v15127_v24  ;;  %v5983_v18 = vcombine.low %v17668_v31, %v14675_v25  ;;  %v8575_v57 = vsel %vm8247_vm11, %v5796_v16, -inf  ;;  %v5911_v45 = vcombine.low %v5846_v21, %v5862_v39  ;;  %v5910_v44 = vrot.slane %v5896_v15, %v12074_v19  ;;  %v17676_v16 = vld [vmem:[#allocation53_spill] sm:$0xff] }
 0x78a   : > { %8561 = vmax.xlane.f32.xlu1 %v8560_v60  ;;  %v5816_v60 = vcombine.high %v17658_v9, %v17657_v47  ;;  %v5797_v47 = vcombine.low %v5758_v36, %v5790_v63  ;;  %v5903_v9 = vrot.slane %v5895_v22, %v12074_v19  ;;  %v5871_v0 = vrot.slane %v5863_v13, %v12074_v19  ;;  %v17672_v13 = vld [vmem:[#allocation174_spill] sm:$0xff] }
 0x78b   : > { %v5798_v8 = vcombine.high %v5758_v36, %v5790_v63  ;;  %v5967_v33 = vcombine.low %v17673_v26, %v17672_v13  ;;  %v5878_v63 = vrot.slane %v5864_v50, %v12074_v19  ;;  %v17675_v36 = vld [vmem:[#allocation120_spill] sm:$0xff] }
 0x78c   : > { %8564 = vmax.xlane.f32.xlu0 %v8563_v38  ;;  %v15121_v46 = vpop.xlane.xlu0 %8354  ;;  %v5830_v23 = vrot.slane %v5816_v60, %v12050_v12  ;;  %v15140_v34 = vpop.xlane.xlu1 %8363  ;;  %v8578_v38 = vsel %vm8247_vm11, %v5797_v47, -inf  ;;  %v5927_v28 = vcombine.low %v5871_v0, %v5903_v9  ;;  %v5912_v47 = vcombine.high %v5846_v21, %v5862_v39 }
 0x78d   : > { %17664 = vst [vmem:[#allocation97_spill] sm:$0xff] %v15121_v46  ;;  %17667 = vst [vmem:[#allocation98_spill] sm:$0xff] %v15140_v34  ;;  %v8581_v15 = vsel %vm8247_vm11, %v5798_v8, -inf  ;;  %v5929_v34 = vcombine.low %v5878_v63, %v5910_v44  ;;  %v5975_v46 = vrot.slane %v5967_v33, %v12050_v12  ;;  %v5930_v8 = vcombine.high %v5878_v63, %v5910_v44 }
 0x78e   : > { %8567 = vmax.xlane.f32.xlu1 %v8566_v17  ;;  %v5879_v22 = vcombine.low %v5814_v62, %v5830_v23  ;;  %v17670_v17 = vld [vmem:[#allocation136_spill] sm:$0xff] }
 0x78f   : > { %v5951_v60 = vcombine.low %v17671_v53, %v17670_v17  ;;  %v8593_v63 = vsel %vm8247_vm11, %v5930_v8, -inf }
 0x790   : > { %8570 = vmax.xlane.f32.xlu0 %v8569_v61  ;;  %v15136_v27 = vpop.xlane.xlu0 %8360  ;;  %v15155_v61 = vpop.xlane.xlu1 %8369 }
 0x791   : > { %17666 = vst [vmem:[#allocation130_spill] sm:$0xff] %v15136_v27  ;;  %17674 = vst [vmem:[#allocation41_spill] sm:$0xff] %v15155_v61  ;;  %v5919_v27 = vrot.slane %v5911_v45, %v12074_v19  ;;  %v5880_v61 = vcombine.high %v5814_v62, %v5830_v23  ;;  %v5959_v50 = vrot.slane %v5951_v60, %v12050_v12 }
 0x792   : > { %8573 = vmax.xlane.f32.xlu1 %v8572_v56  ;;  %v5935_v56 = vcombine.low %v17676_v16, %v17675_v36  ;;  %v5926_v62 = vrot.slane %v5912_v47, %v12074_v19 }
 0x793   : > { %v5894_v44 = vrot.slane %v5880_v61, %v12074_v19 }
 0x794   : > { %8576 = vmax.xlane.f32.xlu0 %v8575_v57  ;;  %v15149_v37 = vpop.xlane.xlu0 %8366  ;;  %v5928_v57 = vcombine.high %v5871_v0, %v5903_v9  ;;  %v15168_v39 = vpop.xlane.xlu1 %8375  ;;  %v5887_v9 = vrot.slane %v5879_v22, %v12074_v19  ;;  %v5943_v21 = vrot.slane %v5935_v56, %v12050_v12  ;;  %v5984_v0 = vcombine.high %v17668_v31, %v14675_v25 }
 0x795   : > { %17669 = vst [vmem:[#allocation114_spill] sm:$0xff] %v15149_v37  ;;  %v8584_v37 = vsel %vm8247_vm11, %v5927_v28, -inf  ;;  %17678 = vst [vmem:[#allocation99_spill] sm:$0xff] %v15168_v39  ;;  %v8590_v28 = vsel %vm8247_vm11, %v5929_v34, -inf  ;;  %v5952_v22 = vcombine.high %v17671_v53, %v17670_v17  ;;  %v5968_v25 = vcombine.high %v17673_v26, %v17672_v13 }
 0x796   : > { %8579 = vmax.xlane.f32.xlu1 %v8578_v38  ;;  %v5991_v38 = vrot.slane %v5983_v18, %v12050_v12  ;;  %v8587_v18 = vsel %vm8247_vm11, %v5928_v57, -inf  ;;  %v5931_v23 = vcombine.low %v5887_v9, %v5919_v27  ;;  %v5999_v60 = vcombine.low %v5943_v21, %v5959_v50 }
 0x797   : > { %v5936_v34 = vcombine.high %v17676_v16, %v17675_v36  ;;  %v5998_v33 = vrot.slane %v5984_v0, %v12050_v12  ;;  %v5932_v56 = vcombine.high %v5887_v9, %v5919_v27  ;;  %v5933_v17 = vcombine.low %v5894_v44, %v5926_v62  ;;  %v17683_v27 = vld [vmem:[#allocation78_spill] sm:$0xff] }
 0x798   : > { %8582 = vmax.xlane.f32.xlu0 %v8581_v15  ;;  %v15164_v24 = vpop.xlane.xlu0 %8372  ;;  %v6031_v45 = vcombine.low %v5975_v46, %v5991_v38  ;;  %v15183_v31 = vpop.xlane.xlu1 %8381  ;;  %v6032_v47 = vcombine.high %v5975_v46, %v5991_v38  ;;  %v8596_v15 = vsel %vm8247_vm11, %v5931_v23, -inf  ;;  %v5966_v26 = vrot.slane %v5952_v22, %v12050_v12  ;;  %v17686_v23 = vld [vmem:[#allocation16_spill] sm:$0xff] }
 0x799   : > { %17677 = vst [vmem:[#allocation131_spill] sm:$0xff] %v15164_v24  ;;  %17680 = vst [vmem:[#allocation43_spill] sm:$0xff] %v15183_v31  ;;  %v6000_v61 = vcombine.high %v5943_v21, %v5959_v50  ;;  %v5982_v36 = vrot.slane %v5968_v25, %v12050_v12  ;;  %v6007_v57 = vrot.slane %v5999_v60, %v12074_v19  ;;  %v8599_v9 = vsel %vm8247_vm11, %v5932_v56, -inf  ;;  %v17687_v60 = vld [vmem:[#allocation89_spill] sm:$0xff]  ;;  %v17688_v25 = vld [vmem:[#allocation68_spill] sm:$0xff] }
 0x79a   : > { %8585 = vmax.xlane.f32.xlu1 %v8584_v37  ;;  %v6039_v53 = vrot.slane %v6031_v45, %v12074_v19  ;;  %v5950_v46 = vrot.slane %v5936_v34, %v12050_v12  ;;  %v6119_v38 = vcombine.low %v17683_v27, %v14690_v58  ;;  %v5934_v0 = vcombine.high %v5894_v44, %v5926_v62  ;;  %v17690_v44 = vld [vmem:[#allocation30_spill] sm:$0xff]  ;;  %v17691_v56 = vld [vmem:[#allocation3_spill] sm:$0xff] }
 0x79b   : > { %v8602_v8 = vsel %vm8247_vm11, %v5933_v17, -inf  ;;  %v6046_v50 = vrot.slane %v6032_v47, %v12074_v19  ;;  %v6103_v34 = vcombine.low %v17688_v25, %v17687_v60  ;;  %v6014_v62 = vrot.slane %v6000_v61, %v12074_v19 }
 0x79c   : > { %8588 = vmax.xlane.f32.xlu0 %v8587_v18  ;;  %v15177_v37 = vpop.xlane.xlu0 %8378  ;;  %v15196_v16 = vpop.xlane.xlu1 %8387  ;;  %v6047_v18 = vcombine.low %v5982_v36, %v5998_v33  ;;  %v6063_v45 = vcombine.low %v6007_v57, %v6039_v53  ;;  %v6071_v17 = vcombine.low %v17691_v56, %v17690_v44  ;;  %v8605_v47 = vsel %vm8247_vm11, %v5934_v0, -inf }
 0x79d   : > { %17679 = vst [vmem:[#allocation115_spill] sm:$0xff] %v15177_v37  ;;  %17682 = vst [vmem:[#allocation100_spill] sm:$0xff] %v15196_v16  ;;  %v6016_v39 = vcombine.high %v5950_v46, %v5966_v26 }
 0x79e   : > { %8591 = vmax.xlane.f32.xlu1 %v8590_v28  ;;  %v17685_v28 = vld [vmem:[#allocation44_spill] sm:$0xff]  ;;  %v8608_v16 = vsel %vm8247_vm11, %v6063_v45, -inf  ;;  %v6055_v31 = vrot.slane %v6047_v18, %v12074_v19 }
 0x79f   : > { %v6087_v22 = vcombine.low %v17686_v23, %v17685_v28 }
 0x7a0   : > { %8594 = vmax.xlane.f32.xlu0 %v8593_v63  ;;  %v15192_v13 = vpop.xlane.xlu0 %8384  ;;  %v6015_v63 = vcombine.low %v5950_v46, %v5966_v26  ;;  %v6088_v46 = vcombine.high %v17686_v23, %v17685_v28 }
 0x7a1   : > { %17681 = vst [vmem:[#allocation132_spill] sm:$0xff] %v15192_v13  ;;  %v6065_v13 = vcombine.low %v6014_v62, %v6046_v50  ;;  %v6095_v61 = vrot.slane %v6087_v22, %v12050_v12 }
 0x7a2   : > { %8597 = vmax.xlane.f32.xlu1 %v8596_v15  ;;  %v15211_v15 = vpop.xlane.xlu1 %8393 }
 0x7a3   : > { %17689 = vst [vmem:[#allocation116_spill] sm:$0xff] %v15211_v15  ;;  %v6111_v15 = vrot.slane %v6103_v34, %v12050_v12  ;;  %v8614_v0 = vsel %vm8247_vm11, %v6065_v13, -inf  ;;  %v6072_v13 = vcombine.high %v17691_v56, %v17690_v44 }
 0x7a4   : > { %8600 = vmax.xlane.f32.xlu0 %v8599_v9  ;;  %v15205_v21 = vpop.xlane.xlu0 %8390  ;;  %v6127_v9 = vrot.slane %v6119_v38, %v12050_v12  ;;  %v6023_v38 = vrot.slane %v6015_v63, %v12074_v19 }
 0x7a5   : > { %17684 = vst [vmem:[#allocation145_spill] sm:$0xff] %v15205_v21  ;;  %v6048_v21 = vcombine.high %v5982_v36, %v5998_v33  ;;  %v6079_v33 = vrot.slane %v6071_v17, %v12050_v12 }
 0x7a6   : > { %8603 = vmax.xlane.f32.xlu1 %v8602_v8  ;;  %v6064_v8 = vcombine.high %v6007_v57, %v6039_v53  ;;  %v15224_v24 = vpop.xlane.xlu1 %8399  ;;  %v6120_v53 = vcombine.high %v17683_v27, %v14690_v58  ;;  %v6066_v57 = vcombine.high %v6014_v62, %v6046_v50  ;;  %v6067_v18 = vcombine.low %v6023_v38, %v6055_v31 }
 0x7a7   : > { %17693 = vst [vmem:[#allocation158_spill] sm:$0xff] %v15224_v24  ;;  %v6062_v45 = vrot.slane %v6048_v21, %v12074_v19  ;;  %v6135_v22 = vcombine.low %v6079_v33, %v6095_v61  ;;  %v6104_v58 = vcombine.high %v17688_v25, %v17687_v60  ;;  %v6030_v50 = vrot.slane %v6016_v39, %v12074_v19 }
 0x7a8   : > { %8606 = vmax.xlane.f32.xlu0 %v8605_v47  ;;  %v15220_v37 = vpop.xlane.xlu0 %8396  ;;  %v8611_v36 = vsel %vm8247_vm11, %v6064_v8, -inf  ;;  %v6134_v34 = vrot.slane %v6120_v53, %v12050_v12  ;;  %v8617_v21 = vsel %vm8247_vm11, %v6066_v57, -inf  ;;  %v6068_v63 = vcombine.high %v6023_v38, %v6055_v31 }
 0x7a9   : > { %17692 = vst [vmem:[#allocation45_spill] sm:$0xff] %v15220_v37  ;;  %v6168_v62 = vcombine.high %v6111_v15, %v6127_v9  ;;  %v8620_v17 = vsel %vm8247_vm11, %v6067_v18, -inf  ;;  %v6069_v28 = vcombine.low %v6030_v50, %v6062_v45  ;;  %v6102_v39 = vrot.slane %v6088_v46, %v12050_v12  ;;  %v17701_v18 = vld [vmem:[#allocation17_spill] sm:$0xff] }
 0x7aa   : > { %8609 = vmax.xlane.f32.xlu1 %v8608_v16  ;;  %v6167_v16 = vcombine.low %v6111_v15, %v6127_v9  ;;  %v15239_v27 = vpop.xlane.xlu1 %8405  ;;  %v6136_v25 = vcombine.high %v6079_v33, %v6095_v61  ;;  %v6118_v44 = vrot.slane %v6104_v58, %v12050_v12  ;;  %v6143_v47 = vrot.slane %v6135_v22, %v12074_v19  ;;  %v17698_v15 = vld [vmem:[#allocation79_spill] sm:$0xff]  ;;  %v17702_v22 = vld [vmem:[#allocation90_spill] sm:$0xff]  ;;  %v17703_v58 = vld [vmem:[#allocation69_spill] sm:$0xff] }
 0x7ab   : > { %17695 = vst [vmem:[#allocation101_spill] sm:$0xff] %v15239_v27  ;;  %v6086_v31 = vrot.slane %v6072_v13, %v12050_v12  ;;  %v6255_v9 = vcombine.low %v17698_v15, %v14694_v5  ;;  %v8623_v8 = vsel %vm8247_vm11, %v6068_v63, -inf  ;;  %v6070_v38 = vcombine.high %v6030_v50, %v6062_v45  ;;  %v17705_v50 = vld [vmem:[#allocation31_spill] sm:$0xff]  ;;  %v17706_v63 = vld [vmem:[#allocation4_spill] sm:$0xff] }
 0x7ac   : > { %8612 = vmax.xlane.f32.xlu0 %v8611_v36  ;;  %v15233_v26 = vpop.xlane.xlu0 %8402  ;;  %v6175_v23 = vrot.slane %v6167_v16, %v12074_v19  ;;  %v6183_v53 = vcombine.low %v6118_v44, %v6134_v34  ;;  %v8626_v36 = vsel %vm8247_vm11, %v6069_v28, -inf  ;;  %v6182_v61 = vrot.slane %v6168_v62, %v12074_v19 }
 0x7ad   : > { %17694 = vst [vmem:[#allocation133_spill] sm:$0xff] %v15233_v26  ;;  %v6151_v16 = vcombine.low %v6086_v31, %v6102_v39  ;;  %v6239_v13 = vcombine.low %v17703_v58, %v17702_v22  ;;  %v6150_v45 = vrot.slane %v6136_v25, %v12074_v19  ;;  %v6263_v28 = vrot.slane %v6255_v9, %v12050_v12 }
 0x7ae   : > { %8615 = vmax.xlane.f32.xlu1 %v8614_v0  ;;  %v15252_v56 = vpop.xlane.xlu1 %8411  ;;  %v6199_v57 = vcombine.low %v6143_v47, %v6175_v23  ;;  %v17700_v0 = vld [vmem:[#allocation46_spill] sm:$0xff]  ;;  %v8629_v62 = vsel %vm8247_vm11, %v6070_v38, -inf }
 0x7af   : > { %17697 = vst [vmem:[#allocation146_spill] sm:$0xff] %v15252_v56  ;;  %v6223_v46 = vcombine.low %v17701_v18, %v17700_v0  ;;  %v6201_v56 = vcombine.low %v6150_v45, %v6182_v61  ;;  %v6247_v26 = vrot.slane %v6239_v13, %v12050_v12  ;;  %v6159_v9 = vrot.slane %v6151_v16, %v12074_v19 }
 0x7b0   : > { %8618 = vmax.xlane.f32.xlu0 %v8617_v21  ;;  %v15248_v60 = vpop.xlane.xlu0 %8408 }
 0x7b1   : > { %17696 = vst [vmem:[#allocation170_spill] sm:$0xff] %v15248_v60  ;;  %v6191_v60 = vrot.slane %v6183_v53, %v12074_v19  ;;  %v6231_v25 = vrot.slane %v6223_v46, %v12050_v12  ;;  %v6303_v38 = vcombine.low %v6247_v26, %v6263_v28  ;;  %v8638_v53 = vsel %vm8247_vm11, %v6201_v56, -inf }
 0x7b2   : > { %8621 = vmax.xlane.f32.xlu1 %v8620_v17  ;;  %v15267_v21 = vpop.xlane.xlu1 %8417  ;;  %v6207_v17 = vcombine.low %v17706_v63, %v17705_v50  ;;  %v6208_v56 = vcombine.high %v17706_v63, %v17705_v50 }
 0x7b3   : > { %17704 = vst [vmem:[#allocation47_spill] sm:$0xff] %v15267_v21  ;;  %v6152_v21 = vcombine.high %v6086_v31, %v6102_v39  ;;  %v6203_v39 = vcombine.low %v6159_v9, %v6191_v60 }
 0x7b4   : > { %8624 = vmax.xlane.f32.xlu0 %v8623_v8  ;;  %v15261_v33 = vpop.xlane.xlu0 %8414  ;;  %v6200_v8 = vcombine.high %v6143_v47, %v6175_v23  ;;  %v6256_v23 = vcombine.high %v17698_v15, %v14694_v5  ;;  %v6202_v47 = vcombine.high %v6150_v45, %v6182_v61  ;;  %v6240_v5 = vcombine.high %v17703_v58, %v17702_v22 }
 0x7b5   : > { %17699 = vst [vmem:[#allocation117_spill] sm:$0xff] %v15261_v33  ;;  %v8632_v33 = vsel %vm8247_vm11, %v6199_v57, -inf  ;;  %v6166_v61 = vrot.slane %v6152_v21, %v12074_v19  ;;  %v6204_v45 = vcombine.high %v6159_v9, %v6191_v60  ;;  %v17713_v60 = vld [vmem:[#allocation80_spill] sm:$0xff] }
 0x7b6   : > { %8627 = vmax.xlane.f32.xlu1 %v8626_v36  ;;  %v6184_v36 = vcombine.high %v6118_v44, %v6134_v34  ;;  %v15280_v24 = vpop.xlane.xlu1 %8423  ;;  %v6215_v34 = vrot.slane %v6207_v17, %v12050_v12  ;;  %v8635_v44 = vsel %vm8247_vm11, %v6200_v8, -inf  ;;  %v6270_v46 = vrot.slane %v6256_v23, %v12050_v12 }
 0x7b7   : > { %17708 = vst [vmem:[#allocation134_spill] sm:$0xff] %v15280_v24  ;;  %v8641_v13 = vsel %vm8247_vm11, %v6202_v47, -inf  ;;  %v6304_v17 = vcombine.high %v6247_v26, %v6263_v28  ;;  %v6254_v50 = vrot.slane %v6240_v5, %v12050_v12  ;;  %v6222_v26 = vrot.slane %v6208_v56, %v12050_v12  ;;  %v17718_v5 = vld [vmem:[#allocation70_spill] sm:$0xff] }
 0x7b8   : > { %8630 = vmax.xlane.f32.xlu0 %v8629_v62  ;;  %v15276_v27 = vpop.xlane.xlu0 %8420  ;;  %v6198_v31 = vrot.slane %v6184_v36, %v12074_v19  ;;  %v6271_v16 = vcombine.low %v6215_v34, %v6231_v25  ;;  %v8644_v62 = vsel %vm8247_vm11, %v6203_v39, -inf  ;;  %v6272_v21 = vcombine.high %v6215_v34, %v6231_v25  ;;  %v17716_v39 = vld [vmem:[#allocation18_spill] sm:$0xff] }
 0x7b9   : > { %17707 = vst [vmem:[#allocation159_spill] sm:$0xff] %v15276_v27  ;;  %v6391_v28 = vcombine.low %v17713_v60, %v14711_v14  ;;  %v8647_v36 = vsel %vm8247_vm11, %v6204_v45, -inf  ;;  %v6319_v23 = vcombine.low %v6254_v50, %v6270_v46  ;;  %v6318_v25 = vrot.slane %v6304_v17, %v12074_v19  ;;  %v17721_v45 = vld [vmem:[#allocation5_spill] sm:$0xff] }
 0x7ba   : > { %8633 = vmax.xlane.f32.xlu1 %v8632_v33  ;;  %v6224_v33 = vcombine.high %v17701_v18, %v17700_v0  ;;  %v15295_v15 = vpop.xlane.xlu1 %8429  ;;  %v6205_v0 = vcombine.low %v6166_v61, %v6198_v31  ;;  %v6311_v18 = vrot.slane %v6303_v38, %v12074_v19  ;;  %v6279_v8 = vrot.slane %v6271_v16, %v12074_v19  ;;  %v17717_v16 = vld [vmem:[#allocation91_spill] sm:$0xff] }
 0x7bb   : > { %17710 = vst [vmem:[#allocation171_spill] sm:$0xff] %v15295_v15  ;;  %v6206_v9 = vcombine.high %v6166_v61, %v6198_v31  ;;  %v6375_v56 = vcombine.low %v17718_v5, %v17717_v16  ;;  %v6286_v31 = vrot.slane %v6272_v21, %v12074_v19  ;;  %v17720_v61 = vld [vmem:[#allocation32_spill] sm:$0xff] }
 0x7bc   : > { %8636 = vmax.xlane.f32.xlu0 %v8635_v44  ;;  %v15289_v57 = vpop.xlane.xlu0 %8426  ;;  %v6238_v58 = vrot.slane %v6224_v33, %v12050_v12  ;;  %v8650_v44 = vsel %vm8247_vm11, %v6205_v0, -inf  ;;  %v6335_v47 = vcombine.low %v6279_v8, %v6311_v18  ;;  %v6399_v0 = vrot.slane %v6391_v28, %v12050_v12 }
 0x7bd   : > { %17709 = vst [vmem:[#allocation102_spill] sm:$0xff] %v15289_v57  ;;  %v8653_v17 = vsel %vm8247_vm11, %v6206_v9, -inf  ;;  %v6383_v57 = vrot.slane %v6375_v56, %v12050_v12 }
 0x7be   : > { %8639 = vmax.xlane.f32.xlu1 %v8638_v53  ;;  %v15308_v63 = vpop.xlane.xlu1 %8435  ;;  %v6287_v38 = vcombine.low %v6222_v26, %v6238_v58  ;;  %v17715_v53 = vld [vmem:[#allocation48_spill] sm:$0xff] }
 0x7bf   : > { %17712 = vst [vmem:[#allocation118_spill] sm:$0xff] %v15308_v63  ;;  %v6359_v33 = vcombine.low %v17716_v39, %v17715_v53  ;;  %v6337_v63 = vcombine.low %v6286_v31, %v6318_v25  ;;  %v6439_v9 = vcombine.low %v6383_v57, %v6399_v0 }
 0x7c0   : > { %8642 = vmax.xlane.f32.xlu0 %v8641_v13  ;;  %v15304_v22 = vpop.xlane.xlu0 %8432  ;;  %v6295_v28 = vrot.slane %v6287_v38, %v12074_v19 }
 0x7c1   : > { %17711 = vst [vmem:[#allocation147_spill] sm:$0xff] %v15304_v22  ;;  %v6327_v22 = vrot.slane %v6319_v23, %v12074_v19  ;;  %v6367_v21 = vrot.slane %v6359_v33, %v12050_v12  ;;  %v8662_v23 = vsel %vm8247_vm11, %v6337_v63, -inf  ;;  %v6344_v63 = vcombine.high %v17721_v45, %v17720_v61 }
 0x7c2   : > { %8645 = vmax.xlane.f32.xlu1 %v8644_v62  ;;  %v15323_v13 = vpop.xlane.xlu1 %8441  ;;  %v6343_v62 = vcombine.low %v17721_v45, %v17720_v61 }
 0x7c3   : > { %17719 = vst [vmem:[#allocation160_spill] sm:$0xff] %v15323_v13  ;;  %v6288_v13 = vcombine.high %v6222_v26, %v6238_v58  ;;  %v6339_v58 = vcombine.low %v6295_v28, %v6327_v22 }
 0x7c4   : > { %8648 = vmax.xlane.f32.xlu0 %v8647_v36  ;;  %v15317_v34 = vpop.xlane.xlu0 %8438  ;;  %v6336_v36 = vcombine.high %v6279_v8, %v6311_v18  ;;  %v6392_v18 = vcombine.high %v17713_v60, %v14711_v14  ;;  %v6338_v8 = vcombine.high %v6286_v31, %v6318_v25  ;;  %v6376_v14 = vcombine.high %v17718_v5, %v17717_v16 }
 0x7c5   : > { %17714 = vst [vmem:[#allocation49_spill] sm:$0xff] %v15317_v34  ;;  %v8656_v34 = vsel %vm8247_vm11, %v6335_v47, -inf  ;;  %v6302_v25 = vrot.slane %v6288_v13, %v12074_v19  ;;  %v6340_v31 = vcombine.high %v6295_v28, %v6327_v22  ;;  %v17728_v22 = vld [vmem:[#allocation81_spill] sm:$0xff] }
 0x7c6   : > { %8651 = vmax.xlane.f32.xlu1 %v8650_v44  ;;  %v6320_v44 = vcombine.high %v6254_v50, %v6270_v46  ;;  %v15336_v24 = vpop.xlane.xlu1 %8447  ;;  %v6351_v46 = vrot.slane %v6343_v62, %v12050_v12  ;;  %v8659_v50 = vsel %vm8247_vm11, %v6336_v36, -inf  ;;  %v6406_v33 = vrot.slane %v6392_v18, %v12050_v12 }
 0x7c7   : > { %17723 = vst [vmem:[#allocation103_spill] sm:$0xff] %v15336_v24  ;;  %v8665_v56 = vsel %vm8247_vm11, %v6338_v8, -inf  ;;  %v6440_v62 = vcombine.high %v6383_v57, %v6399_v0  ;;  %v6390_v61 = vrot.slane %v6376_v14, %v12050_v12  ;;  %v6358_v57 = vrot.slane %v6344_v63, %v12050_v12  ;;  %v17733_v14 = vld [vmem:[#allocation71_spill] sm:$0xff] }
 0x7c8   : > { %8654 = vmax.xlane.f32.xlu0 %v8653_v17  ;;  %v15332_v15 = vpop.xlane.xlu0 %8444  ;;  %v6334_v26 = vrot.slane %v6320_v44, %v12074_v19  ;;  %v6407_v38 = vcombine.low %v6351_v46, %v6367_v21  ;;  %v8668_v17 = vsel %vm8247_vm11, %v6339_v58, -inf  ;;  %v6408_v13 = vcombine.high %v6351_v46, %v6367_v21  ;;  %v17731_v58 = vld [vmem:[#allocation19_spill] sm:$0xff] }
 0x7c9   : > { %17722 = vst [vmem:[#allocation135_spill] sm:$0xff] %v15332_v15  ;;  %v6527_v0 = vcombine.low %v17728_v22, %v14714_v48  ;;  %v8671_v44 = vsel %vm8247_vm11, %v6340_v31, -inf  ;;  %v6455_v18 = vcombine.low %v6390_v61, %v6406_v33  ;;  %v6454_v21 = vrot.slane %v6440_v62, %v12074_v19  ;;  %v17736_v31 = vld [vmem:[#allocation6_spill] sm:$0xff] }
 0x7ca   : > { %8657 = vmax.xlane.f32.xlu1 %v8656_v34  ;;  %v6360_v34 = vcombine.high %v17716_v39, %v17715_v53  ;;  %v15351_v60 = vpop.xlane.xlu1 %8453  ;;  %v6341_v53 = vcombine.low %v6302_v25, %v6334_v26  ;;  %v6447_v39 = vrot.slane %v6439_v9, %v12074_v19  ;;  %v6415_v36 = vrot.slane %v6407_v38, %v12074_v19  ;;  %v17732_v38 = vld [vmem:[#allocation92_spill] sm:$0xff] }
 0x7cb   : > { %17725 = vst [vmem:[#allocation148_spill] sm:$0xff] %v15351_v60  ;;  %v6342_v28 = vcombine.high %v6302_v25, %v6334_v26  ;;  %v6511_v63 = vcombine.low %v17733_v14, %v17732_v38  ;;  %v6422_v26 = vrot.slane %v6408_v13, %v12074_v19  ;;  %v17735_v25 = vld [vmem:[#allocation33_spill] sm:$0xff] }
 0x7cc   : > { %8660 = vmax.xlane.f32.xlu0 %v8659_v50  ;;  %v15345_v47 = vpop.xlane.xlu0 %8450  ;;  %v6374_v5 = vrot.slane %v6360_v34, %v12050_v12  ;;  %v8674_v50 = vsel %vm8247_vm11, %v6341_v53, -inf  ;;  %v6471_v8 = vcombine.low %v6415_v36, %v6447_v39  ;;  %v6456_v53 = vcombine.high %v6390_v61, %v6406_v33 }
 0x7cd   : > { %17724 = vst [vmem:[#allocation172_spill] sm:$0xff] %v15345_v47  ;;  %v8677_v62 = vsel %vm8247_vm11, %v6342_v28, -inf  ;;  %v6519_v47 = vrot.slane %v6511_v63, %v12050_v12  ;;  %v6474_v28 = vcombine.high %v6422_v26, %v6454_v21 }
 0x7ce   : > { %8663 = vmax.xlane.f32.xlu1 %v8662_v23  ;;  %v15364_v45 = vpop.xlane.xlu1 %8459  ;;  %v6423_v9 = vcombine.low %v6358_v57, %v6374_v5  ;;  %v17730_v23 = vld [vmem:[#allocation50_spill] sm:$0xff] }
 0x7cf   : > { %17727 = vst [vmem:[#allocation51_spill] sm:$0xff] %v15364_v45  ;;  %v6495_v34 = vcombine.low %v17731_v58, %v17730_v23  ;;  %v6473_v45 = vcombine.low %v6422_v26, %v6454_v21  ;;  %v8689_v26 = vsel %vm8247_vm11, %v6474_v28, -inf }
 0x7d0   : > { %8666 = vmax.xlane.f32.xlu0 %v8665_v56  ;;  %v15360_v16 = vpop.xlane.xlu0 %8456 }
 0x7d1   : > { %17726 = vst [vmem:[#allocation119_spill] sm:$0xff] %v15360_v16  ;;  %v6463_v16 = vrot.slane %v6455_v18, %v12074_v19  ;;  %v6503_v13 = vrot.slane %v6495_v34, %v12050_v12 }
 0x7d2   : > { %8669 = vmax.xlane.f32.xlu1 %v8668_v17  ;;  %v15379_v56 = vpop.xlane.xlu1 %8465  ;;  %v6479_v17 = vcombine.low %v17736_v31, %v17735_v25 }
 0x7d3   : > { %17734 = vst [vmem:[#allocation136_spill] sm:$0xff] %v15379_v56  ;;  %v6424_v56 = vcombine.high %v6358_v57, %v6374_v5  ;;  %v6470_v57 = vrot.slane %v6456_v53, %v12074_v19 }
 0x7d4   : > { %8672 = vmax.xlane.f32.xlu0 %v8671_v44  ;;  %v15373_v46 = vpop.xlane.xlu0 %8462  ;;  %v6472_v44 = vcombine.high %v6415_v36, %v6447_v39  ;;  %v6431_v39 = vrot.slane %v6423_v9, %v12074_v19  ;;  %v6487_v61 = vrot.slane %v6479_v17, %v12050_v12  ;;  %v6528_v36 = vcombine.high %v17728_v22, %v14714_v48 }
 0x7d5   : > { %17729 = vst [vmem:[#allocation161_spill] sm:$0xff] %v15373_v46  ;;  %v8680_v46 = vsel %vm8247_vm11, %v6471_v8, -inf  ;;  %v8686_v8 = vsel %vm8247_vm11, %v6473_v45, -inf  ;;  %v6496_v9 = vcombine.high %v17731_v58, %v17730_v23  ;;  %v6512_v48 = vcombine.high %v17733_v14, %v17732_v38 }
 0x7d6   : > { %8675 = vmax.xlane.f32.xlu1 %v8674_v50  ;;  %v6535_v50 = vrot.slane %v6527_v0, %v12050_v12  ;;  %v15392_v33 = vpop.xlane.xlu1 %8471  ;;  %v8683_v0 = vsel %vm8247_vm11, %v6472_v44, -inf  ;;  %v6475_v5 = vcombine.low %v6431_v39, %v6463_v16  ;;  %v6543_v34 = vcombine.low %v6487_v61, %v6503_v13 }
 0x7d7   : > { %17738 = vst [vmem:[#allocation174_spill] sm:$0xff] %v15392_v33  ;;  %v6438_v21 = vrot.slane %v6424_v56, %v12074_v19  ;;  %v6480_v45 = vcombine.high %v17736_v31, %v17735_v25  ;;  %v6542_v63 = vrot.slane %v6528_v36, %v12050_v12  ;;  %v6476_v17 = vcombine.high %v6431_v39, %v6463_v16  ;;  %v17743_v16 = vld [vmem:[#allocation82_spill] sm:$0xff] }
 0x7d8   : > { %8678 = vmax.xlane.f32.xlu0 %v8677_v62  ;;  %v15388_v60 = vpop.xlane.xlu0 %8468  ;;  %v6575_v18 = vcombine.low %v6519_v47, %v6535_v50  ;;  %v6576_v53 = vcombine.high %v6519_v47, %v6535_v50  ;;  %v8692_v62 = vsel %vm8247_vm11, %v6475_v5, -inf  ;;  %v6510_v14 = vrot.slane %v6496_v9, %v12050_v12  ;;  %v17745_v5 = vld [vmem:[#allocation52_spill] sm:$0xff] }
 0x7d9   : > { %17737 = vst [vmem:[#allocation104_spill] sm:$0xff] %v15388_v60  ;;  %v6477_v23 = vcombine.low %v6438_v21, %v6470_v57  ;;  %v6544_v56 = vcombine.high %v6487_v61, %v6503_v13  ;;  %v6526_v25 = vrot.slane %v6512_v48, %v12050_v12  ;;  %v6551_v44 = vrot.slane %v6543_v34, %v12074_v19  ;;  %v17746_v9 = vld [vmem:[#allocation20_spill] sm:$0xff]  ;;  %v17747_v48 = vld [vmem:[#allocation93_spill] sm:$0xff] }
 0x7da   : > { %8681 = vmax.xlane.f32.xlu1 %v8680_v46  ;;  %v6583_v58 = vrot.slane %v6575_v18, %v12074_v19  ;;  %v6494_v47 = vrot.slane %v6480_v45, %v12050_v12  ;;  %v6663_v50 = vcombine.low %v17743_v16, %v14727_v4  ;;  %v8695_v39 = vsel %vm8247_vm11, %v6476_v17, -inf  ;;  %v17748_v45 = vld [vmem:[#allocation72_spill] sm:$0xff]  ;;  %v17750_v17 = vld [vmem:[#allocation9_spill] sm:$0xff] }
 0x7db   : > { %v6478_v36 = vcombine.high %v6438_v21, %v6470_v57  ;;  %v8698_v28 = vsel %vm8247_vm11, %v6477_v23, -inf  ;;  %v6590_v13 = vrot.slane %v6576_v53, %v12074_v19  ;;  %v6631_v34 = vcombine.low %v17746_v9, %v17745_v5  ;;  %v17749_v21 = vld [vmem:[#allocation34_spill] sm:$0xff] }
 0x7dc   : > { %8684 = vmax.xlane.f32.xlu0 %v8683_v0  ;;  %v15401_v46 = vpop.xlane.xlu0 %8474  ;;  %v6591_v0 = vcombine.low %v6526_v25, %v6542_v63  ;;  %v6607_v18 = vcombine.low %v6551_v44, %v6583_v58  ;;  %v6558_v57 = vrot.slane %v6544_v56, %v12074_v19  ;;  %v6615_v23 = vcombine.low %v17750_v17, %v17749_v21 }
 0x7dd   : > { %17739 = vst [vmem:[#allocation149_spill] sm:$0xff] %v15401_v46  ;;  %v15407_v22 = vpop.xlane.xlu1 %8477  ;;  %v8701_v53 = vsel %vm8247_vm11, %v6478_v36, -inf  ;;  %v6560_v33 = vcombine.high %v6494_v47, %v6510_v14  ;;  %v6639_v56 = vrot.slane %v6631_v34, %v12050_v12 }
 0x7de   : > { %8687 = vmax.xlane.f32.xlu1 %v8686_v8  ;;  %17740 = vst [vmem:[#allocation120_spill] sm:$0xff] %v15407_v22  ;;  %v6559_v8 = vcombine.low %v6494_v47, %v6510_v14  ;;  %v6599_v22 = vrot.slane %v6591_v0, %v12074_v19  ;;  %v6610_v36 = vcombine.high %v6558_v57, %v6590_v13 }
 0x7e0   : > { %8690 = vmax.xlane.f32.xlu0 %v8689_v26  ;;  %v6647_v26 = vcombine.low %v17748_v45, %v17747_v48 }
 0x7e1   : > { %v15416_v38 = vpop.xlane.xlu0 %8480 }
 0x7e2   : > { %8693 = vmax.xlane.f32.xlu1 %v8692_v62  ;;  %17741 = vst [vmem:[#allocation53_spill] sm:$0xff] %v15416_v38  ;;  %v15420_v31 = vpop.xlane.xlu1 %8483  ;;  %v6609_v38 = vcombine.low %v6558_v57, %v6590_v13  ;;  %v6655_v60 = vrot.slane %v6647_v26, %v12050_v12  ;;  %v6574_v13 = vrot.slane %v6560_v33, %v12074_v19  ;;  %v8713_v57 = vsel %vm8247_vm11, %v6610_v36, -inf }
 0x7e3   : > { %17742 = vst [vmem:[#allocation78_spill] sm:$0xff] %v15420_v31  ;;  %v8704_v31 = vsel %vm8247_vm11, %v6607_v18, -inf }
 0x7e4   : > { %8696 = vmax.xlane.f32.xlu0 %v8695_v39  ;;  %v6592_v39 = vcombine.high %v6526_v25, %v6542_v63  ;;  %v6623_v25 = vrot.slane %v6615_v23, %v12050_v12  ;;  %v8710_v0 = vsel %vm8247_vm11, %v6609_v38, -inf  ;;  %v6616_v38 = vcombine.high %v17750_v17, %v17749_v21 }
 0x7e5   : > { %v15429_v61 = vpop.xlane.xlu0 %8486 }
 0x7e6   : > { %8699 = vmax.xlane.f32.xlu1 %v8698_v28  ;;  %17744 = vst [vmem:[#allocation44_spill] sm:$0xff] %v15429_v61  ;;  %v6608_v28 = vcombine.high %v6551_v44, %v6583_v58  ;;  %v6671_v61 = vrot.slane %v6663_v50, %v12050_v12  ;;  %v6567_v58 = vrot.slane %v6559_v8, %v12074_v19 }
 0x7e7   : > { %v15435_v62 = vpop.xlane.xlu1 %8489  ;;  %v6664_v44 = vcombine.high %v17743_v16, %v14727_v4  ;;  %v6606_v47 = vrot.slane %v6592_v39, %v12074_v19  ;;  %v6632_v8 = vcombine.high %v17746_v9, %v17745_v5  ;;  %v6679_v34 = vcombine.low %v6623_v25, %v6639_v56 }
 0x7e8   : > { %8702 = vmax.xlane.f32.xlu0 %v8701_v53  ;;  %v8707_v50 = vsel %vm8247_vm11, %v6608_v28, -inf  ;;  %v6611_v14 = vcombine.low %v6567_v58, %v6599_v22  ;;  %v6648_v4 = vcombine.high %v17748_v45, %v17747_v48  ;;  %v6612_v23 = vcombine.high %v6567_v58, %v6599_v22  ;;  %v17752_v22 = vld [vmem:[#allocation83_spill] sm:$0xff] }
 0x7e9   : > { %v15444_v46 = vpop.xlane.xlu0 %8492  ;;  %v6678_v26 = vrot.slane %v6664_v44, %v12050_v12  ;;  %v6712_v39 = vcombine.high %v6655_v60, %v6671_v61  ;;  %v6613_v5 = vcombine.low %v6574_v13, %v6606_v47  ;;  %v6646_v33 = vrot.slane %v6632_v8, %v12050_v12  ;;  %v17755_v8 = vld [vmem:[#allocation21_spill] sm:$0xff] }
 0x7ea   : > { %8705 = vmax.xlane.f32.xlu1 %v8704_v31  ;;  %v6711_v31 = vcombine.low %v6655_v60, %v6671_v61  ;;  %v8716_v53 = vsel %vm8247_vm11, %v6611_v14, -inf  ;;  %v6680_v45 = vcombine.high %v6623_v25, %v6639_v56  ;;  %v6662_v21 = vrot.slane %v6648_v4, %v12050_v12  ;;  %v17754_v14 = vld [vmem:[#allocation54_spill] sm:$0xff] }
 0x7eb   : > { %v15448_v63 = vpop.xlane.xlu1 %8495  ;;  %v6687_v28 = vrot.slane %v6679_v34, %v12074_v19  ;;  %v6630_v60 = vrot.slane %v6616_v38, %v12050_v12  ;;  %v6799_v61 = vcombine.low %v17752_v22, %v14733_v42  ;;  %v8719_v58 = vsel %vm8247_vm11, %v6612_v23, -inf  ;;  %v17756_v4 = vld [vmem:[#allocation94_spill] sm:$0xff]  ;;  %v17757_v38 = vld [vmem:[#allocation73_spill] sm:$0xff]  ;;  %v17760_v23 = vld [vmem:[#allocation7_spill] sm:$0xff] }
 0x7ec   : > { %8708 = vmax.xlane.f32.xlu0 %v8707_v50  ;;  %v6719_v9 = vrot.slane %v6711_v31, %v12074_v19  ;;  %v6614_v44 = vcombine.high %v6574_v13, %v6606_v47  ;;  %v6727_v50 = vcombine.low %v6662_v21, %v6678_v26  ;;  %v8722_v36 = vsel %vm8247_vm11, %v6613_v5, -inf  ;;  %v17759_v13 = vld [vmem:[#allocation35_spill] sm:$0xff] }
 0x7ed   : > { %v15457_v18 = vpop.xlane.xlu0 %8498  ;;  %v6726_v56 = vrot.slane %v6712_v39, %v12074_v19  ;;  %v6767_v34 = vcombine.low %v17755_v8, %v17754_v14  ;;  %v6694_v47 = vrot.slane %v6680_v45, %v12074_v19  ;;  %v6751_v5 = vcombine.low %v17760_v23, %v17759_v13 }
 0x7ee   : > { %8711 = vmax.xlane.f32.xlu1 %v8710_v0  ;;  %v6743_v31 = vcombine.low %v6687_v28, %v6719_v9  ;;  %v6695_v0 = vcombine.low %v6630_v60, %v6646_v33  ;;  %v8725_v39 = vsel %vm8247_vm11, %v6614_v44, -inf  ;;  %v6807_v24 = vrot.slane %v6799_v61, %v12050_v12 }
 0x7ef   : > { %v15463_v16 = vpop.xlane.xlu1 %8501  ;;  %v6745_v27 = vcombine.low %v6694_v47, %v6726_v56  ;;  %v6735_v37 = vrot.slane %v6727_v50, %v12074_v19  ;;  %v6775_v45 = vrot.slane %v6767_v34, %v12050_v12  ;;  %v6746_v44 = vcombine.high %v6694_v47, %v6726_v56 }
 0x7f0   : > { %8714 = vmax.xlane.f32.xlu0 %v8713_v57  ;;  %v6783_v57 = vcombine.low %v17757_v38, %v17756_v4  ;;  %v8728_v15 = vsel %vm8247_vm11, %v6743_v31, -inf }
 0x7f1   : > { %v15472_v48 = vpop.xlane.xlu0 %8504  ;;  %v8734_v50 = vsel %vm8247_vm11, %v6745_v27, -inf  ;;  %v6752_v27 = vcombine.high %v17760_v23, %v17759_v13  ;;  %v8737_v47 = vsel %vm8247_vm11, %v6746_v44, -inf }
 0x7f2   : > { %8717 = vmax.xlane.f32.xlu1 %v8716_v53 }
 0x7f3   : > { %v15476_v17 = vpop.xlane.xlu1 %8507 }
 0x7f4   : > { %17751 = vst [vmem:[#allocation16_spill] sm:$0xff] %v15476_v17  ;;  %8720 = vmax.xlane.f32.xlu0 %v8719_v58  ;;  %v6728_v58 = vcombine.high %v6662_v21, %v6678_v26  ;;  %v6791_v17 = vrot.slane %v6783_v57, %v12050_v12  ;;  %v6759_v21 = vrot.slane %v6751_v5, %v12050_v12 }
 0x7f5   : > { %v15485_v25 = vpop.xlane.xlu0 %8510 }
 0x7f6   : > { %8723 = vmax.xlane.f32.xlu1 %v8722_v36  ;;  %17753 = vst [vmem:[#allocation89_spill] sm:$0xff] %v15485_v25  ;;  %v6744_v36 = vcombine.high %v6687_v28, %v6719_v9  ;;  %v6703_v9 = vrot.slane %v6695_v0, %v12074_v19  ;;  %v6800_v28 = vcombine.high %v17752_v22, %v14733_v42 }
 0x7f7   : > { %v15491_v53 = vpop.xlane.xlu1 %8513  ;;  %v6768_v0 = vcombine.high %v17755_v8, %v17754_v14  ;;  %v6815_v34 = vcombine.low %v6759_v21, %v6775_v45  ;;  %v6784_v42 = vcombine.high %v17757_v38, %v17756_v4 }
 0x7f8   : > { %17758 = vst [vmem:[#allocation68_spill] sm:$0xff] %v15491_v53  ;;  %8726 = vmax.xlane.f32.xlu0 %v8725_v39  ;;  %v6696_v53 = vcombine.high %v6630_v60, %v6646_v33  ;;  %v8731_v61 = vsel %vm8247_vm11, %v6744_v36, -inf  ;;  %v6747_v33 = vcombine.low %v6703_v9, %v6735_v37  ;;  %v6742_v60 = vrot.slane %v6728_v58, %v12074_v19 }
 0x7f9   : > { %v15500_v25 = vpop.xlane.xlu0 %8516  ;;  %v6814_v57 = vrot.slane %v6800_v28, %v12050_v12  ;;  %v6748_v5 = vcombine.high %v6703_v9, %v6735_v37  ;;  %v6848_v58 = vcombine.high %v6791_v17, %v6807_v24  ;;  %v6782_v38 = vrot.slane %v6768_v0, %v12050_v12  ;;  %v17767_v37 = vld [vmem:[#allocation84_spill] sm:$0xff]  ;;  %v17770_v0 = vld [vmem:[#allocation22_spill] sm:$0xff] }
 0x7fa   : > { %8729 = vmax.xlane.f32.xlu1 %v8728_v15  ;;  %17761 = vst [vmem:[#allocation30_spill] sm:$0xff] %v15500_v25  ;;  %v6847_v15 = vcombine.low %v6791_v17, %v6807_v24  ;;  %v6710_v56 = vrot.slane %v6696_v53, %v12074_v19  ;;  %v8740_v39 = vsel %vm8247_vm11, %v6747_v33, -inf  ;;  %v6816_v53 = vcombine.high %v6759_v21, %v6775_v45  ;;  %v17769_v33 = vld [vmem:[#allocation56_spill] sm:$0xff] }
 0x7fb   : > { %v15504_v26 = vpop.xlane.xlu1 %8519  ;;  %v6798_v13 = vrot.slane %v6784_v42, %v12050_v12  ;;  %v6823_v36 = vrot.slane %v6815_v34, %v12074_v19  ;;  %v6766_v24 = vrot.slane %v6752_v27, %v12050_v12  ;;  %v6935_v17 = vcombine.low %v17767_v37, %v14748_v7  ;;  %v17771_v42 = vld [vmem:[#allocation95_spill] sm:$0xff]  ;;  %v17772_v27 = vld [vmem:[#allocation74_spill] sm:$0xff] }
 0x7fc   : > { %17762 = vst [vmem:[#allocation3_spill] sm:$0xff] %v15504_v26  ;;  %8732 = vmax.xlane.f32.xlu0 %v8731_v61  ;;  %v6749_v14 = vcombine.low %v6710_v56, %v6742_v60  ;;  %v6855_v8 = vrot.slane %v6847_v15, %v12074_v19  ;;  %v8743_v9 = vsel %vm8247_vm11, %v6748_v5, -inf  ;;  %v6750_v28 = vcombine.high %v6710_v56, %v6742_v60  ;;  %v17774_v56 = vld [vmem:[#allocation36_spill] sm:$0xff]  ;;  %v17775_v5 = vld [vmem:[#allocation10_spill] sm:$0xff] }
 0x7fd   : > { %v15513_v31 = vpop.xlane.xlu0 %8522  ;;  %v6863_v61 = vcombine.low %v6798_v13, %v6814_v57  ;;  %v6862_v45 = vrot.slane %v6848_v58, %v12074_v19  ;;  %v6903_v34 = vcombine.low %v17770_v0, %v17769_v33  ;;  %v6830_v60 = vrot.slane %v6816_v53, %v12074_v19 }
 0x7fe   : > { %8735 = vmax.xlane.f32.xlu1 %v8734_v50  ;;  %17763 = vst [vmem:[#allocation79_spill] sm:$0xff] %v15513_v31  ;;  %v8746_v44 = vsel %vm8247_vm11, %v6749_v14, -inf  ;;  %v6879_v15 = vcombine.low %v6823_v36, %v6855_v8  ;;  %v6831_v50 = vcombine.low %v6766_v24, %v6782_v38  ;;  %v6887_v14 = vcombine.low %v17775_v5, %v17774_v56 }
 0x7ff   : > { %v15519_v22 = vpop.xlane.xlu1 %8525  ;;  %v8749_v58 = vsel %vm8247_vm11, %v6750_v28, -inf  ;;  %v6832_v26 = vcombine.high %v6766_v24, %v6782_v38  ;;  %v6911_v53 = vrot.slane %v6903_v34, %v12050_v12 }
 0x800   : > { %17764 = vst [vmem:[#allocation46_spill] sm:$0xff] %v15519_v22  ;;  %8738 = vmax.xlane.f32.xlu0 %v8737_v47  ;;  %v6919_v47 = vcombine.low %v17772_v27, %v17771_v42  ;;  %v6871_v22 = vrot.slane %v6863_v61, %v12074_v19 }
 0x801   : > { %v15528_v4 = vpop.xlane.xlu0 %8528 }
 0x802   : > { %8741 = vmax.xlane.f32.xlu1 %v8740_v39  ;;  %17765 = vst [vmem:[#allocation17_spill] sm:$0xff] %v15528_v4  ;;  %v6881_v4 = vcombine.low %v6830_v60, %v6862_v45  ;;  %v6927_v25 = vrot.slane %v6919_v47, %v12050_v12 }
 0x803   : > { %v15532_v23 = vpop.xlane.xlu1 %8531 }
 0x804   : > { %17766 = vst [vmem:[#allocation90_spill] sm:$0xff] %v15532_v23  ;;  %8744 = vmax.xlane.f32.xlu0 %v8743_v9  ;;  %v6943_v9 = vrot.slane %v6935_v17, %v12050_v12  ;;  %v8752_v23 = vsel %vm8247_vm11, %v6879_v15, -inf  ;;  %v6839_v17 = vrot.slane %v6831_v50, %v12074_v19  ;;  %v8758_v28 = vsel %vm8247_vm11, %v6881_v4, -inf }
 0x805   : > { %v15541_v21 = vpop.xlane.xlu0 %8534  ;;  %v6904_v15 = vcombine.high %v17770_v0, %v17769_v33  ;;  %v6888_v4 = vcombine.high %v17775_v5, %v17774_v56 }
 0x806   : > { %8747 = vmax.xlane.f32.xlu1 %v8746_v44  ;;  %17768 = vst [vmem:[#allocation69_spill] sm:$0xff] %v15541_v21  ;;  %v6880_v44 = vcombine.high %v6823_v36, %v6855_v8  ;;  %v6864_v21 = vcombine.high %v6798_v13, %v6814_v57  ;;  %v6895_v57 = vrot.slane %v6887_v14, %v12050_v12 }
 0x807   : > { %v15547_v39 = vpop.xlane.xlu1 %8537  ;;  %v6936_v8 = vcombine.high %v17767_v37, %v14748_v7  ;;  %v6882_v36 = vcombine.high %v6830_v60, %v6862_v45  ;;  %v6883_v38 = vcombine.low %v6839_v17, %v6871_v22  ;;  %v6920_v7 = vcombine.high %v17772_v27, %v17771_v42 }
 0x808   : > { %17773 = vst [vmem:[#allocation31_spill] sm:$0xff] %v15547_v39  ;;  %8750 = vmax.xlane.f32.xlu0 %v8749_v58  ;;  %v8755_v13 = vsel %vm8247_vm11, %v6880_v44, -inf  ;;  %v6878_v24 = vrot.slane %v6864_v21, %v12074_v19  ;;  %v6951_v50 = vcombine.low %v6895_v57, %v6911_v53  ;;  %v6846_v45 = vrot.slane %v6832_v26, %v12074_v19 }
 0x809   : > { %v15556_v31 = vpop.xlane.xlu0 %8540  ;;  %v6950_v34 = vrot.slane %v6936_v8, %v12050_v12  ;;  %v8761_v21 = vsel %vm8247_vm11, %v6882_v36, -inf  ;;  %v6884_v47 = vcombine.high %v6839_v17, %v6871_v22  ;;  %v6984_v60 = vcombine.high %v6927_v25, %v6943_v9  ;;  %v17781_v22 = vld [vmem:[#allocation85_spill] sm:$0xff] }
 0x80a   : > { %8753 = vmax.xlane.f32.xlu1 %v8752_v23  ;;  %v6983_v23 = vcombine.low %v6927_v25, %v6943_v9  ;;  %v8764_v14 = vsel %vm8247_vm11, %v6883_v38, -inf  ;;  %v6885_v33 = vcombine.low %v6846_v45, %v6878_v24  ;;  %v6918_v26 = vrot.slane %v6904_v15, %v12050_v12  ;;  %v17784_v38 = vld [vmem:[#allocation23_spill] sm:$0xff] }
 0x80b   : > { %v15560_v39 = vpop.xlane.xlu1 %8543  ;;  %v6952_v27 = vcombine.high %v6895_v57, %v6911_v53  ;;  %v6934_v56 = vrot.slane %v6920_v7, %v12050_v12  ;;  %v6959_v58 = vrot.slane %v6951_v50, %v12074_v19  ;;  %v6902_v25 = vrot.slane %v6888_v4, %v12050_v12  ;;  %v17785_v50 = vld [vmem:[#allocation96_spill] sm:$0xff]  ;;  %v17786_v7 = vld [vmem:[#allocation75_spill] sm:$0xff] }
 0x80c   : > { %17776 = vst [vmem:[#allocation4_spill] sm:$0xff] %v15560_v39  ;;  %8756 = vmax.xlane.f32.xlu0 %v8755_v13  ;;  %v6991_v0 = vrot.slane %v6983_v23, %v12074_v19  ;;  %v7071_v9 = vcombine.low %v17781_v22, %v14751_v20  ;;  %v8767_v44 = vsel %vm8247_vm11, %v6884_v47, -inf  ;;  %v6886_v17 = vcombine.high %v6846_v45, %v6878_v24  ;;  %v17788_v45 = vld [vmem:[#allocation37_spill] sm:$0xff]  ;;  %v17789_v47 = vld [vmem:[#allocation8_spill] sm:$0xff] }
 0x80d   : > { %v15569_v61 = vpop.xlane.xlu0 %8546  ;;  %v6999_v8 = vcombine.low %v6934_v56, %v6950_v34  ;;  %v8770_v13 = vsel %vm8247_vm11, %v6885_v33, -inf  ;;  %v6998_v53 = vrot.slane %v6984_v60, %v12074_v19  ;;  %v6967_v23 = vcombine.low %v6902_v25, %v6918_v26 }
 0x80e   : > { %8759 = vmax.xlane.f32.xlu1 %v8758_v28  ;;  %17777 = vst [vmem:[#allocation80_spill] sm:$0xff] %v15569_v61  ;;  %v7015_v36 = vcombine.low %v6959_v58, %v6991_v0  ;;  %v17783_v28 = vld [vmem:[#allocation58_spill] sm:$0xff]  ;;  %v7055_v4 = vcombine.low %v17786_v7, %v17785_v50  ;;  %v6966_v24 = vrot.slane %v6952_v27, %v12074_v19  ;;  %v8773_v60 = vsel %vm8247_vm11, %v6886_v17, -inf }
 0x80f   : > { %v15575_v37 = vpop.xlane.xlu1 %8549  ;;  %v7039_v15 = vcombine.low %v17784_v38, %v17783_v28  ;;  %v7079_v33 = vrot.slane %v7071_v9, %v12050_v12  ;;  %v6975_v9 = vrot.slane %v6967_v23, %v12074_v19 }
 0x810   : > { %17778 = vst [vmem:[#allocation48_spill] sm:$0xff] %v15575_v37  ;;  %8762 = vmax.xlane.f32.xlu0 %v8761_v21  ;;  %v7063_v61 = vrot.slane %v7055_v4, %v12050_v12 }
 0x811   : > { %v15584_v42 = vpop.xlane.xlu0 %8552  ;;  %v7047_v27 = vrot.slane %v7039_v15, %v12050_v12 }
 0x812   : > { %8765 = vmax.xlane.f32.xlu1 %v8764_v14  ;;  %17779 = vst [vmem:[#allocation18_spill] sm:$0xff] %v15584_v42  ;;  %v7023_v14 = vcombine.low %v17789_v47, %v17788_v45  ;;  %v7007_v42 = vrot.slane %v6999_v8, %v12074_v19  ;;  %v7119_v17 = vcombine.low %v7063_v61, %v7079_v33 }
 0x813   : > { %v15588_v5 = vpop.xlane.xlu1 %8555 }
 0x814   : > { %17780 = vst [vmem:[#allocation91_spill] sm:$0xff] %v15588_v5  ;;  %8768 = vmax.xlane.f32.xlu0 %v8767_v44  ;;  %v7016_v44 = vcombine.high %v6959_v58, %v6991_v0  ;;  %v7017_v5 = vcombine.low %v6966_v24, %v6998_v53  ;;  %v7072_v0 = vcombine.high %v17781_v22, %v14751_v20 }
 0x815   : > { %v15597_v57 = vpop.xlane.xlu0 %8558  ;;  %v7018_v58 = vcombine.high %v6966_v24, %v6998_v53  ;;  %v7056_v20 = vcombine.high %v17786_v7, %v17785_v50  ;;  %v7020_v24 = vcombine.high %v6975_v9, %v7007_v42 }
 0x816   : > { %8771 = vmax.xlane.f32.xlu1 %v8770_v13  ;;  %17782 = vst [vmem:[#allocation70_spill] sm:$0xff] %v15597_v57  ;;  %v7000_v13 = vcombine.high %v6934_v56, %v6950_v34  ;;  %v8776_v57 = vsel %vm8247_vm11, %v7015_v36, -inf  ;;  %v7031_v34 = vrot.slane %v7023_v14, %v12050_v12  ;;  %v8779_v56 = vsel %vm8247_vm11, %v7016_v44, -inf }
 0x817   : > { %v15603_v21 = vpop.xlane.xlu1 %8561  ;;  %v8782_v8 = vsel %vm8247_vm11, %v7017_v5, -inf  ;;  %v7024_v5 = vcombine.high %v17789_v47, %v17788_v45  ;;  %v7086_v15 = vrot.slane %v7072_v0, %v12050_v12  ;;  %v8785_v4 = vsel %vm8247_vm11, %v7018_v58, -inf }
 0x818   : > { %17787 = vst [vmem:[#allocation32_spill] sm:$0xff] %v15603_v21  ;;  %8774 = vmax.xlane.f32.xlu0 %v8773_v60  ;;  %v6968_v21 = vcombine.high %v6902_v25, %v6918_v26  ;;  %v7019_v26 = vcombine.low %v6975_v9, %v7007_v42  ;;  %v7014_v25 = vrot.slane %v7000_v13, %v12074_v19  ;;  %v17796_v42 = vld [vmem:[#allocation162_spill] sm:$0xff]  ;;  %v8791_v13 = vsel %vm8247_vm11, %v7020_v24, -inf  ;;  %v17803_v24 = vld [vmem:[#allocation55_spill] sm:$0xff] }
 0x819   : > { %v15612_v37 = vpop.xlane.xlu0 %8564  ;;  %v7087_v23 = vcombine.low %v7031_v34, %v7047_v27  ;;  %v7120_v14 = vcombine.high %v7063_v61, %v7079_v33  ;;  %v7070_v45 = vrot.slane %v7056_v20, %v12050_v12  ;;  %v7038_v61 = vrot.slane %v7024_v5, %v12050_v12  ;;  %v17801_v20 = vld [vmem:[#allocation150_spill] sm:$0xff] }
 0x81a   : > { %8777 = vmax.xlane.f32.xlu1 %v8776_v57  ;;  %17790 = vst [vmem:[#allocation5_spill] sm:$0xff] %v15612_v37  ;;  %v7040_v57 = vcombine.high %v17784_v38, %v17783_v28  ;;  %v6982_v53 = vrot.slane %v6968_v21, %v12074_v19  ;;  %v8788_v60 = vsel %vm8247_vm11, %v7019_v26, -inf  ;;  %v7127_v38 = vrot.slane %v7119_v17, %v12074_v19  ;;  %v17799_v26 = vld [vmem:[#allocation105_spill] sm:$0xff] }
 0x81b   : > { %v15616_v39 = vpop.xlane.xlu1 %8567  ;;  %v7088_v21 = vcombine.high %v7031_v34, %v7047_v27  ;;  %v7095_v44 = vrot.slane %v7087_v23, %v12074_v19  ;;  %v7207_v33 = vcombine.low %v17796_v42, %v14766_v49  ;;  %v7135_v0 = vcombine.low %v7070_v45, %v7086_v15  ;;  %v17800_v23 = vld [vmem:[#allocation173_spill] sm:$0xff] }
 0x81c   : > { %17791 = vst [vmem:[#allocation81_spill] sm:$0xff] %v15616_v39  ;;  %8780 = vmax.xlane.f32.xlu0 %v8779_v56  ;;  %v7021_v28 = vcombine.low %v6982_v53, %v7014_v25  ;;  %v7054_v7 = vrot.slane %v7040_v57, %v12050_v12  ;;  %v7022_v9 = vcombine.high %v6982_v53, %v7014_v25  ;;  %v17802_v53 = vld [vmem:[#allocation121_spill] sm:$0xff] }
 0x81d   : > { %v15625_v36 = vpop.xlane.xlu0 %8570  ;;  %v7151_v58 = vcombine.low %v7095_v44, %v7127_v38  ;;  %v7134_v27 = vrot.slane %v7120_v14, %v12074_v19  ;;  %v7191_v5 = vcombine.low %v17801_v20, %v17800_v23  ;;  %v7102_v25 = vrot.slane %v7088_v21, %v12074_v19 }
 0x81e   : > { %8783 = vmax.xlane.f32.xlu1 %v8782_v8  ;;  %17792 = vst [vmem:[#allocation50_spill] sm:$0xff] %v15625_v36  ;;  %v8794_v56 = vsel %vm8247_vm11, %v7021_v28, -inf  ;;  %v7103_v17 = vcombine.low %v7038_v61, %v7054_v7  ;;  %v17798_v8 = vld [vmem:[#allocation137_spill] sm:$0xff]  ;;  %v7215_v28 = vrot.slane %v7207_v33, %v12050_v12  ;;  %v8797_v14 = vsel %vm8247_vm11, %v7022_v9, -inf }
 0x81f   : > { %v15631_v22 = vpop.xlane.xlu1 %8573  ;;  %v7175_v57 = vcombine.low %v17799_v26, %v17798_v8  ;;  %v7104_v36 = vcombine.high %v7038_v61, %v7054_v7  ;;  %v7199_v39 = vrot.slane %v7191_v5, %v12050_v12 }
 0x820   : > { %17793 = vst [vmem:[#allocation19_spill] sm:$0xff] %v15631_v22  ;;  %8786 = vmax.xlane.f32.xlu0 %v8785_v4  ;;  %v7111_v33 = vrot.slane %v7103_v17, %v12074_v19 }
 0x821   : > { %v15640_v50 = vpop.xlane.xlu0 %8576  ;;  %v7183_v21 = vrot.slane %v7175_v57, %v12050_v12  ;;  %v7255_v9 = vcombine.low %v7199_v39, %v7215_v28 }
 0x822   : > { %8789 = vmax.xlane.f32.xlu1 %v8788_v60  ;;  %17794 = vst [vmem:[#allocation92_spill] sm:$0xff] %v15640_v50  ;;  %v7159_v60 = vcombine.low %v17803_v24, %v17802_v53  ;;  %v7143_v50 = vrot.slane %v7135_v0, %v12074_v19 }
 0x823   : > { %v15644_v47 = vpop.xlane.xlu1 %8579 }
 0x824   : > { %17795 = vst [vmem:[#allocation71_spill] sm:$0xff] %v15644_v47  ;;  %8792 = vmax.xlane.f32.xlu0 %v8791_v13  ;;  %v7152_v13 = vcombine.high %v7095_v44, %v7127_v38  ;;  %v7153_v47 = vcombine.low %v7102_v25, %v7134_v27  ;;  %v7208_v38 = vcombine.high %v17796_v42, %v14766_v49 }
 0x825   : > { %v15653_v34 = vpop.xlane.xlu0 %8582  ;;  %v7154_v44 = vcombine.high %v7102_v25, %v7134_v27  ;;  %v7155_v7 = vcombine.low %v7111_v33, %v7143_v50  ;;  %v7192_v49 = vcombine.high %v17801_v20, %v17800_v23  ;;  %v7118_v27 = vrot.slane %v7104_v36, %v12074_v19 }
 0x826   : > { %8795 = vmax.xlane.f32.xlu1 %v8794_v56  ;;  %17797 = vst [vmem:[#allocation33_spill] sm:$0xff] %v15653_v34  ;;  %v7136_v56 = vcombine.high %v7070_v45, %v7086_v15  ;;  %v8800_v34 = vsel %vm8247_vm11, %v7151_v58, -inf  ;;  %v7167_v15 = vrot.slane %v7159_v60, %v12050_v12  ;;  %v8803_v45 = vsel %vm8247_vm11, %v7152_v13, -inf }
 0x827   : > { %v15659_v4 = vpop.xlane.xlu1 %8585  ;;  %v8806_v0 = vsel %vm8247_vm11, %v7153_v47, -inf  ;;  %v7160_v47 = vcombine.high %v17803_v24, %v17802_v53  ;;  %v7222_v57 = vrot.slane %v7208_v38, %v12050_v12  ;;  %v8809_v5 = vsel %vm8247_vm11, %v7154_v44, -inf }
 0x828   : > { %8798 = vmax.xlane.f32.xlu0 %v8797_v14  ;;  %v7150_v61 = vrot.slane %v7136_v56, %v12074_v19  ;;  %v7223_v17 = vcombine.low %v7167_v15, %v7183_v21  ;;  %v7156_v25 = vcombine.high %v7111_v33, %v7143_v50  ;;  %v7256_v60 = vcombine.high %v7199_v39, %v7215_v28  ;;  %v17808_v50 = vld [vmem:[#allocation163_spill] sm:$0xff] }
 0x829   : > { %v15668_v22 = vpop.xlane.xlu0 %8588  ;;  %v8812_v14 = vsel %vm8247_vm11, %v7155_v7, -inf  ;;  %v7224_v20 = vcombine.high %v7167_v15, %v7183_v21  ;;  %v7206_v53 = vrot.slane %v7192_v49, %v12050_v12  ;;  %v7174_v39 = vrot.slane %v7160_v47, %v12050_v12  ;;  %v17811_v7 = vld [vmem:[#allocation106_spill] sm:$0xff]  ;;  %v17813_v49 = vld [vmem:[#allocation151_spill] sm:$0xff] }
 0x82a   : > { %8801 = vmax.xlane.f32.xlu1 %v8800_v34  ;;  %v7176_v34 = vcombine.high %v17799_v26, %v17798_v8  ;;  %v7157_v8 = vcombine.low %v7118_v27, %v7150_v61  ;;  %v7263_v26 = vrot.slane %v7255_v9, %v12074_v19  ;;  %v7231_v13 = vrot.slane %v7223_v17, %v12074_v19  ;;  %v17812_v17 = vld [vmem:[#allocation176_spill] sm:$0xff] }
 0x82b   : > { %v15672_v37 = vpop.xlane.xlu1 %8591  ;;  %v7343_v28 = vcombine.low %v17808_v50, %v14770_v41  ;;  %v8815_v56 = vsel %vm8247_vm11, %v7156_v25, -inf  ;;  %v7158_v33 = vcombine.high %v7118_v27, %v7150_v61  ;;  %v7271_v38 = vcombine.low %v7206_v53, %v7222_v57  ;;  %v17815_v27 = vld [vmem:[#allocation122_spill] sm:$0xff]  ;;  %v17816_v25 = vld [vmem:[#allocation57_spill] sm:$0xff] }
 0x82c   : > { %8804 = vmax.xlane.f32.xlu0 %v8803_v45  ;;  %v7190_v36 = vrot.slane %v7176_v34, %v12050_v12  ;;  %v8818_v45 = vsel %vm8247_vm11, %v7157_v8, -inf  ;;  %v7287_v44 = vcombine.low %v7231_v13, %v7263_v26  ;;  %v7270_v21 = vrot.slane %v7256_v60, %v12074_v19 }
 0x82d   : > { %v15681_v58 = vpop.xlane.xlu0 %8594  ;;  %v7327_v47 = vcombine.low %v17813_v49, %v17812_v17  ;;  %v7238_v61 = vrot.slane %v7224_v20, %v12074_v19  ;;  %v7272_v8 = vcombine.high %v7206_v53, %v7222_v57  ;;  %v8821_v60 = vsel %vm8247_vm11, %v7158_v33, -inf }
 0x82e   : > { %8807 = vmax.xlane.f32.xlu1 %v8806_v0  ;;  %17804 = vst [vmem:[#allocation6_spill] sm:$0xff] %v15681_v58  ;;  %v7239_v9 = vcombine.low %v7174_v39, %v7190_v36  ;;  %v17810_v0 = vld [vmem:[#allocation138_spill] sm:$0xff] }
 0x82f   : > { %v15687_v42 = vpop.xlane.xlu1 %8597  ;;  %v7311_v34 = vcombine.low %v17811_v7, %v17810_v0  ;;  %v7335_v58 = vrot.slane %v7327_v47, %v12050_v12  ;;  %v7290_v33 = vcombine.high %v7238_v61, %v7270_v21 }
 0x830   : > { %17805 = vst [vmem:[#allocation82_spill] sm:$0xff] %v15687_v42  ;;  %8810 = vmax.xlane.f32.xlu0 %v8809_v5 }
 0x831   : > { %v15696_v23 = vpop.xlane.xlu0 %8600  ;;  %v7319_v20 = vrot.slane %v7311_v34, %v12050_v12 }
 0x832   : > { %8813 = vmax.xlane.f32.xlu1 %v8812_v14  ;;  %17806 = vst [vmem:[#allocation52_spill] sm:$0xff] %v15696_v23  ;;  %v7295_v14 = vcombine.low %v17816_v25, %v17815_v27  ;;  %v7279_v23 = vrot.slane %v7271_v38, %v12074_v19 }
 0x833   : > { %v15700_v24 = vpop.xlane.xlu1 %8603 }
 0x834   : > { %17807 = vst [vmem:[#allocation20_spill] sm:$0xff] %v15700_v24  ;;  %8816 = vmax.xlane.f32.xlu0 %v8815_v56  ;;  %v7288_v56 = vcombine.high %v7231_v13, %v7263_v26  ;;  %v7289_v24 = vcombine.low %v7238_v61, %v7270_v21  ;;  %v7247_v26 = vrot.slane %v7239_v9, %v12074_v19  ;;  %v8833_v61 = vsel %vm8247_vm11, %v7290_v33, -inf }
 0x835   : > { %v15709_v15 = vpop.xlane.xlu0 %8606  ;;  %v7303_v53 = vrot.slane %v7295_v14, %v12050_v12  ;;  %v7344_v13 = vcombine.high %v17808_v50, %v14770_v41  ;;  %v7328_v41 = vcombine.high %v17813_v49, %v17812_v17 }
 0x836   : > { %8819 = vmax.xlane.f32.xlu1 %v8818_v45  ;;  %17809 = vst [vmem:[#allocation93_spill] sm:$0xff] %v15709_v15  ;;  %v7351_v45 = vrot.slane %v7343_v28, %v12050_v12  ;;  %v8824_v15 = vsel %vm8247_vm11, %v7287_v44, -inf  ;;  %v8827_v28 = vsel %vm8247_vm11, %v7288_v56, -inf  ;;  %v8830_v44 = vsel %vm8247_vm11, %v7289_v24, -inf }
 0x837   : > { %v15715_v5 = vpop.xlane.xlu1 %8609  ;;  %v7359_v34 = vcombine.low %v7303_v53, %v7319_v20  ;;  %v7296_v24 = vcombine.high %v17816_v25, %v17815_v27  ;;  %v7358_v47 = vrot.slane %v7344_v13, %v12050_v12  ;;  %v7292_v14 = vcombine.high %v7247_v26, %v7279_v23 }
 0x838   : > { %17814 = vst [vmem:[#allocation72_spill] sm:$0xff] %v15715_v5  ;;  %8822 = vmax.xlane.f32.xlu0 %v8821_v60  ;;  %v7240_v5 = vcombine.high %v7174_v39, %v7190_v36  ;;  %v7391_v38 = vcombine.low %v7335_v58, %v7351_v45  ;;  %v7291_v36 = vcombine.low %v7247_v26, %v7279_v23  ;;  %v17823_v23 = vld [vmem:[#allocation164_spill] sm:$0xff] }
 0x839   : > { %v15724_v42 = vpop.xlane.xlu0 %8612  ;;  %v7286_v39 = vrot.slane %v7272_v8, %v12074_v19  ;;  %v7342_v27 = vrot.slane %v7328_v41, %v12050_v12  ;;  %v7367_v56 = vrot.slane %v7359_v34, %v12074_v19  ;;  %v8839_v26 = vsel %vm8247_vm11, %v7292_v14, -inf  ;;  %v17826_v34 = vld [vmem:[#allocation107_spill] sm:$0xff] }
 0x83a   : > { %8825 = vmax.xlane.f32.xlu1 %v8824_v15  ;;  %17817 = vst [vmem:[#allocation34_spill] sm:$0xff] %v15724_v42  ;;  %v7312_v15 = vcombine.high %v17811_v7, %v17810_v0  ;;  %v7254_v21 = vrot.slane %v7240_v5, %v12074_v19  ;;  %v7392_v0 = vcombine.high %v7335_v58, %v7351_v45  ;;  %v8836_v7 = vsel %vm8247_vm11, %v7291_v36, -inf }
 0x83b   : > { %v15728_v57 = vpop.xlane.xlu1 %8615  ;;  %v7399_v60 = vrot.slane %v7391_v38, %v12074_v19  ;;  %v7360_v5 = vcombine.high %v7303_v53, %v7319_v20  ;;  %v7310_v58 = vrot.slane %v7296_v24, %v12050_v12  ;;  %v7479_v45 = vcombine.low %v17823_v23, %v14786_v35  ;;  %v17827_v24 = vld [vmem:[#allocation175_spill] sm:$0xff] }
 0x83c   : > { %17818 = vst [vmem:[#allocation9_spill] sm:$0xff] %v15728_v57  ;;  %8828 = vmax.xlane.f32.xlu0 %v8827_v28  ;;  %v7293_v8 = vcombine.low %v7254_v21, %v7286_v39  ;;  %v7326_v17 = vrot.slane %v7312_v15, %v12050_v12  ;;  %v7294_v13 = vcombine.high %v7254_v21, %v7286_v39  ;;  %v11997_v28 = vmov 0   ;;  %v17825_v15 = vld [vmem:[#allocation139_spill] sm:$0xff] }
 0x83d   : > { %v15739_v9 = vpop.xlane.xlu0 %8618  ;;  %11957 = vset.pattern.permute.xlu1 %v11997_v28  ;;  %11958 = vset.pattern.permute.xlu0 %v11997_v28  ;;  %v7407_v33 = vcombine.low %v7342_v27, %v7358_v47  ;;  %v7423_v53 = vcombine.low %v7367_v56, %v7399_v60  ;;  %v7406_v38 = vrot.slane %v7392_v0, %v12074_v19 }
 0x83e   : > { %8831 = vmax.xlane.f32.xlu1 %v8830_v44  ;;  %17819 = vst [vmem:[#allocation83_spill] sm:$0xff] %v15739_v9  ;;  %v8842_v20 = vsel %vm8247_vm11, %v7293_v8, -inf  ;;  %v7375_v36 = vcombine.low %v7310_v58, %v7326_v17  ;;  %v7447_v41 = vcombine.low %v17826_v34, %v17825_v15  ;;  %v7374_v14 = vrot.slane %v7360_v5, %v12074_v19  ;;  %v17830_v8 = vld [vmem:[#allocation59_spill] sm:$0xff] }
 0x83f   : > { %v15743_v50 = vpop.xlane.xlu1 %8621  ;;  %v7408_v28 = vcombine.high %v7342_v27, %v7358_v47  ;;  %v8845_v0 = vsel %vm8247_vm11, %v7294_v13, -inf  ;;  %v7376_v57 = vcombine.high %v7310_v58, %v7326_v17 }
 0x840   : > { %17820 = vst [vmem:[#allocation54_spill] sm:$0xff] %v15743_v50  ;;  %8834 = vmax.xlane.f32.xlu0 %v8833_v61  ;;  %v17828_v61 = vld [vmem:[#allocation152_spill] sm:$0xff]  ;;  %v7415_v50 = vrot.slane %v7407_v33, %v12074_v19  ;;  %v7455_v5 = vrot.slane %v7447_v41, %v12050_v12  ;;  %v7426_v13 = vcombine.high %v7374_v14, %v7406_v38 }
 0x841   : > { %v15753_v49 = vpop.xlane.xlu0 %8624  ;;  %v7463_v39 = vcombine.low %v17828_v61, %v17827_v24  ;;  %v7422_v58 = vrot.slane %v7408_v28, %v12074_v19 }
 0x842   : > { %8837 = vmax.xlane.f32.xlu1 %v8836_v7  ;;  %17821 = vst [vmem:[#allocation21_spill] sm:$0xff] %v15753_v49  ;;  %v17829_v7 = vld [vmem:[#allocation123_spill] sm:$0xff]  ;;  %v7425_v49 = vcombine.low %v7374_v14, %v7406_v38  ;;  %v7390_v38 = vrot.slane %v7376_v57, %v12074_v19  ;;  %v8857_v14 = vsel %vm8247_vm11, %v7426_v13, -inf }
 0x843   : > { %v15756_v25 = vpop.xlane.xlu1 %8627  ;;  %v7471_v42 = vrot.slane %v7463_v39, %v12050_v12 }
 0x844   : > { %17822 = vst [vmem:[#allocation94_spill] sm:$0xff] %v15756_v25  ;;  %8840 = vmax.xlane.f32.xlu0 %v8839_v26  ;;  %v7431_v26 = vcombine.low %v17830_v8, %v17829_v7  ;;  %v8848_v25 = vsel %vm8247_vm11, %v7423_v53, -inf  ;;  %v8854_v33 = vsel %vm8247_vm11, %v7425_v49, -inf  ;;  %v7432_v49 = vcombine.high %v17830_v8, %v17829_v7 }
 0x845   : > { %v15765_v44 = vpop.xlane.xlu0 %8630 }
 0x846   : > { %8843 = vmax.xlane.f32.xlu1 %v8842_v20  ;;  %17824 = vst [vmem:[#allocation73_spill] sm:$0xff] %v15765_v44  ;;  %v7424_v20 = vcombine.high %v7367_v56, %v7399_v60  ;;  %v7487_v44 = vrot.slane %v7479_v45, %v12050_v12  ;;  %v7383_v60 = vrot.slane %v7375_v36, %v12074_v19 }
 0x847   : > { %v15771_v21 = vpop.xlane.xlu1 %8633  ;;  %v7439_v27 = vrot.slane %v7431_v26, %v12050_v12  ;;  %v7480_v56 = vcombine.high %v17823_v23, %v14786_v35  ;;  %v7448_v36 = vcombine.high %v17826_v34, %v17825_v15  ;;  %v7464_v35 = vcombine.high %v17828_v61, %v17827_v24 }
 0x848   : > { %8846 = vmax.xlane.f32.xlu0 %v8845_v0  ;;  %v8851_v45 = vsel %vm8247_vm11, %v7424_v20, -inf  ;;  %v7427_v17 = vcombine.low %v7383_v60, %v7415_v50  ;;  %v7428_v26 = vcombine.high %v7383_v60, %v7415_v50  ;;  %v7528_v28 = vcombine.high %v7471_v42, %v7487_v44  ;;  %v17837_v50 = vld [vmem:[#allocation165_spill] sm:$0xff] }
 0x849   : > { %v15780_v9 = vpop.xlane.xlu0 %8636  ;;  %v7495_v41 = vcombine.low %v7439_v27, %v7455_v5  ;;  %v7494_v39 = vrot.slane %v7480_v56, %v12050_v12  ;;  %v7429_v15 = vcombine.low %v7390_v38, %v7422_v58  ;;  %v7462_v57 = vrot.slane %v7448_v36, %v12050_v12  ;;  %v17840_v36 = vld [vmem:[#allocation108_spill] sm:$0xff] }
 0x84a   : > { %8849 = vmax.xlane.f32.xlu1 %v8848_v25  ;;  %17831 = vst [vmem:[#allocation35_spill] sm:$0xff] %v15780_v9  ;;  %v7527_v25 = vcombine.low %v7471_v42, %v7487_v44  ;;  %v8860_v0 = vsel %vm8247_vm11, %v7427_v17, -inf  ;;  %v7496_v61 = vcombine.high %v7439_v27, %v7455_v5  ;;  %v7478_v7 = vrot.slane %v7464_v35, %v12050_v12  ;;  %v17839_v17 = vld [vmem:[#allocation140_spill] sm:$0xff]  ;;  %v17841_v35 = vld [vmem:[#allocation179_spill] sm:$0xff] }
 0x84b   : > { %v15784_v47 = vpop.xlane.xlu1 %8639  ;;  %v7503_v20 = vrot.slane %v7495_v41, %v12074_v19  ;;  %v7446_v42 = vrot.slane %v7432_v49, %v12050_v12  ;;  %v7615_v44 = vcombine.low %v17837_v50, %v14790_v55  ;;  %v8863_v60 = vsel %vm8247_vm11, %v7428_v26, -inf  ;;  %v17842_v49 = vld [vmem:[#allocation153_spill] sm:$0xff]  ;;  %v17845_v26 = vld [vmem:[#allocation60_spill] sm:$0xff] }
 0x84c   : > { %17832 = vst [vmem:[#allocation7_spill] sm:$0xff] %v15784_v47  ;;  %8852 = vmax.xlane.f32.xlu0 %v8851_v45  ;;  %v7535_v34 = vrot.slane %v7527_v25, %v12074_v19  ;;  %v7430_v56 = vcombine.high %v7390_v38, %v7422_v58  ;;  %v7543_v45 = vcombine.low %v7478_v7, %v7494_v39  ;;  %v8866_v13 = vsel %vm8247_vm11, %v7429_v15, -inf  ;;  %v17844_v38 = vld [vmem:[#allocation124_spill] sm:$0xff] }
 0x84d   : > { %v15793_v53 = vpop.xlane.xlu0 %8642  ;;  %v7542_v5 = vrot.slane %v7528_v28, %v12074_v19  ;;  %v7583_v41 = vcombine.low %v17840_v36, %v17839_v17  ;;  %v7510_v58 = vrot.slane %v7496_v61, %v12074_v19  ;;  %v7567_v15 = vcombine.low %v17845_v26, %v17844_v38 }
 0x84e   : > { %8855 = vmax.xlane.f32.xlu1 %v8854_v33  ;;  %17833 = vst [vmem:[#allocation84_spill] sm:$0xff] %v15793_v53  ;;  %v7559_v25 = vcombine.low %v7503_v20, %v7535_v34  ;;  %v7511_v33 = vcombine.low %v7446_v42, %v7462_v57  ;;  %v8869_v28 = vsel %vm8247_vm11, %v7430_v56, -inf }
 0x84f   : > { %v15799_v23 = vpop.xlane.xlu1 %8645  ;;  %v7591_v61 = vrot.slane %v7583_v41, %v12050_v12 }
 0x850   : > { %17834 = vst [vmem:[#allocation56_spill] sm:$0xff] %v15799_v23  ;;  %8858 = vmax.xlane.f32.xlu0 %v8857_v14  ;;  %v7599_v14 = vcombine.low %v17842_v49, %v17841_v35  ;;  %v7551_v23 = vrot.slane %v7543_v45, %v12074_v19 }
 0x851   : > { %v15808_v24 = vpop.xlane.xlu0 %8648 }
 0x852   : > { %8861 = vmax.xlane.f32.xlu1 %v8860_v0  ;;  %17835 = vst [vmem:[#allocation22_spill] sm:$0xff] %v15808_v24  ;;  %v7561_v24 = vcombine.low %v7510_v58, %v7542_v5  ;;  %v7607_v47 = vrot.slane %v7599_v14, %v12050_v12 }
 0x853   : > { %v15812_v8 = vpop.xlane.xlu1 %8651 }
 0x854   : > { %17836 = vst [vmem:[#allocation95_spill] sm:$0xff] %v15812_v8  ;;  %8864 = vmax.xlane.f32.xlu0 %v8863_v60  ;;  %v7623_v60 = vrot.slane %v7615_v44, %v12050_v12  ;;  %v8872_v8 = vsel %vm8247_vm11, %v7559_v25, -inf  ;;  %v7519_v44 = vrot.slane %v7511_v33, %v12074_v19  ;;  %v8878_v56 = vsel %vm8247_vm11, %v7561_v24, -inf }
 0x855   : > { %v15821_v27 = vpop.xlane.xlu0 %8654  ;;  %v7584_v25 = vcombine.high %v17840_v36, %v17839_v17  ;;  %v7568_v24 = vcombine.high %v17845_v26, %v17844_v38 }
 0x856   : > { %8867 = vmax.xlane.f32.xlu1 %v8866_v13  ;;  %17838 = vst [vmem:[#allocation74_spill] sm:$0xff] %v15821_v27  ;;  %v7560_v13 = vcombine.high %v7503_v20, %v7535_v34  ;;  %v7544_v27 = vcombine.high %v7478_v7, %v7494_v39  ;;  %v7575_v39 = vrot.slane %v7567_v15, %v12050_v12 }
 0x857   : > { %v15827_v0 = vpop.xlane.xlu1 %8657  ;;  %v7616_v34 = vcombine.high %v17837_v50, %v14790_v55  ;;  %v7562_v20 = vcombine.high %v7510_v58, %v7542_v5  ;;  %v7600_v55 = vcombine.high %v17842_v49, %v17841_v35  ;;  %v7564_v14 = vcombine.high %v7519_v44, %v7551_v23 }
 0x858   : > { %17843 = vst [vmem:[#allocation36_spill] sm:$0xff] %v15827_v0  ;;  %8870 = vmax.xlane.f32.xlu0 %v8869_v28  ;;  %v7512_v0 = vcombine.high %v7446_v42, %v7462_v57  ;;  %v8875_v7 = vsel %vm8247_vm11, %v7560_v13, -inf  ;;  %v7563_v57 = vcombine.low %v7519_v44, %v7551_v23  ;;  %v7558_v42 = vrot.slane %v7544_v27, %v12074_v19  ;;  %v17852_v23 = vld [vmem:[#allocation166_spill] sm:$0xff] }
 0x859   : > { %v15836_v53 = vpop.xlane.xlu0 %8660  ;;  %v7631_v33 = vcombine.low %v7575_v39, %v7591_v61  ;;  %v7630_v41 = vrot.slane %v7616_v34, %v12050_v12  ;;  %v8881_v27 = vsel %vm8247_vm11, %v7562_v20, -inf  ;;  %v7664_v58 = vcombine.high %v7607_v47, %v7623_v60 }
 0x85a   : > { %8873 = vmax.xlane.f32.xlu1 %v8872_v8  ;;  %17846 = vst [vmem:[#allocation10_spill] sm:$0xff] %v15836_v53  ;;  %v7663_v8 = vcombine.low %v7607_v47, %v7623_v60  ;;  %v7526_v5 = vrot.slane %v7512_v0, %v12074_v19  ;;  %v8884_v15 = vsel %vm8247_vm11, %v7563_v57, -inf  ;;  %v7598_v49 = vrot.slane %v7584_v25, %v12050_v12  ;;  %v17855_v57 = vld [vmem:[#allocation109_spill] sm:$0xff] }
 0x85b   : > { %v15840_v9 = vpop.xlane.xlu1 %8663  ;;  %v7632_v0 = vcombine.high %v7575_v39, %v7591_v61  ;;  %v7614_v38 = vrot.slane %v7600_v55, %v12050_v12  ;;  %v7639_v28 = vrot.slane %v7631_v33, %v12074_v19  ;;  %v7582_v47 = vrot.slane %v7568_v24, %v12050_v12  ;;  %v17856_v33 = vld [vmem:[#allocation177_spill] sm:$0xff]  ;;  %v17857_v55 = vld [vmem:[#allocation154_spill] sm:$0xff] }
 0x85c   : > { %17847 = vst [vmem:[#allocation85_spill] sm:$0xff] %v15840_v9  ;;  %8876 = vmax.xlane.f32.xlu0 %v8875_v7  ;;  %v7565_v17 = vcombine.low %v7526_v5, %v7558_v42  ;;  %v7671_v36 = vrot.slane %v7663_v8, %v12074_v19  ;;  %v7751_v60 = vcombine.low %v17852_v23, %v14803_v40  ;;  %v8887_v13 = vsel %vm8247_vm11, %v7564_v14, -inf  ;;  %v17859_v14 = vld [vmem:[#allocation61_spill] sm:$0xff] }
 0x85d   : > { %v15849_v45 = vpop.xlane.xlu0 %8666  ;;  %v7566_v44 = vcombine.high %v7526_v5, %v7558_v42  ;;  %v7679_v34 = vcombine.low %v7614_v38, %v7630_v41  ;;  %v7678_v61 = vrot.slane %v7664_v58, %v12074_v19  ;;  %v7647_v8 = vcombine.low %v7582_v47, %v7598_v49  ;;  %v17858_v5 = vld [vmem:[#allocation125_spill] sm:$0xff] }
 0x85e   : > { %8879 = vmax.xlane.f32.xlu1 %v8878_v56  ;;  %17848 = vst [vmem:[#allocation58_spill] sm:$0xff] %v15849_v45  ;;  %v8890_v7 = vsel %vm8247_vm11, %v7565_v17, -inf  ;;  %v7695_v20 = vcombine.low %v7639_v28, %v7671_v36  ;;  %v17854_v56 = vld [vmem:[#allocation141_spill] sm:$0xff]  ;;  %v7735_v24 = vcombine.low %v17857_v55, %v17856_v33  ;;  %v7646_v42 = vrot.slane %v7632_v0, %v12074_v19 }
 0x85f   : > { %v15855_v50 = vpop.xlane.xlu1 %8669  ;;  %v7719_v25 = vcombine.low %v17855_v57, %v17854_v56  ;;  %v7759_v17 = vrot.slane %v7751_v60, %v12050_v12  ;;  %v8893_v58 = vsel %vm8247_vm11, %v7566_v44, -inf  ;;  %v7648_v45 = vcombine.high %v7582_v47, %v7598_v49 }
 0x860   : > { %17849 = vst [vmem:[#allocation23_spill] sm:$0xff] %v15855_v50  ;;  %8882 = vmax.xlane.f32.xlu0 %v8881_v27  ;;  %v7743_v9 = vrot.slane %v7735_v24, %v12050_v12  ;;  %v7655_v60 = vrot.slane %v7647_v8, %v12074_v19 }
 0x861   : > { %v15864_v35 = vpop.xlane.xlu0 %8672  ;;  %v7727_v0 = vrot.slane %v7719_v25, %v12050_v12 }
 0x862   : > { %8885 = vmax.xlane.f32.xlu1 %v8884_v15  ;;  %17850 = vst [vmem:[#allocation96_spill] sm:$0xff] %v15864_v35  ;;  %v7703_v15 = vcombine.low %v17859_v14, %v17858_v5  ;;  %v7687_v35 = vrot.slane %v7679_v34, %v12074_v19  ;;  %v7799_v44 = vcombine.low %v7743_v9, %v7759_v17 }
 0x863   : > { %v15868_v26 = vpop.xlane.xlu1 %8675 }
 0x864   : > { %17851 = vst [vmem:[#allocation75_spill] sm:$0xff] %v15868_v26  ;;  %8888 = vmax.xlane.f32.xlu0 %v8887_v13  ;;  %v7696_v13 = vcombine.high %v7639_v28, %v7671_v36  ;;  %v7697_v26 = vcombine.low %v7646_v42, %v7678_v61  ;;  %v7752_v36 = vcombine.high %v17852_v23, %v14803_v40 }
 0x865   : > { %v15877_v39 = vpop.xlane.xlu0 %8678  ;;  %v7698_v28 = vcombine.high %v7646_v42, %v7678_v61  ;;  %v7699_v49 = vcombine.low %v7655_v60, %v7687_v35  ;;  %v7736_v40 = vcombine.high %v17857_v55, %v17856_v33  ;;  %v7662_v61 = vrot.slane %v7648_v45, %v12074_v19 }
 0x866   : > { %8891 = vmax.xlane.f32.xlu1 %v8890_v7  ;;  %17853 = vst [vmem:[#allocation37_spill] sm:$0xff] %v15877_v39  ;;  %v7680_v7 = vcombine.high %v7614_v38, %v7630_v41  ;;  %v8896_v39 = vsel %vm8247_vm11, %v7695_v20, -inf  ;;  %v7711_v41 = vrot.slane %v7703_v15, %v12050_v12  ;;  %v8899_v38 = vsel %vm8247_vm11, %v7696_v13, -inf }
 0x867   : > { %v15883_v27 = vpop.xlane.xlu1 %8681  ;;  %v8902_v34 = vsel %vm8247_vm11, %v7697_v26, -inf  ;;  %v7704_v26 = vcombine.high %v17859_v14, %v17858_v5  ;;  %v7766_v25 = vrot.slane %v7752_v36, %v12050_v12  ;;  %v8905_v24 = vsel %vm8247_vm11, %v7698_v28, -inf }
 0x868   : > { %8894 = vmax.xlane.f32.xlu0 %v8893_v58  ;;  %v7694_v47 = vrot.slane %v7680_v7, %v12074_v19  ;;  %v7767_v8 = vcombine.low %v7711_v41, %v7727_v0  ;;  %v7700_v42 = vcombine.high %v7655_v60, %v7687_v35  ;;  %v7800_v15 = vcombine.high %v7743_v9, %v7759_v17  ;;  %v17865_v35 = vld [vmem:[#allocation167_spill] sm:$0xff] }
 0x869   : > { %v15892_v50 = vpop.xlane.xlu0 %8684  ;;  %v8908_v58 = vsel %vm8247_vm11, %v7699_v49, -inf  ;;  %v7768_v55 = vcombine.high %v7711_v41, %v7727_v0  ;;  %v7750_v5 = vrot.slane %v7736_v40, %v12050_v12  ;;  %v7718_v9 = vrot.slane %v7704_v26, %v12050_v12  ;;  %v17868_v49 = vld [vmem:[#allocation110_spill] sm:$0xff]  ;;  %v17870_v40 = vld [vmem:[#allocation155_spill] sm:$0xff] }
 0x86a   : > { %8897 = vmax.xlane.f32.xlu1 %v8896_v39  ;;  %v7720_v39 = vcombine.high %v17855_v57, %v17854_v56  ;;  %v7701_v56 = vcombine.low %v7662_v61, %v7694_v47  ;;  %v7807_v57 = vrot.slane %v7799_v44, %v12074_v19  ;;  %v7775_v13 = vrot.slane %v7767_v8, %v12074_v19  ;;  %v17869_v8 = vld [vmem:[#allocation180_spill] sm:$0xff] }
 0x86b   : > { %v15896_v53 = vpop.xlane.xlu1 %8687  ;;  %v7887_v17 = vcombine.low %v17865_v35, %v14809_v29  ;;  %v8911_v7 = vsel %vm8247_vm11, %v7700_v42, -inf  ;;  %v7702_v60 = vcombine.high %v7662_v61, %v7694_v47  ;;  %v7815_v36 = vcombine.low %v7750_v5, %v7766_v25  ;;  %v17872_v61 = vld [vmem:[#allocation126_spill] sm:$0xff] }
 0x86c   : > { %17860 = vst [vmem:[#allocation8_spill] sm:$0xff] %v15896_v53  ;;  %8900 = vmax.xlane.f32.xlu0 %v8899_v38  ;;  %v7734_v45 = vrot.slane %v7720_v39, %v12050_v12  ;;  %v8914_v38 = vsel %vm8247_vm11, %v7701_v56, -inf  ;;  %v7831_v28 = vcombine.low %v7775_v13, %v7807_v57  ;;  %v7814_v0 = vrot.slane %v7800_v15, %v12074_v19  ;;  %v17873_v42 = vld [vmem:[#allocation62_spill] sm:$0xff] }
 0x86d   : > { %v15905_v20 = vpop.xlane.xlu0 %8690  ;;  %v7871_v26 = vcombine.low %v17870_v40, %v17869_v8  ;;  %v7782_v47 = vrot.slane %v7768_v55, %v12074_v19  ;;  %v7895_v56 = vrot.slane %v7887_v17, %v12050_v12  ;;  %v8917_v15 = vsel %vm8247_vm11, %v7702_v60, -inf }
 0x86e   : > { %8903 = vmax.xlane.f32.xlu1 %v8902_v34  ;;  %17861 = vst [vmem:[#allocation162_spill] sm:$0xff] %v15905_v20  ;;  %v7783_v44 = vcombine.low %v7718_v9, %v7734_v45  ;;  %v17867_v34 = vld [vmem:[#allocation142_spill] sm:$0xff] }
 0x86f   : > { %v15911_v23 = vpop.xlane.xlu1 %8693  ;;  %v7855_v39 = vcombine.low %v17868_v49, %v17867_v34  ;;  %v7879_v20 = vrot.slane %v7871_v26, %v12050_v12 }
 0x870   : > { %17862 = vst [vmem:[#allocation137_spill] sm:$0xff] %v15911_v23  ;;  %8906 = vmax.xlane.f32.xlu0 %v8905_v24  ;;  %v7791_v17 = vrot.slane %v7783_v44, %v12074_v19 }
 0x871   : > { %v15920_v33 = vpop.xlane.xlu0 %8696  ;;  %v7863_v55 = vrot.slane %v7855_v39, %v12050_v12  ;;  %v7935_v60 = vcombine.low %v7879_v20, %v7895_v56 }
 0x872   : > { %8909 = vmax.xlane.f32.xlu1 %v8908_v58  ;;  %17863 = vst [vmem:[#allocation105_spill] sm:$0xff] %v15920_v33  ;;  %v7839_v58 = vcombine.low %v17873_v42, %v17872_v61  ;;  %v7823_v33 = vrot.slane %v7815_v36, %v12074_v19 }
 0x873   : > { %v15924_v14 = vpop.xlane.xlu1 %8699 }
 0x874   : > { %17864 = vst [vmem:[#allocation173_spill] sm:$0xff] %v15924_v14  ;;  %8912 = vmax.xlane.f32.xlu0 %v8911_v7  ;;  %v7832_v7 = vcombine.high %v7775_v13, %v7807_v57  ;;  %v7833_v14 = vcombine.low %v7782_v47, %v7814_v0  ;;  %v7888_v57 = vcombine.high %v17865_v35, %v14809_v29 }
 0x875   : > { %v15933_v41 = vpop.xlane.xlu0 %8702  ;;  %v7834_v13 = vcombine.high %v7782_v47, %v7814_v0  ;;  %v7872_v29 = vcombine.high %v17870_v40, %v17869_v8  ;;  %v7836_v47 = vcombine.high %v7791_v17, %v7823_v33 }
 0x876   : > { %8915 = vmax.xlane.f32.xlu1 %v8914_v38  ;;  %17866 = vst [vmem:[#allocation150_spill] sm:$0xff] %v15933_v41  ;;  %v7816_v38 = vcombine.high %v7750_v5, %v7766_v25  ;;  %v8920_v41 = vsel %vm8247_vm11, %v7831_v28, -inf  ;;  %v7847_v25 = vrot.slane %v7839_v58, %v12050_v12  ;;  %v8923_v5 = vsel %vm8247_vm11, %v7832_v7, -inf }
 0x877   : > { %v15939_v24 = vpop.xlane.xlu1 %8705  ;;  %v8926_v36 = vsel %vm8247_vm11, %v7833_v14, -inf  ;;  %v7840_v14 = vcombine.high %v17873_v42, %v17872_v61  ;;  %v7902_v39 = vrot.slane %v7888_v57, %v12050_v12  ;;  %v8929_v26 = vsel %vm8247_vm11, %v7834_v13, -inf }
 0x878   : > { %17871 = vst [vmem:[#allocation121_spill] sm:$0xff] %v15939_v24  ;;  %8918 = vmax.xlane.f32.xlu0 %v8917_v15  ;;  %v7784_v24 = vcombine.high %v7718_v9, %v7734_v45  ;;  %v7835_v45 = vcombine.low %v7791_v17, %v7823_v33  ;;  %v7830_v9 = vrot.slane %v7816_v38, %v12074_v19  ;;  %v17880_v33 = vld [vmem:[#allocation168_spill] sm:$0xff]  ;;  %v8935_v38 = vsel %vm8247_vm11, %v7836_v47, -inf  ;;  %v17887_v47 = vld [vmem:[#allocation63_spill] sm:$0xff] }
 0x879   : > { %v15948_v23 = vpop.xlane.xlu0 %8708  ;;  %v7903_v44 = vcombine.low %v7847_v25, %v7863_v55  ;;  %v7936_v58 = vcombine.high %v7879_v20, %v7895_v56  ;;  %v7886_v61 = vrot.slane %v7872_v29, %v12050_v12  ;;  %v7854_v20 = vrot.slane %v7840_v14, %v12050_v12  ;;  %v17885_v29 = vld [vmem:[#allocation156_spill] sm:$0xff] }
 0x87a   : > { %8921 = vmax.xlane.f32.xlu1 %v8920_v41  ;;  %17874 = vst [vmem:[#allocation55_spill] sm:$0xff] %v15948_v23  ;;  %v7856_v41 = vcombine.high %v17868_v49, %v17867_v34  ;;  %v7798_v0 = vrot.slane %v7784_v24, %v12074_v19  ;;  %v8932_v15 = vsel %vm8247_vm11, %v7835_v45, -inf  ;;  %v7943_v49 = vrot.slane %v7935_v60, %v12074_v19  ;;  %v17883_v45 = vld [vmem:[#allocation111_spill] sm:$0xff] }
 0x87b   : > { %v15952_v53 = vpop.xlane.xlu1 %8711  ;;  %v7904_v24 = vcombine.high %v7847_v25, %v7863_v55  ;;  %v7911_v7 = vrot.slane %v7903_v44, %v12074_v19  ;;  %v8023_v56 = vcombine.low %v17880_v33, %v14824_v2  ;;  %v7951_v57 = vcombine.low %v7886_v61, %v7902_v39  ;;  %v17884_v44 = vld [vmem:[#allocation178_spill] sm:$0xff] }
 0x87c   : > { %17875 = vst [vmem:[#allocation163_spill] sm:$0xff] %v15952_v53  ;;  %8924 = vmax.xlane.f32.xlu0 %v8923_v5  ;;  %v7837_v34 = vcombine.low %v7798_v0, %v7830_v9  ;;  %v7870_v40 = vrot.slane %v7856_v41, %v12050_v12  ;;  %v7838_v17 = vcombine.high %v7798_v0, %v7830_v9  ;;  %v17886_v0 = vld [vmem:[#allocation127_spill] sm:$0xff] }
 0x87d   : > { %v15961_v28 = vpop.xlane.xlu0 %8714  ;;  %v7967_v13 = vcombine.low %v7911_v7, %v7943_v49  ;;  %v7950_v55 = vrot.slane %v7936_v58, %v12074_v19  ;;  %v8007_v14 = vcombine.low %v17885_v29, %v17884_v44  ;;  %v7918_v9 = vrot.slane %v7904_v24, %v12074_v19 }
 0x87e   : > { %8927 = vmax.xlane.f32.xlu1 %v8926_v36  ;;  %17876 = vst [vmem:[#allocation138_spill] sm:$0xff] %v15961_v28  ;;  %v8938_v5 = vsel %vm8247_vm11, %v7837_v34, -inf  ;;  %v7919_v60 = vcombine.low %v7854_v20, %v7870_v40  ;;  %v17882_v36 = vld [vmem:[#allocation143_spill] sm:$0xff]  ;;  %v7952_v34 = vcombine.high %v7886_v61, %v7902_v39  ;;  %v8941_v58 = vsel %vm8247_vm11, %v7838_v17, -inf }
 0x87f   : > { %v15967_v35 = vpop.xlane.xlu1 %8717  ;;  %v7991_v41 = vcombine.low %v17883_v45, %v17882_v36  ;;  %v7920_v28 = vcombine.high %v7854_v20, %v7870_v40  ;;  %v8015_v53 = vrot.slane %v8007_v14, %v12050_v12  ;;  %v7970_v17 = vcombine.high %v7918_v9, %v7950_v55 }
 0x880   : > { %17877 = vst [vmem:[#allocation106_spill] sm:$0xff] %v15967_v35  ;;  %8930 = vmax.xlane.f32.xlu0 %v8929_v26  ;;  %v7966_v20 = vrot.slane %v7952_v34, %v12074_v19 }
 0x881   : > { %v15976_v8 = vpop.xlane.xlu0 %8720  ;;  %v7999_v24 = vrot.slane %v7991_v41, %v12050_v12 }
 0x882   : > { %8933 = vmax.xlane.f32.xlu1 %v8932_v15  ;;  %17878 = vst [vmem:[#allocation176_spill] sm:$0xff] %v15976_v8  ;;  %v7975_v15 = vcombine.low %v17887_v47, %v17886_v0  ;;  %v7959_v8 = vrot.slane %v7951_v57, %v12074_v19 }
 0x883   : > { %v15980_v42 = vpop.xlane.xlu1 %8723 }
 0x884   : > { %17879 = vst [vmem:[#allocation151_spill] sm:$0xff] %v15980_v42  ;;  %8936 = vmax.xlane.f32.xlu0 %v8935_v38  ;;  %v7968_v38 = vcombine.high %v7911_v7, %v7943_v49  ;;  %v7969_v42 = vcombine.low %v7918_v9, %v7950_v55  ;;  %v7927_v49 = vrot.slane %v7919_v60, %v12074_v19  ;;  %v8953_v9 = vsel %vm8247_vm11, %v7970_v17, -inf }
 0x885   : > { %v15989_v25 = vpop.xlane.xlu0 %8726  ;;  %v7983_v61 = vrot.slane %v7975_v15, %v12050_v12  ;;  %v8024_v7 = vcombine.high %v17880_v33, %v14824_v2  ;;  %v7992_v60 = vcombine.high %v17883_v45, %v17882_v36  ;;  %v8008_v2 = vcombine.high %v17885_v29, %v17884_v44 }
 0x886   : > { %8939 = vmax.xlane.f32.xlu1 %v8938_v5  ;;  %17881 = vst [vmem:[#allocation122_spill] sm:$0xff] %v15989_v25  ;;  %v8031_v5 = vrot.slane %v8023_v56, %v12050_v12  ;;  %v8944_v25 = vsel %vm8247_vm11, %v7967_v13, -inf  ;;  %v8947_v56 = vsel %vm8247_vm11, %v7968_v38, -inf  ;;  %v8950_v13 = vsel %vm8247_vm11, %v7969_v42, -inf }
 0x887   : > { %v15995_v26 = vpop.xlane.xlu1 %8729  ;;  %v7971_v40 = vcombine.low %v7927_v49, %v7959_v8  ;;  %v8039_v41 = vcombine.low %v7983_v61, %v7999_v24  ;;  %v7934_v55 = vrot.slane %v7920_v28, %v12074_v19  ;;  %v7976_v42 = vcombine.high %v17887_v47, %v17886_v0 }
 0x888   : > { %8942 = vmax.xlane.f32.xlu0 %v8941_v58  ;;  %v8071_v57 = vcombine.low %v8015_v53, %v8031_v5  ;;  %v8038_v14 = vrot.slane %v8024_v7, %v12050_v12  ;;  %v7972_v15 = vcombine.high %v7927_v49, %v7959_v8  ;;  %v8072_v34 = vcombine.high %v8015_v53, %v8031_v5  ;;  %v17892_v8 = vld [vmem:[#allocation169_spill] sm:$0xff] }
 0x889   : > { %v16004_v35 = vpop.xlane.xlu0 %8732  ;;  %v8956_v58 = vsel %vm8247_vm11, %v7971_v40, -inf  ;;  %v7973_v36 = vcombine.low %v7934_v55, %v7966_v20  ;;  %v8006_v28 = vrot.slane %v7992_v60, %v12050_v12  ;;  %v8040_v29 = vcombine.high %v7983_v61, %v7999_v24  ;;  %v17894_v40 = vld [vmem:[#allocation144_spill] sm:$0xff] }
 0x88a   : > { %8945 = vmax.xlane.f32.xlu1 %v8944_v25  ;;  %v8079_v45 = vrot.slane %v8071_v57, %v12074_v19  ;;  %v8022_v0 = vrot.slane %v8008_v2, %v12050_v12  ;;  %v8047_v38 = vrot.slane %v8039_v41, %v12074_v19  ;;  %v7990_v53 = vrot.slane %v7976_v42, %v12050_v12  ;;  %v17895_v60 = vld [vmem:[#allocation112_spill] sm:$0xff]  ;;  %v17896_v2 = vld [vmem:[#allocation181_spill] sm:$0xff] }
 0x88b   : > { %v16008_v39 = vpop.xlane.xlu1 %8735  ;;  %v8159_v5 = vcombine.low %v17892_v8, %v14827_v10  ;;  %v8959_v49 = vsel %vm8247_vm11, %v7972_v15, -inf  ;;  %v7974_v7 = vcombine.high %v7934_v55, %v7966_v20  ;;  %v8962_v17 = vsel %vm8247_vm11, %v7973_v36, -inf  ;;  %v17897_v42 = vld [vmem:[#allocation157_spill] sm:$0xff]  ;;  %v17899_v55 = vld [vmem:[#allocation128_spill] sm:$0xff] }
 0x88c   : > { %8948 = vmax.xlane.f32.xlu0 %v8947_v56  ;;  %v8087_v56 = vcombine.low %v8022_v0, %v8038_v14  ;;  %v8103_v57 = vcombine.low %v8047_v38, %v8079_v45  ;;  %v8086_v24 = vrot.slane %v8072_v34, %v12074_v19  ;;  %v8127_v41 = vcombine.low %v17895_v60, %v17894_v40  ;;  %v17900_v15 = vld [vmem:[#allocation64_spill] sm:$0xff] }
 0x88d   : > { %v16017_v25 = vpop.xlane.xlu0 %8738  ;;  %v8054_v20 = vrot.slane %v8040_v29, %v12074_v19  ;;  %v8111_v36 = vcombine.low %v17900_v15, %v17899_v55  ;;  %v8965_v34 = vsel %vm8247_vm11, %v7974_v7, -inf  ;;  %v8167_v23 = vrot.slane %v8159_v5, %v12050_v12 }
 0x88e   : > { %8951 = vmax.xlane.f32.xlu1 %v8950_v13  ;;  %17888 = vst [vmem:[#allocation57_spill] sm:$0xff] %v16017_v25  ;;  %v8055_v13 = vcombine.low %v7990_v53, %v8006_v28  ;;  %v8135_v29 = vrot.slane %v8127_v41, %v12050_v12 }
 0x88f   : > { %v16023_v33 = vpop.xlane.xlu1 %8741  ;;  %v8106_v7 = vcombine.high %v8054_v20, %v8086_v24 }
 0x890   : > { %17889 = vst [vmem:[#allocation164_spill] sm:$0xff] %v16023_v33  ;;  %8954 = vmax.xlane.f32.xlu0 %v8953_v9  ;;  %v8143_v9 = vcombine.low %v17897_v42, %v17896_v2 }
 0x891   : > { %v16032_v44 = vpop.xlane.xlu0 %8744 }
 0x892   : > { %8957 = vmax.xlane.f32.xlu1 %v8956_v58  ;;  %17890 = vst [vmem:[#allocation139_spill] sm:$0xff] %v16032_v44  ;;  %v8095_v44 = vrot.slane %v8087_v56, %v12074_v19  ;;  %v8151_v25 = vrot.slane %v8143_v9, %v12050_v12 }
 0x893   : > { %v16036_v47 = vpop.xlane.xlu1 %8747 }
 0x894   : > { %17891 = vst [vmem:[#allocation107_spill] sm:$0xff] %v16036_v47  ;;  %8960 = vmax.xlane.f32.xlu0 %v8959_v49  ;;  %v8088_v49 = vcombine.high %v8022_v0, %v8038_v14  ;;  %v8105_v47 = vcombine.low %v8054_v20, %v8086_v24  ;;  %v8119_v0 = vrot.slane %v8111_v36, %v12050_v12  ;;  %v8977_v20 = vsel %vm8247_vm11, %v8106_v7, -inf }
 0x895   : > { %v16045_v61 = vpop.xlane.xlu0 %8750  ;;  %v8207_v56 = vcombine.low %v8151_v25, %v8167_v23 }
 0x896   : > { %8963 = vmax.xlane.f32.xlu1 %v8962_v17  ;;  %17893 = vst [vmem:[#allocation175_spill] sm:$0xff] %v16045_v61  ;;  %v8104_v17 = vcombine.high %v8047_v38, %v8079_v45  ;;  %v8968_v61 = vsel %vm8247_vm11, %v8103_v57, -inf  ;;  %v8063_v45 = vrot.slane %v8055_v13, %v12074_v19  ;;  %v8160_v38 = vcombine.high %v17892_v8, %v14827_v10 }
 0x897   : > { %v16051_v58 = vpop.xlane.xlu1 %8753  ;;  %v8974_v57 = vsel %vm8247_vm11, %v8105_v47, -inf  ;;  %v8128_v13 = vcombine.high %v17895_v60, %v17894_v40  ;;  %v8175_v41 = vcombine.low %v8119_v0, %v8135_v29  ;;  %v8144_v10 = vcombine.high %v17897_v42, %v17896_v2 }
 0x898   : > { %17898 = vst [vmem:[#allocation152_spill] sm:$0xff] %v16051_v58  ;;  %8966 = vmax.xlane.f32.xlu0 %v8965_v34  ;;  %v8056_v58 = vcombine.high %v7990_v53, %v8006_v28  ;;  %v8971_v5 = vsel %vm8247_vm11, %v8104_v17, -inf  ;;  %v8107_v28 = vcombine.low %v8063_v45, %v8095_v44  ;;  %v8102_v53 = vrot.slane %v8088_v49, %v12074_v19 }
 0x899   : > { %v16060_v33 = vpop.xlane.xlu0 %8756  ;;  %v8112_v47 = vcombine.high %v17900_v15, %v17899_v55  ;;  %v8174_v9 = vrot.slane %v8160_v38, %v12050_v12  ;;  %v8108_v36 = vcombine.high %v8063_v45, %v8095_v44  ;;  %v8208_v49 = vcombine.high %v8151_v25, %v8167_v23 }
 0x89a   : > { %8969 = vmax.xlane.f32.xlu1 %v8968_v61  ;;  %17901 = vst [vmem:[#allocation123_spill] sm:$0xff] %v16060_v33  ;;  %v8070_v24 = vrot.slane %v8056_v58, %v12074_v19  ;;  %v8980_v34 = vsel %vm8247_vm11, %v8107_v28, -inf  ;;  %v8215_v60 = vrot.slane %v8207_v56, %v12074_v19  ;;  %v8142_v42 = vrot.slane %v8128_v13, %v12050_v12 }
 0x89b   : > { %v16064_v14 = vpop.xlane.xlu1 %8759  ;;  %v8176_v58 = vcombine.high %v8119_v0, %v8135_v29  ;;  %v8158_v55 = vrot.slane %v8144_v10, %v12050_v12  ;;  %v8183_v17 = vrot.slane %v8175_v41, %v12074_v19  ;;  %v8126_v23 = vrot.slane %v8112_v47, %v12050_v12 }
 0x89c   : > { %17902 = vst [vmem:[#allocation59_spill] sm:$0xff] %v16064_v14  ;;  %8972 = vmax.xlane.f32.xlu0 %v8971_v5  ;;  %v8109_v40 = vcombine.low %v8070_v24, %v8102_v53  ;;  %v8983_v25 = vsel %vm8247_vm11, %v8108_v36, -inf  ;;  %v8110_v44 = vcombine.high %v8070_v24, %v8102_v53  ;;  %v8222_v7 = vrot.slane %v8208_v49, %v12074_v19 }
 0x89d   : > { %v16073_v61 = vpop.xlane.xlu0 %8762  ;;  %v8223_v45 = vcombine.low %v8158_v55, %v8174_v9  ;;  %v8239_v5 = vcombine.low %v8183_v17, %v8215_v60  ;;  %v8191_v0 = vcombine.low %v8126_v23, %v8142_v42  ;;  %v8240_v28 = vcombine.high %v8183_v17, %v8215_v60 }
 0x89e   : > { %8975 = vmax.xlane.f32.xlu1 %v8974_v57  ;;  %17903 = vst [vmem:[#allocation165_spill] sm:$0xff] %v16073_v61  ;;  %v8986_v38 = vsel %vm8247_vm11, %v8109_v40, -inf  ;;  %v8190_v57 = vrot.slane %v8176_v58, %v12074_v19  ;;  %v8989_v12 = vsel %vm8247_vm11, %v8110_v44, -inf  ;;  %v8224_v13 = vcombine.high %v8158_v55, %v8174_v9 }
 0x89f   : > { %v16079_v8 = vpop.xlane.xlu1 %8765  ;;  %v8992_v53 = vsel %vm8247_vm11, %v8239_v5, -inf  ;;  %v8231_v10 = vrot.slane %v8223_v45, %v12074_v19  ;;  %v8192_v47 = vcombine.high %v8126_v23, %v8142_v42  ;;  %v8199_v36 = vrot.slane %v8191_v0, %v12074_v19 }
 0x8a0   : > { %17904 = vst [vmem:[#allocation140_spill] sm:$0xff] %v16079_v8  ;;  %8978 = vmax.xlane.f32.xlu0 %v8977_v20  ;;  %v8241_v41 = vcombine.low %v8190_v57, %v8222_v7  ;;  %v8995_v49 = vsel %vm8247_vm11, %v8240_v28, -inf  ;;  %v8238_v60 = vrot.slane %v8224_v13, %v12074_v19  ;;  %v11998_v17 = vmov 1966171168  }
 0x8a1   : > { %v16088_v2 = vpop.xlane.xlu0 %8768  ;;  %v8243_v9 = vcombine.low %v8199_v36, %v8231_v10  ;;  %v8206_v42 = vrot.slane %v8192_v47, %v12074_v19  ;;  %v9022_v23 = vunpack.c.l.s4 %v11998_v17  ;;  %v8244_v44 = vcombine.high %v8199_v36, %v8231_v10  ;;  %v2403_v47 = vld [vmem:[%s17164_s2] sm:$0xff] }
 0x8a2   : > { %8981 = vmax.xlane.f32.xlu1 %v8980_v34  ;;  %17905 = vst [vmem:[#allocation108_spill] sm:$0xff] %v16088_v2  ;;  %v8242_v34 = vcombine.high %v8190_v57, %v8222_v7  ;;  %v8998_v40 = vsel %vm8247_vm11, %v8241_v41, -inf }
 0x8a3   : > { %v16092_v15 = vpop.xlane.xlu1 %8771  ;;  %v9004_v45 = vsel %vm8247_vm11, %v8243_v9, -inf  ;;  %v9023_v0 = vunpack.c.0.s8 %v9022_v23  ;;  %v9007_v57 = vsel %vm8247_vm11, %v8244_v44, -inf  ;;  %v2404_v23 = vld [vmem:[%s17164_s2 + $0x8] sm:$0xff] }
 0x8a4   : > { %17906 = vst [vmem:[#allocation179_spill] sm:$0xff] %v16092_v15  ;;  %8984 = vmax.xlane.f32.xlu0 %v8983_v25  ;;  %v9001_v25 = vsel %vm8247_vm11, %v8242_v34, -inf }
 0x8a5   : > { %v16099_v29 = vpop.xlane.xlu0 %8774 }
 0x8a6   : > { %8987 = vmax.xlane.f32.xlu1 %v8986_v38  ;;  %17907 = vst [vmem:[#allocation153_spill] sm:$0xff] %v16099_v29  ;;  %v8245_v38 = vcombine.low %v8206_v42, %v8238_v60 }
 0x8a7   : > { %v16101_v56 = vpop.xlane.xlu1 %8777 }
 0x8a8   : > { %8990 = vmax.xlane.f32.xlu0 %v8989_v12  ;;  %v8246_v12 = vcombine.high %v8206_v42, %v8238_v60  ;;  %v9010_v19 = vsel %vm8247_vm11, %v8245_v38, -inf }
 0x8a9   : > { %v16107_v24 = vpop.xlane.xlu0 %8780 }
 0x8aa   : > { %8993 = vmax.xlane.f32.xlu1 %v8992_v53  ;;  %v17909_v53 = vld [vmem:[#allocation2_spill] sm:$0xff]  ;;  %v9013_v10 = vsel %vm8247_vm11, %v8246_v12, -inf }
 0x8ab   : > { %v16109_v20 = vpop.xlane.xlu1 %8783  ;;  %v16133_v41 = vsub.s32 %v9023_v0, %v17909_v53  ;;  %v16150_v17 = vsub.s32 0, %v17909_v53 }
 0x8ac   : > { %8996 = vmax.xlane.f32.xlu0 %v8995_v49 }
 0x8ad   : > { %v16115_v58 = vpop.xlane.xlu0 %8786  ;;  %v9027_v34 = vrot.slane %v2403_v47, %v16133_v41  ;;  %v9076_v12 = vrot.slane %v2404_v23, %v16133_v41 }
 0x8ae   : > { %8999 = vmax.xlane.f32.xlu1 %v8998_v40 }
 0x8af   : > { %v16117_v55 = vpop.xlane.xlu1 %8789  ;;  %v9035_v9 = vcombine.high %v9027_v34, %v9027_v34  ;;  %v9043_v42 = vrot.slane %v9027_v34, %v16133_v41 }
 0x8b0   : > { %9002 = vmax.xlane.f32.xlu0 %v9001_v25 }
 0x8b1   : > { %v16122_v5 = vpop.xlane.xlu0 %8792  ;;  %v9057_v44 = vrot.slane %v9035_v9, %v16133_v41  ;;  %v9219_v38 = vrot.slane %v9043_v42, %v16150_v17  ;;  %v9065_v0 = vcombine.high %v9043_v42, %v9043_v42  ;;  %v9092_v9 = vrot.slane %v9076_v12, %v16133_v41 }
 0x8b2   : > { %9005 = vmax.xlane.f32.xlu1 %v9004_v45 }
 0x8b3   : > { %v16124_v7 = vpop.xlane.xlu1 %8795 }
 0x8b4   : > { %9008 = vmax.xlane.f32.xlu0 %v9007_v57  ;;  %v9020_v57 = vcombine.high %v2403_v47, %v2403_v47 }
 0x8b5   : > { %v16128_v28 = vpop.xlane.xlu0 %8798 }
 0x8b6   : > { %9011 = vmax.xlane.f32.xlu1 %v9010_v19 }
 0x8b7   : > { %v16130_v13 = vpop.xlane.xlu1 %8801 }
 0x8b8   : > { %17908 = vst [vmem:[#allocation124_spill] sm:$0xff] %v16130_v13  ;;  %9014 = vmax.xlane.f32.xlu0 %v9013_v10  ;;  %v9067_v10 = vcombine.high %v9057_v44, %v9057_v44 }
 0x8b9   : > { %v16139_v36 = vpop.xlane.xlu0 %8804 }
 0x8ba   : > { %17910 = vst [vmem:[#allocation60_spill] sm:$0xff] %v16139_v36  ;;  %v9231_v42 = vrot.slane %v9067_v10, %v16150_v17  ;;  %v9114_v36 = vcombine.high %v9092_v9, %v9092_v9 }
 0x8bb   : > { %v16141_v49 = vpop.xlane.xlu1 %8807 }
 0x8bc   : > { %17911 = vst [vmem:[#allocation166_spill] sm:$0xff] %v16141_v49 }
 0x8bd   : > { %v16144_v40 = vpop.xlane.xlu0 %8810 }
 0x8be   : > { %17912 = vst [vmem:[#allocation141_spill] sm:$0xff] %v16144_v40  ;;  %v9069_v40 = vcombine.high %v2404_v23, %v2404_v23 }
 0x8bf   : > { %v16146_v60 = vpop.xlane.xlu1 %8813 }
 0x8c0   : > { %17913 = vst [vmem:[#allocation109_spill] sm:$0xff] %v16146_v60  ;;  %v9227_v60 = vrot.slane %v9065_v0, %v16150_v17  ;;  %v9083_v0 = vrot.slane %v9069_v40, %v16133_v41 }
 0x8c1   : > { %v16155_v25 = vpop.xlane.xlu0 %8816 }
 0x8c2   : > { %17914 = vst [vmem:[#allocation177_spill] sm:$0xff] %v16155_v25  ;;  %v9034_v25 = vrot.slane %v9020_v57, %v16133_v41  ;;  %v9099_v29 = vrot.slane %v9083_v0, %v16133_v41 }
 0x8c3   : > { %v16158_v45 = vpop.xlane.xlu1 %8819 }
 0x8c4   : > { %17915 = vst [vmem:[#allocation154_spill] sm:$0xff] %v16158_v45  ;;  %v9036_v47 = vcombine.high %v9034_v25, %v9034_v25 }
 0x8c5   : > { %v16162_v19 = vpop.xlane.xlu0 %8822 }
 0x8c6   : > { %17916 = vst [vmem:[#allocation125_spill] sm:$0xff] %v16162_v19  ;;  %v9050_v19 = vrot.slane %v9034_v25, %v16133_v41  ;;  %v9064_v57 = vrot.slane %v9036_v47, %v16133_v41  ;;  %v2405_v25 = vld [vmem:[%s17164_s2 + $0x10] sm:$0xff]  ;;  %v9267_v47 = vrot.slane %v9099_v29, %v16150_v17 }
 0x8c7   : > { %9345 = vperm.xlu1 %11957, %v9219_v38   ;;  %v16164_v34 = vpop.xlane.xlu1 %8825  ;;  %v9223_v38 = vrot.slane %v9057_v44, %v16150_v17  ;;  %v9118_v33 = vcombine.high %v2405_v25, %v2405_v25 }
 0x8c8   : > { %v9235_v10 = vrot.slane %v9050_v19, %v16150_v17  ;;  %v9239_v40 = vrot.slane %v9064_v57, %v16150_v17  ;;  %v9066_v15 = vcombine.high %v9050_v19, %v9050_v19  ;;  %v9068_v61 = vcombine.high %v9064_v57, %v9064_v57 }
 0x8c9   : > { %v16169_v45 = vpop.xlane.xlu0 %8828 }
 0x8ca   : > { %v9243_v8 = vrot.slane %v9066_v15, %v16150_v17 }
 0x8cb   : > { %9353 = vperm.xlu1 %11957, %v9227_v60   ;;  %v16172_v49 = vpop.xlane.xlu1 %8831  ;;  %v9259_v60 = vrot.slane %v9114_v36, %v16150_v17  ;;  %v9125_v36 = vrot.slane %v2405_v25, %v16133_v41 }
 0x8cd   : > { %v16177_v13 = vpop.xlane.xlu0 %8834 }
 0x8ce   : > { %9349 = vperm.xlu0 %11958, %v9223_v38   ;;  %v9115_v38 = vcombine.high %v9099_v29, %v9099_v29  ;;  %v9247_v29 = vrot.slane %v9068_v61, %v16150_v17 }
 0x8cf   : > { %9357 = vperm.xlu1 %11957, %v9231_v42   ;;  %v16180_v23 = vpop.xlane.xlu1 %8837 }
 0x8d0   : > { %v9275_v19 = vrot.slane %v9115_v38, %v16150_v17 }
 0x8d1   : > { %v16188_v44 = vpop.xlane.xlu0 %8840 }
 0x8d2   : > { %17917 = vst [vmem:[#allocation61_spill] sm:$0xff] %v16188_v44  ;;  %9385 = vperm.xlu0 %11958, %v9259_v60  }
 0x8d3   : > { %9361 = vperm.xlu1 %11957, %v9235_v10   ;;  %v16191_v42 = vpop.xlane.xlu1 %8843  ;;  %v9141_v10 = vrot.slane %v9125_v36, %v16133_v41 }
 0x8d4   : > { %17918 = vst [vmem:[#allocation167_spill] sm:$0xff] %v16191_v42  ;;  %v9084_v42 = vcombine.high %v9076_v12, %v9076_v12  ;;  %v2406_v12 = vld [vmem:[%s17164_s2 + $0x18] sm:$0xff] }
 0x8d5   : > { %v16195_v2 = vpop.xlane.xlu0 %8846  ;;  %v9283_v15 = vrot.slane %v9141_v10, %v16150_v17  ;;  %v9163_v57 = vcombine.high %v9141_v10, %v9141_v10 }
 0x8d6   : > { %9393 = vperm.xlu0 %11958, %v9267_v47   ;;  %v9106_v38 = vrot.slane %v9084_v42, %v16133_v41  ;;  %v9085_v42 = vcombine.high %v9083_v0, %v9083_v0 }
 0x8d7   : > { %9365 = vperm.xlu1 %11957, %v9239_v40   ;;  %v16198_v14 = vpop.xlane.xlu1 %8849  ;;  %v9132_v40 = vrot.slane %v9118_v33, %v16133_v41  ;;  %v9291_v61 = vrot.slane %v9163_v57, %v16150_v17  ;;  %v9174_v57 = vrot.slane %v2406_v12, %v16133_v41 }
 0x8d8   : > { %17919 = vst [vmem:[#allocation142_spill] sm:$0xff] %v16198_v14  ;;  %v9255_v33 = vrot.slane %v9106_v38, %v16150_v17  ;;  %v9116_v10 = vcombine.high %v9106_v38, %v9106_v38  ;;  %v9167_v38 = vcombine.high %v2406_v12, %v2406_v12  ;;  %v9133_v14 = vcombine.high %v9125_v36, %v9125_v36 }
 0x8d9   : > { %v16202_v60 = vpop.xlane.xlu0 %8852 }
 0x8da   : > { %17920 = vst [vmem:[#allocation110_spill] sm:$0xff] %v16202_v60  ;;  %9401 = vperm.xlu0 %11958, %v9275_v19   ;;  %v9251_v60 = vrot.slane %v9092_v9, %v16150_v17 }
 0x8db   : > { %9369 = vperm.xlu1 %11957, %v9243_v8   ;;  %v16205_v44 = vpop.xlane.xlu1 %8855  ;;  %v9148_v8 = vrot.slane %v9132_v40, %v16133_v41 }
 0x8dc   : > { %17921 = vst [vmem:[#allocation180_spill] sm:$0xff] %v16205_v44  ;;  %v9113_v44 = vrot.slane %v9085_v42, %v16133_v41  ;;  %v9181_v42 = vrot.slane %v9167_v38, %v16133_v41 }
 0x8dd   : > { %v16209_v47 = vpop.xlane.xlu0 %8858  ;;  %v9299_v9 = vrot.slane %v9148_v8, %v16150_v17 }
 0x8de   : > { %17922 = vst [vmem:[#allocation155_spill] sm:$0xff] %v16209_v47  ;;  %9409 = vperm.xlu0 %11958, %v9283_v15   ;;  %v9164_v15 = vcombine.high %v9148_v8, %v9148_v8  ;;  %v9263_v47 = vrot.slane %v9116_v10, %v16150_v17  ;;  %v9271_v8 = vrot.slane %v9113_v44, %v16150_v17 }
 0x8df   : > { %9373 = vperm.xlu1 %11957, %v9247_v29   ;;  %v16212_v25 = vpop.xlane.xlu1 %8861  ;;  %v9197_v36 = vrot.slane %v9181_v42, %v16133_v41 }
 0x8e0   : > { %17923 = vst [vmem:[#allocation126_spill] sm:$0xff] %v16212_v25  ;;  %v9307_v0 = vrot.slane %v9164_v15, %v16150_v17  ;;  %v9155_v15 = vrot.slane %v9133_v14, %v16133_v41 }
 0x8e1   : > { %v16220_v19 = vpop.xlane.xlu0 %8864  ;;  %v9331_v14 = vrot.slane %v9197_v36, %v16150_v17 }
 0x8e2   : > { %17924 = vst [vmem:[#allocation62_spill] sm:$0xff] %v16220_v19  ;;  %9417 = vperm.xlu0 %11958, %v9291_v61  }
 0x8e3   : > { %9377 = vperm.xlu1 %11957, %v9251_v60   ;;  %v16223_v29 = vpop.xlane.xlu1 %8867  ;;  %v9190_v60 = vrot.slane %v9174_v57, %v16133_v41 }
 0x8e4   : > { %17925 = vst [vmem:[#allocation168_spill] sm:$0xff] %v16223_v29  ;;  %v9117_v29 = vcombine.high %v9113_v44, %v9113_v44 }
 0x8e5   : > { %v16227_v25 = vpop.xlane.xlu0 %8870  ;;  %v9212_v10 = vcombine.high %v9190_v60, %v9190_v60 }
 0x8e6   : > { %17926 = vst [vmem:[#allocation143_spill] sm:$0xff] %v16227_v25  ;;  %9425 = vperm.xlu0 %11958, %v9299_v9  }
 0x8e7   : > { %9381 = vperm.xlu1 %11957, %v9255_v33   ;;  %v16231_v19 = vpop.xlane.xlu1 %8873  ;;  %v9315_v33 = vrot.slane %v9190_v60, %v16150_v17  ;;  %v9323_v44 = vrot.slane %v9212_v10, %v16150_v17  ;;  %v9165_v60 = vcombine.high %v9155_v15, %v9155_v15 }
 0x8e9   : > { %v16235_v61 = vpop.xlane.xlu0 %8876 }
 0x8ea   : > { %17927 = vst [vmem:[#allocation111_spill] sm:$0xff] %v16235_v61  ;;  %9433 = vperm.xlu0 %11958, %v9307_v0   ;;  %v9279_v61 = vrot.slane %v9117_v29, %v16150_v17  ;;  %v9287_v0 = vrot.slane %v9155_v15, %v16150_v17 }
 0x8eb   : > { %9389 = vperm.xlu1 %11957, %v9263_v47   ;;  %v16238_v25 = vpop.xlane.xlu1 %8879 }
 0x8ed   : > { %v16242_v9 = vpop.xlane.xlu0 %8882 }
 0x8ee   : > { %17928 = vst [vmem:[#allocation178_spill] sm:$0xff] %v16242_v9  ;;  %9441 = vperm.xlu0 %11958, %v9315_v33   ;;  %v9295_v33 = vrot.slane %v9165_v60, %v16150_v17 }
 0x8ef   : > { %9397 = vperm.xlu1 %11957, %v9271_v8   ;;  %v16245_v12 = vpop.xlane.xlu1 %8885  ;;  %v9134_v8 = vcombine.high %v9132_v40, %v9132_v40 }
 0x8f0   : > { %17929 = vst [vmem:[#allocation156_spill] sm:$0xff] %v16245_v12  ;;  %v9213_v12 = vcombine.high %v9197_v36, %v9197_v36 }
 0x8f1   : > { %v16250_v47 = vpop.xlane.xlu0 %8888  ;;  %v9162_v10 = vrot.slane %v9134_v8, %v16133_v41 }
 0x8f2   : > { %17930 = vst [vmem:[#allocation127_spill] sm:$0xff] %v16250_v47  ;;  %9449 = vperm.xlu0 %11958, %v9323_v44   ;;  %v9339_v15 = vrot.slane %v9213_v12, %v16150_v17 }
 0x8f3   : > { %9405 = vperm.xlu1 %11957, %v9279_v61   ;;  %v16253_v38 = vpop.xlane.xlu1 %8891  ;;  %v9303_v40 = vrot.slane %v9162_v10, %v16150_v17  ;;  %v9166_v36 = vcombine.high %v9162_v10, %v9162_v10 }
 0x8f4   : > { %17931 = vst [vmem:[#allocation63_spill] sm:$0xff] %v16253_v38 }
 0x8f5   : > { %v16256_v9 = vpop.xlane.xlu0 %8894  ;;  %v9311_v60 = vrot.slane %v9166_v36, %v16150_v17 }
 0x8f6   : > { %17932 = vst [vmem:[#allocation169_spill] sm:$0xff] %v16256_v9  ;;  %9457 = vperm.xlu0 %11958, %v9331_v14   ;;  %v9182_v9 = vcombine.high %v9174_v57, %v9174_v57 }
 0x8f7   : > { %9413 = vperm.xlu1 %11957, %v9287_v0   ;;  %v16258_v29 = vpop.xlane.xlu1 %8897 }
 0x8f8   : > { %17933 = vst [vmem:[#allocation144_spill] sm:$0xff] %v16258_v29  ;;  %v9204_v14 = vrot.slane %v9182_v9, %v16133_v41 }
 0x8f9   : > { %v16263_v61 = vpop.xlane.xlu0 %8900 }
 0x8fa   : > { %17934 = vst [vmem:[#allocation112_spill] sm:$0xff] %v16263_v61  ;;  %9465 = vperm.xlu0 %11958, %v9339_v15   ;;  %v9183_v15 = vcombine.high %v9181_v42, %v9181_v42 }
 0x8fb   : > { %9421 = vperm.xlu1 %11957, %v9295_v33   ;;  %v16265_v44 = vpop.xlane.xlu1 %8903  ;;  %v9319_v33 = vrot.slane %v9204_v14, %v16150_v17 }
 0x8fc   : > { %17935 = vst [vmem:[#allocation181_spill] sm:$0xff] %v16265_v44  ;;  %v9214_v44 = vcombine.high %v9204_v14, %v9204_v14  ;;  %v9211_v36 = vrot.slane %v9183_v15, %v16133_v41 }
 0x8fd   : > { %v16268_v0 = vpop.xlane.xlu0 %8906 }
 0x8fe   : > { %17936 = vst [vmem:[#allocation157_spill] sm:$0xff] %v16268_v0 }
 0x8ff   : > { %9429 = vperm.xlu1 %11957, %v9303_v40   ;;  %v16270_v29 = vpop.xlane.xlu1 %8909  ;;  %v9327_v40 = vrot.slane %v9214_v44, %v16150_v17 }
 0x900   : > { %17937 = vst [vmem:[#allocation128_spill] sm:$0xff] %v16270_v29 }
 0x901   : > { %v16274_v12 = vpop.xlane.xlu0 %8912 }
 0x902   : > { %17938 = vst [vmem:[#allocation64_spill] sm:$0xff] %v16274_v12 }
 0x903   : > { %9437 = vperm.xlu1 %11957, %v9311_v60   ;;  %v16276_v8 = vpop.xlane.xlu1 %8915  ;;  %v9335_v60 = vrot.slane %v9211_v36, %v16150_v17 }
 0x904   : > { %17939 = vst [vmem:[#allocation2_spill] sm:$0xff] %v16276_v8  ;;  %v9215_v8 = vcombine.high %v9211_v36, %v9211_v36 }
 0x905   : > { %v16279_v10 = vpop.xlane.xlu0 %8918 }
 0x906   : > { %17940 = vst [vmem:[#allocation182_spill] sm:$0xff] %v16279_v10  ;;  %v9343_v14 = vrot.slane %v9215_v8, %v16150_v17 }
 0x907   : > { %9445 = vperm.xlu1 %11957, %v9319_v33   ;;  %v16281_v57 = vpop.xlane.xlu1 %8921 }
 0x908   : > { %17941 = vst [vmem:[#allocation183_spill] sm:$0xff] %v16281_v57 }
 0x909   : > { %v16285_v29 = vpop.xlane.xlu0 %8924 }
 0x90a   : > { %17942 = vst [vmem:[#allocation184_spill] sm:$0xff] %v16285_v29 }
 0x90b   : > { %9453 = vperm.xlu1 %11957, %v9327_v40   ;;  %v16287_v9 = vpop.xlane.xlu1 %8927 }
 0x90c   : > { %17943 = vst [vmem:[#allocation185_spill] sm:$0xff] %v16287_v9 }
 0x90d   : > { %v16290_v12 = vpop.xlane.xlu0 %8930 }
 0x90e   : > { %17944 = vst [vmem:[#allocation186_spill] sm:$0xff] %v16290_v12 }
 0x90f   : > { %9461 = vperm.xlu1 %11957, %v9335_v60   ;;  %v16292_v42 = vpop.xlane.xlu1 %8933 }
 0x910   : > { %17945 = vst [vmem:[#allocation187_spill] sm:$0xff] %v16292_v42 }
 0x911   : > { %v16295_v33 = vpop.xlane.xlu0 %8936 }
 0x912   : > { %17946 = vst [vmem:[#allocation188_spill] sm:$0xff] %v16295_v33 }
 0x913   : > { %9469 = vperm.xlu1 %11957, %v9343_v14   ;;  %v16297_v44 = vpop.xlane.xlu1 %8939 }
 0x914   : > { %17947 = vst [vmem:[#allocation189_spill] sm:$0xff] %v16297_v44 }
 0x915   : > { %v16299_v41 = vpop.xlane.xlu0 %8942 }
 0x916   : > { %17948 = vst [vmem:[#allocation190_spill] sm:$0xff] %v16299_v41 }
 0x917   : > { %v16301_v15 = vpop.xlane.xlu1 %8945 }
 0x918   : > { %17949 = vst [vmem:[#allocation191_spill] sm:$0xff] %v16301_v15 }
 0x919   : > { %v16303_v40 = vpop.xlane.xlu0 %8948 }
 0x91a   : > { %17950 = vst [vmem:[#allocation192_spill] sm:$0xff] %v16303_v40 }
 0x91b   : > { %v16305_v10 = vpop.xlane.xlu1 %8951 }
 0x91c   : > { %17951 = vst [vmem:[#allocation193_spill] sm:$0xff] %v16305_v10 }
 0x91d   : > { %v16307_v36 = vpop.xlane.xlu0 %8954 }
 0x91e   : > { %17952 = vst [vmem:[#allocation194_spill] sm:$0xff] %v16307_v36 }
 0x91f   : > { %v16309_v60 = vpop.xlane.xlu1 %8957 }
 0x920   : > { %17953 = vst [vmem:[#allocation195_spill] sm:$0xff] %v16309_v60 }
 0x921   : > { %v16311_v0 = vpop.xlane.xlu0 %8960 }
 0x922   : > { %17954 = vst [vmem:[#allocation196_spill] sm:$0xff] %v16311_v0 }
 0x923   : > { %v16313_v17 = vpop.xlane.xlu1 %8963 }
 0x924   : > { %17955 = vst [vmem:[#allocation197_spill] sm:$0xff] %v16313_v17 }
 0x925   : > { %v16315_v8 = vpop.xlane.xlu0 %8966 }
 0x926   : > { %17956 = vst [vmem:[#allocation198_spill] sm:$0xff] %v16315_v8 }
 0x927   : > { %v16317_v14 = vpop.xlane.xlu1 %8969 }
 0x928   : > { %17957 = vst [vmem:[#allocation199_spill] sm:$0xff] %v16317_v14 }
 0x929   : > { %v16321_v41 = vpop.xlane.xlu0 %8972 }
 0x92a   : > { %17959 = vst [vmem:[#allocation201_spill] sm:$0xff] %v16321_v41 }
 0x92b   : > { %v16319_v61 = vpop.xlane.xlu1 %8975 }
 0x92c   : > { %17958 = vst [vmem:[#allocation200_spill] sm:$0xff] %v16319_v61  ;;  %v17969_v61 = vlaneseq }
 0x92d   : > { %v16325_v40 = vpop.xlane.xlu0 %8978 }
 0x92e   : > { %17961 = vst [vmem:[#allocation203_spill] sm:$0xff] %v16325_v40  ;;  %v10241_v41 = vand.u32 127, %v17969_v61 }
 0x92f   : > { %v16323_v15 = vpop.xlane.xlu1 %8981 }
 0x930   : > { %17960 = vst [vmem:[#allocation202_spill] sm:$0xff] %v16323_v15 }
 0x931   : > { %v16331_v60 = vpop.xlane.xlu0 %8984 }
 0x932   : > { %17964 = vst [vmem:[#allocation206_spill] sm:$0xff] %v16331_v60  ;;  %v17972_v60 = vld [vmem:[#allocation11_spill] sm:$0xff] }
 0x933   : > { %v16327_v10 = vpop.xlane.xlu1 %8987 }
 0x934   : > { %17962 = vst [vmem:[#allocation204_spill] sm:$0xff] %v16327_v10  ;;  %v16345_v10 = vsub.s32 %v10241_v41, %v17909_v53  ;;  %v17973_v53 = vld [vmem:[#allocation38_spill] sm:$0xff] }
 0x935   : > { %v16335_v17 = vpop.xlane.xlu0 %8990 }
 0x936   : > { %17966 = vst [vmem:[#allocation208_spill] sm:$0xff] %v16335_v17 }
 0x937   : > { %v16329_v36 = vpop.xlane.xlu1 %8993 }
 0x938   : > { %17963 = vst [vmem:[#allocation205_spill] sm:$0xff] %v16329_v36 }
 0x939   : > { %v16342_v44 = vpop.xlane.xlu0 %8996 }
 0x93a   : > { %17970 = vst [vmem:[#allocation211_spill] sm:$0xff] %v16342_v44  ;;  %v17971_v44 = vld [vmem:[#allocation24_spill] sm:$0xff] }
 0x93b   : > { %v16333_v0 = vpop.xlane.xlu1 %8999 }
 0x93c   : > { %17965 = vst [vmem:[#allocation207_spill] sm:$0xff] %v16333_v0 }
 0x93d   : > { %v16355_v33 = vpop.xlane.xlu0 %9002 }
 0x93e   : > { %17974 = vst [vmem:[#allocation24_spill] sm:$0xff] %v16355_v33 }
 0x93f   : > { %v16337_v8 = vpop.xlane.xlu1 %9005 }
 0x940   : > { %17967 = vst [vmem:[#allocation209_spill] sm:$0xff] %v16337_v8 }
 0x943   : > { %v16339_v14 = vpop.xlane.xlu1 %9011 }
 0x944   : > { %17968 = vst [vmem:[#allocation210_spill] sm:$0xff] %v16339_v14 }
 0x947   : > { %v9346_v36 = vpop.permute.xlu1 %9345 }
 0x948   : > { %v9472_v0 = vadd.f32 %v9346_v36, %v14840_v52  ;;  %v9473_v8 = vadd.f32 %v9346_v36, %v14844_v11  ;;  %v9474_v14 = vadd.f32 %v9346_v36, %v14853_v3  ;;  %v9475_v61 = vadd.f32 %v9346_v36, %v14870_v51 }
 0x949   : > { %v9476_v17 = vadd.f32 %v9346_v36, %v17971_v44  ;;  %v9477_v15 = vadd.f32 %v9346_v36, %v17972_v60  ;;  %v9478_v41 = vadd.f32 %v9346_v36, %v17973_v53  ;;  %v9479_v40 = vadd.f32 %v9346_v36, %v14907_v43 }
 0x94a   : > { %v9728_v42 = vmax.f32 %v9472_v0, 0.0  ;;  %v9729_v52 = vmax.f32 %v9473_v8, 0.0  ;;  %v9730_v12 = vmax.f32 %v9474_v14, 0.0  ;;  %v9731_v11 = vmax.f32 %v9475_v61, 0.0  ;;  %v17975_v61 = vld [vmem:[#allocation40_spill] sm:$0xff] }
 0x94b   : > { %v9732_v9 = vmax.f32 %v9476_v17, 0.0  ;;  %v9733_v3 = vmax.f32 %v9477_v15, 0.0  ;;  %v9734_v51 = vmax.f32 %v9478_v41, 0.0  ;;  %v9735_v29 = vmax.f32 %v9479_v40, 0.0  ;;  %v9354_v57 = vpop.permute.xlu1 %9353 }
 0x94c   : > { %v10245_v44 = vrot.slane %v9728_v42, %v16345_v10  ;;  %v10249_v60 = vrot.slane %v9729_v52, %v16345_v10  ;;  %v10253_v53 = vrot.slane %v9730_v12, %v16345_v10  ;;  %v10257_v43 = vrot.slane %v9731_v11, %v16345_v10  ;;  %v17977_v11 = vld [vmem:[#allocation87_spill] sm:$0xff] }
 0x94d   : > { %v10261_v36 = vrot.slane %v9732_v9, %v16345_v10  ;;  %v10265_v0 = vrot.slane %v9733_v3, %v16345_v10  ;;  %v10269_v8 = vrot.slane %v9734_v51, %v16345_v10  ;;  %v10273_v15 = vrot.slane %v9735_v29, %v16345_v10  ;;  %v17976_v9 = vld [vmem:[#allocation76_spill] sm:$0xff]  ;;  %v16374_v51 = vpop.xlane.xlu0 %9008 }
 0x94e   : > { %v11267_v17 = vsel %vm11266_vm12, %v10249_v60, %v10245_v44  ;;  %v9488_v40 = vadd.f32 %v9354_v57, %v14966_v1  ;;  %v9489_v42 = vadd.f32 %v9354_v57, %v14987_v54  ;;  %v9490_v14 = vadd.f32 %v9354_v57, %v14984_v6  ;;  %v17978_v44 = vld [vmem:[#allocation14_spill] sm:$0xff]  ;;  %v17979_v1 = vld [vmem:[#allocation28_spill] sm:$0xff] }
 0x94f   : > { %v11269_v12 = vsel %vm11268_vm13, %v10253_v53, %v11267_v17  ;;  %v9491_v41 = vadd.f32 %v9354_v57, %v17975_v61  ;;  %v9492_v52 = vadd.f32 %v9354_v57, %v17976_v9  ;;  %v9493_v3 = vadd.f32 %v9354_v57, %v17977_v11 }
 0x950   : > { %v11271_v29 = vsel %vm11270_vm14, %v10257_v43, %v11269_v12  ;;  %v9494_v60 = vadd.f32 %v9354_v57, %v17978_v44  ;;  %v9495_v33 = vadd.f32 %v9354_v57, %v17979_v1  ;;  %v9744_v54 = vmax.f32 %v9488_v40, 0.0 }
 0x951   : > { %v11273_v6 = vsel %vm11272_vm15, %v10261_v36, %v11271_v29  ;;  %v9745_v38 = vmax.f32 %v9489_v42, 0.0  ;;  %v9746_v47 = vmax.f32 %v9490_v14, 0.0  ;;  %v9747_v53 = vmax.f32 %v9491_v41, 0.0  ;;  %v9358_v42 = vpop.permute.xlu1 %9357 }
 0x952   : > { %v11275_v17 = vsel %vm11274_vm0, %v10265_v0, %v11273_v6  ;;  %v9748_v61 = vmax.f32 %v9492_v52, 0.0  ;;  %v9749_v43 = vmax.f32 %v9493_v3, 0.0  ;;  %v9750_v12 = vmax.f32 %v9494_v60, 0.0  ;;  %v17981_v3 = vld [vmem:[#allocation66_spill] sm:$0xff]  ;;  %v17982_v60 = vld [vmem:[#allocation77_spill] sm:$0xff] }
 0x953   : > { %v11277_v9 = vsel %vm11276_vm1, %v10269_v8, %v11275_v17  ;;  %v9751_v57 = vmax.f32 %v9495_v33, 0.0  ;;  %v10309_v40 = vrot.slane %v9744_v54, %v16345_v10  ;;  %v10313_v36 = vrot.slane %v9745_v38, %v16345_v10  ;;  %v16399_v38 = vpop.xlane.xlu0 %9014  ;;  %v17983_v6 = vld [vmem:[#allocation42_spill] sm:$0xff]  ;;  %v17984_v17 = vld [vmem:[#allocation15_spill] sm:$0xff] }
 0x954   : > { %v11279_v14 = vsel %vm11278_vm2, %v10273_v15, %v11277_v9  ;;  %v10317_v41 = vrot.slane %v9746_v47, %v16345_v10  ;;  %v10321_v11 = vrot.slane %v9747_v53, %v16345_v10  ;;  %v10325_v29 = vrot.slane %v9748_v61, %v16345_v10  ;;  %17980 = vst [vmem:[#allocation11_spill] sm:$0xff] %v16399_v38 }
 0x955   : > { %11530 = vst.msk [vmem:[%s16383_s26] sm:$0xff] %vm11529_vm3, %v11279_v14  ;;  %v10329_v0 = vrot.slane %v9749_v43, %v16345_v10  ;;  %v10333_v8 = vrot.slane %v9750_v12, %v16345_v10  ;;  %v10337_v33 = vrot.slane %v9751_v57, %v16345_v10  ;;  %v11287_v52 = vsel %vm11266_vm12, %v10313_v36, %v10309_v40  ;;  %v17985_v43 = vld [vmem:[#allocation88_spill] sm:$0xff]  ;;  %v17986_v57 = vld [vmem:[#allocation67_spill] sm:$0xff]  ;;  %v17987_v36 = vld [vmem:[#allocation29_spill] sm:$0xff] }
 0x956   : > { %v11288_v15 = vsel %vm11268_vm13, %v10317_v41, %v11287_v52  ;;  %v9496_v47 = vadd.f32 %v9358_v42, %v17981_v3  ;;  %v9497_v44 = vadd.f32 %v9358_v42, %v15052_v32  ;;  %v9498_v1 = vadd.f32 %v9358_v42, %v17982_v60 }
 0x957   : > { %v11289_v54 = vsel %vm11270_vm14, %v10321_v11, %v11288_v15  ;;  %v9499_v53 = vadd.f32 %v9358_v42, %v17983_v6  ;;  %v9500_v61 = vadd.f32 %v9358_v42, %v17984_v17  ;;  %v9501_v12 = vadd.f32 %v9358_v42, %v17985_v43  ;;  %v9350_v38 = vpop.permute.xlu0 %9349 }
 0x958   : > { %v11290_v9 = vsel %vm11272_vm15, %v10325_v29, %v11289_v54  ;;  %v9502_v40 = vadd.f32 %v9358_v42, %v17986_v57  ;;  %v9503_v14 = vadd.f32 %v9358_v42, %v17987_v36  ;;  %v9752_v41 = vmax.f32 %v9496_v47, 0.0  ;;  %v17990_v36 = vld [vmem:[#allocation12_spill] sm:$0xff] }
 0x959   : > { %v11291_v32 = vsel %vm11274_vm0, %v10329_v0, %v11290_v9  ;;  %v9753_v52 = vmax.f32 %v9497_v44, 0.0  ;;  %v9754_v3 = vmax.f32 %v9498_v1, 0.0  ;;  %v9755_v60 = vmax.f32 %v9499_v53, 0.0  ;;  %v17988_v53 = vld [vmem:[#allocation25_spill] sm:$0xff]  ;;  %v17989_v9 = vld [vmem:[#allocation26_spill] sm:$0xff] }
 0x95a   : > { %v11292_v11 = vsel %vm11276_vm1, %v10333_v8, %v11291_v32  ;;  %v9756_v15 = vmax.f32 %v9500_v61, 0.0  ;;  %v9757_v6 = vmax.f32 %v9501_v12, 0.0  ;;  %v9758_v17 = vmax.f32 %v9502_v40, 0.0 }
 0x95b   : > { %v11293_v43 = vsel %vm11278_vm2, %v10337_v33, %v11292_v11  ;;  %v9759_v29 = vmax.f32 %v9503_v14, 0.0  ;;  %v10341_v54 = vrot.slane %v9752_v41, %v16345_v10  ;;  %v10345_v57 = vrot.slane %v9753_v52, %v16345_v10  ;;  %v17991_v41 = vld [vmem:[#allocation13_spill] sm:$0xff] }
 0x95c   : > { %11532 = vst.msk [vmem:[%s16383_s26 + $0x10] sm:$0xff] %vm11529_vm3, %v11293_v43  ;;  %v10349_v42 = vrot.slane %v9754_v3, %v16345_v10  ;;  %v10353_v0 = vrot.slane %v9755_v60, %v16345_v10  ;;  %v10357_v47 = vrot.slane %v9756_v15, %v16345_v10  ;;  %v10361_v8 = vrot.slane %v9757_v6, %v16345_v10  ;;  %v17992_v3 = vld [vmem:[#allocation39_spill] sm:$0xff]  ;;  %v17993_v11 = vld [vmem:[#allocation65_spill] sm:$0xff]  ;;  %v17994_v6 = vld [vmem:[#allocation86_spill] sm:$0xff] }
 0x95d   : > { %v10365_v44 = vrot.slane %v9758_v17, %v16345_v10  ;;  %v10369_v1 = vrot.slane %v9759_v29, %v16345_v10  ;;  %v11294_v33 = vsel %vm11266_vm12, %v10345_v57, %v10341_v54  ;;  %v9480_v61 = vadd.f32 %v9350_v38, %v17988_v53  ;;  %v17995_v29 = vld [vmem:[#allocation27_spill] sm:$0xff] }
 0x95e   : > { %v11295_v12 = vsel %vm11268_vm13, %v10349_v42, %v11294_v33  ;;  %v9481_v40 = vadd.f32 %v9350_v38, %v17989_v9  ;;  %v9482_v14 = vadd.f32 %v9350_v38, %v17990_v36  ;;  %v9483_v32 = vadd.f32 %v9350_v38, %v17991_v41 }
 0x95f   : > { %v11296_v52 = vsel %vm11270_vm14, %v10353_v0, %v11295_v12  ;;  %v9484_v60 = vadd.f32 %v9350_v38, %v17992_v3  ;;  %v9485_v15 = vadd.f32 %v9350_v38, %v17993_v11  ;;  %v9486_v17 = vadd.f32 %v9350_v38, %v17994_v6  ;;  %v9362_v11 = vpop.permute.xlu1 %9361 }
 0x960   : > { %v11297_v43 = vsel %vm11272_vm15, %v10357_v47, %v11296_v52  ;;  %v9487_v54 = vadd.f32 %v9350_v38, %v17995_v29  ;;  %v9736_v57 = vmax.f32 %v9480_v61, 0.0  ;;  %v9737_v42 = vmax.f32 %v9481_v40, 0.0  ;;  %v17996_v52 = vld [vmem:[#allocation129_spill] sm:$0xff] }
 0x961   : > { %v11298_v33 = vsel %vm11274_vm0, %v10361_v8, %v11297_v43  ;;  %v9738_v53 = vmax.f32 %v9482_v14, 0.0  ;;  %v9739_v9 = vmax.f32 %v9483_v32, 0.0  ;;  %v9740_v36 = vmax.f32 %v9484_v60, 0.0  ;;  %v17997_v29 = vld [vmem:[#allocation97_spill] sm:$0xff] }
 0x962   : > { %v11299_v0 = vsel %vm11276_vm1, %v10365_v44, %v11298_v33  ;;  %v9741_v12 = vmax.f32 %v9485_v15, 0.0  ;;  %v9742_v41 = vmax.f32 %v9486_v17, 0.0  ;;  %v9743_v3 = vmax.f32 %v9487_v54, 0.0 }
 0x963   : > { %v11300_v6 = vsel %vm11278_vm2, %v10369_v1, %v11299_v0  ;;  %v10277_v47 = vrot.slane %v9736_v57, %v16345_v10  ;;  %v10281_v38 = vrot.slane %v9737_v42, %v16345_v10  ;;  %v10285_v61 = vrot.slane %v9738_v53, %v16345_v10  ;;  %v17998_v57 = vld [vmem:[#allocation113_spill] sm:$0xff]  ;;  %v17999_v53 = vld [vmem:[#allocation130_spill] sm:$0xff] }
 0x964   : > { %11533 = vst.msk [vmem:[%s16383_s26 + $0x18] sm:$0xff] %vm11529_vm3, %v11300_v6  ;;  %v10289_v8 = vrot.slane %v9739_v9, %v16345_v10  ;;  %v10293_v40 = vrot.slane %v9740_v36, %v16345_v10  ;;  %v10297_v44 = vrot.slane %v9741_v12, %v16345_v10  ;;  %v10301_v14 = vrot.slane %v9742_v41, %v16345_v10  ;;  %v18000_v36 = vld [vmem:[#allocation98_spill] sm:$0xff] }
 0x965   : > { %v10305_v32 = vrot.slane %v9743_v3, %v16345_v10  ;;  %v11280_v1 = vsel %vm11266_vm12, %v10281_v38, %v10277_v47  ;;  %v9504_v60 = vadd.f32 %v9362_v11, %v17996_v52  ;;  %v9505_v15 = vadd.f32 %v9362_v11, %v15108_v59  ;;  %v18001_v12 = vld [vmem:[#allocation114_spill] sm:$0xff] }
 0x966   : > { %v11281_v17 = vsel %vm11268_vm13, %v10285_v61, %v11280_v1  ;;  %v9506_v43 = vadd.f32 %v9362_v11, %v15112_v30  ;;  %v9507_v54 = vadd.f32 %v9362_v11, %v17997_v29  ;;  %v9508_v42 = vadd.f32 %v9362_v11, %v17998_v57  ;;  %v9386_v57 = vpop.permute.xlu0 %9385 }
 0x967   : > { %v11282_v33 = vsel %vm11270_vm14, %v10289_v8, %v11281_v17  ;;  %v9509_v9 = vadd.f32 %v9362_v11, %v17999_v53  ;;  %v9510_v0 = vadd.f32 %v9362_v11, %v18000_v36  ;;  %v9511_v41 = vadd.f32 %v9362_v11, %v18001_v12 }
 0x968   : > { %v11283_v3 = vsel %vm11272_vm15, %v10293_v40, %v11282_v33  ;;  %v9760_v6 = vmax.f32 %v9504_v60, 0.0  ;;  %v9761_v59 = vmax.f32 %v9505_v15, 0.0  ;;  %v9762_v47 = vmax.f32 %v9506_v43, 0.0 }
 0x969   : > { %v11284_v30 = vsel %vm11274_vm0, %v10297_v44, %v11283_v3  ;;  %v9763_v38 = vmax.f32 %v9507_v54, 0.0  ;;  %v9764_v61 = vmax.f32 %v9508_v42, 0.0  ;;  %v9765_v1 = vmax.f32 %v9509_v9, 0.0  ;;  %v18002_v3 = vld [vmem:[#allocation16_spill] sm:$0xff] }
 0x96a   : > { %v11285_v52 = vsel %vm11276_vm1, %v10301_v14, %v11284_v30  ;;  %v9766_v8 = vmax.f32 %v9510_v0, 0.0  ;;  %v9767_v17 = vmax.f32 %v9511_v41, 0.0  ;;  %v10373_v29 = vrot.slane %v9760_v6, %v16345_v10 }
 0x96b   : > { %v11286_v11 = vsel %vm11278_vm2, %v10305_v32, %v11285_v52  ;;  %v10377_v40 = vrot.slane %v9761_v59, %v16345_v10  ;;  %v10381_v60 = vrot.slane %v9762_v47, %v16345_v10  ;;  %v10385_v15 = vrot.slane %v9763_v38, %v16345_v10  ;;  %v18003_v59 = vld [vmem:[#allocation89_spill] sm:$0xff] }
 0x96c   : > { %11531 = vst.msk [vmem:[%s16383_s26 + $0x8] sm:$0xff] %vm11529_vm3, %v11286_v11  ;;  %v10389_v44 = vrot.slane %v9764_v61, %v16345_v10  ;;  %v10393_v43 = vrot.slane %v9765_v1, %v16345_v10  ;;  %v10397_v14 = vrot.slane %v9766_v8, %v16345_v10  ;;  %v10401_v54 = vrot.slane %v9767_v17, %v16345_v10 }
 0x96d   : > { %v11301_v42 = vsel %vm11266_vm12, %v10377_v40, %v10373_v29  ;;  %v9552_v32 = vadd.f32 %v9386_v57, %v15435_v62  ;;  %v9553_v33 = vadd.f32 %v9386_v57, %v15444_v46  ;;  %v9554_v53 = vadd.f32 %v9386_v57, %v15448_v63  ;;  %v9366_v29 = vpop.permute.xlu1 %9365 }
 0x96e   : > { %v11302_v9 = vsel %vm11268_vm13, %v10381_v60, %v11301_v42  ;;  %v9555_v36 = vadd.f32 %v9386_v57, %v15457_v18  ;;  %v9556_v0 = vadd.f32 %v9386_v57, %v15463_v16  ;;  %v9557_v12 = vadd.f32 %v9386_v57, %v15472_v48 }
 0x96f   : > { %v11303_v41 = vsel %vm11270_vm14, %v10385_v15, %v11302_v9  ;;  %v9558_v6 = vadd.f32 %v9386_v57, %v18002_v3  ;;  %v9559_v47 = vadd.f32 %v9386_v57, %v18003_v59  ;;  %v9808_v30 = vmax.f32 %v9552_v32, 0.0  ;;  %v18004_v32 = vld [vmem:[#allocation41_spill] sm:$0xff]  ;;  %v18006_v9 = vld [vmem:[#allocation99_spill] sm:$0xff]  ;;  %v18009_v59 = vld [vmem:[#allocation132_spill] sm:$0xff] }
 0x970   : > { %v11304_v62 = vsel %vm11272_vm15, %v10389_v44, %v11303_v41  ;;  %v9809_v46 = vmax.f32 %v9553_v33, 0.0  ;;  %v9810_v63 = vmax.f32 %v9554_v53, 0.0  ;;  %v9811_v38 = vmax.f32 %v9555_v36, 0.0  ;;  %v18005_v33 = vld [vmem:[#allocation131_spill] sm:$0xff] }
 0x971   : > { %v11305_v61 = vsel %vm11274_vm0, %v10393_v43, %v11304_v62  ;;  %v9812_v18 = vmax.f32 %v9556_v0, 0.0  ;;  %v9813_v1 = vmax.f32 %v9557_v12, 0.0  ;;  %v9814_v16 = vmax.f32 %v9558_v6, 0.0  ;;  %v18007_v12 = vld [vmem:[#allocation115_spill] sm:$0xff]  ;;  %v18010_v62 = vld [vmem:[#allocation100_spill] sm:$0xff] }
 0x972   : > { %v11306_v48 = vsel %vm11276_vm1, %v10397_v14, %v11305_v61  ;;  %v9815_v52 = vmax.f32 %v9559_v47, 0.0  ;;  %v10565_v8 = vrot.slane %v9808_v30, %v16345_v10  ;;  %v10569_v17 = vrot.slane %v9809_v46, %v16345_v10  ;;  %v18008_v3 = vld [vmem:[#allocation43_spill] sm:$0xff] }
 0x973   : > { %v11307_v57 = vsel %vm11278_vm2, %v10401_v54, %v11306_v48  ;;  %v10573_v11 = vrot.slane %v9810_v63, %v16345_v10  ;;  %v10577_v40 = vrot.slane %v9811_v38, %v16345_v10  ;;  %v10581_v60 = vrot.slane %v9812_v18, %v16345_v10  ;;  %v18011_v63 = vld [vmem:[#allocation145_spill] sm:$0xff] }
 0x974   : > { %11534 = vst.msk [vmem:[%s16383_s26 + $0x20] sm:$0xff] %vm11529_vm3, %v11307_v57  ;;  %v10585_v15 = vrot.slane %v9813_v1, %v16345_v10  ;;  %v10589_v44 = vrot.slane %v9814_v16, %v16345_v10  ;;  %v10593_v43 = vrot.slane %v9815_v52, %v16345_v10  ;;  %v11343_v14 = vsel %vm11266_vm12, %v10569_v17, %v10565_v8 }
 0x975   : > { %v11344_v42 = vsel %vm11268_vm13, %v10573_v11, %v11343_v14  ;;  %v9512_v54 = vadd.f32 %v9366_v29, %v18004_v32  ;;  %v9513_v53 = vadd.f32 %v9366_v29, %v18005_v33  ;;  %v9514_v36 = vadd.f32 %v9366_v29, %v18006_v9  ;;  %v9394_v11 = vpop.permute.xlu0 %9393 }
 0x976   : > { %v11345_v0 = vsel %vm11270_vm14, %v10577_v40, %v11344_v42  ;;  %v9515_v41 = vadd.f32 %v9366_v29, %v18007_v12  ;;  %v9516_v6 = vadd.f32 %v9366_v29, %v18008_v3  ;;  %v9517_v47 = vadd.f32 %v9366_v29, %v18009_v59  ;;  %v18013_v12 = vld [vmem:[#allocation4_spill] sm:$0xff] }
 0x977   : > { %v11346_v30 = vsel %vm11272_vm15, %v10581_v60, %v11345_v0  ;;  %v9518_v46 = vadd.f32 %v9366_v29, %v18010_v62  ;;  %v9519_v38 = vadd.f32 %v9366_v29, %v18011_v63  ;;  %v9768_v61 = vmax.f32 %v9512_v54, 0.0  ;;  %v18014_v3 = vld [vmem:[#allocation80_spill] sm:$0xff]  ;;  %v18016_v62 = vld [vmem:[#allocation18_spill] sm:$0xff]  ;;  %v18017_v63 = vld [vmem:[#allocation91_spill] sm:$0xff] }
 0x978   : > { %v11347_v18 = vsel %vm11274_vm0, %v10585_v15, %v11346_v30  ;;  %v9769_v1 = vmax.f32 %v9513_v53, 0.0  ;;  %v9770_v16 = vmax.f32 %v9514_v36, 0.0  ;;  %v9771_v48 = vmax.f32 %v9515_v41, 0.0  ;;  %v18012_v53 = vld [vmem:[#allocation31_spill] sm:$0xff] }
 0x979   : > { %v11348_v52 = vsel %vm11276_vm1, %v10589_v44, %v11347_v18  ;;  %v9772_v8 = vmax.f32 %v9516_v6, 0.0  ;;  %v9773_v17 = vmax.f32 %v9517_v47, 0.0  ;;  %v9774_v57 = vmax.f32 %v9518_v46, 0.0  ;;  %v18015_v47 = vld [vmem:[#allocation48_spill] sm:$0xff]  ;;  %v18018_v18 = vld [vmem:[#allocation70_spill] sm:$0xff] }
 0x97a   : > { %v11349_v40 = vsel %vm11278_vm2, %v10593_v43, %v11348_v52  ;;  %v9775_v60 = vmax.f32 %v9519_v38, 0.0  ;;  %v10405_v14 = vrot.slane %v9768_v61, %v16345_v10  ;;  %v10409_v42 = vrot.slane %v9769_v1, %v16345_v10 }
 0x97b   : > { %11540 = vst.msk [vmem:[%s16383_s26 + $0x50] sm:$0xff] %vm11529_vm3, %v11349_v40  ;;  %v10413_v29 = vrot.slane %v9770_v16, %v16345_v10  ;;  %v10417_v15 = vrot.slane %v9771_v48, %v16345_v10  ;;  %v10421_v32 = vrot.slane %v9772_v8, %v16345_v10  ;;  %v10425_v44 = vrot.slane %v9773_v17, %v16345_v10 }
 0x97c   : > { %v10429_v54 = vrot.slane %v9774_v57, %v16345_v10  ;;  %v10433_v33 = vrot.slane %v9775_v60, %v16345_v10  ;;  %v11308_v43 = vsel %vm11266_vm12, %v10409_v42, %v10405_v14  ;;  %v9568_v9 = vadd.f32 %v9394_v11, %v18012_v53  ;;  %v9370_v42 = vpop.permute.xlu1 %9369 }
 0x97d   : > { %v11309_v36 = vsel %vm11268_vm13, %v10413_v29, %v11308_v43  ;;  %v9569_v0 = vadd.f32 %v9394_v11, %v15556_v31  ;;  %v9570_v41 = vadd.f32 %v9394_v11, %v18013_v12  ;;  %v9571_v6 = vadd.f32 %v9394_v11, %v18014_v3  ;;  %v18020_v12 = vld [vmem:[#allocation45_spill] sm:$0xff] }
 0x97e   : > { %v11310_v59 = vsel %vm11270_vm14, %v10417_v15, %v11309_v36  ;;  %v9572_v30 = vadd.f32 %v9394_v11, %v18015_v47  ;;  %v9573_v46 = vadd.f32 %v9394_v11, %v18016_v62  ;;  %v9574_v38 = vadd.f32 %v9394_v11, %v18017_v63  ;;  %v18019_v36 = vld [vmem:[#allocation116_spill] sm:$0xff]  ;;  %v18022_v47 = vld [vmem:[#allocation133_spill] sm:$0xff] }
 0x97f   : > { %v11311_v61 = vsel %vm11272_vm15, %v10421_v32, %v11310_v59  ;;  %v9575_v1 = vadd.f32 %v9394_v11, %v18018_v18  ;;  %v9824_v16 = vmax.f32 %v9568_v9, 0.0  ;;  %v9825_v48 = vmax.f32 %v9569_v0, 0.0  ;;  %v18023_v62 = vld [vmem:[#allocation101_spill] sm:$0xff]  ;;  %v18025_v18 = vld [vmem:[#allocation146_spill] sm:$0xff] }
 0x980   : > { %v11312_v31 = vsel %vm11274_vm0, %v10425_v44, %v11311_v61  ;;  %v9826_v52 = vmax.f32 %v9570_v41, 0.0  ;;  %v9827_v8 = vmax.f32 %v9571_v6, 0.0  ;;  %v9828_v17 = vmax.f32 %v9572_v30, 0.0  ;;  %v18021_v6 = vld [vmem:[#allocation158_spill] sm:$0xff] }
 0x981   : > { %v11313_v57 = vsel %vm11276_vm1, %v10429_v54, %v11312_v31  ;;  %v9829_v40 = vmax.f32 %v9573_v46, 0.0  ;;  %v9830_v60 = vmax.f32 %v9574_v38, 0.0  ;;  %v9831_v14 = vmax.f32 %v9575_v1, 0.0  ;;  %v18024_v38 = vld [vmem:[#allocation170_spill] sm:$0xff] }
 0x982   : > { %v11314_v29 = vsel %vm11278_vm2, %v10433_v33, %v11313_v57  ;;  %v10629_v15 = vrot.slane %v9824_v16, %v16345_v10  ;;  %v10633_v11 = vrot.slane %v9825_v48, %v16345_v10  ;;  %v10637_v32 = vrot.slane %v9826_v52, %v16345_v10  ;;  %v18026_v16 = vld [vmem:[#allocation117_spill] sm:$0xff] }
 0x983   : > { %11535 = vst.msk [vmem:[%s16383_s26 + $0x28] sm:$0xff] %vm11529_vm3, %v11314_v29  ;;  %v10641_v44 = vrot.slane %v9827_v8, %v16345_v10  ;;  %v10645_v43 = vrot.slane %v9828_v17, %v16345_v10  ;;  %v10649_v54 = vrot.slane %v9829_v40, %v16345_v10  ;;  %v10653_v53 = vrot.slane %v9830_v60, %v16345_v10 }
 0x984   : > { %v10657_v9 = vrot.slane %v9831_v14, %v16345_v10  ;;  %v11357_v33 = vsel %vm11266_vm12, %v10633_v11, %v10629_v15  ;;  %v9520_v0 = vadd.f32 %v9370_v42, %v18019_v36  ;;  %v9521_v41 = vadd.f32 %v9370_v42, %v18020_v12 }
 0x985   : > { %v11358_v3 = vsel %vm11268_vm13, %v10637_v32, %v11357_v33  ;;  %v9522_v59 = vadd.f32 %v9370_v42, %v18021_v6  ;;  %v9523_v30 = vadd.f32 %v9370_v42, %v18022_v47  ;;  %v9524_v46 = vadd.f32 %v9370_v42, %v18023_v62  ;;  %v18027_v47 = vld [vmem:[#allocation6_spill] sm:$0xff] }
 0x986   : > { %v11359_v63 = vsel %vm11270_vm14, %v10641_v44, %v11358_v3  ;;  %v9525_v61 = vadd.f32 %v9370_v42, %v18024_v38  ;;  %v9526_v1 = vadd.f32 %v9370_v42, %v18025_v18  ;;  %v9527_v48 = vadd.f32 %v9370_v42, %v18026_v16  ;;  %v9402_v44 = vpop.permute.xlu0 %9401  ;;  %v18028_v62 = vld [vmem:[#allocation82_spill] sm:$0xff]  ;;  %v18030_v18 = vld [vmem:[#allocation20_spill] sm:$0xff]  ;;  %v18031_v16 = vld [vmem:[#allocation93_spill] sm:$0xff] }
 0x987   : > { %v11360_v31 = vsel %vm11272_vm15, %v10645_v43, %v11359_v63  ;;  %v9776_v52 = vmax.f32 %v9520_v0, 0.0  ;;  %v9777_v8 = vmax.f32 %v9521_v41, 0.0  ;;  %v9778_v17 = vmax.f32 %v9522_v59, 0.0  ;;  %v18029_v63 = vld [vmem:[#allocation52_spill] sm:$0xff] }
 0x988   : > { %v11361_v57 = vsel %vm11274_vm0, %v10649_v54, %v11360_v31  ;;  %v9779_v40 = vmax.f32 %v9523_v30, 0.0  ;;  %v9780_v60 = vmax.f32 %v9524_v46, 0.0  ;;  %v9781_v14 = vmax.f32 %v9525_v61, 0.0 }
 0x989   : > { %v11362_v29 = vsel %vm11276_vm1, %v10653_v53, %v11361_v57  ;;  %v9782_v15 = vmax.f32 %v9526_v1, 0.0  ;;  %v9783_v11 = vmax.f32 %v9527_v48, 0.0  ;;  %v10437_v32 = vrot.slane %v9776_v52, %v16345_v10 }
 0x98a   : > { %v11363_v42 = vsel %vm11278_vm2, %v10657_v9, %v11362_v29  ;;  %v10441_v43 = vrot.slane %v9777_v8, %v16345_v10  ;;  %v10445_v33 = vrot.slane %v9778_v17, %v16345_v10  ;;  %v10449_v36 = vrot.slane %v9779_v40, %v16345_v10 }
 0x98b   : > { %11542 = vst.msk [vmem:[%s16383_s26 + $0x60] sm:$0xff] %vm11529_vm3, %v11363_v42  ;;  %v10453_v54 = vrot.slane %v9780_v60, %v16345_v10  ;;  %v10457_v0 = vrot.slane %v9781_v14, %v16345_v10  ;;  %v10461_v53 = vrot.slane %v9782_v15, %v16345_v10  ;;  %v10465_v12 = vrot.slane %v9783_v11, %v16345_v10  ;;  %v9374_v11 = vpop.permute.xlu1 %9373 }
 0x98c   : > { %v11315_v41 = vsel %vm11266_vm12, %v10441_v43, %v10437_v32  ;;  %v9584_v9 = vadd.f32 %v9402_v44, %v15659_v4  ;;  %v9585_v3 = vadd.f32 %v9402_v44, %v15668_v22  ;;  %v9586_v6 = vadd.f32 %v9402_v44, %v15672_v37 }
 0x98d   : > { %v11316_v59 = vsel %vm11268_vm13, %v10445_v33, %v11315_v41  ;;  %v9587_v30 = vadd.f32 %v9402_v44, %v18027_v47  ;;  %v9588_v46 = vadd.f32 %v9402_v44, %v18028_v62  ;;  %v9589_v38 = vadd.f32 %v9402_v44, %v18029_v63  ;;  %v18032_v41 = vld [vmem:[#allocation47_spill] sm:$0xff] }
 0x98e   : > { %v11317_v61 = vsel %vm11270_vm14, %v10449_v36, %v11316_v59  ;;  %v9590_v1 = vadd.f32 %v9402_v44, %v18030_v18  ;;  %v9591_v48 = vadd.f32 %v9402_v44, %v18031_v16  ;;  %v9840_v31 = vmax.f32 %v9584_v9, 0.0  ;;  %v18033_v9 = vld [vmem:[#allocation159_spill] sm:$0xff] }
 0x98f   : > { %v11318_v4 = vsel %vm11272_vm15, %v10453_v54, %v11317_v61  ;;  %v9841_v22 = vmax.f32 %v9585_v3, 0.0  ;;  %v9842_v37 = vmax.f32 %v9586_v6, 0.0  ;;  %v9843_v52 = vmax.f32 %v9587_v30, 0.0  ;;  %v18034_v6 = vld [vmem:[#allocation134_spill] sm:$0xff] }
 0x990   : > { %v11319_v8 = vsel %vm11274_vm0, %v10457_v0, %v11318_v4  ;;  %v9844_v17 = vmax.f32 %v9588_v46, 0.0  ;;  %v9845_v57 = vmax.f32 %v9589_v38, 0.0  ;;  %v9846_v40 = vmax.f32 %v9590_v1, 0.0  ;;  %v18035_v30 = vld [vmem:[#allocation102_spill] sm:$0xff]  ;;  %v18036_v46 = vld [vmem:[#allocation171_spill] sm:$0xff] }
 0x991   : > { %v11320_v60 = vsel %vm11276_vm1, %v10461_v53, %v11319_v8  ;;  %v9847_v14 = vmax.f32 %v9591_v48, 0.0  ;;  %v10693_v29 = vrot.slane %v9840_v31, %v16345_v10  ;;  %v10697_v15 = vrot.slane %v9841_v22, %v16345_v10  ;;  %v18037_v38 = vld [vmem:[#allocation147_spill] sm:$0xff]  ;;  %v18038_v1 = vld [vmem:[#allocation118_spill] sm:$0xff]  ;;  %v18039_v48 = vld [vmem:[#allocation49_spill] sm:$0xff] }
 0x992   : > { %v11321_v32 = vsel %vm11278_vm2, %v10465_v12, %v11320_v60  ;;  %v10701_v44 = vrot.slane %v9842_v37, %v16345_v10  ;;  %v10705_v42 = vrot.slane %v9843_v52, %v16345_v10  ;;  %v10709_v43 = vrot.slane %v9844_v17, %v16345_v10 }
 0x993   : > { %11536 = vst.msk [vmem:[%s16383_s26 + $0x30] sm:$0xff] %vm11529_vm3, %v11321_v32  ;;  %v10713_v33 = vrot.slane %v9845_v57, %v16345_v10  ;;  %v10717_v36 = vrot.slane %v9846_v40, %v16345_v10  ;;  %v10721_v54 = vrot.slane %v9847_v14, %v16345_v10  ;;  %v11371_v0 = vsel %vm11266_vm12, %v10697_v15, %v10693_v29  ;;  %v9410_v14 = vpop.permute.xlu0 %9409 }
 0x994   : > { %v11372_v53 = vsel %vm11268_vm13, %v10701_v44, %v11371_v0  ;;  %v9528_v12 = vadd.f32 %v9374_v11, %v18032_v41  ;;  %v9529_v3 = vadd.f32 %v9374_v11, %v18033_v9  ;;  %v9530_v59 = vadd.f32 %v9374_v11, %v18034_v6 }
 0x995   : > { %v11373_v47 = vsel %vm11270_vm14, %v10705_v42, %v11372_v53  ;;  %v9531_v62 = vadd.f32 %v9374_v11, %v18035_v30  ;;  %v9532_v63 = vadd.f32 %v9374_v11, %v18036_v46  ;;  %v9533_v61 = vadd.f32 %v9374_v11, %v18037_v38 }
 0x996   : > { %v11374_v18 = vsel %vm11272_vm15, %v10709_v43, %v11373_v47  ;;  %v9534_v16 = vadd.f32 %v9374_v11, %v18038_v1  ;;  %v9535_v31 = vadd.f32 %v9374_v11, %v18039_v48  ;;  %v9784_v4 = vmax.f32 %v9528_v12, 0.0  ;;  %v18040_v12 = vld [vmem:[#allocation35_spill] sm:$0xff] }
 0x997   : > { %v11375_v22 = vsel %vm11274_vm0, %v10713_v33, %v11374_v18  ;;  %v9785_v37 = vmax.f32 %v9529_v3, 0.0  ;;  %v9786_v52 = vmax.f32 %v9530_v59, 0.0  ;;  %v9787_v8 = vmax.f32 %v9531_v62, 0.0  ;;  %v18041_v3 = vld [vmem:[#allocation7_spill] sm:$0xff]  ;;  %v18042_v59 = vld [vmem:[#allocation84_spill] sm:$0xff] }
 0x998   : > { %v11376_v17 = vsel %vm11276_vm1, %v10717_v36, %v11375_v22  ;;  %v9788_v57 = vmax.f32 %v9532_v63, 0.0  ;;  %v9789_v40 = vmax.f32 %v9533_v61, 0.0  ;;  %v9790_v60 = vmax.f32 %v9534_v16, 0.0  ;;  %v18043_v62 = vld [vmem:[#allocation56_spill] sm:$0xff]  ;;  %v18044_v63 = vld [vmem:[#allocation22_spill] sm:$0xff]  ;;  %v18045_v61 = vld [vmem:[#allocation95_spill] sm:$0xff] }
 0x999   : > { %v11377_v29 = vsel %vm11278_vm2, %v10721_v54, %v11376_v17  ;;  %v9791_v15 = vmax.f32 %v9535_v31, 0.0  ;;  %v10469_v32 = vrot.slane %v9784_v4, %v16345_v10  ;;  %v10473_v44 = vrot.slane %v9785_v37, %v16345_v10  ;;  %v18046_v16 = vld [vmem:[#allocation74_spill] sm:$0xff] }
 0x99a   : > { %11544 = vst.msk [vmem:[%s16383_s26 + $0x70] sm:$0xff] %vm11529_vm3, %v11377_v29  ;;  %v10477_v11 = vrot.slane %v9786_v52, %v16345_v10  ;;  %v10481_v42 = vrot.slane %v9787_v8, %v16345_v10  ;;  %v10485_v43 = vrot.slane %v9788_v57, %v16345_v10  ;;  %v10489_v33 = vrot.slane %v9789_v40, %v16345_v10 }
 0x99b   : > { %v10493_v36 = vrot.slane %v9790_v60, %v16345_v10  ;;  %v10497_v0 = vrot.slane %v9791_v15, %v16345_v10  ;;  %v11322_v54 = vsel %vm11266_vm12, %v10473_v44, %v10469_v32  ;;  %v9600_v53 = vadd.f32 %v9410_v14, %v15771_v21  ;;  %v9378_v60 = vpop.permute.xlu1 %9377 }
 0x99c   : > { %v11323_v41 = vsel %vm11268_vm13, %v10477_v11, %v11322_v54  ;;  %v9601_v9 = vadd.f32 %v9410_v14, %v18040_v12  ;;  %v9602_v6 = vadd.f32 %v9410_v14, %v18041_v3  ;;  %v9603_v47 = vadd.f32 %v9410_v14, %v18042_v59 }
 0x99d   : > { %v11324_v30 = vsel %vm11270_vm14, %v10481_v42, %v11323_v41  ;;  %v9604_v46 = vadd.f32 %v9410_v14, %v18043_v62  ;;  %v9605_v38 = vadd.f32 %v9410_v14, %v18044_v63  ;;  %v9606_v18 = vadd.f32 %v9410_v14, %v18045_v61 }
 0x99e   : > { %v11325_v1 = vsel %vm11272_vm15, %v10485_v43, %v11324_v30  ;;  %v9607_v21 = vadd.f32 %v9410_v14, %v18046_v16  ;;  %v9856_v48 = vmax.f32 %v9600_v53, 0.0  ;;  %v9857_v31 = vmax.f32 %v9601_v9, 0.0  ;;  %v18048_v53 = vld [vmem:[#allocation135_spill] sm:$0xff] }
 0x99f   : > { %v11326_v4 = vsel %vm11274_vm0, %v10489_v33, %v11325_v1  ;;  %v9858_v22 = vmax.f32 %v9602_v6, 0.0  ;;  %v9859_v37 = vmax.f32 %v9603_v47, 0.0  ;;  %v9860_v52 = vmax.f32 %v9604_v46, 0.0  ;;  %v18049_v9 = vld [vmem:[#allocation103_spill] sm:$0xff]  ;;  %v18050_v6 = vld [vmem:[#allocation172_spill] sm:$0xff] }
 0x9a0   : > { %v11327_v8 = vsel %vm11276_vm1, %v10493_v36, %v11326_v4  ;;  %v9861_v17 = vmax.f32 %v9605_v38, 0.0  ;;  %v9862_v57 = vmax.f32 %v9606_v18, 0.0  ;;  %v9863_v40 = vmax.f32 %v9607_v21, 0.0  ;;  %v18051_v47 = vld [vmem:[#allocation148_spill] sm:$0xff]  ;;  %v18052_v46 = vld [vmem:[#allocation119_spill] sm:$0xff]  ;;  %v18054_v18 = vld [vmem:[#allocation161_spill] sm:$0xff] }
 0x9a1   : > { %v11328_v29 = vsel %vm11278_vm2, %v10497_v0, %v11327_v8  ;;  %v10757_v15 = vrot.slane %v9856_v48, %v16345_v10  ;;  %v10761_v14 = vrot.slane %v9857_v31, %v16345_v10  ;;  %v10765_v32 = vrot.slane %v9858_v22, %v16345_v10  ;;  %v18047_v0 = vld [vmem:[#allocation160_spill] sm:$0xff]  ;;  %v18053_v38 = vld [vmem:[#allocation51_spill] sm:$0xff] }
 0x9a2   : > { %11537 = vst.msk [vmem:[%s16383_s26 + $0x38] sm:$0xff] %vm11529_vm3, %v11328_v29  ;;  %v10769_v44 = vrot.slane %v9859_v37, %v16345_v10  ;;  %v10773_v11 = vrot.slane %v9860_v52, %v16345_v10  ;;  %v10777_v42 = vrot.slane %v9861_v17, %v16345_v10  ;;  %v10781_v43 = vrot.slane %v9862_v57, %v16345_v10  ;;  %v9418_v29 = vpop.permute.xlu0 %9417 }
 0x9a3   : > { %v10785_v33 = vrot.slane %v9863_v40, %v16345_v10  ;;  %v11385_v36 = vsel %vm11266_vm12, %v10761_v14, %v10757_v15  ;;  %v9536_v54 = vadd.f32 %v9378_v60, %v18047_v0  ;;  %v9537_v41 = vadd.f32 %v9378_v60, %v18048_v53 }
 0x9a4   : > { %v11386_v12 = vsel %vm11268_vm13, %v10765_v32, %v11385_v36  ;;  %v9538_v3 = vadd.f32 %v9378_v60, %v18049_v9  ;;  %v9539_v59 = vadd.f32 %v9378_v60, %v18050_v6  ;;  %v9540_v30 = vadd.f32 %v9378_v60, %v18051_v47 }
 0x9a5   : > { %v11387_v62 = vsel %vm11270_vm14, %v10769_v44, %v11386_v12  ;;  %v9541_v63 = vadd.f32 %v9378_v60, %v18052_v46  ;;  %v9542_v61 = vadd.f32 %v9378_v60, %v18053_v38  ;;  %v9543_v1 = vadd.f32 %v9378_v60, %v18054_v18  ;;  %v18056_v12 = vld [vmem:[#allocation162_spill] sm:$0xff] }
 0x9a6   : > { %v11388_v16 = vsel %vm11272_vm15, %v10773_v11, %v11387_v62  ;;  %v9792_v21 = vmax.f32 %v9536_v54, 0.0  ;;  %v9793_v48 = vmax.f32 %v9537_v41, 0.0  ;;  %v9794_v31 = vmax.f32 %v9538_v3, 0.0  ;;  %v18055_v54 = vld [vmem:[#allocation8_spill] sm:$0xff]  ;;  %v18057_v3 = vld [vmem:[#allocation137_spill] sm:$0xff] }
 0x9a7   : > { %v11389_v4 = vsel %vm11274_vm0, %v10777_v42, %v11388_v16  ;;  %v9795_v22 = vmax.f32 %v9539_v59, 0.0  ;;  %v9796_v37 = vmax.f32 %v9540_v30, 0.0  ;;  %v9797_v52 = vmax.f32 %v9541_v63, 0.0  ;;  %v18058_v59 = vld [vmem:[#allocation105_spill] sm:$0xff]  ;;  %v18060_v63 = vld [vmem:[#allocation150_spill] sm:$0xff] }
 0x9a8   : > { %v11390_v8 = vsel %vm11276_vm1, %v10781_v43, %v11389_v4  ;;  %v9798_v17 = vmax.f32 %v9542_v61, 0.0  ;;  %v9799_v57 = vmax.f32 %v9543_v1, 0.0  ;;  %v10501_v40 = vrot.slane %v9792_v21, %v16345_v10  ;;  %v18059_v62 = vld [vmem:[#allocation173_spill] sm:$0xff] }
 0x9a9   : > { %v11391_v60 = vsel %vm11278_vm2, %v10785_v33, %v11390_v8  ;;  %v10505_v15 = vrot.slane %v9793_v48, %v16345_v10  ;;  %v10509_v14 = vrot.slane %v9794_v31, %v16345_v10  ;;  %v10513_v32 = vrot.slane %v9795_v22, %v16345_v10  ;;  %v9382_v8 = vpop.permute.xlu1 %9381 }
 0x9aa   : > { %11546 = vst.msk [vmem:[%s16383_s26 + $0x80] sm:$0xff] %vm11529_vm3, %v11391_v60  ;;  %v10517_v44 = vrot.slane %v9796_v37, %v16345_v10  ;;  %v10521_v11 = vrot.slane %v9797_v52, %v16345_v10  ;;  %v10525_v42 = vrot.slane %v9798_v17, %v16345_v10  ;;  %v10529_v43 = vrot.slane %v9799_v57, %v16345_v10 }
 0x9ab   : > { %v11329_v36 = vsel %vm11266_vm12, %v10505_v15, %v10501_v40  ;;  %v9616_v33 = vadd.f32 %v9418_v29, %v15883_v27  ;;  %v9617_v0 = vadd.f32 %v9418_v29, %v15892_v50  ;;  %v9618_v53 = vadd.f32 %v9418_v29, %v18055_v54 }
 0x9ac   : > { %v11330_v41 = vsel %vm11268_vm13, %v10509_v14, %v11329_v36  ;;  %v9619_v9 = vadd.f32 %v9418_v29, %v18056_v12  ;;  %v9620_v6 = vadd.f32 %v9418_v29, %v18057_v3  ;;  %v9621_v47 = vadd.f32 %v9418_v29, %v18058_v59  ;;  %v18065_v12 = vld [vmem:[#allocation120_spill] sm:$0xff]  ;;  %v18066_v3 = vld [vmem:[#allocation53_spill] sm:$0xff] }
 0x9ad   : > { %v11331_v30 = vsel %vm11270_vm14, %v10513_v32, %v11330_v41  ;;  %v9622_v46 = vadd.f32 %v9418_v29, %v18059_v62  ;;  %v9623_v38 = vadd.f32 %v9418_v29, %v18060_v63  ;;  %v9872_v61 = vmax.f32 %v9616_v33, 0.0  ;;  %v18063_v33 = vld [vmem:[#allocation174_spill] sm:$0xff]  ;;  %v18068_v62 = vld [vmem:[#allocation44_spill] sm:$0xff] }
 0x9ae   : > { %v11332_v27 = vsel %vm11272_vm15, %v10517_v44, %v11331_v30  ;;  %v9873_v50 = vmax.f32 %v9617_v0, 0.0  ;;  %v9874_v18 = vmax.f32 %v9618_v53, 0.0  ;;  %v9875_v1 = vmax.f32 %v9619_v9, 0.0  ;;  %v18064_v53 = vld [vmem:[#allocation149_spill] sm:$0xff] }
 0x9af   : > { %v11333_v16 = vsel %vm11274_vm0, %v10521_v11, %v11332_v27  ;;  %v9876_v21 = vmax.f32 %v9620_v6, 0.0  ;;  %v9877_v48 = vmax.f32 %v9621_v47, 0.0  ;;  %v9878_v31 = vmax.f32 %v9622_v46, 0.0  ;;  %v18061_v11 = vld [vmem:[#allocation136_spill] sm:$0xff]  ;;  %v18067_v47 = vld [vmem:[#allocation78_spill] sm:$0xff] }
 0x9b0   : > { %v11334_v4 = vsel %vm11276_vm1, %v10525_v42, %v11333_v16  ;;  %v9879_v22 = vmax.f32 %v9623_v38, 0.0  ;;  %v10821_v37 = vrot.slane %v9872_v61, %v16345_v10  ;;  %v10825_v52 = vrot.slane %v9873_v50, %v16345_v10 }
 0x9b1   : > { %v11335_v17 = vsel %vm11278_vm2, %v10529_v43, %v11334_v4  ;;  %v10829_v57 = vrot.slane %v9874_v18, %v16345_v10  ;;  %v10833_v40 = vrot.slane %v9875_v1, %v16345_v10  ;;  %v10837_v29 = vrot.slane %v9876_v21, %v16345_v10  ;;  %v18062_v43 = vld [vmem:[#allocation104_spill] sm:$0xff] }
 0x9b2   : > { %11538 = vst.msk [vmem:[%s16383_s26 + $0x40] sm:$0xff] %vm11529_vm3, %v11335_v17  ;;  %v10841_v60 = vrot.slane %v9877_v48, %v16345_v10  ;;  %v10845_v15 = vrot.slane %v9878_v31, %v16345_v10  ;;  %v10849_v14 = vrot.slane %v9879_v22, %v16345_v10  ;;  %v11399_v32 = vsel %vm11266_vm12, %v10825_v52, %v10821_v37  ;;  %v9426_v48 = vpop.permute.xlu0 %9425 }
 0x9b3   : > { %v11400_v44 = vsel %vm11268_vm13, %v10829_v57, %v11399_v32  ;;  %v9544_v42 = vadd.f32 %v9382_v8, %v18061_v11  ;;  %v9545_v36 = vadd.f32 %v9382_v8, %v18062_v43  ;;  %v9546_v0 = vadd.f32 %v9382_v8, %v18063_v33  ;;  %v18069_v11 = vld [vmem:[#allocation57_spill] sm:$0xff] }
 0x9b4   : > { %v11401_v54 = vsel %vm11270_vm14, %v10833_v40, %v11400_v44  ;;  %v9547_v41 = vadd.f32 %v9382_v8, %v18064_v53  ;;  %v9548_v9 = vadd.f32 %v9382_v8, %v18065_v12  ;;  %v9549_v6 = vadd.f32 %v9382_v8, %v18066_v3  ;;  %v18072_v53 = vld [vmem:[#allocation107_spill] sm:$0xff] }
 0x9b5   : > { %v11402_v59 = vsel %vm11272_vm15, %v10837_v29, %v11401_v54  ;;  %v9550_v30 = vadd.f32 %v9382_v8, %v18067_v47  ;;  %v9551_v46 = vadd.f32 %v9382_v8, %v18068_v62  ;;  %v9800_v63 = vmax.f32 %v9544_v42, 0.0 }
 0x9b6   : > { %v11403_v38 = vsel %vm11274_vm0, %v10841_v60, %v11402_v59  ;;  %v9801_v61 = vmax.f32 %v9545_v36, 0.0  ;;  %v9802_v27 = vmax.f32 %v9546_v0, 0.0  ;;  %v9803_v50 = vmax.f32 %v9547_v41, 0.0  ;;  %v18070_v36 = vld [vmem:[#allocation164_spill] sm:$0xff]  ;;  %v18071_v0 = vld [vmem:[#allocation139_spill] sm:$0xff] }
 0x9b7   : > { %v11404_v18 = vsel %vm11276_vm1, %v10845_v15, %v11403_v38  ;;  %v9804_v1 = vmax.f32 %v9548_v9, 0.0  ;;  %v9805_v16 = vmax.f32 %v9549_v6, 0.0  ;;  %v9806_v21 = vmax.f32 %v9550_v30, 0.0  ;;  %v18073_v9 = vld [vmem:[#allocation175_spill] sm:$0xff]  ;;  %v9390_v38 = vpop.permute.xlu1 %9389 }
 0x9b8   : > { %v11405_v31 = vsel %vm11278_vm2, %v10849_v14, %v11404_v18  ;;  %v9807_v4 = vmax.f32 %v9551_v46, 0.0  ;;  %v10533_v22 = vrot.slane %v9800_v63, %v16345_v10  ;;  %v10537_v37 = vrot.slane %v9801_v61, %v16345_v10 }
 0x9b9   : > { %11548 = vst.msk [vmem:[%s16383_s26 + $0x90] sm:$0xff] %vm11529_vm3, %v11405_v31  ;;  %v10541_v52 = vrot.slane %v9802_v27, %v16345_v10  ;;  %v10545_v8 = vrot.slane %v9803_v50, %v16345_v10  ;;  %v10549_v17 = vrot.slane %v9804_v1, %v16345_v10  ;;  %v10553_v57 = vrot.slane %v9805_v16, %v16345_v10 }
 0x9ba   : > { %v10557_v40 = vrot.slane %v9806_v21, %v16345_v10  ;;  %v10561_v29 = vrot.slane %v9807_v4, %v16345_v10  ;;  %v11336_v60 = vsel %vm11266_vm12, %v10537_v37, %v10533_v22  ;;  %v9632_v15 = vadd.f32 %v9426_v48, %v15995_v26  ;;  %v18074_v22 = vld [vmem:[#allocation68_spill] sm:$0xff] }
 0x9bb   : > { %v11337_v14 = vsel %vm11268_vm13, %v10541_v52, %v11336_v60  ;;  %v9633_v32 = vadd.f32 %v9426_v48, %v16004_v35  ;;  %v9634_v44 = vadd.f32 %v9426_v48, %v16008_v39  ;;  %v9635_v42 = vadd.f32 %v9426_v48, %v18069_v11  ;;  %v18075_v52 = vld [vmem:[#allocation30_spill] sm:$0xff] }
 0x9bc   : > { %v11338_v43 = vsel %vm11270_vm14, %v10545_v8, %v11337_v14  ;;  %v9636_v33 = vadd.f32 %v9426_v48, %v18070_v36  ;;  %v9637_v54 = vadd.f32 %v9426_v48, %v18071_v0  ;;  %v9638_v41 = vadd.f32 %v9426_v48, %v18072_v53  ;;  %v18081_v36 = vld [vmem:[#allocation69_spill] sm:$0xff] }
 0x9bd   : > { %v11339_v12 = vsel %vm11272_vm15, %v10549_v17, %v11338_v43  ;;  %v9639_v26 = vadd.f32 %v9426_v48, %v18073_v9  ;;  %v9888_v3 = vmax.f32 %v9632_v15, 0.0  ;;  %v9889_v6 = vmax.f32 %v9633_v32, 0.0  ;;  %v18078_v15 = vld [vmem:[#allocation46_spill] sm:$0xff] }
 0x9be   : > { %v11340_v35 = vsel %vm11274_vm0, %v10553_v57, %v11339_v12  ;;  %v9890_v39 = vmax.f32 %v9634_v44, 0.0  ;;  %v9891_v59 = vmax.f32 %v9635_v42, 0.0  ;;  %v9892_v47 = vmax.f32 %v9636_v33, 0.0  ;;  %v18076_v57 = vld [vmem:[#allocation3_spill] sm:$0xff]  ;;  %v18079_v44 = vld [vmem:[#allocation17_spill] sm:$0xff]  ;;  %v18080_v42 = vld [vmem:[#allocation90_spill] sm:$0xff] }
 0x9bf   : > { %v11341_v30 = vsel %vm11276_vm1, %v10557_v40, %v11340_v35  ;;  %v9893_v62 = vmax.f32 %v9637_v54, 0.0  ;;  %v9894_v46 = vmax.f32 %v9638_v41, 0.0  ;;  %v9895_v63 = vmax.f32 %v9639_v26, 0.0 }
 0x9c0   : > { %v11342_v61 = vsel %vm11278_vm2, %v10561_v29, %v11341_v30  ;;  %v10885_v27 = vrot.slane %v9888_v3, %v16345_v10  ;;  %v10889_v50 = vrot.slane %v9889_v6, %v16345_v10  ;;  %v10893_v18 = vrot.slane %v9890_v39, %v16345_v10  ;;  %v18077_v29 = vld [vmem:[#allocation79_spill] sm:$0xff] }
 0x9c1   : > { %11539 = vst.msk [vmem:[%s16383_s26 + $0x48] sm:$0xff] %vm11529_vm3, %v11342_v61  ;;  %v10897_v1 = vrot.slane %v9891_v59, %v16345_v10  ;;  %v10901_v16 = vrot.slane %v9892_v47, %v16345_v10  ;;  %v10905_v21 = vrot.slane %v9893_v62, %v16345_v10  ;;  %v10909_v48 = vrot.slane %v9894_v46, %v16345_v10  ;;  %v9434_v47 = vpop.permute.xlu0 %9433 }
 0x9c2   : > { %v10913_v31 = vrot.slane %v9895_v63, %v16345_v10  ;;  %v11413_v4 = vsel %vm11266_vm12, %v10889_v50, %v10885_v27  ;;  %v9560_v37 = vadd.f32 %v9390_v38, %v18074_v22  ;;  %v9561_v8 = vadd.f32 %v9390_v38, %v18075_v52 }
 0x9c3   : > { %v11414_v17 = vsel %vm11268_vm13, %v10893_v18, %v11413_v4  ;;  %v9562_v40 = vadd.f32 %v9390_v38, %v18076_v57  ;;  %v9563_v60 = vadd.f32 %v9390_v38, %v18077_v29  ;;  %v9564_v14 = vadd.f32 %v9390_v38, %v18078_v15 }
 0x9c4   : > { %v11415_v32 = vsel %vm11270_vm14, %v10897_v1, %v11414_v17  ;;  %v9565_v11 = vadd.f32 %v9390_v38, %v18079_v44  ;;  %v9566_v43 = vadd.f32 %v9390_v38, %v18080_v42  ;;  %v9567_v33 = vadd.f32 %v9390_v38, %v18081_v36 }
 0x9c5   : > { %v11416_v0 = vsel %vm11272_vm15, %v10901_v16, %v11415_v32  ;;  %v9816_v54 = vmax.f32 %v9560_v37, 0.0  ;;  %v9817_v53 = vmax.f32 %v9561_v8, 0.0  ;;  %v9818_v41 = vmax.f32 %v9562_v40, 0.0 }
 0x9c6   : > { %v11417_v12 = vsel %vm11274_vm0, %v10905_v21, %v11416_v0  ;;  %v9819_v9 = vmax.f32 %v9563_v60, 0.0  ;;  %v9820_v26 = vmax.f32 %v9564_v14, 0.0  ;;  %v9821_v3 = vmax.f32 %v9565_v11, 0.0 }
 0x9c7   : > { %v11418_v6 = vsel %vm11276_vm1, %v10909_v48, %v11417_v12  ;;  %v9822_v35 = vmax.f32 %v9566_v43, 0.0  ;;  %v9823_v39 = vmax.f32 %v9567_v33, 0.0  ;;  %v10597_v59 = vrot.slane %v9816_v54, %v16345_v10  ;;  %v18082_v54 = vld [vmem:[#allocation32_spill] sm:$0xff] }
 0x9c8   : > { %v11419_v30 = vsel %vm11278_vm2, %v10913_v31, %v11418_v6  ;;  %v10601_v62 = vrot.slane %v9817_v53, %v16345_v10  ;;  %v10605_v46 = vrot.slane %v9818_v41, %v16345_v10  ;;  %v10609_v63 = vrot.slane %v9819_v9, %v16345_v10  ;;  %v18083_v41 = vld [vmem:[#allocation5_spill] sm:$0xff]  ;;  %v18085_v6 = vld [vmem:[#allocation50_spill] sm:$0xff] }
 0x9c9   : > { %11550 = vst.msk [vmem:[%s16383_s26 + $0xa0] sm:$0xff] %vm11529_vm3, %v11419_v30  ;;  %v10613_v38 = vrot.slane %v9820_v26, %v16345_v10  ;;  %v10617_v61 = vrot.slane %v9821_v3, %v16345_v10  ;;  %v10621_v27 = vrot.slane %v9822_v35, %v16345_v10  ;;  %v10625_v50 = vrot.slane %v9823_v39, %v16345_v10  ;;  %v18084_v9 = vld [vmem:[#allocation81_spill] sm:$0xff]  ;;  %v18086_v39 = vld [vmem:[#allocation19_spill] sm:$0xff] }
 0x9ca   : > { %v11350_v18 = vsel %vm11266_vm12, %v10601_v62, %v10597_v59  ;;  %v9648_v1 = vadd.f32 %v9434_v47, %v16101_v56  ;;  %v9649_v16 = vadd.f32 %v9434_v47, %v16107_v24  ;;  %v9650_v21 = vadd.f32 %v9434_v47, %v16109_v20 }
 0x9cb   : > { %v11351_v48 = vsel %vm11268_vm13, %v10605_v46, %v11350_v18  ;;  %v9651_v31 = vadd.f32 %v9434_v47, %v16115_v58  ;;  %v9652_v4 = vadd.f32 %v9434_v47, %v16117_v55  ;;  %v9653_v22 = vadd.f32 %v9434_v47, %v16122_v5  ;;  %v18088_v46 = vld [vmem:[#allocation71_spill] sm:$0xff] }
 0x9cc   : > { %v11352_v37 = vsel %vm11270_vm14, %v10609_v63, %v11351_v48  ;;  %v9654_v52 = vadd.f32 %v9434_v47, %v16124_v7  ;;  %v9655_v8 = vadd.f32 %v9434_v47, %v16128_v28  ;;  %v9904_v17 = vmax.f32 %v9648_v1, 0.0  ;;  %v9398_v28 = vpop.permute.xlu1 %9397  ;;  %v18087_v47 = vld [vmem:[#allocation92_spill] sm:$0xff] }
 0x9cd   : > { %v11353_v56 = vsel %vm11272_vm15, %v10613_v38, %v11352_v37  ;;  %v9905_v24 = vmax.f32 %v9649_v16, 0.0  ;;  %v9906_v20 = vmax.f32 %v9650_v21, 0.0  ;;  %v9907_v57 = vmax.f32 %v9651_v31, 0.0  ;;  %v18089_v38 = vld [vmem:[#allocation33_spill] sm:$0xff] }
 0x9ce   : > { %v11354_v40 = vsel %vm11274_vm0, %v10617_v61, %v11353_v56  ;;  %v9908_v58 = vmax.f32 %v9652_v4, 0.0  ;;  %v9909_v29 = vmax.f32 %v9653_v22, 0.0  ;;  %v9910_v55 = vmax.f32 %v9654_v52, 0.0  ;;  %v9442_v22 = vpop.permute.xlu0 %9441 }
 0x9cf   : > { %v11355_v5 = vsel %vm11276_vm1, %v10621_v27, %v11354_v40  ;;  %v9911_v60 = vmax.f32 %v9655_v8, 0.0  ;;  %v10949_v15 = vrot.slane %v9904_v17, %v16345_v10  ;;  %v10953_v7 = vrot.slane %v9905_v24, %v16345_v10 }
 0x9d0   : > { %v11356_v14 = vsel %vm11278_vm2, %v10625_v50, %v11355_v5  ;;  %v10957_v32 = vrot.slane %v9906_v20, %v16345_v10  ;;  %v10961_v44 = vrot.slane %v9907_v57, %v16345_v10  ;;  %v10965_v11 = vrot.slane %v9908_v58, %v16345_v10 }
 0x9d1   : > { %11541 = vst.msk [vmem:[%s16383_s26 + $0x58] sm:$0xff] %vm11529_vm3, %v11356_v14  ;;  %v10969_v42 = vrot.slane %v9909_v29, %v16345_v10  ;;  %v10973_v43 = vrot.slane %v9910_v55, %v16345_v10  ;;  %v10977_v36 = vrot.slane %v9911_v60, %v16345_v10  ;;  %v11427_v33 = vsel %vm11266_vm12, %v10953_v7, %v10949_v15 }
 0x9d2   : > { %v11428_v0 = vsel %vm11268_vm13, %v10957_v32, %v11427_v33  ;;  %v9576_v53 = vadd.f32 %v9398_v28, %v18082_v54  ;;  %v9577_v12 = vadd.f32 %v9398_v28, %v18083_v41  ;;  %v9578_v26 = vadd.f32 %v9398_v28, %v18084_v9  ;;  %v18090_v32 = vld [vmem:[#allocation61_spill] sm:$0xff] }
 0x9d3   : > { %v11429_v3 = vsel %vm11270_vm14, %v10961_v44, %v11428_v0  ;;  %v9579_v35 = vadd.f32 %v9398_v28, %v18085_v6  ;;  %v9580_v59 = vadd.f32 %v9398_v28, %v18086_v39  ;;  %v9581_v30 = vadd.f32 %v9398_v28, %v18087_v47 }
 0x9d4   : > { %v11430_v62 = vsel %vm11272_vm15, %v10965_v11, %v11429_v3  ;;  %v9582_v63 = vadd.f32 %v9398_v28, %v18088_v46  ;;  %v9583_v61 = vadd.f32 %v9398_v28, %v18089_v38  ;;  %v9832_v27 = vmax.f32 %v9576_v53, 0.0  ;;  %v18091_v11 = vld [vmem:[#allocation167_spill] sm:$0xff] }
 0x9d5   : > { %v11431_v50 = vsel %vm11274_vm0, %v10969_v42, %v11430_v62  ;;  %v9833_v18 = vmax.f32 %v9577_v12, 0.0  ;;  %v9834_v1 = vmax.f32 %v9578_v26, 0.0  ;;  %v9835_v16 = vmax.f32 %v9579_v35, 0.0  ;;  %v9406_v12 = vpop.permute.xlu1 %9405  ;;  %v18092_v62 = vld [vmem:[#allocation72_spill] sm:$0xff] }
 0x9d6   : > { %v11432_v21 = vsel %vm11276_vm1, %v10973_v43, %v11431_v50  ;;  %v9836_v48 = vmax.f32 %v9580_v59, 0.0  ;;  %v9837_v31 = vmax.f32 %v9581_v30, 0.0  ;;  %v9838_v4 = vmax.f32 %v9582_v63, 0.0  ;;  %v18093_v63 = vld [vmem:[#allocation34_spill] sm:$0xff] }
 0x9d7   : > { %v11433_v37 = vsel %vm11278_vm2, %v10977_v36, %v11432_v21  ;;  %v9839_v52 = vmax.f32 %v9583_v61, 0.0  ;;  %v10661_v8 = vrot.slane %v9832_v27, %v16345_v10  ;;  %v10665_v17 = vrot.slane %v9833_v18, %v16345_v10  ;;  %v18094_v27 = vld [vmem:[#allocation9_spill] sm:$0xff]  ;;  %v18095_v18 = vld [vmem:[#allocation83_spill] sm:$0xff] }
 0x9d8   : > { %11552 = vst.msk [vmem:[%s16383_s26 + $0xb0] sm:$0xff] %vm11529_vm3, %v11433_v37  ;;  %v10669_v56 = vrot.slane %v9834_v1, %v16345_v10  ;;  %v10673_v24 = vrot.slane %v9835_v16, %v16345_v10  ;;  %v10677_v20 = vrot.slane %v9836_v48, %v16345_v10  ;;  %v10681_v57 = vrot.slane %v9837_v31, %v16345_v10  ;;  %v18096_v16 = vld [vmem:[#allocation54_spill] sm:$0xff]  ;;  %v18097_v31 = vld [vmem:[#allocation21_spill] sm:$0xff] }
 0x9d9   : > { %v10685_v40 = vrot.slane %v9838_v4, %v16345_v10  ;;  %v10689_v58 = vrot.slane %v9839_v52, %v16345_v10  ;;  %v11364_v29 = vsel %vm11266_vm12, %v10665_v17, %v10661_v8  ;;  %v9664_v55 = vadd.f32 %v9442_v22, %v16164_v34  ;;  %v18099_v52 = vld [vmem:[#allocation73_spill] sm:$0xff] }
 0x9da   : > { %v11365_v5 = vsel %vm11268_vm13, %v10669_v56, %v11364_v29  ;;  %v9665_v60 = vadd.f32 %v9442_v22, %v16169_v45  ;;  %v9666_v15 = vadd.f32 %v9442_v22, %v16172_v49  ;;  %v9667_v7 = vadd.f32 %v9442_v22, %v16177_v13 }
 0x9db   : > { %v11366_v28 = vsel %vm11270_vm14, %v10673_v24, %v11365_v5  ;;  %v9668_v14 = vadd.f32 %v9442_v22, %v16180_v23  ;;  %v9669_v44 = vadd.f32 %v9442_v22, %v18090_v32  ;;  %v9670_v42 = vadd.f32 %v9442_v22, %v18091_v11 }
 0x9dc   : > { %v11367_v43 = vsel %vm11272_vm15, %v10677_v20, %v11366_v28  ;;  %v9671_v34 = vadd.f32 %v9442_v22, %v16195_v2  ;;  %v9920_v36 = vmax.f32 %v9664_v55, 0.0  ;;  %v9921_v33 = vmax.f32 %v9665_v60, 0.0  ;;  %v18098_v22 = vld [vmem:[#allocation94_spill] sm:$0xff] }
 0x9dd   : > { %v11368_v45 = vsel %vm11274_vm0, %v10681_v57, %v11367_v43  ;;  %v9922_v49 = vmax.f32 %v9666_v15, 0.0  ;;  %v9923_v0 = vmax.f32 %v9667_v7, 0.0  ;;  %v9924_v13 = vmax.f32 %v9668_v14, 0.0  ;;  %v9450_v7 = vpop.permute.xlu0 %9449 }
 0x9de   : > { %v11369_v54 = vsel %vm11276_vm1, %v10685_v40, %v11368_v45  ;;  %v9925_v53 = vmax.f32 %v9669_v44, 0.0  ;;  %v9926_v23 = vmax.f32 %v9670_v42, 0.0  ;;  %v9927_v41 = vmax.f32 %v9671_v34, 0.0  ;;  %v18100_v45 = vld [vmem:[#allocation111_spill] sm:$0xff] }
 0x9df   : > { %v11370_v9 = vsel %vm11278_vm2, %v10689_v58, %v11369_v54  ;;  %v11013_v26 = vrot.slane %v9920_v36, %v16345_v10  ;;  %v11017_v2 = vrot.slane %v9921_v33, %v16345_v10  ;;  %v11021_v3 = vrot.slane %v9922_v49, %v16345_v10  ;;  %v18101_v54 = vld [vmem:[#allocation178_spill] sm:$0xff] }
 0x9e0   : > { %11543 = vst.msk [vmem:[%s16383_s26 + $0x68] sm:$0xff] %vm11529_vm3, %v11370_v9  ;;  %v11025_v6 = vrot.slane %v9923_v0, %v16345_v10  ;;  %v11029_v35 = vrot.slane %v9924_v13, %v16345_v10  ;;  %v11033_v39 = vrot.slane %v9925_v53, %v16345_v10  ;;  %v11037_v59 = vrot.slane %v9926_v23, %v16345_v10  ;;  %v18102_v23 = vld [vmem:[#allocation156_spill] sm:$0xff] }
 0x9e1   : > { %v11041_v47 = vrot.slane %v9927_v41, %v16345_v10  ;;  %v11441_v30 = vsel %vm11266_vm12, %v11017_v2, %v11013_v26  ;;  %v9592_v46 = vadd.f32 %v9406_v12, %v18092_v62  ;;  %v9593_v38 = vadd.f32 %v9406_v12, %v18093_v63  ;;  %v18104_v2 = vld [vmem:[#allocation63_spill] sm:$0xff] }
 0x9e2   : > { %v11442_v61 = vsel %vm11268_vm13, %v11021_v3, %v11441_v30  ;;  %v9594_v50 = vadd.f32 %v9406_v12, %v18094_v27  ;;  %v9595_v1 = vadd.f32 %v9406_v12, %v18095_v18  ;;  %v9596_v21 = vadd.f32 %v9406_v12, %v18096_v16  ;;  %v9414_v18 = vpop.permute.xlu1 %9413 }
 0x9e3   : > { %v11443_v48 = vsel %vm11270_vm14, %v11025_v6, %v11442_v61  ;;  %v9597_v4 = vadd.f32 %v9406_v12, %v18097_v31  ;;  %v9598_v37 = vadd.f32 %v9406_v12, %v18098_v22  ;;  %v9599_v8 = vadd.f32 %v9406_v12, %v18099_v52  ;;  %v18103_v12 = vld [vmem:[#allocation127_spill] sm:$0xff]  ;;  %v18105_v6 = vld [vmem:[#allocation169_spill] sm:$0xff] }
 0x9e4   : > { %v11444_v17 = vsel %vm11272_vm15, %v11029_v35, %v11443_v48  ;;  %v9848_v56 = vmax.f32 %v9592_v46, 0.0  ;;  %v9849_v24 = vmax.f32 %v9593_v38, 0.0  ;;  %v9850_v20 = vmax.f32 %v9594_v50, 0.0 }
 0x9e5   : > { %v11445_v57 = vsel %vm11274_vm0, %v11033_v39, %v11444_v17  ;;  %v9851_v40 = vmax.f32 %v9595_v1, 0.0  ;;  %v9852_v58 = vmax.f32 %v9596_v21, 0.0  ;;  %v9853_v29 = vmax.f32 %v9597_v4, 0.0 }
 0x9e6   : > { %v11446_v55 = vsel %vm11276_vm1, %v11037_v59, %v11445_v57  ;;  %v9854_v5 = vmax.f32 %v9598_v37, 0.0  ;;  %v9855_v60 = vmax.f32 %v9599_v8, 0.0  ;;  %v10725_v15 = vrot.slane %v9848_v56, %v16345_v10  ;;  %v18106_v8 = vld [vmem:[#allocation36_spill] sm:$0xff]  ;;  %v18107_v56 = vld [vmem:[#allocation10_spill] sm:$0xff] }
 0x9e7   : > { %v11447_v28 = vsel %vm11278_vm2, %v11041_v47, %v11446_v55  ;;  %v10729_v14 = vrot.slane %v9849_v24, %v16345_v10  ;;  %v10733_v32 = vrot.slane %v9850_v20, %v16345_v10  ;;  %v10737_v44 = vrot.slane %v9851_v40, %v16345_v10  ;;  %v18108_v20 = vld [vmem:[#allocation85_spill] sm:$0xff]  ;;  %v18110_v55 = vld [vmem:[#allocation23_spill] sm:$0xff] }
 0x9e8   : > { %11554 = vst.msk [vmem:[%s16383_s26 + $0xc0] sm:$0xff] %vm11529_vm3, %v11447_v28  ;;  %v10741_v11 = vrot.slane %v9852_v58, %v16345_v10  ;;  %v10745_v42 = vrot.slane %v9853_v29, %v16345_v10  ;;  %v10749_v43 = vrot.slane %v9854_v5, %v16345_v10  ;;  %v10753_v34 = vrot.slane %v9855_v60, %v16345_v10  ;;  %v18109_v58 = vld [vmem:[#allocation58_spill] sm:$0xff]  ;;  %v18111_v60 = vld [vmem:[#allocation96_spill] sm:$0xff]  ;;  %v18112_v28 = vld [vmem:[#allocation75_spill] sm:$0xff] }
 0x9e9   : > { %v11378_v36 = vsel %vm11266_vm12, %v10729_v14, %v10725_v15  ;;  %v9680_v33 = vadd.f32 %v9450_v7, %v16231_v19  ;;  %v9681_v49 = vadd.f32 %v9450_v7, %v18100_v45  ;;  %v9682_v0 = vadd.f32 %v9450_v7, %v16238_v25 }
 0x9ea   : > { %v11379_v13 = vsel %vm11268_vm13, %v10733_v32, %v11378_v36  ;;  %v9683_v53 = vadd.f32 %v9450_v7, %v18101_v54  ;;  %v9684_v41 = vadd.f32 %v9450_v7, %v18102_v23  ;;  %v9685_v9 = vadd.f32 %v9450_v7, %v18103_v12  ;;  %v18113_v32 = vld [vmem:[#allocation37_spill] sm:$0xff] }
 0x9eb   : > { %v11380_v26 = vsel %vm11270_vm14, %v10737_v44, %v11379_v13  ;;  %v9686_v3 = vadd.f32 %v9450_v7, %v18104_v2  ;;  %v9687_v35 = vadd.f32 %v9450_v7, %v18105_v6  ;;  %v9936_v39 = vmax.f32 %v9680_v33, 0.0  ;;  %v9458_v13 = vpop.permute.xlu0 %9457 }
 0x9ec   : > { %v11381_v19 = vsel %vm11272_vm15, %v10741_v11, %v11380_v26  ;;  %v9937_v59 = vmax.f32 %v9681_v49, 0.0  ;;  %v9938_v25 = vmax.f32 %v9682_v0, 0.0  ;;  %v9939_v47 = vmax.f32 %v9683_v53, 0.0 }
 0x9ed   : > { %v11382_v30 = vsel %vm11274_vm0, %v10745_v42, %v11381_v19  ;;  %v9940_v62 = vmax.f32 %v9684_v41, 0.0  ;;  %v9941_v46 = vmax.f32 %v9685_v9, 0.0  ;;  %v9942_v63 = vmax.f32 %v9686_v3, 0.0 }
 0x9ee   : > { %v11383_v38 = vsel %vm11276_vm1, %v10749_v43, %v11382_v30  ;;  %v9943_v61 = vmax.f32 %v9687_v35, 0.0  ;;  %v11077_v27 = vrot.slane %v9936_v39, %v16345_v10  ;;  %v11081_v50 = vrot.slane %v9937_v59, %v16345_v10  ;;  %v18114_v39 = vld [vmem:[#allocation183_spill] sm:$0xff]  ;;  %v18116_v30 = vld [vmem:[#allocation185_spill] sm:$0xff] }
 0x9ef   : > { %v11384_v1 = vsel %vm11278_vm2, %v10753_v34, %v11383_v38  ;;  %v11085_v16 = vrot.slane %v9938_v25, %v16345_v10  ;;  %v11089_v21 = vrot.slane %v9939_v47, %v16345_v10  ;;  %v11093_v48 = vrot.slane %v9940_v62, %v16345_v10  ;;  %v18115_v25 = vld [vmem:[#allocation184_spill] sm:$0xff] }
 0x9f0   : > { %11545 = vst.msk [vmem:[%s16383_s26 + $0x78] sm:$0xff] %vm11529_vm3, %v11384_v1  ;;  %v11097_v31 = vrot.slane %v9941_v46, %v16345_v10  ;;  %v11101_v4 = vrot.slane %v9942_v63, %v16345_v10  ;;  %v11105_v22 = vrot.slane %v9943_v61, %v16345_v10  ;;  %v11455_v37 = vsel %vm11266_vm12, %v11081_v50, %v11077_v27  ;;  %v18117_v46 = vld [vmem:[#allocation186_spill] sm:$0xff]  ;;  %v18118_v61 = vld [vmem:[#allocation187_spill] sm:$0xff]  ;;  %v18119_v50 = vld [vmem:[#allocation188_spill] sm:$0xff] }
 0x9f1   : > { %v11456_v52 = vsel %vm11268_vm13, %v11085_v16, %v11455_v37  ;;  %v9608_v17 = vadd.f32 %v9414_v18, %v18106_v8  ;;  %v9609_v24 = vadd.f32 %v9414_v18, %v18107_v56  ;;  %v9610_v57 = vadd.f32 %v9414_v18, %v18108_v20  ;;  %v18120_v1 = vld [vmem:[#allocation189_spill] sm:$0xff] }
 0x9f2   : > { %v11457_v40 = vsel %vm11270_vm14, %v11089_v21, %v11456_v52  ;;  %v9611_v29 = vadd.f32 %v9414_v18, %v18109_v58  ;;  %v9612_v5 = vadd.f32 %v9414_v18, %v18110_v55  ;;  %v9613_v15 = vadd.f32 %v9414_v18, %v18111_v60 }
 0x9f3   : > { %v11458_v7 = vsel %vm11272_vm15, %v11093_v48, %v11457_v40  ;;  %v9614_v14 = vadd.f32 %v9414_v18, %v18112_v28  ;;  %v9615_v44 = vadd.f32 %v9414_v18, %v18113_v32  ;;  %v9864_v11 = vmax.f32 %v9608_v17, 0.0  ;;  %v18121_v48 = vld [vmem:[#allocation190_spill] sm:$0xff]  ;;  %v9422_v40 = vpop.permute.xlu1 %9421 }
 0x9f4   : > { %v11459_v42 = vsel %vm11274_vm0, %v11097_v31, %v11458_v7  ;;  %v9865_v43 = vmax.f32 %v9609_v24, 0.0  ;;  %v9866_v34 = vmax.f32 %v9610_v57, 0.0  ;;  %v9867_v36 = vmax.f32 %v9611_v29, 0.0 }
 0x9f5   : > { %v11460_v33 = vsel %vm11276_vm1, %v11101_v4, %v11459_v42  ;;  %v9868_v45 = vmax.f32 %v9612_v5, 0.0  ;;  %v9869_v49 = vmax.f32 %v9613_v15, 0.0  ;;  %v9870_v0 = vmax.f32 %v9614_v14, 0.0  ;;  %v18123_v42 = vld [vmem:[#allocation55_spill] sm:$0xff] }
 0x9f6   : > { %v11461_v54 = vsel %vm11278_vm2, %v11105_v22, %v11460_v33  ;;  %v9871_v53 = vmax.f32 %v9615_v44, 0.0  ;;  %v10789_v23 = vrot.slane %v9864_v11, %v16345_v10  ;;  %v10793_v41 = vrot.slane %v9865_v43, %v16345_v10  ;;  %v18122_v44 = vld [vmem:[#allocation121_spill] sm:$0xff] }
 0x9f7   : > { %11556 = vst.msk [vmem:[%s16383_s26 + $0xd0] sm:$0xff] %vm11529_vm3, %v11461_v54  ;;  %v10797_v12 = vrot.slane %v9866_v34, %v16345_v10  ;;  %v10801_v9 = vrot.slane %v9867_v36, %v16345_v10  ;;  %v10805_v26 = vrot.slane %v9868_v45, %v16345_v10  ;;  %v10809_v2 = vrot.slane %v9869_v49, %v16345_v10  ;;  %v18124_v36 = vld [vmem:[#allocation163_spill] sm:$0xff]  ;;  %v18125_v45 = vld [vmem:[#allocation138_spill] sm:$0xff] }
 0x9f8   : > { %v10813_v3 = vrot.slane %v9870_v0, %v16345_v10  ;;  %v10817_v6 = vrot.slane %v9871_v53, %v16345_v10  ;;  %v11392_v35 = vsel %vm11266_vm12, %v10793_v41, %v10789_v23  ;;  %v9696_v19 = vadd.f32 %v9458_v13, %v18114_v39  ;;  %v18126_v0 = vld [vmem:[#allocation106_spill] sm:$0xff]  ;;  %v18127_v53 = vld [vmem:[#allocation176_spill] sm:$0xff]  ;;  %v18128_v41 = vld [vmem:[#allocation151_spill] sm:$0xff] }
 0x9f9   : > { %v11393_v59 = vsel %vm11268_vm13, %v10797_v12, %v11392_v35  ;;  %v9697_v47 = vadd.f32 %v9458_v13, %v18115_v25  ;;  %v9698_v62 = vadd.f32 %v9458_v13, %v18116_v30  ;;  %v9699_v63 = vadd.f32 %v9458_v13, %v18117_v46 }
 0x9fa   : > { %v11394_v38 = vsel %vm11270_vm14, %v10801_v9, %v11393_v59  ;;  %v9700_v27 = vadd.f32 %v9458_v13, %v18118_v61  ;;  %v9701_v18 = vadd.f32 %v9458_v13, %v18119_v50  ;;  %v9702_v16 = vadd.f32 %v9458_v13, %v18120_v1  ;;  %v18129_v9 = vld [vmem:[#allocation122_spill] sm:$0xff] }
 0x9fb   : > { %v11395_v21 = vsel %vm11272_vm15, %v10805_v26, %v11394_v38  ;;  %v9703_v31 = vadd.f32 %v9458_v13, %v18121_v48  ;;  %v9952_v4 = vmax.f32 %v9696_v19, 0.0  ;;  %v9953_v22 = vmax.f32 %v9697_v47, 0.0 }
 0x9fc   : > { %v11396_v37 = vsel %vm11274_vm0, %v10809_v2, %v11395_v21  ;;  %v9954_v52 = vmax.f32 %v9698_v62, 0.0  ;;  %v9955_v8 = vmax.f32 %v9699_v63, 0.0  ;;  %v9956_v17 = vmax.f32 %v9700_v27, 0.0  ;;  %v9466_v63 = vpop.permute.xlu0 %9465 }
 0x9fd   : > { %v11397_v56 = vsel %vm11276_vm1, %v10813_v3, %v11396_v37  ;;  %v9957_v24 = vmax.f32 %v9701_v18, 0.0  ;;  %v9958_v20 = vmax.f32 %v9702_v16, 0.0  ;;  %v9959_v57 = vmax.f32 %v9703_v31, 0.0  ;;  %v18130_v31 = vld [vmem:[#allocation199_spill] sm:$0xff] }
 0x9fe   : > { %v11398_v58 = vsel %vm11278_vm2, %v10817_v6, %v11397_v56  ;;  %v11141_v29 = vrot.slane %v9952_v4, %v16345_v10  ;;  %v11145_v55 = vrot.slane %v9953_v22, %v16345_v10  ;;  %v11149_v5 = vrot.slane %v9954_v52, %v16345_v10  ;;  %v18131_v22 = vld [vmem:[#allocation201_spill] sm:$0xff]  ;;  %v18132_v52 = vld [vmem:[#allocation200_spill] sm:$0xff]  ;;  %v18133_v56 = vld [vmem:[#allocation203_spill] sm:$0xff] }
 0x9ff   : > { %11547 = vst.msk [vmem:[%s16383_s26 + $0x88] sm:$0xff] %vm11529_vm3, %v11398_v58  ;;  %v11153_v60 = vrot.slane %v9955_v8, %v16345_v10  ;;  %v11157_v15 = vrot.slane %v9956_v17, %v16345_v10  ;;  %v11161_v7 = vrot.slane %v9957_v24, %v16345_v10  ;;  %v11165_v28 = vrot.slane %v9958_v20, %v16345_v10  ;;  %v18134_v20 = vld [vmem:[#allocation202_spill] sm:$0xff] }
 0xa00   : > { %v11169_v14 = vrot.slane %v9959_v57, %v16345_v10  ;;  %v11469_v32 = vsel %vm11266_vm12, %v11145_v55, %v11141_v29  ;;  %v9624_v11 = vadd.f32 %v9422_v40, %v18122_v44  ;;  %v9625_v43 = vadd.f32 %v9422_v40, %v18123_v42  ;;  %v18136_v55 = vld [vmem:[#allocation204_spill] sm:$0xff] }
 0xa01   : > { %v11470_v34 = vsel %vm11268_vm13, %v11149_v5, %v11469_v32  ;;  %v9626_v33 = vadd.f32 %v9422_v40, %v18124_v36  ;;  %v9627_v49 = vadd.f32 %v9422_v40, %v18125_v45  ;;  %v9628_v13 = vadd.f32 %v9422_v40, %v18126_v0  ;;  %v9430_v0 = vpop.permute.xlu1 %9429 }
 0xa02   : > { %v11471_v54 = vsel %vm11270_vm14, %v11153_v60, %v11470_v34  ;;  %v9629_v23 = vadd.f32 %v9422_v40, %v18127_v53  ;;  %v9630_v12 = vadd.f32 %v9422_v40, %v18128_v41  ;;  %v9631_v26 = vadd.f32 %v9422_v40, %v18129_v9  ;;  %v18135_v40 = vld [vmem:[#allocation206_spill] sm:$0xff]  ;;  %v18137_v60 = vld [vmem:[#allocation208_spill] sm:$0xff] }
 0xa03   : > { %v11472_v2 = vsel %vm11272_vm15, %v11157_v15, %v11471_v54  ;;  %v9880_v3 = vmax.f32 %v9624_v11, 0.0  ;;  %v9881_v6 = vmax.f32 %v9625_v43, 0.0  ;;  %v9882_v35 = vmax.f32 %v9626_v33, 0.0 }
 0xa04   : > { %v11473_v39 = vsel %vm11274_vm0, %v11161_v7, %v11472_v2  ;;  %v9883_v19 = vmax.f32 %v9627_v49, 0.0  ;;  %v9884_v59 = vmax.f32 %v9628_v13, 0.0  ;;  %v9885_v25 = vmax.f32 %v9629_v23, 0.0 }
 0xa05   : > { %v11474_v47 = vsel %vm11276_vm1, %v11165_v28, %v11473_v39  ;;  %v9886_v30 = vmax.f32 %v9630_v12, 0.0  ;;  %v9887_v62 = vmax.f32 %v9631_v26, 0.0  ;;  %v10853_v46 = vrot.slane %v9880_v3, %v16345_v10  ;;  %v18138_v3 = vld [vmem:[#allocation152_spill] sm:$0xff] }
 0xa06   : > { %v11475_v38 = vsel %vm11278_vm2, %v11169_v14, %v11474_v47  ;;  %v10857_v61 = vrot.slane %v9881_v6, %v16345_v10  ;;  %v10861_v27 = vrot.slane %v9882_v35, %v16345_v10  ;;  %v10865_v50 = vrot.slane %v9883_v19, %v16345_v10  ;;  %v18139_v35 = vld [vmem:[#allocation123_spill] sm:$0xff]  ;;  %v18141_v47 = vld [vmem:[#allocation165_spill] sm:$0xff] }
 0xa07   : > { %11558 = vst.msk [vmem:[%s16383_s26 + $0xe0] sm:$0xff] %vm11529_vm3, %v11475_v38  ;;  %v10869_v18 = vrot.slane %v9884_v59, %v16345_v10  ;;  %v10873_v1 = vrot.slane %v9885_v25, %v16345_v10  ;;  %v10877_v16 = vrot.slane %v9886_v30, %v16345_v10  ;;  %v10881_v21 = vrot.slane %v9887_v62, %v16345_v10  ;;  %v18140_v19 = vld [vmem:[#allocation59_spill] sm:$0xff]  ;;  %v18142_v62 = vld [vmem:[#allocation140_spill] sm:$0xff] }
 0xa08   : > { %v11406_v48 = vsel %vm11266_vm12, %v10857_v61, %v10853_v46  ;;  %v9712_v4 = vadd.f32 %v9466_v63, %v18130_v31  ;;  %v9713_v37 = vadd.f32 %v9466_v63, %v18131_v22  ;;  %v9714_v8 = vadd.f32 %v9466_v63, %v18132_v52 }
 0xa09   : > { %v11407_v17 = vsel %vm11268_vm13, %v10861_v27, %v11406_v48  ;;  %v9715_v24 = vadd.f32 %v9466_v63, %v18133_v56  ;;  %v9716_v57 = vadd.f32 %v9466_v63, %v18134_v20  ;;  %v9717_v58 = vadd.f32 %v9466_v63, %v18135_v40  ;;  %v18144_v27 = vld [vmem:[#allocation179_spill] sm:$0xff] }
 0xa0a   : > { %v11408_v29 = vsel %vm11270_vm14, %v10865_v50, %v11407_v17  ;;  %v9718_v5 = vadd.f32 %v9466_v63, %v18136_v55  ;;  %v9719_v15 = vadd.f32 %v9466_v63, %v18137_v60  ;;  %v9968_v7 = vmax.f32 %v9712_v4, 0.0  ;;  %v18143_v63 = vld [vmem:[#allocation108_spill] sm:$0xff]  ;;  %v9438_v17 = vpop.permute.xlu1 %9437 }
 0xa0b   : > { %v11409_v28 = vsel %vm11272_vm15, %v10869_v18, %v11408_v29  ;;  %v9969_v14 = vmax.f32 %v9713_v37, 0.0  ;;  %v9970_v32 = vmax.f32 %v9714_v8, 0.0  ;;  %v9971_v44 = vmax.f32 %v9715_v24, 0.0  ;;  %v18145_v18 = vld [vmem:[#allocation153_spill] sm:$0xff] }
 0xa0c   : > { %v11410_v11 = vsel %vm11274_vm0, %v10873_v1, %v11409_v28  ;;  %v9972_v42 = vmax.f32 %v9716_v57, 0.0  ;;  %v9973_v43 = vmax.f32 %v9717_v58, 0.0  ;;  %v9974_v34 = vmax.f32 %v9718_v5, 0.0 }
 0xa0d   : > { %v11411_v36 = vsel %vm11276_vm1, %v10877_v16, %v11410_v11  ;;  %v9975_v33 = vmax.f32 %v9719_v15, 0.0  ;;  %v11205_v45 = vrot.slane %v9968_v7, %v16345_v10  ;;  %v11209_v49 = vrot.slane %v9969_v14, %v16345_v10  ;;  %v18146_v7 = vld [vmem:[#allocation124_spill] sm:$0xff]  ;;  %v18148_v11 = vld [vmem:[#allocation166_spill] sm:$0xff] }
 0xa0e   : > { %v11412_v13 = vsel %vm11278_vm2, %v10881_v21, %v11411_v36  ;;  %v11213_v54 = vrot.slane %v9970_v32, %v16345_v10  ;;  %v11217_v53 = vrot.slane %v9971_v44, %v16345_v10  ;;  %v11221_v23 = vrot.slane %v9972_v42, %v16345_v10  ;;  %v18147_v32 = vld [vmem:[#allocation60_spill] sm:$0xff] }
 0xa0f   : > { %11549 = vst.msk [vmem:[%s16383_s26 + $0x98] sm:$0xff] %vm11529_vm3, %v11412_v13  ;;  %v11225_v41 = vrot.slane %v9973_v43, %v16345_v10  ;;  %v11229_v12 = vrot.slane %v9974_v34, %v16345_v10  ;;  %v11233_v9 = vrot.slane %v9975_v33, %v16345_v10  ;;  %v11483_v26 = vsel %vm11266_vm12, %v11209_v49, %v11205_v45  ;;  %v18149_v43 = vld [vmem:[#allocation141_spill] sm:$0xff]  ;;  %v18152_v13 = vld [vmem:[#allocation154_spill] sm:$0xff] }
 0xa10   : > { %v11484_v2 = vsel %vm11268_vm13, %v11213_v54, %v11483_v26  ;;  %v9640_v6 = vadd.f32 %v9430_v0, %v18138_v3  ;;  %v9641_v39 = vadd.f32 %v9430_v0, %v18139_v35  ;;  %v9642_v59 = vadd.f32 %v9430_v0, %v18140_v19  ;;  %v18150_v33 = vld [vmem:[#allocation109_spill] sm:$0xff] }
 0xa11   : > { %v11485_v25 = vsel %vm11270_vm14, %v11217_v53, %v11484_v2  ;;  %v9643_v30 = vadd.f32 %v9430_v0, %v18141_v47  ;;  %v9644_v46 = vadd.f32 %v9430_v0, %v18142_v62  ;;  %v9645_v38 = vadd.f32 %v9430_v0, %v18143_v63  ;;  %v18151_v49 = vld [vmem:[#allocation177_spill] sm:$0xff] }
 0xa12   : > { %v11486_v61 = vsel %vm11272_vm15, %v11221_v23, %v11485_v25  ;;  %v9646_v50 = vadd.f32 %v9430_v0, %v18144_v27  ;;  %v9647_v1 = vadd.f32 %v9430_v0, %v18145_v18  ;;  %v9896_v16 = vmax.f32 %v9640_v6, 0.0  ;;  %v18153_v23 = vld [vmem:[#allocation125_spill] sm:$0xff]  ;;  %v9446_v25 = vpop.permute.xlu1 %9445 }
 0xa13   : > { %v11487_v21 = vsel %vm11274_vm0, %v11225_v41, %v11486_v61  ;;  %v9897_v48 = vmax.f32 %v9641_v39, 0.0  ;;  %v9898_v31 = vmax.f32 %v9642_v59, 0.0  ;;  %v9899_v4 = vmax.f32 %v9643_v30, 0.0 }
 0xa14   : > { %v11488_v22 = vsel %vm11276_vm1, %v11229_v12, %v11487_v21  ;;  %v9900_v37 = vmax.f32 %v9644_v46, 0.0  ;;  %v9901_v52 = vmax.f32 %v9645_v38, 0.0  ;;  %v9902_v8 = vmax.f32 %v9646_v50, 0.0  ;;  %v18155_v21 = vld [vmem:[#allocation110_spill] sm:$0xff] }
 0xa15   : > { %v11489_v56 = vsel %vm11278_vm2, %v11233_v9, %v11488_v22  ;;  %v9903_v24 = vmax.f32 %v9647_v1, 0.0  ;;  %v10917_v20 = vrot.slane %v9896_v16, %v16345_v10  ;;  %v10921_v57 = vrot.slane %v9897_v48, %v16345_v10  ;;  %v18154_v1 = vld [vmem:[#allocation142_spill] sm:$0xff] }
 0xa16   : > { %11560 = vst.msk [vmem:[%s16383_s26 + $0xf0] sm:$0xff] %vm11529_vm3, %v11489_v56  ;;  %v10925_v40 = vrot.slane %v9898_v31, %v16345_v10  ;;  %v10929_v58 = vrot.slane %v9899_v4, %v16345_v10  ;;  %v10933_v29 = vrot.slane %v9900_v37, %v16345_v10  ;;  %v10937_v55 = vrot.slane %v9901_v52, %v16345_v10  ;;  %v18156_v4 = vld [vmem:[#allocation180_spill] sm:$0xff]  ;;  %v18157_v37 = vld [vmem:[#allocation155_spill] sm:$0xff] }
 0xa17   : > { %v10941_v5 = vrot.slane %v9902_v8, %v16345_v10  ;;  %v10945_v60 = vrot.slane %v9903_v24, %v16345_v10  ;;  %v11420_v15 = vsel %vm11266_vm12, %v10921_v57, %v10917_v20  ;;  %v9656_v28 = vadd.f32 %v9438_v17, %v18146_v7  ;;  %v18158_v8 = vld [vmem:[#allocation126_spill] sm:$0xff]  ;;  %v18160_v57 = vld [vmem:[#allocation168_spill] sm:$0xff] }
 0xa18   : > { %v11421_v14 = vsel %vm11268_vm13, %v10925_v40, %v11420_v15  ;;  %v9657_v44 = vadd.f32 %v9438_v17, %v18147_v32  ;;  %v9658_v42 = vadd.f32 %v9438_v17, %v18148_v11  ;;  %v9659_v34 = vadd.f32 %v9438_v17, %v18149_v43  ;;  %v18159_v24 = vld [vmem:[#allocation62_spill] sm:$0xff] }
 0xa19   : > { %v11422_v36 = vsel %vm11270_vm14, %v10929_v58, %v11421_v14  ;;  %v9660_v45 = vadd.f32 %v9438_v17, %v18150_v33  ;;  %v9661_v0 = vadd.f32 %v9438_v17, %v18151_v49  ;;  %v9662_v54 = vadd.f32 %v9438_v17, %v18152_v13  ;;  %v18161_v58 = vld [vmem:[#allocation143_spill] sm:$0xff] }
 0xa1a   : > { %v11423_v53 = vsel %vm11272_vm15, %v10933_v29, %v11422_v36  ;;  %v9663_v41 = vadd.f32 %v9438_v17, %v18153_v23  ;;  %v9912_v12 = vmax.f32 %v9656_v28, 0.0  ;;  %v9913_v9 = vmax.f32 %v9657_v44, 0.0 }
 0xa1b   : > { %v11424_v26 = vsel %vm11274_vm0, %v10937_v55, %v11423_v53  ;;  %v9914_v2 = vmax.f32 %v9658_v42, 0.0  ;;  %v9915_v3 = vmax.f32 %v9659_v34, 0.0  ;;  %v9916_v6 = vmax.f32 %v9660_v45, 0.0  ;;  %v9454_v34 = vpop.permute.xlu1 %9453 }
 0xa1c   : > { %v11425_v35 = vsel %vm11276_vm1, %v10941_v5, %v11424_v26  ;;  %v9917_v39 = vmax.f32 %v9661_v0, 0.0  ;;  %v9918_v19 = vmax.f32 %v9662_v54, 0.0  ;;  %v9919_v59 = vmax.f32 %v9663_v41, 0.0  ;;  %v18162_v41 = vld [vmem:[#allocation144_spill] sm:$0xff] }
 0xa1d   : > { %v11426_v47 = vsel %vm11278_vm2, %v10945_v60, %v11425_v35  ;;  %v10981_v30 = vrot.slane %v9912_v12, %v16345_v10  ;;  %v10985_v62 = vrot.slane %v9913_v9, %v16345_v10  ;;  %v10989_v46 = vrot.slane %v9914_v2, %v16345_v10  ;;  %v18163_v9 = vld [vmem:[#allocation112_spill] sm:$0xff]  ;;  %v18164_v2 = vld [vmem:[#allocation181_spill] sm:$0xff] }
 0xa1e   : > { %11551 = vst.msk [vmem:[%s16383_s26 + $0xa8] sm:$0xff] %vm11529_vm3, %v11426_v47  ;;  %v10993_v63 = vrot.slane %v9915_v3, %v16345_v10  ;;  %v10997_v38 = vrot.slane %v9916_v6, %v16345_v10  ;;  %v11001_v61 = vrot.slane %v9917_v39, %v16345_v10  ;;  %v11005_v27 = vrot.slane %v9918_v19, %v16345_v10  ;;  %v18165_v35 = vld [vmem:[#allocation157_spill] sm:$0xff]  ;;  %v18166_v19 = vld [vmem:[#allocation128_spill] sm:$0xff] }
 0xa1f   : > { %v11009_v50 = vrot.slane %v9919_v59, %v16345_v10  ;;  %v11434_v18 = vsel %vm11266_vm12, %v10985_v62, %v10981_v30  ;;  %v9672_v16 = vadd.f32 %v9446_v25, %v18154_v1  ;;  %v9673_v48 = vadd.f32 %v9446_v25, %v18155_v21  ;;  %v18168_v62 = vld [vmem:[#allocation2_spill] sm:$0xff] }
 0xa20   : > { %v11435_v31 = vsel %vm11268_vm13, %v10989_v46, %v11434_v18  ;;  %v9674_v22 = vadd.f32 %v9446_v25, %v18156_v4  ;;  %v9675_v52 = vadd.f32 %v9446_v25, %v18157_v37  ;;  %v9676_v17 = vadd.f32 %v9446_v25, %v18158_v8  ;;  %v9462_v8 = vpop.permute.xlu1 %9461 }
 0xa21   : > { %v11436_v56 = vsel %vm11270_vm14, %v10993_v63, %v11435_v31  ;;  %v9677_v20 = vadd.f32 %v9446_v25, %v18159_v24  ;;  %v9678_v40 = vadd.f32 %v9446_v25, %v18160_v57  ;;  %v9679_v29 = vadd.f32 %v9446_v25, %v18161_v58  ;;  %v18167_v25 = vld [vmem:[#allocation64_spill] sm:$0xff]  ;;  %v18169_v63 = vld [vmem:[#allocation182_spill] sm:$0xff] }
 0xa22   : > { %v11437_v55 = vsel %vm11272_vm15, %v10997_v38, %v11436_v56  ;;  %v9928_v5 = vmax.f32 %v9672_v16, 0.0  ;;  %v9929_v60 = vmax.f32 %v9673_v48, 0.0  ;;  %v9930_v15 = vmax.f32 %v9674_v22, 0.0 }
 0xa23   : > { %v11438_v7 = vsel %vm11274_vm0, %v11001_v61, %v11437_v55  ;;  %v9931_v28 = vmax.f32 %v9675_v52, 0.0  ;;  %v9932_v14 = vmax.f32 %v9676_v17, 0.0  ;;  %v9933_v32 = vmax.f32 %v9677_v20, 0.0 }
 0xa24   : > { %v11439_v44 = vsel %vm11276_vm1, %v11005_v27, %v11438_v7  ;;  %v9934_v11 = vmax.f32 %v9678_v40, 0.0  ;;  %v9935_v42 = vmax.f32 %v9679_v29, 0.0  ;;  %v11045_v43 = vrot.slane %v9928_v5, %v16345_v10  ;;  %v18170_v5 = vld [vmem:[#allocation191_spill] sm:$0xff] }
 0xa25   : > { %v11440_v36 = vsel %vm11278_vm2, %v11009_v50, %v11439_v44  ;;  %v11049_v33 = vrot.slane %v9929_v60, %v16345_v10  ;;  %v11053_v45 = vrot.slane %v9930_v15, %v16345_v10  ;;  %v11057_v49 = vrot.slane %v9931_v28, %v16345_v10  ;;  %v18171_v15 = vld [vmem:[#allocation192_spill] sm:$0xff]  ;;  %v18172_v28 = vld [vmem:[#allocation193_spill] sm:$0xff]  ;;  %v18173_v44 = vld [vmem:[#allocation194_spill] sm:$0xff] }
 0xa26   : > { %11553 = vst.msk [vmem:[%s16383_s26 + $0xb8] sm:$0xff] %vm11529_vm3, %v11440_v36  ;;  %v11061_v0 = vrot.slane %v9932_v14, %v16345_v10  ;;  %v11065_v13 = vrot.slane %v9933_v32, %v16345_v10  ;;  %v11069_v54 = vrot.slane %v9934_v11, %v16345_v10  ;;  %v11073_v53 = vrot.slane %v9935_v42, %v16345_v10  ;;  %v18174_v42 = vld [vmem:[#allocation195_spill] sm:$0xff] }
 0xa27   : > { %v11448_v23 = vsel %vm11266_vm12, %v11049_v33, %v11045_v43  ;;  %v9688_v12 = vadd.f32 %v9454_v34, %v18162_v41  ;;  %v9689_v26 = vadd.f32 %v9454_v34, %v18163_v9  ;;  %v9690_v3 = vadd.f32 %v9454_v34, %v18164_v2 }
 0xa28   : > { %v11449_v6 = vsel %vm11268_vm13, %v11053_v45, %v11448_v23  ;;  %v9691_v39 = vadd.f32 %v9454_v34, %v18165_v35  ;;  %v9692_v59 = vadd.f32 %v9454_v34, %v18166_v19  ;;  %v9693_v47 = vadd.f32 %v9454_v34, %v18167_v25  ;;  %v18176_v45 = vld [vmem:[#allocation197_spill] sm:$0xff] }
 0xa29   : > { %v11450_v30 = vsel %vm11270_vm14, %v11057_v49, %v11449_v6  ;;  %v9694_v46 = vadd.f32 %v9454_v34, %v18168_v62  ;;  %v9695_v38 = vadd.f32 %v9454_v34, %v18169_v63  ;;  %v9944_v61 = vmax.f32 %v9688_v12, 0.0  ;;  %v18175_v34 = vld [vmem:[#allocation196_spill] sm:$0xff]  ;;  %v9470_v6 = vpop.permute.xlu1 %9469 }
 0xa2a   : > { %v11451_v27 = vsel %vm11272_vm15, %v11061_v0, %v11450_v30  ;;  %v9945_v50 = vmax.f32 %v9689_v26, 0.0  ;;  %v9946_v18 = vmax.f32 %v9690_v3, 0.0  ;;  %v9947_v1 = vmax.f32 %v9691_v39, 0.0  ;;  %v18177_v0 = vld [vmem:[#allocation198_spill] sm:$0xff] }
 0xa2b   : > { %v11452_v16 = vsel %vm11274_vm0, %v11065_v13, %v11451_v27  ;;  %v9948_v21 = vmax.f32 %v9692_v59, 0.0  ;;  %v9949_v48 = vmax.f32 %v9693_v47, 0.0  ;;  %v9950_v31 = vmax.f32 %v9694_v46, 0.0 }
 0xa2c   : > { %v11453_v4 = vsel %vm11276_vm1, %v11069_v54, %v11452_v16  ;;  %v9951_v22 = vmax.f32 %v9695_v38, 0.0  ;;  %v11109_v37 = vrot.slane %v9944_v61, %v16345_v10  ;;  %v11113_v52 = vrot.slane %v9945_v50, %v16345_v10  ;;  %v18178_v38 = vld [vmem:[#allocation205_spill] sm:$0xff]  ;;  %v18179_v50 = vld [vmem:[#allocation211_spill] sm:$0xff] }
 0xa2d   : > { %v11454_v17 = vsel %vm11278_vm2, %v11073_v53, %v11453_v4  ;;  %v11117_v56 = vrot.slane %v9946_v18, %v16345_v10  ;;  %v11121_v24 = vrot.slane %v9947_v1, %v16345_v10  ;;  %v11125_v20 = vrot.slane %v9948_v21, %v16345_v10  ;;  %v18180_v1 = vld [vmem:[#allocation207_spill] sm:$0xff]  ;;  %v18181_v21 = vld [vmem:[#allocation24_spill] sm:$0xff] }
 0xa2e   : > { %11555 = vst.msk [vmem:[%s16383_s26 + $0xc8] sm:$0xff] %vm11529_vm3, %v11454_v17  ;;  %v11129_v57 = vrot.slane %v9949_v48, %v16345_v10  ;;  %v11133_v40 = vrot.slane %v9950_v31, %v16345_v10  ;;  %v11137_v58 = vrot.slane %v9951_v22, %v16345_v10  ;;  %v11462_v29 = vsel %vm11266_vm12, %v11113_v52, %v11109_v37  ;;  %v18182_v22 = vld [vmem:[#allocation209_spill] sm:$0xff]  ;;  %v18183_v17 = vld [vmem:[#allocation210_spill] sm:$0xff] }
 0xa2f   : > { %v11463_v55 = vsel %vm11268_vm13, %v11117_v56, %v11462_v29  ;;  %v9704_v60 = vadd.f32 %v9462_v8, %v18170_v5  ;;  %v9705_v7 = vadd.f32 %v9462_v8, %v18171_v15  ;;  %v9706_v14 = vadd.f32 %v9462_v8, %v18172_v28 }
 0xa30   : > { %v11464_v32 = vsel %vm11270_vm14, %v11121_v24, %v11463_v55  ;;  %v9707_v11 = vadd.f32 %v9462_v8, %v18173_v44  ;;  %v9708_v43 = vadd.f32 %v9462_v8, %v18174_v42  ;;  %v9709_v36 = vadd.f32 %v9462_v8, %v18175_v34 }
 0xa31   : > { %v11465_v33 = vsel %vm11272_vm15, %v11125_v20, %v11464_v32  ;;  %v9710_v49 = vadd.f32 %v9462_v8, %v18176_v45  ;;  %v9711_v13 = vadd.f32 %v9462_v8, %v18177_v0  ;;  %v9960_v54 = vmax.f32 %v9704_v60, 0.0 }
 0xa32   : > { %v11466_v53 = vsel %vm11274_vm0, %v11129_v57, %v11465_v33  ;;  %v9961_v23 = vmax.f32 %v9705_v7, 0.0  ;;  %v9962_v41 = vmax.f32 %v9706_v14, 0.0  ;;  %v9963_v12 = vmax.f32 %v9707_v11, 0.0 }
 0xa33   : > { %v11467_v9 = vsel %vm11276_vm1, %v11133_v40, %v11466_v53  ;;  %v9964_v26 = vmax.f32 %v9708_v43, 0.0  ;;  %v9965_v2 = vmax.f32 %v9709_v36, 0.0  ;;  %v9966_v3 = vmax.f32 %v9710_v49, 0.0  ;;  %v18184_v40 = vld [vmem:[#allocation11_spill] sm:$0xff] }
 0xa34   : > { %v11468_v35 = vsel %vm11278_vm2, %v11137_v58, %v11467_v9  ;;  %v9967_v39 = vmax.f32 %v9711_v13, 0.0  ;;  %v11173_v19 = vrot.slane %v9960_v54, %v16345_v10  ;;  %v11177_v59 = vrot.slane %v9961_v23, %v16345_v10 }
 0xa35   : > { %11557 = vst.msk [vmem:[%s16383_s26 + $0xd8] sm:$0xff] %vm11529_vm3, %v11468_v35  ;;  %v11181_v25 = vrot.slane %v9962_v41, %v16345_v10  ;;  %v11185_v47 = vrot.slane %v9963_v12, %v16345_v10  ;;  %v11189_v30 = vrot.slane %v9964_v26, %v16345_v10  ;;  %v11193_v62 = vrot.slane %v9965_v2, %v16345_v10 }
 0xa36   : > { %v11197_v46 = vrot.slane %v9966_v3, %v16345_v10  ;;  %v11476_v63 = vsel %vm11266_vm12, %v11177_v59, %v11173_v19  ;;  %v9720_v61 = vadd.f32 %v9470_v6, %v18178_v38  ;;  %v9721_v18 = vadd.f32 %v9470_v6, %v18179_v50 }
 0xa37   : > { %v11477_v27 = vsel %vm11268_vm13, %v11181_v25, %v11476_v63  ;;  %v9722_v16 = vadd.f32 %v9470_v6, %v18180_v1  ;;  %v9723_v48 = vadd.f32 %v9470_v6, %v18181_v21  ;;  %v11201_v31 = vrot.slane %v9967_v39, %v16345_v10 }
 0xa38   : > { %v11478_v4 = vsel %vm11270_vm14, %v11185_v47, %v11477_v27  ;;  %v9724_v37 = vadd.f32 %v9470_v6, %v18182_v22  ;;  %v9725_v52 = vadd.f32 %v9470_v6, %v16374_v51  ;;  %v9726_v56 = vadd.f32 %v9470_v6, %v18183_v17 }
 0xa39   : > { %v11479_v8 = vsel %vm11272_vm15, %v11189_v30, %v11478_v4  ;;  %v9976_v24 = vmax.f32 %v9720_v61, 0.0  ;;  %v9977_v20 = vmax.f32 %v9721_v18, 0.0  ;;  %v9727_v58 = vadd.f32 %v9470_v6, %v18184_v40 }
 0xa3a   : > { %v11480_v57 = vsel %vm11274_vm0, %v11193_v62, %v11479_v8  ;;  %v9978_v29 = vmax.f32 %v9722_v16, 0.0  ;;  %v9979_v55 = vmax.f32 %v9723_v48, 0.0  ;;  %v9980_v60 = vmax.f32 %v9724_v37, 0.0 }
 0xa3b   : > { %v11481_v5 = vsel %vm11276_vm1, %v11197_v46, %v11480_v57  ;;  %v9981_v15 = vmax.f32 %v9725_v52, 0.0  ;;  %v11237_v51 = vrot.slane %v9976_v24, %v16345_v10  ;;  %v11241_v28 = vrot.slane %v9977_v20, %v16345_v10 }
 0xa3c   : > { %v11482_v7 = vsel %vm11278_vm2, %v11201_v31, %v11481_v5  ;;  %v11245_v14 = vrot.slane %v9978_v29, %v16345_v10  ;;  %v9982_v32 = vmax.f32 %v9726_v56, 0.0  ;;  %v9983_v44 = vmax.f32 %v9727_v58, 0.0 }
 0xa3d   : > { %11559 = vst.msk [vmem:[%s16383_s26 + $0xe8] sm:$0xff] %vm11529_vm3, %v11482_v7  ;;  %v11249_v11 = vrot.slane %v9979_v55, %v16345_v10  ;;  %v11490_v42 = vsel %vm11266_vm12, %v11241_v28, %v11237_v51  ;;  %v11253_v43 = vrot.slane %v9980_v60, %v16345_v10  ;;  %v11257_v36 = vrot.slane %v9981_v15, %v16345_v10 }
 0xa3e   : > { %v11491_v34 = vsel %vm11268_vm13, %v11245_v14, %v11490_v42  ;;  %v11261_v45 = vrot.slane %v9982_v32, %v16345_v10  ;;  %v11265_v0 = vrot.slane %v9983_v44, %v16345_v10 }
 0xa3f   : > { %v11492_v33 = vsel %vm11270_vm14, %v11249_v11, %v11491_v34 }
 0xa40   : > { %v11493_v49 = vsel %vm11272_vm15, %v11253_v43, %v11492_v33 }
 0xa41   : > { %v11494_v13 = vsel %vm11274_vm0, %v11257_v36, %v11493_v49 }
 0xa42   : > { %v11495_v54 = vsel %vm11276_vm1, %v11261_v45, %v11494_v13 }
 0xa43   : > { %v11496_v53 = vsel %vm11278_vm2, %v11265_v0, %v11495_v54 }
 0xa44   : > { %11561 = vst.msk [vmem:[%s16383_s26 + $0xf8] sm:$0xff] %vm11529_vm3, %v11496_v53 }
 0xa45 PF: > { %s13_s12 = sadd.s32 1, %s11977_s12  }
 0xa46   : > { %p10_p4 = scmp.ge.s32.totalorder %s13_s12, 4  }
 0xa48   :  { %12 = sbr.rel (!%p10_p4) target bundleno = 1 (0x1), region = 62 }

</bundles_post_ra>
